<compile_context>
chip_gen: v7x
topology: tpu7x:2x2x1
jax: 0.10.0
libtpu: 0.0.40
codegen_flags: <defaults>
</compile_context>

<pallas_src>
import functools

import numpy as np
import jax
import jax.numpy as jnp
from jax import lax
from jax.experimental import pallas as pl
from jax.experimental.pallas import tpu as pltpu


def _round_up(v, m):
    return (v + m - 1) // m * m


# (coarse offset, phase) combinations a 3x3 fine stencil touches along one axis.
_PHASE_COMBOS = ((-1, 1), (0, 0), (0, 1), (1, 0))


def _prep_deconv_taps(w):
    """torch ConvTranspose2d weight (Cin, Cout, 4, 4) -> (9, Cin, 4*Cout).

    Tap t = k*3 + l applies to the (top/left padded) input pixel at coarse
    offset (k, l) from the output's coarse position; its 4*Cout columns are
    phase-major [r*2 + c]: fine output (2i+r, 2j+c) uses transposed-conv tap
    (ky, kx) = (3 - 2k + r, 3 - 2l + c); phases a tap does not feed are zero."""
    ci, co = w.shape[0], w.shape[1]
    taps = []
    for k in range(3):
        for l in range(3):
            cols = []
            for r in range(2):
                for c in range(2):
                    ky, kx = 3 - 2 * k + r, 3 - 2 * l + c
                    if 0 <= ky <= 3 and 0 <= kx <= 3:
                        cols.append(w[:, :, ky, kx])
                    else:
                        cols.append(jnp.zeros((ci, co), w.dtype))
            taps.append(jnp.concatenate(cols, axis=1))
    return jnp.stack(taps, axis=0)


def _prep_phase_conv_windows(w):
    """torch Conv2d weight (Cout, Cin, 3, 3) -> (16, Cin, 4*Cout).

    Window 4*row_combo + col_combo over _PHASE_COMBOS: a 3x3/pad-1 fine conv in
    phase-major layout is 16 matmuls, each reading one input-phase lane slice of
    a coarse-shifted row window.  Output columns are phase-major [r*2+c]; the
    output phases a window does not feed get zero weight blocks."""
    co, ci = w.shape[0], w.shape[1]
    wt = jnp.transpose(w, (2, 3, 1, 0))          # (ky, kx, Cin, Cout), ky = dy+1
    wins = []
    for (di, pr) in _PHASE_COMBOS:
        for (du, pc) in _PHASE_COMBOS:
            blocks = []
            for r in range(2):
                for c in range(2):
                    dy, dx = 2 * di + pr - r, 2 * du + pc - c
                    if -1 <= dy <= 1 and -1 <= dx <= 1:
                        blocks.append(wt[dy + 1, dx + 1])
                    else:
                        blocks.append(jnp.zeros((ci, co), w.dtype))
            wins.append(jnp.concatenate(blocks, axis=-1))
    return jnp.stack(wins, axis=0)


def _to_coarse_slab(x_nhwc, w_stride, dtype):
    """(N, H, W, C) -> (N, (H+3)*w_stride, C) flattened, zero-bordered slab.

    One jnp.pad (single XLA copy pass): 1 zero row/col top/left, 2 zero rows
    bottom and (w_stride - W - 1) zero cols right, then a free row-major
    flatten.  Coarse (i, j) lives at slab row (i+1)*w_stride + (j+1)."""
    N, H, W, C = x_nhwc.shape
    xp = jnp.pad(x_nhwc, ((0, 0), (1, 2), (1, w_stride - W - 1), (0, 0)))
    return xp.reshape(N, (H + 3) * w_stride, C).astype(dtype)


def _fused_kernel(x_ref, skip_ref, mask_ref, wd_ref, w1u_ref, w1s_ref, w2_ref,
                  bu_ref, b1_ref, b2_ref, o_ref, up_ref, mid_ref,
                  *, wpr, m_rows, tm):
    """deconv -> (concat) conv3x3+ReLU -> conv3x3+ReLU, all phase-major in VMEM."""
    lp, cup4 = up_ref.shape
    cmid4 = mid_ref.shape[-1]
    cup, cmid = cup4 // 4, cmid4 // 4
    csk = skip_ref.shape[-1] // 4
    base = wpr + 1                                   # slab row of coarse (0, 0)

    tap_offs = [k * wpr + l for k in range(3) for l in range(3)]
    windows = []                                     # (row offset, input phase)
    for (di, pr) in _PHASE_COMBOS:
        for (du, pc) in _PHASE_COMBOS:
            windows.append(((di + 1) * wpr + (du + 1), pr * 2 + pc))

    # Zero the halo/border rows of the persistent slabs.  Cheap (~3*wpr rows) and
    # done every step so it stays correct if the batch axis is megacore-sharded.
    up_ref[0:base, :] = jnp.zeros((base, cup4), up_ref.dtype)
    up_ref[base + m_rows:lp, :] = jnp.zeros((lp - base - m_rows, cup4), up_ref.dtype)
    mid_ref[0:base, :] = jnp.zeros((base, cmid4), mid_ref.dtype)
    mid_ref[base + m_rows:lp, :] = jnp.zeros((lp - base - m_rows, cmid4), mid_ref.dtype)

    n_chunks = pl.cdiv(m_rows, tm)
    starts = [min(c * tm, m_rows - tm) for c in range(n_chunks)]

    # ---- stage 1: ConvTranspose2d(4,2,1), all 4 sub-pixel phases at once ------
    for m0 in starts:
        acc = None
        for t, off in enumerate(tap_offs):
            part = jnp.dot(x_ref[0, off + m0:off + m0 + tm, :], wd_ref[t],
                           preferred_element_type=jnp.float32)
            acc = part if acc is None else acc + part
        acc = (acc + bu_ref[...]) * mask_ref[m0:m0 + tm, :]   # zero wrap columns
        up_ref[base + m0:base + m0 + tm, :] = acc.astype(up_ref.dtype)

    # ---- stage 2: concat([up, skip]) -> conv3x3 + ReLU (two matmul streams) ---
    for m0 in starts:
        acc = None
        for w, (off, ph) in enumerate(windows):
            pu = jnp.dot(up_ref[off + m0:off + m0 + tm, ph * cup:(ph + 1) * cup],
                         w1u_ref[w], preferred_element_type=jnp.float32)
            ps = jnp.dot(skip_ref[0, off + m0:off + m0 + tm, ph * csk:(ph + 1) * csk],
                         w1s_ref[w], preferred_element_type=jnp.float32)
            contrib = pu + ps
            acc = contrib if acc is None else acc + contrib
        acc = jnp.maximum(acc + b1_ref[...], 0.0) * mask_ref[m0:m0 + tm, :]
        mid_ref[base + m0:base + m0 + tm, :] = acc.astype(mid_ref.dtype)

    # ---- stage 3: conv3x3 + ReLU, accumulated in registers, stored to o_ref ---
    for m0 in starts:
        acc = None
        for w, (off, ph) in enumerate(windows):
            part = jnp.dot(mid_ref[off + m0:off + m0 + tm, ph * cmid:(ph + 1) * cmid],
                           w2_ref[w], preferred_element_type=jnp.float32)
            acc = part if acc is None else acc + part
        o_ref[0, m0:m0 + tm, :] = jnp.maximum(acc + b2_ref[...], 0.0).astype(o_ref.dtype)


def unet_up_origin_forward(params, inputs0, *skips, compute_dtype=jnp.float32):
    """unetUp_origin.forward: up(inputs0), concat skips, 2x(conv3x3+ReLU).

    I/O layout is PyTorch NCHW float32.  compute_dtype selects the MXU operand /
    VMEM slab dtype (bf16 recommended on v5e/v6e/v7x; accumulation stays f32)."""
    if not skips:
        raise ValueError("unetUp_origin forward expects at least one skip input")

    N, Cin, H, W = inputs0.shape
    Cup = params["up_w"].shape[1]
    Cmid = params["conv1_w"].shape[0]
    Co = params["conv2_w"].shape[0]

    Wpr = _round_up(W + 2, 8)            # coarse slab row stride (sublane aligned)
    Lp = (H + 3) * Wpr                   # slab rows (covers max read offset)
    M = H * Wpr                          # rows computed per image
    TM = min(M, 512)                     # register-accumulated row chunk

    # ---- input / skip slabs (one pad pass each) ------------------------------
    x_nhwc = jnp.transpose(inputs0, (0, 2, 3, 1))
    x_slab = _to_coarse_slab(x_nhwc, Wpr, compute_dtype)

    skips_nhwc = [jnp.transpose(s, (0, 2, 3, 1)) for s in skips]
    skip = skips_nhwc[0] if len(skips_nhwc) == 1 else jnp.concatenate(skips_nhwc, -1)
    Csk = skip.shape[-1]
    # fine (N,2H,2W,Csk) -> phase-major coarse (N,H,W,4*Csk), lane block r*2+c.
    skip_pm = skip.reshape(N, H, 2, W, 2, Csk).transpose(0, 1, 3, 2, 4, 5)
    skip_pm = skip_pm.reshape(N, H, W, 4 * Csk)
    skip_slab = _to_coarse_slab(skip_pm, Wpr, compute_dtype)

    # wrap-column mask (coarse col < W), precomputed once instead of per-step iota
    mask = jnp.asarray((np.arange(M) % Wpr < W).astype(np.float32)).reshape(M, 1)

    # ---- weights / biases -----------------------------------------------------
    wd = _prep_deconv_taps(params["up_w"]).astype(compute_dtype)      # (9,Cin,4Cup)
    w1 = _prep_phase_conv_windows(params["conv1_w"])                  # (16,Cup+Csk,4Cmid)
    w1u = w1[:, :Cup, :].astype(compute_dtype)
    w1s = w1[:, Cup:, :].astype(compute_dtype)
    w2 = _prep_phase_conv_windows(params["conv2_w"]).astype(compute_dtype)
    bu = jnp.tile(params["up_b"], 4).reshape(1, 4 * Cup).astype(jnp.float32)
    b1 = jnp.tile(params["conv1_b"], 4).reshape(1, 4 * Cmid).astype(jnp.float32)
    b2 = jnp.tile(params["conv2_b"], 4).reshape(1, 4 * Co).astype(jnp.float32)

    # ---- explicit VMEM budget -------------------------------------------------
    isz = jnp.dtype(compute_dtype).itemsize
    w_elems = 9 * Cin * 4 * Cup + 16 * (Cup + Csk) * 4 * Cmid + 16 * Cmid * 4 * Co
    vmem_need = (2 * Lp * (Cin + 4 * Csk) * isz          # double-buffered inputs
                 + 2 * M * 4 * Co * 4                    # double-buffered output
                 + Lp * (4 * Cup + 4 * Cmid) * isz       # persistent slab scratch
                 + 2 * w_elems * isz + M * 4 + (1 << 20))
    vmem_limit = int(min(max(2 * vmem_need, 16 << 20), 128 << 20))

    out_pm = pl.pallas_call(
        functools.partial(_fused_kernel, wpr=Wpr, m_rows=M, tm=TM),
        out_shape=jax.ShapeDtypeStruct((N, M, 4 * Co), jnp.float32),
        grid_spec=pltpu.PrefetchScalarGridSpec(
            num_scalar_prefetch=0,
            grid=(N,),
            in_specs=[
                pl.BlockSpec((1, Lp, Cin), lambda n: (n, 0, 0)),
                pl.BlockSpec((1, Lp, 4 * Csk), lambda n: (n, 0, 0)),
                pl.BlockSpec((M, 1), lambda n: (0, 0)),
                pl.BlockSpec((9, Cin, 4 * Cup), lambda n: (0, 0, 0)),
                pl.BlockSpec((16, Cup, 4 * Cmid), lambda n: (0, 0, 0)),
                pl.BlockSpec((16, Csk, 4 * Cmid), lambda n: (0, 0, 0)),
                pl.BlockSpec((16, Cmid, 4 * Co), lambda n: (0, 0, 0)),
                pl.BlockSpec((1, 4 * Cup), lambda n: (0, 0)),
                pl.BlockSpec((1, 4 * Cmid), lambda n: (0, 0)),
                pl.BlockSpec((1, 4 * Co), lambda n: (0, 0)),
            ],
            out_specs=pl.BlockSpec((1, M, 4 * Co), lambda n: (n, 0, 0)),
            scratch_shapes=[
                pltpu.VMEM((Lp, 4 * Cup), compute_dtype),    # phase-major up slab
                pltpu.VMEM((Lp, 4 * Cmid), compute_dtype),   # phase-major conv1 act
            ],
        ),
        compiler_params=pltpu.CompilerParams(
            dimension_semantics=("parallel",),
            vmem_limit_bytes=vmem_limit),
    )(x_slab, skip_slab, mask, wd, w1u, w1s, w2, bu, b1, b2)

    # phase-major (N, M, 4*Co) -> NCHW (N, Co, 2H, 2W); wrap columns are cropped.
    out = out_pm.reshape(N, H, Wpr, 2, 2, Co)[:, :, :W]
    out = out.transpose(0, 5, 1, 3, 2, 4).reshape(N, Co, 2 * H, 2 * W)
    return out


def reference_forward(params, inputs0, *skips):
    """Pure-JAX reference (lax convs) for correctness checking."""
    dn = ("NCHW", "OIHW", "NCHW")
    w = params["up_w"]                                   # (Cin, Cout, 4, 4)
    rhs = jnp.flip(w, (2, 3)).transpose(1, 0, 2, 3)      # (Cout, Cin, 4, 4)
    x = lax.conv_general_dilated(
        inputs0, rhs, window_strides=(1, 1), padding=((2, 2), (2, 2)),
        lhs_dilation=(2, 2), dimension_numbers=dn,
        precision=lax.Precision.HIGHEST)
    x = x + params["up_b"][None, :, None, None]
    for s in skips:
        x = jnp.concatenate([x, s], axis=1)
    for wk, bk in (("conv1_w", "conv1_b"), ("conv2_w", "conv2_b")):
        x = lax.conv_general_dilated(
            x, params[wk], (1, 1), ((1, 1), (1, 1)),
            dimension_numbers=dn, precision=lax.Precision.HIGHEST)
        x = jnp.maximum(x + params[bk][None, :, None, None], 0.0)
    return x


if __name__ == "__main__":
    key = jax.random.PRNGKey(0)
    # unetUp_origin(in_size=16, out_size=8, is_deconv=True, n_concat=2)
    in_size, out_size, n_concat = 16, 8, 2
    N, H, W = 2, 8, 8
    conv_in = in_size + (n_concat - 2) * out_size

    keys = jax.random.split(key, 8)

    def kaiming(k, shape, fan_in):
        return (jnp.sqrt(2.0 / fan_in)
                * jax.random.normal(k, shape)).astype(jnp.float32)

    params = {
        # ConvTranspose2d(in_size, out_size, 4, 2, 1) weight: (in, out, 4, 4)
        "up_w": kaiming(keys[0], (in_size, out_size, 4, 4), out_size * 16),
        "up_b": (0.01 * jax.random.normal(keys[1], (out_size,))).astype(jnp.float32),
        # unetConv2: Conv2d(conv_in, out_size, 3, 1, 1) then Conv2d(out, out, 3, 1, 1)
        "conv1_w": kaiming(keys[2], (out_size, conv_in, 3, 3), conv_in * 9),
        "conv1_b": (0.01 * jax.random.normal(keys[3], (out_size,))).astype(jnp.float32),
        "conv2_w": kaiming(keys[4], (out_size, out_size, 3, 3), out_size * 9),
        "conv2_b": (0.01 * jax.random.normal(keys[5], (out_size,))).astype(jnp.float32),
    }

    inputs0 = jax.random.normal(keys[6], (N, in_size, H, W), jnp.float32)
    skip = jax.random.normal(keys[7], (N, out_size, 2 * H, 2 * W), jnp.float32)

    ref = reference_forward(params, inputs0, skip)

    # f32 path (strict tolerance).
    fwd_f32 = jax.jit(functools.partial(unet_up_origin_forward,
                                        compute_dtype=jnp.float32))
    out = jax.block_until_ready(fwd_f32(params, inputs0, skip))
    assert out.shape == (N, out_size, 2 * H, 2 * W), out.shape
    np.testing.assert_allclose(np.asarray(out), np.asarray(ref),
                               rtol=2e-3, atol=2e-3)

    # bf16 MXU fast path (v5e/v6e/v7x): bf16 operands + slabs, f32 accumulation.
    fwd_bf16 = jax.jit(functools.partial(unet_up_origin_forward,
                                         compute_dtype=jnp.bfloat16))
    out_bf16 = jax.block_until_ready(fwd_bf16(params, inputs0, skip))
    np.testing.assert_allclose(np.asarray(out_bf16), np.asarray(ref),
                               rtol=5e-2, atol=5e-2)

    print("KERNEL_OK")
</pallas_src>

<mosaic_0001>
module attributes {stable_mosaic.version = 11 : i64} {
  func.func @_fused_kernel(%arg0: i32, %arg1: memref<1x176x16xf32, #tpu.memory_space<vmem>>, %arg2: memref<1x176x32xf32, #tpu.memory_space<vmem>>, %arg3: memref<128x1xf32, #tpu.memory_space<vmem>>, %arg4: memref<9x16x32xf32, #tpu.memory_space<vmem>>, %arg5: memref<16x8x32xf32, #tpu.memory_space<vmem>>, %arg6: memref<16x8x32xf32, #tpu.memory_space<vmem>>, %arg7: memref<16x8x32xf32, #tpu.memory_space<vmem>>, %arg8: memref<1x32xf32, #tpu.memory_space<vmem>>, %arg9: memref<1x32xf32, #tpu.memory_space<vmem>>, %arg10: memref<1x32xf32, #tpu.memory_space<vmem>>, %arg11: memref<1x128x32xf32, #tpu.memory_space<vmem>>, %arg12: memref<176x32xf32, #tpu.memory_space<vmem>>, %arg13: memref<176x32xf32, #tpu.memory_space<vmem>>) attributes {dimension_semantics = [#tpu.dimension_semantics<parallel>], iteration_bounds = array<i64: 2>, scalar_prefetch = 0 : i64, scratch_operands = 2 : i64, tpu.core_type = #tpu.core_type<tc>, window_params = [{transform_indices = @transform_0, window_bounds = array<i64: 1, 176, 16>}, {transform_indices = @transform_1, window_bounds = array<i64: 1, 176, 32>}, {pipeline_mode = #tpu.pipeline_mode<synchronous>, transform_indices = @transform_2, window_bounds = array<i64: 128, 1>}, {pipeline_mode = #tpu.pipeline_mode<synchronous>, transform_indices = @transform_3, window_bounds = array<i64: 9, 16, 32>}, {pipeline_mode = #tpu.pipeline_mode<synchronous>, transform_indices = @transform_4, window_bounds = array<i64: 16, 8, 32>}, {pipeline_mode = #tpu.pipeline_mode<synchronous>, transform_indices = @transform_5, window_bounds = array<i64: 16, 8, 32>}, {pipeline_mode = #tpu.pipeline_mode<synchronous>, transform_indices = @transform_6, window_bounds = array<i64: 16, 8, 32>}, {pipeline_mode = #tpu.pipeline_mode<synchronous>, transform_indices = @transform_7, window_bounds = array<i64: 1, 32>}, {pipeline_mode = #tpu.pipeline_mode<synchronous>, transform_indices = @transform_8, window_bounds = array<i64: 1, 32>}, {pipeline_mode = #tpu.pipeline_mode<synchronous>, transform_indices = @transform_9, window_bounds = array<i64: 1, 32>}, {transform_indices = @transform_10, window_bounds = array<i64: 1, 128, 32>}]} {
    %cst = arith.constant 0.000000e+00 : f32
    %0 = vector.broadcast %cst : f32 to vector<17x32xf32>
    %c0 = arith.constant 0 : index
    %c0_0 = arith.constant 0 : index
    %1 = vector.load %arg12[%c0, %c0_0] : memref<176x32xf32, #tpu.memory_space<vmem>>, vector<17x32xf32>
    tpu.vector_store %arg12[%c0, %c0_0], %0 {strides = array<i32>} : memref<176x32xf32, #tpu.memory_space<vmem>>, vector<17x32xf32>,
    %cst_1 = arith.constant 0.000000e+00 : f32
    %2 = vector.broadcast %cst_1 : f32 to vector<31x32xf32>
    %c145 = arith.constant 145 : index
    %c0_2 = arith.constant 0 : index
    %3 = vector.load %arg12[%c145, %c0_2] : memref<176x32xf32, #tpu.memory_space<vmem>>, vector<31x32xf32>
    tpu.vector_store %arg12[%c145, %c0_2], %2 {strides = array<i32>} : memref<176x32xf32, #tpu.memory_space<vmem>>, vector<31x32xf32>,
    %cst_3 = arith.constant 0.000000e+00 : f32
    %4 = vector.broadcast %cst_3 : f32 to vector<17x32xf32>
    %c0_4 = arith.constant 0 : index
    %c0_5 = arith.constant 0 : index
    %5 = vector.load %arg13[%c0_4, %c0_5] : memref<176x32xf32, #tpu.memory_space<vmem>>, vector<17x32xf32>
    tpu.vector_store %arg13[%c0_4, %c0_5], %4 {strides = array<i32>} : memref<176x32xf32, #tpu.memory_space<vmem>>, vector<17x32xf32>,
    %cst_6 = arith.constant 0.000000e+00 : f32
    %6 = vector.broadcast %cst_6 : f32 to vector<31x32xf32>
    %c145_7 = arith.constant 145 : index
    %c0_8 = arith.constant 0 : index
    %7 = vector.load %arg13[%c145_7, %c0_8] : memref<176x32xf32, #tpu.memory_space<vmem>>, vector<31x32xf32>
    tpu.vector_store %arg13[%c145_7, %c0_8], %6 {strides = array<i32>} : memref<176x32xf32, #tpu.memory_space<vmem>>, vector<31x32xf32>,
    %c0_9 = arith.constant 0 : index
    %c0_10 = arith.constant 0 : index
    %c0_11 = arith.constant 0 : index
    %8 = vector.load %arg1[%c0_9, %c0_10, %c0_11] : memref<1x176x16xf32, #tpu.memory_space<vmem>>, vector<1x128x16xf32>
    %9 = vector.shape_cast %8 : vector<1x128x16xf32> to vector<128x16xf32>
    %c0_12 = arith.constant 0 : index
    %c0_13 = arith.constant 0 : index
    %c0_14 = arith.constant 0 : index
    %10 = vector.load %arg4[%c0_12, %c0_13, %c0_14] : memref<9x16x32xf32, #tpu.memory_space<vmem>>, vector<1x16x32xf32>
    %11 = vector.shape_cast %10 : vector<1x16x32xf32> to vector<16x32xf32>
    %cst_15 = arith.constant dense<0.000000e+00> : vector<128x32xf32>
    %12 = tpu.matmul %9, %11, %cst_15 {dimension_numbers = #tpu.dot_dimension_numbers<[1], [0], [0], [1], [0, 0, 1, 1], [], []>} : vector<128x16xf32>, vector<16x32xf32>, vector<128x32xf32> -> vector<128x32xf32>
    %c0_16 = arith.constant 0 : index
    %c1 = arith.constant 1 : index
    %c0_17 = arith.constant 0 : index
    %13 = vector.load %arg1[%c0_16, %c1, %c0_17] : memref<1x176x16xf32, #tpu.memory_space<vmem>>, vector<1x128x16xf32>
    %14 = vector.shape_cast %13 : vector<1x128x16xf32> to vector<128x16xf32>
    %c1_18 = arith.constant 1 : index
    %c0_19 = arith.constant 0 : index
    %c0_20 = arith.constant 0 : index
    %15 = vector.load %arg4[%c1_18, %c0_19, %c0_20] : memref<9x16x32xf32, #tpu.memory_space<vmem>>, vector<1x16x32xf32>
    %16 = vector.shape_cast %15 : vector<1x16x32xf32> to vector<16x32xf32>
    %cst_21 = arith.constant dense<0.000000e+00> : vector<128x32xf32>
    %17 = tpu.matmul %14, %16, %cst_21 {dimension_numbers = #tpu.dot_dimension_numbers<[1], [0], [0], [1], [0, 0, 1, 1], [], []>} : vector<128x16xf32>, vector<16x32xf32>, vector<128x32xf32> -> vector<128x32xf32>
    %18 = arith.addf %12, %17 : vector<128x32xf32>
    %c0_22 = arith.constant 0 : index
    %c2 = arith.constant 2 : index
    %c0_23 = arith.constant 0 : index
    %19 = vector.load %arg1[%c0_22, %c2, %c0_23] : memref<1x176x16xf32, #tpu.memory_space<vmem>>, vector<1x128x16xf32>
    %20 = vector.shape_cast %19 : vector<1x128x16xf32> to vector<128x16xf32>
    %c2_24 = arith.constant 2 : index
    %c0_25 = arith.constant 0 : index
    %c0_26 = arith.constant 0 : index
    %21 = vector.load %arg4[%c2_24, %c0_25, %c0_26] : memref<9x16x32xf32, #tpu.memory_space<vmem>>, vector<1x16x32xf32>
    %22 = vector.shape_cast %21 : vector<1x16x32xf32> to vector<16x32xf32>
    %cst_27 = arith.constant dense<0.000000e+00> : vector<128x32xf32>
    %23 = tpu.matmul %20, %22, %cst_27 {dimension_numbers = #tpu.dot_dimension_numbers<[1], [0], [0], [1], [0, 0, 1, 1], [], []>} : vector<128x16xf32>, vector<16x32xf32>, vector<128x32xf32> -> vector<128x32xf32>
    %24 = arith.addf %18, %23 : vector<128x32xf32>
    %c0_28 = arith.constant 0 : index
    %c16 = arith.constant 16 : index
    %c0_29 = arith.constant 0 : index
    %25 = vector.load %arg1[%c0_28, %c16, %c0_29] : memref<1x176x16xf32, #tpu.memory_space<vmem>>, vector<1x128x16xf32>
    %26 = vector.shape_cast %25 : vector<1x128x16xf32> to vector<128x16xf32>
    %c3 = arith.constant 3 : index
    %c0_30 = arith.constant 0 : index
    %c0_31 = arith.constant 0 : index
    %27 = vector.load %arg4[%c3, %c0_30, %c0_31] : memref<9x16x32xf32, #tpu.memory_space<vmem>>, vector<1x16x32xf32>
    %28 = vector.shape_cast %27 : vector<1x16x32xf32> to vector<16x32xf32>
    %cst_32 = arith.constant dense<0.000000e+00> : vector<128x32xf32>
    %29 = tpu.matmul %26, %28, %cst_32 {dimension_numbers = #tpu.dot_dimension_numbers<[1], [0], [0], [1], [0, 0, 1, 1], [], []>} : vector<128x16xf32>, vector<16x32xf32>, vector<128x32xf32> -> vector<128x32xf32>
    %30 = arith.addf %24, %29 : vector<128x32xf32>
    %c0_33 = arith.constant 0 : index
    %c17 = arith.constant 17 : index
    %c0_34 = arith.constant 0 : index
    %31 = vector.load %arg1[%c0_33, %c17, %c0_34] : memref<1x176x16xf32, #tpu.memory_space<vmem>>, vector<1x128x16xf32>
    %32 = vector.shape_cast %31 : vector<1x128x16xf32> to vector<128x16xf32>
    %c4 = arith.constant 4 : index
    %c0_35 = arith.constant 0 : index
    %c0_36 = arith.constant 0 : index
    %33 = vector.load %arg4[%c4, %c0_35, %c0_36] : memref<9x16x32xf32, #tpu.memory_space<vmem>>, vector<1x16x32xf32>
    %34 = vector.shape_cast %33 : vector<1x16x32xf32> to vector<16x32xf32>
    %cst_37 = arith.constant dense<0.000000e+00> : vector<128x32xf32>
    %35 = tpu.matmul %32, %34, %cst_37 {dimension_numbers = #tpu.dot_dimension_numbers<[1], [0], [0], [1], [0, 0, 1, 1], [], []>} : vector<128x16xf32>, vector<16x32xf32>, vector<128x32xf32> -> vector<128x32xf32>
    %36 = arith.addf %30, %35 : vector<128x32xf32>
    %c0_38 = arith.constant 0 : index
    %c18 = arith.constant 18 : index
    %c0_39 = arith.constant 0 : index
    %37 = vector.load %arg1[%c0_38, %c18, %c0_39] : memref<1x176x16xf32, #tpu.memory_space<vmem>>, vector<1x128x16xf32>
    %38 = vector.shape_cast %37 : vector<1x128x16xf32> to vector<128x16xf32>
    %c5 = arith.constant 5 : index
    %c0_40 = arith.constant 0 : index
    %c0_41 = arith.constant 0 : index
    %39 = vector.load %arg4[%c5, %c0_40, %c0_41] : memref<9x16x32xf32, #tpu.memory_space<vmem>>, vector<1x16x32xf32>
    %40 = vector.shape_cast %39 : vector<1x16x32xf32> to vector<16x32xf32>
    %cst_42 = arith.constant dense<0.000000e+00> : vector<128x32xf32>
    %41 = tpu.matmul %38, %40, %cst_42 {dimension_numbers = #tpu.dot_dimension_numbers<[1], [0], [0], [1], [0, 0, 1, 1], [], []>} : vector<128x16xf32>, vector<16x32xf32>, vector<128x32xf32> -> vector<128x32xf32>
    %42 = arith.addf %36, %41 : vector<128x32xf32>
    %c0_43 = arith.constant 0 : index
    %c32 = arith.constant 32 : index
    %c0_44 = arith.constant 0 : index
    %43 = vector.load %arg1[%c0_43, %c32, %c0_44] : memref<1x176x16xf32, #tpu.memory_space<vmem>>, vector<1x128x16xf32>
    %44 = vector.shape_cast %43 : vector<1x128x16xf32> to vector<128x16xf32>
    %c6 = arith.constant 6 : index
    %c0_45 = arith.constant 0 : index
    %c0_46 = arith.constant 0 : index
    %45 = vector.load %arg4[%c6, %c0_45, %c0_46] : memref<9x16x32xf32, #tpu.memory_space<vmem>>, vector<1x16x32xf32>
    %46 = vector.shape_cast %45 : vector<1x16x32xf32> to vector<16x32xf32>
    %cst_47 = arith.constant dense<0.000000e+00> : vector<128x32xf32>
    %47 = tpu.matmul %44, %46, %cst_47 {dimension_numbers = #tpu.dot_dimension_numbers<[1], [0], [0], [1], [0, 0, 1, 1], [], []>} : vector<128x16xf32>, vector<16x32xf32>, vector<128x32xf32> -> vector<128x32xf32>
    %48 = arith.addf %42, %47 : vector<128x32xf32>
    %c0_48 = arith.constant 0 : index
    %c33 = arith.constant 33 : index
    %c0_49 = arith.constant 0 : index
    %49 = vector.load %arg1[%c0_48, %c33, %c0_49] : memref<1x176x16xf32, #tpu.memory_space<vmem>>, vector<1x128x16xf32>
    %50 = vector.shape_cast %49 : vector<1x128x16xf32> to vector<128x16xf32>
    %c7 = arith.constant 7 : index
    %c0_50 = arith.constant 0 : index
    %c0_51 = arith.constant 0 : index
    %51 = vector.load %arg4[%c7, %c0_50, %c0_51] : memref<9x16x32xf32, #tpu.memory_space<vmem>>, vector<1x16x32xf32>
    %52 = vector.shape_cast %51 : vector<1x16x32xf32> to vector<16x32xf32>
    %cst_52 = arith.constant dense<0.000000e+00> : vector<128x32xf32>
    %53 = tpu.matmul %50, %52, %cst_52 {dimension_numbers = #tpu.dot_dimension_numbers<[1], [0], [0], [1], [0, 0, 1, 1], [], []>} : vector<128x16xf32>, vector<16x32xf32>, vector<128x32xf32> -> vector<128x32xf32>
    %54 = arith.addf %48, %53 : vector<128x32xf32>
    %c0_53 = arith.constant 0 : index
    %c34 = arith.constant 34 : index
    %c0_54 = arith.constant 0 : index
    %55 = vector.load %arg1[%c0_53, %c34, %c0_54] : memref<1x176x16xf32, #tpu.memory_space<vmem>>, vector<1x128x16xf32>
    %56 = vector.shape_cast %55 : vector<1x128x16xf32> to vector<128x16xf32>
    %c8 = arith.constant 8 : index
    %c0_55 = arith.constant 0 : index
    %c0_56 = arith.constant 0 : index
    %57 = vector.load %arg4[%c8, %c0_55, %c0_56] : memref<9x16x32xf32, #tpu.memory_space<vmem>>, vector<1x16x32xf32>
    %58 = vector.shape_cast %57 : vector<1x16x32xf32> to vector<16x32xf32>
    %cst_57 = arith.constant dense<0.000000e+00> : vector<128x32xf32>
    %59 = tpu.matmul %56, %58, %cst_57 {dimension_numbers = #tpu.dot_dimension_numbers<[1], [0], [0], [1], [0, 0, 1, 1], [], []>} : vector<128x16xf32>, vector<16x32xf32>, vector<128x32xf32> -> vector<128x32xf32>
    %60 = arith.addf %54, %59 : vector<128x32xf32>
    %c0_58 = arith.constant 0 : index
    %c0_59 = arith.constant 0 : index
    %61 = vector.load %arg8[%c0_58, %c0_59] : memref<1x32xf32, #tpu.memory_space<vmem>>, vector<1x32xf32>
    %62 = vector.broadcast %61 : vector<1x32xf32> to vector<128x32xf32>
    %63 = arith.addf %60, %62 : vector<128x32xf32>
    %c0_60 = arith.constant 0 : index
    %c0_61 = arith.constant 0 : index
    %64 = vector.load %arg3[%c0_60, %c0_61] : memref<128x1xf32, #tpu.memory_space<vmem>>, vector<128x1xf32>
    %65 = vector.broadcast %64 : vector<128x1xf32> to vector<128x32xf32>
    %66 = arith.mulf %63, %65 : vector<128x32xf32>
    %c17_62 = arith.constant 17 : index
    %c0_63 = arith.constant 0 : index
    %67 = vector.load %arg12[%c17_62, %c0_63] : memref<176x32xf32, #tpu.memory_space<vmem>>, vector<128x32xf32>
    tpu.vector_store %arg12[%c17_62, %c0_63], %66 {strides = array<i32>} : memref<176x32xf32, #tpu.memory_space<vmem>>, vector<128x32xf32>,
    %c0_64 = arith.constant 0 : index
    %c24 = arith.constant 24 : index
    %68 = vector.load %arg12[%c0_64, %c24] : memref<176x32xf32, #tpu.memory_space<vmem>>, vector<128x8xf32>
    %c0_65 = arith.constant 0 : index
    %c0_66 = arith.constant 0 : index
    %c0_67 = arith.constant 0 : index
    %69 = vector.load %arg5[%c0_65, %c0_66, %c0_67] : memref<16x8x32xf32, #tpu.memory_space<vmem>>, vector<1x8x32xf32>
    %70 = vector.shape_cast %69 : vector<1x8x32xf32> to vector<8x32xf32>
    %cst_68 = arith.constant dense<0.000000e+00> : vector<128x32xf32>
    %71 = tpu.matmul %68, %70, %cst_68 {dimension_numbers = #tpu.dot_dimension_numbers<[1], [0], [0], [1], [0, 0, 1, 1], [], []>} : vector<128x8xf32>, vector<8x32xf32>, vector<128x32xf32> -> vector<128x32xf32>
    %c0_69 = arith.constant 0 : index
    %c0_70 = arith.constant 0 : index
    %c24_71 = arith.constant 24 : index
    %72 = vector.load %arg2[%c0_69, %c0_70, %c24_71] : memref<1x176x32xf32, #tpu.memory_space<vmem>>, vector<1x128x8xf32>
    %73 = vector.shape_cast %72 : vector<1x128x8xf32> to vector<128x8xf32>
    %c0_72 = arith.constant 0 : index
    %c0_73 = arith.constant 0 : index
    %c0_74 = arith.constant 0 : index
    %74 = vector.load %arg6[%c0_72, %c0_73, %c0_74] : memref<16x8x32xf32, #tpu.memory_space<vmem>>, vector<1x8x32xf32>
    %75 = vector.shape_cast %74 : vector<1x8x32xf32> to vector<8x32xf32>
    %cst_75 = arith.constant dense<0.000000e+00> : vector<128x32xf32>
    %76 = tpu.matmul %73, %75, %cst_75 {dimension_numbers = #tpu.dot_dimension_numbers<[1], [0], [0], [1], [0, 0, 1, 1], [], []>} : vector<128x8xf32>, vector<8x32xf32>, vector<128x32xf32> -> vector<128x32xf32>
    %77 = arith.addf %71, %76 : vector<128x32xf32>
    %c1_76 = arith.constant 1 : index
    %c16_77 = arith.constant 16 : index
    %78 = vector.load %arg12[%c1_76, %c16_77] : memref<176x32xf32, #tpu.memory_space<vmem>>, vector<128x8xf32>
    %c1_78 = arith.constant 1 : index
    %c0_79 = arith.constant 0 : index
    %c0_80 = arith.constant 0 : index
    %79 = vector.load %arg5[%c1_78, %c0_79, %c0_80] : memref<16x8x32xf32, #tpu.memory_space<vmem>>, vector<1x8x32xf32>
    %80 = vector.shape_cast %79 : vector<1x8x32xf32> to vector<8x32xf32>
    %cst_81 = arith.constant dense<0.000000e+00> : vector<128x32xf32>
    %81 = tpu.matmul %78, %80, %cst_81 {dimension_numbers = #tpu.dot_dimension_numbers<[1], [0], [0], [1], [0, 0, 1, 1], [], []>} : vector<128x8xf32>, vector<8x32xf32>, vector<128x32xf32> -> vector<128x32xf32>
    %c0_82 = arith.constant 0 : index
    %c1_83 = arith.constant 1 : index
    %c16_84 = arith.constant 16 : index
    %82 = vector.load %arg2[%c0_82, %c1_83, %c16_84] : memref<1x176x32xf32, #tpu.memory_space<vmem>>, vector<1x128x8xf32>
    %83 = vector.shape_cast %82 : vector<1x128x8xf32> to vector<128x8xf32>
    %c1_85 = arith.constant 1 : index
    %c0_86 = arith.constant 0 : index
    %c0_87 = arith.constant 0 : index
    %84 = vector.load %arg6[%c1_85, %c0_86, %c0_87] : memref<16x8x32xf32, #tpu.memory_space<vmem>>, vector<1x8x32xf32>
    %85 = vector.shape_cast %84 : vector<1x8x32xf32> to vector<8x32xf32>
    %cst_88 = arith.constant dense<0.000000e+00> : vector<128x32xf32>
    %86 = tpu.matmul %83, %85, %cst_88 {dimension_numbers = #tpu.dot_dimension_numbers<[1], [0], [0], [1], [0, 0, 1, 1], [], []>} : vector<128x8xf32>, vector<8x32xf32>, vector<128x32xf32> -> vector<128x32xf32>
    %87 = arith.addf %81, %86 : vector<128x32xf32>
    %88 = arith.addf %77, %87 : vector<128x32xf32>
    %c1_89 = arith.constant 1 : index
    %c24_90 = arith.constant 24 : index
    %89 = vector.load %arg12[%c1_89, %c24_90] : memref<176x32xf32, #tpu.memory_space<vmem>>, vector<128x8xf32>
    %c2_91 = arith.constant 2 : index
    %c0_92 = arith.constant 0 : index
    %c0_93 = arith.constant 0 : index
    %90 = vector.load %arg5[%c2_91, %c0_92, %c0_93] : memref<16x8x32xf32, #tpu.memory_space<vmem>>, vector<1x8x32xf32>
    %91 = vector.shape_cast %90 : vector<1x8x32xf32> to vector<8x32xf32>
    %cst_94 = arith.constant dense<0.000000e+00> : vector<128x32xf32>
    %92 = tpu.matmul %89, %91, %cst_94 {dimension_numbers = #tpu.dot_dimension_numbers<[1], [0], [0], [1], [0, 0, 1, 1], [], []>} : vector<128x8xf32>, vector<8x32xf32>, vector<128x32xf32> -> vector<128x32xf32>
    %c0_95 = arith.constant 0 : index
    %c1_96 = arith.constant 1 : index
    %c24_97 = arith.constant 24 : index
    %93 = vector.load %arg2[%c0_95, %c1_96, %c24_97] : memref<1x176x32xf32, #tpu.memory_space<vmem>>, vector<1x128x8xf32>
    %94 = vector.shape_cast %93 : vector<1x128x8xf32> to vector<128x8xf32>
    %c2_98 = arith.constant 2 : index
    %c0_99 = arith.constant 0 : index
    %c0_100 = arith.constant 0 : index
    %95 = vector.load %arg6[%c2_98, %c0_99, %c0_100] : memref<16x8x32xf32, #tpu.memory_space<vmem>>, vector<1x8x32xf32>
    %96 = vector.shape_cast %95 : vector<1x8x32xf32> to vector<8x32xf32>
    %cst_101 = arith.constant dense<0.000000e+00> : vector<128x32xf32>
    %97 = tpu.matmul %94, %96, %cst_101 {dimension_numbers = #tpu.dot_dimension_numbers<[1], [0], [0], [1], [0, 0, 1, 1], [], []>} : vector<128x8xf32>, vector<8x32xf32>, vector<128x32xf32> -> vector<128x32xf32>
    %98 = arith.addf %92, %97 : vector<128x32xf32>
    %99 = arith.addf %88, %98 : vector<128x32xf32>
    %c2_102 = arith.constant 2 : index
    %c16_103 = arith.constant 16 : index
    %100 = vector.load %arg12[%c2_102, %c16_103] : memref<176x32xf32, #tpu.memory_space<vmem>>, vector<128x8xf32>
    %c3_104 = arith.constant 3 : index
    %c0_105 = arith.constant 0 : index
    %c0_106 = arith.constant 0 : index
    %101 = vector.load %arg5[%c3_104, %c0_105, %c0_106] : memref<16x8x32xf32, #tpu.memory_space<vmem>>, vector<1x8x32xf32>
    %102 = vector.shape_cast %101 : vector<1x8x32xf32> to vector<8x32xf32>
    %cst_107 = arith.constant dense<0.000000e+00> : vector<128x32xf32>
    %103 = tpu.matmul %100, %102, %cst_107 {dimension_numbers = #tpu.dot_dimension_numbers<[1], [0], [0], [1], [0, 0, 1, 1], [], []>} : vector<128x8xf32>, vector<8x32xf32>, vector<128x32xf32> -> vector<128x32xf32>
    %c0_108 = arith.constant 0 : index
    %c2_109 = arith.constant 2 : index
    %c16_110 = arith.constant 16 : index
    %104 = vector.load %arg2[%c0_108, %c2_109, %c16_110] : memref<1x176x32xf32, #tpu.memory_space<vmem>>, vector<1x128x8xf32>
    %105 = vector.shape_cast %104 : vector<1x128x8xf32> to vector<128x8xf32>
    %c3_111 = arith.constant 3 : index
    %c0_112 = arith.constant 0 : index
    %c0_113 = arith.constant 0 : index
    %106 = vector.load %arg6[%c3_111, %c0_112, %c0_113] : memref<16x8x32xf32, #tpu.memory_space<vmem>>, vector<1x8x32xf32>
    %107 = vector.shape_cast %106 : vector<1x8x32xf32> to vector<8x32xf32>
    %cst_114 = arith.constant dense<0.000000e+00> : vector<128x32xf32>
    %108 = tpu.matmul %105, %107, %cst_114 {dimension_numbers = #tpu.dot_dimension_numbers<[1], [0], [0], [1], [0, 0, 1, 1], [], []>} : vector<128x8xf32>, vector<8x32xf32>, vector<128x32xf32> -> vector<128x32xf32>
    %109 = arith.addf %103, %108 : vector<128x32xf32>
    %110 = arith.addf %99, %109 : vector<128x32xf32>
    %c16_115 = arith.constant 16 : index
    %c8_116 = arith.constant 8 : index
    %111 = vector.load %arg12[%c16_115, %c8_116] : memref<176x32xf32, #tpu.memory_space<vmem>>, vector<128x8xf32>
    %c4_117 = arith.constant 4 : index
    %c0_118 = arith.constant 0 : index
    %c0_119 = arith.constant 0 : index
    %112 = vector.load %arg5[%c4_117, %c0_118, %c0_119] : memref<16x8x32xf32, #tpu.memory_space<vmem>>, vector<1x8x32xf32>
    %113 = vector.shape_cast %112 : vector<1x8x32xf32> to vector<8x32xf32>
    %cst_120 = arith.constant dense<0.000000e+00> : vector<128x32xf32>
    %114 = tpu.matmul %111, %113, %cst_120 {dimension_numbers = #tpu.dot_dimension_numbers<[1], [0], [0], [1], [0, 0, 1, 1], [], []>} : vector<128x8xf32>, vector<8x32xf32>, vector<128x32xf32> -> vector<128x32xf32>
    %c0_121 = arith.constant 0 : index
    %c16_122 = arith.constant 16 : index
    %c8_123 = arith.constant 8 : index
    %115 = vector.load %arg2[%c0_121, %c16_122, %c8_123] : memref<1x176x32xf32, #tpu.memory_space<vmem>>, vector<1x128x8xf32>
    %116 = vector.shape_cast %115 : vector<1x128x8xf32> to vector<128x8xf32>
    %c4_124 = arith.constant 4 : index
    %c0_125 = arith.constant 0 : index
    %c0_126 = arith.constant 0 : index
    %117 = vector.load %arg6[%c4_124, %c0_125, %c0_126] : memref<16x8x32xf32, #tpu.memory_space<vmem>>, vector<1x8x32xf32>
    %118 = vector.shape_cast %117 : vector<1x8x32xf32> to vector<8x32xf32>
    %cst_127 = arith.constant dense<0.000000e+00> : vector<128x32xf32>
    %119 = tpu.matmul %116, %118, %cst_127 {dimension_numbers = #tpu.dot_dimension_numbers<[1], [0], [0], [1], [0, 0, 1, 1], [], []>} : vector<128x8xf32>, vector<8x32xf32>, vector<128x32xf32> -> vector<128x32xf32>
    %120 = arith.addf %114, %119 : vector<128x32xf32>
    %121 = arith.addf %110, %120 : vector<128x32xf32>
    %c17_128 = arith.constant 17 : index
    %c0_129 = arith.constant 0 : index
    %122 = vector.load %arg12[%c17_128, %c0_129] : memref<176x32xf32, #tpu.memory_space<vmem>>, vector<128x8xf32>
    %c5_130 = arith.constant 5 : index
    %c0_131 = arith.constant 0 : index
    %c0_132 = arith.constant 0 : index
    %123 = vector.load %arg5[%c5_130, %c0_131, %c0_132] : memref<16x8x32xf32, #tpu.memory_space<vmem>>, vector<1x8x32xf32>
    %124 = vector.shape_cast %123 : vector<1x8x32xf32> to vector<8x32xf32>
    %cst_133 = arith.constant dense<0.000000e+00> : vector<128x32xf32>
    %125 = tpu.matmul %122, %124, %cst_133 {dimension_numbers = #tpu.dot_dimension_numbers<[1], [0], [0], [1], [0, 0, 1, 1], [], []>} : vector<128x8xf32>, vector<8x32xf32>, vector<128x32xf32> -> vector<128x32xf32>
    %c0_134 = arith.constant 0 : index
    %c17_135 = arith.constant 17 : index
    %c0_136 = arith.constant 0 : index
    %126 = vector.load %arg2[%c0_134, %c17_135, %c0_136] : memref<1x176x32xf32, #tpu.memory_space<vmem>>, vector<1x128x8xf32>
    %127 = vector.shape_cast %126 : vector<1x128x8xf32> to vector<128x8xf32>
    %c5_137 = arith.constant 5 : index
    %c0_138 = arith.constant 0 : index
    %c0_139 = arith.constant 0 : index
    %128 = vector.load %arg6[%c5_137, %c0_138, %c0_139] : memref<16x8x32xf32, #tpu.memory_space<vmem>>, vector<1x8x32xf32>
    %129 = vector.shape_cast %128 : vector<1x8x32xf32> to vector<8x32xf32>
    %cst_140 = arith.constant dense<0.000000e+00> : vector<128x32xf32>
    %130 = tpu.matmul %127, %129, %cst_140 {dimension_numbers = #tpu.dot_dimension_numbers<[1], [0], [0], [1], [0, 0, 1, 1], [], []>} : vector<128x8xf32>, vector<8x32xf32>, vector<128x32xf32> -> vector<128x32xf32>
    %131 = arith.addf %125, %130 : vector<128x32xf32>
    %132 = arith.addf %121, %131 : vector<128x32xf32>
    %c17_141 = arith.constant 17 : index
    %c8_142 = arith.constant 8 : index
    %133 = vector.load %arg12[%c17_141, %c8_142] : memref<176x32xf32, #tpu.memory_space<vmem>>, vector<128x8xf32>
    %c6_143 = arith.constant 6 : index
    %c0_144 = arith.constant 0 : index
    %c0_145 = arith.constant 0 : index
    %134 = vector.load %arg5[%c6_143, %c0_144, %c0_145] : memref<16x8x32xf32, #tpu.memory_space<vmem>>, vector<1x8x32xf32>
    %135 = vector.shape_cast %134 : vector<1x8x32xf32> to vector<8x32xf32>
    %cst_146 = arith.constant dense<0.000000e+00> : vector<128x32xf32>
    %136 = tpu.matmul %133, %135, %cst_146 {dimension_numbers = #tpu.dot_dimension_numbers<[1], [0], [0], [1], [0, 0, 1, 1], [], []>} : vector<128x8xf32>, vector<8x32xf32>, vector<128x32xf32> -> vector<128x32xf32>
    %c0_147 = arith.constant 0 : index
    %c17_148 = arith.constant 17 : index
    %c8_149 = arith.constant 8 : index
    %137 = vector.load %arg2[%c0_147, %c17_148, %c8_149] : memref<1x176x32xf32, #tpu.memory_space<vmem>>, vector<1x128x8xf32>
    %138 = vector.shape_cast %137 : vector<1x128x8xf32> to vector<128x8xf32>
    %c6_150 = arith.constant 6 : index
    %c0_151 = arith.constant 0 : index
    %c0_152 = arith.constant 0 : index
    %139 = vector.load %arg6[%c6_150, %c0_151, %c0_152] : memref<16x8x32xf32, #tpu.memory_space<vmem>>, vector<1x8x32xf32>
    %140 = vector.shape_cast %139 : vector<1x8x32xf32> to vector<8x32xf32>
    %cst_153 = arith.constant dense<0.000000e+00> : vector<128x32xf32>
    %141 = tpu.matmul %138, %140, %cst_153 {dimension_numbers = #tpu.dot_dimension_numbers<[1], [0], [0], [1], [0, 0, 1, 1], [], []>} : vector<128x8xf32>, vector<8x32xf32>, vector<128x32xf32> -> vector<128x32xf32>
    %142 = arith.addf %136, %141 : vector<128x32xf32>
    %143 = arith.addf %132, %142 : vector<128x32xf32>
    %c18_154 = arith.constant 18 : index
    %c0_155 = arith.constant 0 : index
    %144 = vector.load %arg12[%c18_154, %c0_155] : memref<176x32xf32, #tpu.memory_space<vmem>>, vector<128x8xf32>
    %c7_156 = arith.constant 7 : index
    %c0_157 = arith.constant 0 : index
    %c0_158 = arith.constant 0 : index
    %145 = vector.load %arg5[%c7_156, %c0_157, %c0_158] : memref<16x8x32xf32, #tpu.memory_space<vmem>>, vector<1x8x32xf32>
    %146 = vector.shape_cast %145 : vector<1x8x32xf32> to vector<8x32xf32>
    %cst_159 = arith.constant dense<0.000000e+00> : vector<128x32xf32>
    %147 = tpu.matmul %144, %146, %cst_159 {dimension_numbers = #tpu.dot_dimension_numbers<[1], [0], [0], [1], [0, 0, 1, 1], [], []>} : vector<128x8xf32>, vector<8x32xf32>, vector<128x32xf32> -> vector<128x32xf32>
    %c0_160 = arith.constant 0 : index
    %c18_161 = arith.constant 18 : index
    %c0_162 = arith.constant 0 : index
    %148 = vector.load %arg2[%c0_160, %c18_161, %c0_162] : memref<1x176x32xf32, #tpu.memory_space<vmem>>, vector<1x128x8xf32>
    %149 = vector.shape_cast %148 : vector<1x128x8xf32> to vector<128x8xf32>
    %c7_163 = arith.constant 7 : index
    %c0_164 = arith.constant 0 : index
    %c0_165 = arith.constant 0 : index
    %150 = vector.load %arg6[%c7_163, %c0_164, %c0_165] : memref<16x8x32xf32, #tpu.memory_space<vmem>>, vector<1x8x32xf32>
    %151 = vector.shape_cast %150 : vector<1x8x32xf32> to vector<8x32xf32>
    %cst_166 = arith.constant dense<0.000000e+00> : vector<128x32xf32>
    %152 = tpu.matmul %149, %151, %cst_166 {dimension_numbers = #tpu.dot_dimension_numbers<[1], [0], [0], [1], [0, 0, 1, 1], [], []>} : vector<128x8xf32>, vector<8x32xf32>, vector<128x32xf32> -> vector<128x32xf32>
    %153 = arith.addf %147, %152 : vector<128x32xf32>
    %154 = arith.addf %143, %153 : vector<128x32xf32>
    %c16_167 = arith.constant 16 : index
    %c24_168 = arith.constant 24 : index
    %155 = vector.load %arg12[%c16_167, %c24_168] : memref<176x32xf32, #tpu.memory_space<vmem>>, vector<128x8xf32>
    %c8_169 = arith.constant 8 : index
    %c0_170 = arith.constant 0 : index
    %c0_171 = arith.constant 0 : index
    %156 = vector.load %arg5[%c8_169, %c0_170, %c0_171] : memref<16x8x32xf32, #tpu.memory_space<vmem>>, vector<1x8x32xf32>
    %157 = vector.shape_cast %156 : vector<1x8x32xf32> to vector<8x32xf32>
    %cst_172 = arith.constant dense<0.000000e+00> : vector<128x32xf32>
    %158 = tpu.matmul %155, %157, %cst_172 {dimension_numbers = #tpu.dot_dimension_numbers<[1], [0], [0], [1], [0, 0, 1, 1], [], []>} : vector<128x8xf32>, vector<8x32xf32>, vector<128x32xf32> -> vector<128x32xf32>
    %c0_173 = arith.constant 0 : index
    %c16_174 = arith.constant 16 : index
    %c24_175 = arith.constant 24 : index
    %159 = vector.load %arg2[%c0_173, %c16_174, %c24_175] : memref<1x176x32xf32, #tpu.memory_space<vmem>>, vector<1x128x8xf32>
    %160 = vector.shape_cast %159 : vector<1x128x8xf32> to vector<128x8xf32>
    %c8_176 = arith.constant 8 : index
    %c0_177 = arith.constant 0 : index
    %c0_178 = arith.constant 0 : index
    %161 = vector.load %arg6[%c8_176, %c0_177, %c0_178] : memref<16x8x32xf32, #tpu.memory_space<vmem>>, vector<1x8x32xf32>
    %162 = vector.shape_cast %161 : vector<1x8x32xf32> to vector<8x32xf32>
    %cst_179 = arith.constant dense<0.000000e+00> : vector<128x32xf32>
    %163 = tpu.matmul %160, %162, %cst_179 {dimension_numbers = #tpu.dot_dimension_numbers<[1], [0], [0], [1], [0, 0, 1, 1], [], []>} : vector<128x8xf32>, vector<8x32xf32>, vector<128x32xf32> -> vector<128x32xf32>
    %164 = arith.addf %158, %163 : vector<128x32xf32>
    %165 = arith.addf %154, %164 : vector<128x32xf32>
    %c17_180 = arith.constant 17 : index
    %c16_181 = arith.constant 16 : index
    %166 = vector.load %arg12[%c17_180, %c16_181] : memref<176x32xf32, #tpu.memory_space<vmem>>, vector<128x8xf32>
    %c9 = arith.constant 9 : index
    %c0_182 = arith.constant 0 : index
    %c0_183 = arith.constant 0 : index
    %167 = vector.load %arg5[%c9, %c0_182, %c0_183] : memref<16x8x32xf32, #tpu.memory_space<vmem>>, vector<1x8x32xf32>
    %168 = vector.shape_cast %167 : vector<1x8x32xf32> to vector<8x32xf32>
    %cst_184 = arith.constant dense<0.000000e+00> : vector<128x32xf32>
    %169 = tpu.matmul %166, %168, %cst_184 {dimension_numbers = #tpu.dot_dimension_numbers<[1], [0], [0], [1], [0, 0, 1, 1], [], []>} : vector<128x8xf32>, vector<8x32xf32>, vector<128x32xf32> -> vector<128x32xf32>
    %c0_185 = arith.constant 0 : index
    %c17_186 = arith.constant 17 : index
    %c16_187 = arith.constant 16 : index
    %170 = vector.load %arg2[%c0_185, %c17_186, %c16_187] : memref<1x176x32xf32, #tpu.memory_space<vmem>>, vector<1x128x8xf32>
    %171 = vector.shape_cast %170 : vector<1x128x8xf32> to vector<128x8xf32>
    %c9_188 = arith.constant 9 : index
    %c0_189 = arith.constant 0 : index
    %c0_190 = arith.constant 0 : index
    %172 = vector.load %arg6[%c9_188, %c0_189, %c0_190] : memref<16x8x32xf32, #tpu.memory_space<vmem>>, vector<1x8x32xf32>
    %173 = vector.shape_cast %172 : vector<1x8x32xf32> to vector<8x32xf32>
    %cst_191 = arith.constant dense<0.000000e+00> : vector<128x32xf32>
    %174 = tpu.matmul %171, %173, %cst_191 {dimension_numbers = #tpu.dot_dimension_numbers<[1], [0], [0], [1], [0, 0, 1, 1], [], []>} : vector<128x8xf32>, vector<8x32xf32>, vector<128x32xf32> -> vector<128x32xf32>
    %175 = arith.addf %169, %174 : vector<128x32xf32>
    %176 = arith.addf %165, %175 : vector<128x32xf32>
    %c17_192 = arith.constant 17 : index
    %c24_193 = arith.constant 24 : index
    %177 = vector.load %arg12[%c17_192, %c24_193] : memref<176x32xf32, #tpu.memory_space<vmem>>, vector<128x8xf32>
    %c10 = arith.constant 10 : index
    %c0_194 = arith.constant 0 : index
    %c0_195 = arith.constant 0 : index
    %178 = vector.load %arg5[%c10, %c0_194, %c0_195] : memref<16x8x32xf32, #tpu.memory_space<vmem>>, vector<1x8x32xf32>
    %179 = vector.shape_cast %178 : vector<1x8x32xf32> to vector<8x32xf32>
    %cst_196 = arith.constant dense<0.000000e+00> : vector<128x32xf32>
    %180 = tpu.matmul %177, %179, %cst_196 {dimension_numbers = #tpu.dot_dimension_numbers<[1], [0], [0], [1], [0, 0, 1, 1], [], []>} : vector<128x8xf32>, vector<8x32xf32>, vector<128x32xf32> -> vector<128x32xf32>
    %c0_197 = arith.constant 0 : index
    %c17_198 = arith.constant 17 : index
    %c24_199 = arith.constant 24 : index
    %181 = vector.load %arg2[%c0_197, %c17_198, %c24_199] : memref<1x176x32xf32, #tpu.memory_space<vmem>>, vector<1x128x8xf32>
    %182 = vector.shape_cast %181 : vector<1x128x8xf32> to vector<128x8xf32>
    %c10_200 = arith.constant 10 : index
    %c0_201 = arith.constant 0 : index
    %c0_202 = arith.constant 0 : index
    %183 = vector.load %arg6[%c10_200, %c0_201, %c0_202] : memref<16x8x32xf32, #tpu.memory_space<vmem>>, vector<1x8x32xf32>
    %184 = vector.shape_cast %183 : vector<1x8x32xf32> to vector<8x32xf32>
    %cst_203 = arith.constant dense<0.000000e+00> : vector<128x32xf32>
    %185 = tpu.matmul %182, %184, %cst_203 {dimension_numbers = #tpu.dot_dimension_numbers<[1], [0], [0], [1], [0, 0, 1, 1], [], []>} : vector<128x8xf32>, vector<8x32xf32>, vector<128x32xf32> -> vector<128x32xf32>
    %186 = arith.addf %180, %185 : vector<128x32xf32>
    %187 = arith.addf %176, %186 : vector<128x32xf32>
    %c18_204 = arith.constant 18 : index
    %c16_205 = arith.constant 16 : index
    %188 = vector.load %arg12[%c18_204, %c16_205] : memref<176x32xf32, #tpu.memory_space<vmem>>, vector<128x8xf32>
    %c11 = arith.constant 11 : index
    %c0_206 = arith.constant 0 : index
    %c0_207 = arith.constant 0 : index
    %189 = vector.load %arg5[%c11, %c0_206, %c0_207] : memref<16x8x32xf32, #tpu.memory_space<vmem>>, vector<1x8x32xf32>
    %190 = vector.shape_cast %189 : vector<1x8x32xf32> to vector<8x32xf32>
    %cst_208 = arith.constant dense<0.000000e+00> : vector<128x32xf32>
    %191 = tpu.matmul %188, %190, %cst_208 {dimension_numbers = #tpu.dot_dimension_numbers<[1], [0], [0], [1], [0, 0, 1, 1], [], []>} : vector<128x8xf32>, vector<8x32xf32>, vector<128x32xf32> -> vector<128x32xf32>
    %c0_209 = arith.constant 0 : index
    %c18_210 = arith.constant 18 : index
    %c16_211 = arith.constant 16 : index
    %192 = vector.load %arg2[%c0_209, %c18_210, %c16_211] : memref<1x176x32xf32, #tpu.memory_space<vmem>>, vector<1x128x8xf32>
    %193 = vector.shape_cast %192 : vector<1x128x8xf32> to vector<128x8xf32>
    %c11_212 = arith.constant 11 : index
    %c0_213 = arith.constant 0 : index
    %c0_214 = arith.constant 0 : index
    %194 = vector.load %arg6[%c11_212, %c0_213, %c0_214] : memref<16x8x32xf32, #tpu.memory_space<vmem>>, vector<1x8x32xf32>
    %195 = vector.shape_cast %194 : vector<1x8x32xf32> to vector<8x32xf32>
    %cst_215 = arith.constant dense<0.000000e+00> : vector<128x32xf32>
    %196 = tpu.matmul %193, %195, %cst_215 {dimension_numbers = #tpu.dot_dimension_numbers<[1], [0], [0], [1], [0, 0, 1, 1], [], []>} : vector<128x8xf32>, vector<8x32xf32>, vector<128x32xf32> -> vector<128x32xf32>
    %197 = arith.addf %191, %196 : vector<128x32xf32>
    %198 = arith.addf %187, %197 : vector<128x32xf32>
    %c32_216 = arith.constant 32 : index
    %c8_217 = arith.constant 8 : index
    %199 = vector.load %arg12[%c32_216, %c8_217] : memref<176x32xf32, #tpu.memory_space<vmem>>, vector<128x8xf32>
    %c12 = arith.constant 12 : index
    %c0_218 = arith.constant 0 : index
    %c0_219 = arith.constant 0 : index
    %200 = vector.load %arg5[%c12, %c0_218, %c0_219] : memref<16x8x32xf32, #tpu.memory_space<vmem>>, vector<1x8x32xf32>
    %201 = vector.shape_cast %200 : vector<1x8x32xf32> to vector<8x32xf32>
    %cst_220 = arith.constant dense<0.000000e+00> : vector<128x32xf32>
    %202 = tpu.matmul %199, %201, %cst_220 {dimension_numbers = #tpu.dot_dimension_numbers<[1], [0], [0], [1], [0, 0, 1, 1], [], []>} : vector<128x8xf32>, vector<8x32xf32>, vector<128x32xf32> -> vector<128x32xf32>
    %c0_221 = arith.constant 0 : index
    %c32_222 = arith.constant 32 : index
    %c8_223 = arith.constant 8 : index
    %203 = vector.load %arg2[%c0_221, %c32_222, %c8_223] : memref<1x176x32xf32, #tpu.memory_space<vmem>>, vector<1x128x8xf32>
    %204 = vector.shape_cast %203 : vector<1x128x8xf32> to vector<128x8xf32>
    %c12_224 = arith.constant 12 : index
    %c0_225 = arith.constant 0 : index
    %c0_226 = arith.constant 0 : index
    %205 = vector.load %arg6[%c12_224, %c0_225, %c0_226] : memref<16x8x32xf32, #tpu.memory_space<vmem>>, vector<1x8x32xf32>
    %206 = vector.shape_cast %205 : vector<1x8x32xf32> to vector<8x32xf32>
    %cst_227 = arith.constant dense<0.000000e+00> : vector<128x32xf32>
    %207 = tpu.matmul %204, %206, %cst_227 {dimension_numbers = #tpu.dot_dimension_numbers<[1], [0], [0], [1], [0, 0, 1, 1], [], []>} : vector<128x8xf32>, vector<8x32xf32>, vector<128x32xf32> -> vector<128x32xf32>
    %208 = arith.addf %202, %207 : vector<128x32xf32>
    %209 = arith.addf %198, %208 : vector<128x32xf32>
    %c33_228 = arith.constant 33 : index
    %c0_229 = arith.constant 0 : index
    %210 = vector.load %arg12[%c33_228, %c0_229] : memref<176x32xf32, #tpu.memory_space<vmem>>, vector<128x8xf32>
    %c13 = arith.constant 13 : index
    %c0_230 = arith.constant 0 : index
    %c0_231 = arith.constant 0 : index
    %211 = vector.load %arg5[%c13, %c0_230, %c0_231] : memref<16x8x32xf32, #tpu.memory_space<vmem>>, vector<1x8x32xf32>
    %212 = vector.shape_cast %211 : vector<1x8x32xf32> to vector<8x32xf32>
    %cst_232 = arith.constant dense<0.000000e+00> : vector<128x32xf32>
    %213 = tpu.matmul %210, %212, %cst_232 {dimension_numbers = #tpu.dot_dimension_numbers<[1], [0], [0], [1], [0, 0, 1, 1], [], []>} : vector<128x8xf32>, vector<8x32xf32>, vector<128x32xf32> -> vector<128x32xf32>
    %c0_233 = arith.constant 0 : index
    %c33_234 = arith.constant 33 : index
    %c0_235 = arith.constant 0 : index
    %214 = vector.load %arg2[%c0_233, %c33_234, %c0_235] : memref<1x176x32xf32, #tpu.memory_space<vmem>>, vector<1x128x8xf32>
    %215 = vector.shape_cast %214 : vector<1x128x8xf32> to vector<128x8xf32>
    %c13_236 = arith.constant 13 : index
    %c0_237 = arith.constant 0 : index
    %c0_238 = arith.constant 0 : index
    %216 = vector.load %arg6[%c13_236, %c0_237, %c0_238] : memref<16x8x32xf32, #tpu.memory_space<vmem>>, vector<1x8x32xf32>
    %217 = vector.shape_cast %216 : vector<1x8x32xf32> to vector<8x32xf32>
    %cst_239 = arith.constant dense<0.000000e+00> : vector<128x32xf32>
    %218 = tpu.matmul %215, %217, %cst_239 {dimension_numbers = #tpu.dot_dimension_numbers<[1], [0], [0], [1], [0, 0, 1, 1], [], []>} : vector<128x8xf32>, vector<8x32xf32>, vector<128x32xf32> -> vector<128x32xf32>
    %219 = arith.addf %213, %218 : vector<128x32xf32>
    %220 = arith.addf %209, %219 : vector<128x32xf32>
    %c33_240 = arith.constant 33 : index
    %c8_241 = arith.constant 8 : index
    %221 = vector.load %arg12[%c33_240, %c8_241] : memref<176x32xf32, #tpu.memory_space<vmem>>, vector<128x8xf32>
    %c14 = arith.constant 14 : index
    %c0_242 = arith.constant 0 : index
    %c0_243 = arith.constant 0 : index
    %222 = vector.load %arg5[%c14, %c0_242, %c0_243] : memref<16x8x32xf32, #tpu.memory_space<vmem>>, vector<1x8x32xf32>
    %223 = vector.shape_cast %222 : vector<1x8x32xf32> to vector<8x32xf32>
    %cst_244 = arith.constant dense<0.000000e+00> : vector<128x32xf32>
    %224 = tpu.matmul %221, %223, %cst_244 {dimension_numbers = #tpu.dot_dimension_numbers<[1], [0], [0], [1], [0, 0, 1, 1], [], []>} : vector<128x8xf32>, vector<8x32xf32>, vector<128x32xf32> -> vector<128x32xf32>
    %c0_245 = arith.constant 0 : index
    %c33_246 = arith.constant 33 : index
    %c8_247 = arith.constant 8 : index
    %225 = vector.load %arg2[%c0_245, %c33_246, %c8_247] : memref<1x176x32xf32, #tpu.memory_space<vmem>>, vector<1x128x8xf32>
    %226 = vector.shape_cast %225 : vector<1x128x8xf32> to vector<128x8xf32>
    %c14_248 = arith.constant 14 : index
    %c0_249 = arith.constant 0 : index
    %c0_250 = arith.constant 0 : index
    %227 = vector.load %arg6[%c14_248, %c0_249, %c0_250] : memref<16x8x32xf32, #tpu.memory_space<vmem>>, vector<1x8x32xf32>
    %228 = vector.shape_cast %227 : vector<1x8x32xf32> to vector<8x32xf32>
    %cst_251 = arith.constant dense<0.000000e+00> : vector<128x32xf32>
    %229 = tpu.matmul %226, %228, %cst_251 {dimension_numbers = #tpu.dot_dimension_numbers<[1], [0], [0], [1], [0, 0, 1, 1], [], []>} : vector<128x8xf32>, vector<8x32xf32>, vector<128x32xf32> -> vector<128x32xf32>
    %230 = arith.addf %224, %229 : vector<128x32xf32>
    %231 = arith.addf %220, %230 : vector<128x32xf32>
    %c34_252 = arith.constant 34 : index
    %c0_253 = arith.constant 0 : index
    %232 = vector.load %arg12[%c34_252, %c0_253] : memref<176x32xf32, #tpu.memory_space<vmem>>, vector<128x8xf32>
    %c15 = arith.constant 15 : index
    %c0_254 = arith.constant 0 : index
    %c0_255 = arith.constant 0 : index
    %233 = vector.load %arg5[%c15, %c0_254, %c0_255] : memref<16x8x32xf32, #tpu.memory_space<vmem>>, vector<1x8x32xf32>
    %234 = vector.shape_cast %233 : vector<1x8x32xf32> to vector<8x32xf32>
    %cst_256 = arith.constant dense<0.000000e+00> : vector<128x32xf32>
    %235 = tpu.matmul %232, %234, %cst_256 {dimension_numbers = #tpu.dot_dimension_numbers<[1], [0], [0], [1], [0, 0, 1, 1], [], []>} : vector<128x8xf32>, vector<8x32xf32>, vector<128x32xf32> -> vector<128x32xf32>
    %c0_257 = arith.constant 0 : index
    %c34_258 = arith.constant 34 : index
    %c0_259 = arith.constant 0 : index
    %236 = vector.load %arg2[%c0_257, %c34_258, %c0_259] : memref<1x176x32xf32, #tpu.memory_space<vmem>>, vector<1x128x8xf32>
    %237 = vector.shape_cast %236 : vector<1x128x8xf32> to vector<128x8xf32>
    %c15_260 = arith.constant 15 : index
    %c0_261 = arith.constant 0 : index
    %c0_262 = arith.constant 0 : index
    %238 = vector.load %arg6[%c15_260, %c0_261, %c0_262] : memref<16x8x32xf32, #tpu.memory_space<vmem>>, vector<1x8x32xf32>
    %239 = vector.shape_cast %238 : vector<1x8x32xf32> to vector<8x32xf32>
    %cst_263 = arith.constant dense<0.000000e+00> : vector<128x32xf32>
    %240 = tpu.matmul %237, %239, %cst_263 {dimension_numbers = #tpu.dot_dimension_numbers<[1], [0], [0], [1], [0, 0, 1, 1], [], []>} : vector<128x8xf32>, vector<8x32xf32>, vector<128x32xf32> -> vector<128x32xf32>
    %241 = arith.addf %235, %240 : vector<128x32xf32>
    %242 = arith.addf %231, %241 : vector<128x32xf32>
    %c0_264 = arith.constant 0 : index
    %c0_265 = arith.constant 0 : index
    %243 = vector.load %arg9[%c0_264, %c0_265] : memref<1x32xf32, #tpu.memory_space<vmem>>, vector<1x32xf32>
    %244 = vector.broadcast %243 : vector<1x32xf32> to vector<128x32xf32>
    %245 = arith.addf %242, %244 : vector<128x32xf32>
    %cst_266 = arith.constant 0.000000e+00 : f32
    %246 = vector.broadcast %cst_266 : f32 to vector<128x32xf32>
    %247 = arith.maximumf %245, %246 : vector<128x32xf32>
    %c0_267 = arith.constant 0 : index
    %c0_268 = arith.constant 0 : index
    %248 = vector.load %arg3[%c0_267, %c0_268] : memref<128x1xf32, #tpu.memory_space<vmem>>, vector<128x1xf32>
    %249 = vector.broadcast %248 : vector<128x1xf32> to vector<128x32xf32>
    %250 = arith.mulf %247, %249 : vector<128x32xf32>
    %c17_269 = arith.constant 17 : index
    %c0_270 = arith.constant 0 : index
    %251 = vector.load %arg13[%c17_269, %c0_270] : memref<176x32xf32, #tpu.memory_space<vmem>>, vector<128x32xf32>
    tpu.vector_store %arg13[%c17_269, %c0_270], %250 {strides = array<i32>} : memref<176x32xf32, #tpu.memory_space<vmem>>, vector<128x32xf32>,
    %c0_271 = arith.constant 0 : index
    %c24_272 = arith.constant 24 : index
    %252 = vector.load %arg13[%c0_271, %c24_272] : memref<176x32xf32, #tpu.memory_space<vmem>>, vector<128x8xf32>
    %c0_273 = arith.constant 0 : index
    %c0_274 = arith.constant 0 : index
    %c0_275 = arith.constant 0 : index
    %253 = vector.load %arg7[%c0_273, %c0_274, %c0_275] : memref<16x8x32xf32, #tpu.memory_space<vmem>>, vector<1x8x32xf32>
    %254 = vector.shape_cast %253 : vector<1x8x32xf32> to vector<8x32xf32>
    %cst_276 = arith.constant dense<0.000000e+00> : vector<128x32xf32>
    %255 = tpu.matmul %252, %254, %cst_276 {dimension_numbers = #tpu.dot_dimension_numbers<[1], [0], [0], [1], [0, 0, 1, 1], [], []>} : vector<128x8xf32>, vector<8x32xf32>, vector<128x32xf32> -> vector<128x32xf32>
    %c1_277 = arith.constant 1 : index
    %c16_278 = arith.constant 16 : index
    %256 = vector.load %arg13[%c1_277, %c16_278] : memref<176x32xf32, #tpu.memory_space<vmem>>, vector<128x8xf32>
    %c1_279 = arith.constant 1 : index
    %c0_280 = arith.constant 0 : index
    %c0_281 = arith.constant 0 : index
    %257 = vector.load %arg7[%c1_279, %c0_280, %c0_281] : memref<16x8x32xf32, #tpu.memory_space<vmem>>, vector<1x8x32xf32>
    %258 = vector.shape_cast %257 : vector<1x8x32xf32> to vector<8x32xf32>
    %cst_282 = arith.constant dense<0.000000e+00> : vector<128x32xf32>
    %259 = tpu.matmul %256, %258, %cst_282 {dimension_numbers = #tpu.dot_dimension_numbers<[1], [0], [0], [1], [0, 0, 1, 1], [], []>} : vector<128x8xf32>, vector<8x32xf32>, vector<128x32xf32> -> vector<128x32xf32>
    %260 = arith.addf %255, %259 : vector<128x32xf32>
    %c1_283 = arith.constant 1 : index
    %c24_284 = arith.constant 24 : index
    %261 = vector.load %arg13[%c1_283, %c24_284] : memref<176x32xf32, #tpu.memory_space<vmem>>, vector<128x8xf32>
    %c2_285 = arith.constant 2 : index
    %c0_286 = arith.constant 0 : index
    %c0_287 = arith.constant 0 : index
    %262 = vector.load %arg7[%c2_285, %c0_286, %c0_287] : memref<16x8x32xf32, #tpu.memory_space<vmem>>, vector<1x8x32xf32>
    %263 = vector.shape_cast %262 : vector<1x8x32xf32> to vector<8x32xf32>
    %cst_288 = arith.constant dense<0.000000e+00> : vector<128x32xf32>
    %264 = tpu.matmul %261, %263, %cst_288 {dimension_numbers = #tpu.dot_dimension_numbers<[1], [0], [0], [1], [0, 0, 1, 1], [], []>} : vector<128x8xf32>, vector<8x32xf32>, vector<128x32xf32> -> vector<128x32xf32>
    %265 = arith.addf %260, %264 : vector<128x32xf32>
    %c2_289 = arith.constant 2 : index
    %c16_290 = arith.constant 16 : index
    %266 = vector.load %arg13[%c2_289, %c16_290] : memref<176x32xf32, #tpu.memory_space<vmem>>, vector<128x8xf32>
    %c3_291 = arith.constant 3 : index
    %c0_292 = arith.constant 0 : index
    %c0_293 = arith.constant 0 : index
    %267 = vector.load %arg7[%c3_291, %c0_292, %c0_293] : memref<16x8x32xf32, #tpu.memory_space<vmem>>, vector<1x8x32xf32>
    %268 = vector.shape_cast %267 : vector<1x8x32xf32> to vector<8x32xf32>
    %cst_294 = arith.constant dense<0.000000e+00> : vector<128x32xf32>
    %269 = tpu.matmul %266, %268, %cst_294 {dimension_numbers = #tpu.dot_dimension_numbers<[1], [0], [0], [1], [0, 0, 1, 1], [], []>} : vector<128x8xf32>, vector<8x32xf32>, vector<128x32xf32> -> vector<128x32xf32>
    %270 = arith.addf %265, %269 : vector<128x32xf32>
    %c16_295 = arith.constant 16 : index
    %c8_296 = arith.constant 8 : index
    %271 = vector.load %arg13[%c16_295, %c8_296] : memref<176x32xf32, #tpu.memory_space<vmem>>, vector<128x8xf32>
    %c4_297 = arith.constant 4 : index
    %c0_298 = arith.constant 0 : index
    %c0_299 = arith.constant 0 : index
    %272 = vector.load %arg7[%c4_297, %c0_298, %c0_299] : memref<16x8x32xf32, #tpu.memory_space<vmem>>, vector<1x8x32xf32>
    %273 = vector.shape_cast %272 : vector<1x8x32xf32> to vector<8x32xf32>
    %cst_300 = arith.constant dense<0.000000e+00> : vector<128x32xf32>
    %274 = tpu.matmul %271, %273, %cst_300 {dimension_numbers = #tpu.dot_dimension_numbers<[1], [0], [0], [1], [0, 0, 1, 1], [], []>} : vector<128x8xf32>, vector<8x32xf32>, vector<128x32xf32> -> vector<128x32xf32>
    %275 = arith.addf %270, %274 : vector<128x32xf32>
    %c17_301 = arith.constant 17 : index
    %c0_302 = arith.constant 0 : index
    %276 = vector.load %arg13[%c17_301, %c0_302] : memref<176x32xf32, #tpu.memory_space<vmem>>, vector<128x8xf32>
    %c5_303 = arith.constant 5 : index
    %c0_304 = arith.constant 0 : index
    %c0_305 = arith.constant 0 : index
    %277 = vector.load %arg7[%c5_303, %c0_304, %c0_305] : memref<16x8x32xf32, #tpu.memory_space<vmem>>, vector<1x8x32xf32>
    %278 = vector.shape_cast %277 : vector<1x8x32xf32> to vector<8x32xf32>
    %cst_306 = arith.constant dense<0.000000e+00> : vector<128x32xf32>
    %279 = tpu.matmul %276, %278, %cst_306 {dimension_numbers = #tpu.dot_dimension_numbers<[1], [0], [0], [1], [0, 0, 1, 1], [], []>} : vector<128x8xf32>, vector<8x32xf32>, vector<128x32xf32> -> vector<128x32xf32>
    %280 = arith.addf %275, %279 : vector<128x32xf32>
    %c17_307 = arith.constant 17 : index
    %c8_308 = arith.constant 8 : index
    %281 = vector.load %arg13[%c17_307, %c8_308] : memref<176x32xf32, #tpu.memory_space<vmem>>, vector<128x8xf32>
    %c6_309 = arith.constant 6 : index
    %c0_310 = arith.constant 0 : index
    %c0_311 = arith.constant 0 : index
    %282 = vector.load %arg7[%c6_309, %c0_310, %c0_311] : memref<16x8x32xf32, #tpu.memory_space<vmem>>, vector<1x8x32xf32>
    %283 = vector.shape_cast %282 : vector<1x8x32xf32> to vector<8x32xf32>
    %cst_312 = arith.constant dense<0.000000e+00> : vector<128x32xf32>
    %284 = tpu.matmul %281, %283, %cst_312 {dimension_numbers = #tpu.dot_dimension_numbers<[1], [0], [0], [1], [0, 0, 1, 1], [], []>} : vector<128x8xf32>, vector<8x32xf32>, vector<128x32xf32> -> vector<128x32xf32>
    %285 = arith.addf %280, %284 : vector<128x32xf32>
    %c18_313 = arith.constant 18 : index
    %c0_314 = arith.constant 0 : index
    %286 = vector.load %arg13[%c18_313, %c0_314] : memref<176x32xf32, #tpu.memory_space<vmem>>, vector<128x8xf32>
    %c7_315 = arith.constant 7 : index
    %c0_316 = arith.constant 0 : index
    %c0_317 = arith.constant 0 : index
    %287 = vector.load %arg7[%c7_315, %c0_316, %c0_317] : memref<16x8x32xf32, #tpu.memory_space<vmem>>, vector<1x8x32xf32>
    %288 = vector.shape_cast %287 : vector<1x8x32xf32> to vector<8x32xf32>
    %cst_318 = arith.constant dense<0.000000e+00> : vector<128x32xf32>
    %289 = tpu.matmul %286, %288, %cst_318 {dimension_numbers = #tpu.dot_dimension_numbers<[1], [0], [0], [1], [0, 0, 1, 1], [], []>} : vector<128x8xf32>, vector<8x32xf32>, vector<128x32xf32> -> vector<128x32xf32>
    %290 = arith.addf %285, %289 : vector<128x32xf32>
    %c16_319 = arith.constant 16 : index
    %c24_320 = arith.constant 24 : index
    %291 = vector.load %arg13[%c16_319, %c24_320] : memref<176x32xf32, #tpu.memory_space<vmem>>, vector<128x8xf32>
    %c8_321 = arith.constant 8 : index
    %c0_322 = arith.constant 0 : index
    %c0_323 = arith.constant 0 : index
    %292 = vector.load %arg7[%c8_321, %c0_322, %c0_323] : memref<16x8x32xf32, #tpu.memory_space<vmem>>, vector<1x8x32xf32>
    %293 = vector.shape_cast %292 : vector<1x8x32xf32> to vector<8x32xf32>
    %cst_324 = arith.constant dense<0.000000e+00> : vector<128x32xf32>
    %294 = tpu.matmul %291, %293, %cst_324 {dimension_numbers = #tpu.dot_dimension_numbers<[1], [0], [0], [1], [0, 0, 1, 1], [], []>} : vector<128x8xf32>, vector<8x32xf32>, vector<128x32xf32> -> vector<128x32xf32>
    %295 = arith.addf %290, %294 : vector<128x32xf32>
    %c17_325 = arith.constant 17 : index
    %c16_326 = arith.constant 16 : index
    %296 = vector.load %arg13[%c17_325, %c16_326] : memref<176x32xf32, #tpu.memory_space<vmem>>, vector<128x8xf32>
    %c9_327 = arith.constant 9 : index
    %c0_328 = arith.constant 0 : index
    %c0_329 = arith.constant 0 : index
    %297 = vector.load %arg7[%c9_327, %c0_328, %c0_329] : memref<16x8x32xf32, #tpu.memory_space<vmem>>, vector<1x8x32xf32>
    %298 = vector.shape_cast %297 : vector<1x8x32xf32> to vector<8x32xf32>
    %cst_330 = arith.constant dense<0.000000e+00> : vector<128x32xf32>
    %299 = tpu.matmul %296, %298, %cst_330 {dimension_numbers = #tpu.dot_dimension_numbers<[1], [0], [0], [1], [0, 0, 1, 1], [], []>} : vector<128x8xf32>, vector<8x32xf32>, vector<128x32xf32> -> vector<128x32xf32>
    %300 = arith.addf %295, %299 : vector<128x32xf32>
    %c17_331 = arith.constant 17 : index
    %c24_332 = arith.constant 24 : index
    %301 = vector.load %arg13[%c17_331, %c24_332] : memref<176x32xf32, #tpu.memory_space<vmem>>, vector<128x8xf32>
    %c10_333 = arith.constant 10 : index
    %c0_334 = arith.constant 0 : index
    %c0_335 = arith.constant 0 : index
    %302 = vector.load %arg7[%c10_333, %c0_334, %c0_335] : memref<16x8x32xf32, #tpu.memory_space<vmem>>, vector<1x8x32xf32>
    %303 = vector.shape_cast %302 : vector<1x8x32xf32> to vector<8x32xf32>
    %cst_336 = arith.constant dense<0.000000e+00> : vector<128x32xf32>
    %304 = tpu.matmul %301, %303, %cst_336 {dimension_numbers = #tpu.dot_dimension_numbers<[1], [0], [0], [1], [0, 0, 1, 1], [], []>} : vector<128x8xf32>, vector<8x32xf32>, vector<128x32xf32> -> vector<128x32xf32>
    %305 = arith.addf %300, %304 : vector<128x32xf32>
    %c18_337 = arith.constant 18 : index
    %c16_338 = arith.constant 16 : index
    %306 = vector.load %arg13[%c18_337, %c16_338] : memref<176x32xf32, #tpu.memory_space<vmem>>, vector<128x8xf32>
    %c11_339 = arith.constant 11 : index
    %c0_340 = arith.constant 0 : index
    %c0_341 = arith.constant 0 : index
    %307 = vector.load %arg7[%c11_339, %c0_340, %c0_341] : memref<16x8x32xf32, #tpu.memory_space<vmem>>, vector<1x8x32xf32>
    %308 = vector.shape_cast %307 : vector<1x8x32xf32> to vector<8x32xf32>
    %cst_342 = arith.constant dense<0.000000e+00> : vector<128x32xf32>
    %309 = tpu.matmul %306, %308, %cst_342 {dimension_numbers = #tpu.dot_dimension_numbers<[1], [0], [0], [1], [0, 0, 1, 1], [], []>} : vector<128x8xf32>, vector<8x32xf32>, vector<128x32xf32> -> vector<128x32xf32>
    %310 = arith.addf %305, %309 : vector<128x32xf32>
    %c32_343 = arith.constant 32 : index
    %c8_344 = arith.constant 8 : index
    %311 = vector.load %arg13[%c32_343, %c8_344] : memref<176x32xf32, #tpu.memory_space<vmem>>, vector<128x8xf32>
    %c12_345 = arith.constant 12 : index
    %c0_346 = arith.constant 0 : index
    %c0_347 = arith.constant 0 : index
    %312 = vector.load %arg7[%c12_345, %c0_346, %c0_347] : memref<16x8x32xf32, #tpu.memory_space<vmem>>, vector<1x8x32xf32>
    %313 = vector.shape_cast %312 : vector<1x8x32xf32> to vector<8x32xf32>
    %cst_348 = arith.constant dense<0.000000e+00> : vector<128x32xf32>
    %314 = tpu.matmul %311, %313, %cst_348 {dimension_numbers = #tpu.dot_dimension_numbers<[1], [0], [0], [1], [0, 0, 1, 1], [], []>} : vector<128x8xf32>, vector<8x32xf32>, vector<128x32xf32> -> vector<128x32xf32>
    %315 = arith.addf %310, %314 : vector<128x32xf32>
    %c33_349 = arith.constant 33 : index
    %c0_350 = arith.constant 0 : index
    %316 = vector.load %arg13[%c33_349, %c0_350] : memref<176x32xf32, #tpu.memory_space<vmem>>, vector<128x8xf32>
    %c13_351 = arith.constant 13 : index
    %c0_352 = arith.constant 0 : index
    %c0_353 = arith.constant 0 : index
    %317 = vector.load %arg7[%c13_351, %c0_352, %c0_353] : memref<16x8x32xf32, #tpu.memory_space<vmem>>, vector<1x8x32xf32>
    %318 = vector.shape_cast %317 : vector<1x8x32xf32> to vector<8x32xf32>
    %cst_354 = arith.constant dense<0.000000e+00> : vector<128x32xf32>
    %319 = tpu.matmul %316, %318, %cst_354 {dimension_numbers = #tpu.dot_dimension_numbers<[1], [0], [0], [1], [0, 0, 1, 1], [], []>} : vector<128x8xf32>, vector<8x32xf32>, vector<128x32xf32> -> vector<128x32xf32>
    %320 = arith.addf %315, %319 : vector<128x32xf32>
    %c33_355 = arith.constant 33 : index
    %c8_356 = arith.constant 8 : index
    %321 = vector.load %arg13[%c33_355, %c8_356] : memref<176x32xf32, #tpu.memory_space<vmem>>, vector<128x8xf32>
    %c14_357 = arith.constant 14 : index
    %c0_358 = arith.constant 0 : index
    %c0_359 = arith.constant 0 : index
    %322 = vector.load %arg7[%c14_357, %c0_358, %c0_359] : memref<16x8x32xf32, #tpu.memory_space<vmem>>, vector<1x8x32xf32>
    %323 = vector.shape_cast %322 : vector<1x8x32xf32> to vector<8x32xf32>
    %cst_360 = arith.constant dense<0.000000e+00> : vector<128x32xf32>
    %324 = tpu.matmul %321, %323, %cst_360 {dimension_numbers = #tpu.dot_dimension_numbers<[1], [0], [0], [1], [0, 0, 1, 1], [], []>} : vector<128x8xf32>, vector<8x32xf32>, vector<128x32xf32> -> vector<128x32xf32>
    %325 = arith.addf %320, %324 : vector<128x32xf32>
    %c34_361 = arith.constant 34 : index
    %c0_362 = arith.constant 0 : index
    %326 = vector.load %arg13[%c34_361, %c0_362] : memref<176x32xf32, #tpu.memory_space<vmem>>, vector<128x8xf32>
    %c15_363 = arith.constant 15 : index
    %c0_364 = arith.constant 0 : index
    %c0_365 = arith.constant 0 : index
    %327 = vector.load %arg7[%c15_363, %c0_364, %c0_365] : memref<16x8x32xf32, #tpu.memory_space<vmem>>, vector<1x8x32xf32>
    %328 = vector.shape_cast %327 : vector<1x8x32xf32> to vector<8x32xf32>
    %cst_366 = arith.constant dense<0.000000e+00> : vector<128x32xf32>
    %329 = tpu.matmul %326, %328, %cst_366 {dimension_numbers = #tpu.dot_dimension_numbers<[1], [0], [0], [1], [0, 0, 1, 1], [], []>} : vector<128x8xf32>, vector<8x32xf32>, vector<128x32xf32> -> vector<128x32xf32>
    %330 = arith.addf %325, %329 : vector<128x32xf32>
    %c0_367 = arith.constant 0 : index
    %c0_368 = arith.constant 0 : index
    %331 = vector.load %arg10[%c0_367, %c0_368] : memref<1x32xf32, #tpu.memory_space<vmem>>, vector<1x32xf32>
    %332 = vector.broadcast %331 : vector<1x32xf32> to vector<128x32xf32>
    %333 = arith.addf %330, %332 : vector<128x32xf32>
    %cst_369 = arith.constant 0.000000e+00 : f32
    %334 = vector.broadcast %cst_369 : f32 to vector<128x32xf32>
    %335 = arith.maximumf %333, %334 : vector<128x32xf32>
    %c0_370 = arith.constant 0 : index
    %c0_371 = arith.constant 0 : index
    %c0_372 = arith.constant 0 : index
    %336 = vector.load %arg11[%c0_370, %c0_371, %c0_372] : memref<1x128x32xf32, #tpu.memory_space<vmem>>, vector<1x128x32xf32>
    %337 = vector.shape_cast %336 : vector<1x128x32xf32> to vector<128x32xf32>
    %338 = vector.shape_cast %335 : vector<128x32xf32> to vector<1x128x32xf32>
    tpu.vector_store %arg11[%c0_370, %c0_371, %c0_372], %338 {strides = array<i32>} : memref<1x128x32xf32, #tpu.memory_space<vmem>>, vector<1x128x32xf32>,
    return
  }
  func.func @transform_0(%arg0: i32) -> (i32, i32, i32) {
    %c0_i32 = arith.constant 0 : i32
    %c0_i32_0 = arith.constant 0 : i32
    %c0_i32_1 = arith.constant 0 : i32
    return %arg0, %c0_i32, %c0_i32_0 : i32, i32, i32
  }
  func.func @transform_1(%arg0: i32) -> (i32, i32, i32) {
    %c0_i32 = arith.constant 0 : i32
    %c0_i32_0 = arith.constant 0 : i32
    %c0_i32_1 = arith.constant 0 : i32
    return %arg0, %c0_i32, %c0_i32_0 : i32, i32, i32
  }
  func.func @transform_2(%arg0: i32) -> (i32, i32) {
    %c0_i32 = arith.constant 0 : i32
    %c0_i32_0 = arith.constant 0 : i32
    %c0_i32_1 = arith.constant 0 : i32
    return %c0_i32, %c0_i32_0 : i32, i32
  }
  func.func @transform_3(%arg0: i32) -> (i32, i32, i32) {
    %c0_i32 = arith.constant 0 : i32
    %c0_i32_0 = arith.constant 0 : i32
    %c0_i32_1 = arith.constant 0 : i32
    %c0_i32_2 = arith.constant 0 : i32
    return %c0_i32, %c0_i32_0, %c0_i32_1 : i32, i32, i32
  }
  func.func @transform_4(%arg0: i32) -> (i32, i32, i32) {
    %c0_i32 = arith.constant 0 : i32
    %c0_i32_0 = arith.constant 0 : i32
    %c0_i32_1 = arith.constant 0 : i32
    %c0_i32_2 = arith.constant 0 : i32
    return %c0_i32, %c0_i32_0, %c0_i32_1 : i32, i32, i32
  }
  func.func @transform_5(%arg0: i32) -> (i32, i32, i32) {
    %c0_i32 = arith.constant 0 : i32
    %c0_i32_0 = arith.constant 0 : i32
    %c0_i32_1 = arith.constant 0 : i32
    %c0_i32_2 = arith.constant 0 : i32
    return %c0_i32, %c0_i32_0, %c0_i32_1 : i32, i32, i32
  }
  func.func @transform_6(%arg0: i32) -> (i32, i32, i32) {
    %c0_i32 = arith.constant 0 : i32
    %c0_i32_0 = arith.constant 0 : i32
    %c0_i32_1 = arith.constant 0 : i32
    %c0_i32_2 = arith.constant 0 : i32
    return %c0_i32, %c0_i32_0, %c0_i32_1 : i32, i32, i32
  }
  func.func @transform_7(%arg0: i32) -> (i32, i32) {
    %c0_i32 = arith.constant 0 : i32
    %c0_i32_0 = arith.constant 0 : i32
    %c0_i32_1 = arith.constant 0 : i32
    return %c0_i32, %c0_i32_0 : i32, i32
  }
  func.func @transform_8(%arg0: i32) -> (i32, i32) {
    %c0_i32 = arith.constant 0 : i32
    %c0_i32_0 = arith.constant 0 : i32
    %c0_i32_1 = arith.constant 0 : i32
    return %c0_i32, %c0_i32_0 : i32, i32
  }
  func.func @transform_9(%arg0: i32) -> (i32, i32) {
    %c0_i32 = arith.constant 0 : i32
    %c0_i32_0 = arith.constant 0 : i32
    %c0_i32_1 = arith.constant 0 : i32
    return %c0_i32, %c0_i32_0 : i32, i32
  }
  func.func @transform_10(%arg0: i32) -> (i32, i32, i32) {
    %c0_i32 = arith.constant 0 : i32
    %c0_i32_0 = arith.constant 0 : i32
    %c0_i32_1 = arith.constant 0 : i32
    return %arg0, %c0_i32, %c0_i32_0 : i32, i32, i32
  }
}

</mosaic_0001>

<bundles_post_ra>
// kernel: tile.18
= control target key start
LH: loop header
LB: loop body
LE: loop exit
PB: predicated region body
PF: predicated region fallthrough
CT: control target
= control target key end

     0   :  { %s22_s0 = inlined_call_operand.vmem [shape: f32[8], index: 0, kind: input, shape index: {}]   ;;  %s23_s1 = inlined_call_operand.vmem [shape: f32[4,8], index: 1, kind: output, shape index: {}]  }
   0x1   :  { %v4_v0 = vld [vmem:[%s22_s0] ss:$0 sm:$0xff] }
   0x2   :  { %5 = vst [vmem:[%s23_s1] sm:$0xf] %v4_v0 }

// kernel: tile.19
= control target key start
LH: loop header
LB: loop body
LE: loop exit
PB: predicated region body
PF: predicated region fallthrough
CT: control target
= control target key end

     0   :  { %vm7_vm0 = vcmask 64512   ;;  %s37_s8 = smov 8   ;;  %s38_s9 = smov 16   ;;  %vm13_vm1 = vcmask 261312   ;;  %vm19_vm2 = vcmask 195712   ;;  %vm25_vm3 = vcmask 130112   ;;  %s55_s0 = inlined_call_operand.vmem [shape: f32[4,8], index: 0, kind: input, shape index: {}]   ;;  %s56_s1 = inlined_call_operand.vmem [shape: f32[1,32], index: 1, kind: output, shape index: {}]  }
   0x1   :  { %v4_v0 = vld [vmem:[%s55_s0] sm:$0xf]  ;;  %s36_s0 = smov 24  }
   0x2   :  { %5 = vst [vmem:[#allocation1] sm:$0xf] %v4_v0 }
   0x9   :  { %v10_v1 = vld [vmem:[#allocation1 + $0x3] sm:$0x1]   ;;  %v22_v2 = vld [vmem:[#allocation1 + $0x1] sm:$0x1]   ;;  %v6_v3 = vld [vmem:[#allocation1] sm:$0x1]  }
   0xa   :  { %11 = vrot.lane.b32.xlu0 %v10_v1, %s36_s0  ;;  %23 = vrot.lane.b32.xlu1 %v22_v2, %s37_s8  ;;  %v16_v4 = vld [vmem:[#allocation1 + $0x2] sm:$0x1]   ;;  %8 = vst.msk [vmem:[#allocation0] sm:$0x1] %vm7_vm0, %v6_v3  }
   0xe   :  { %17 = vrot.lane.b32.xlu0 %v16_v4, %s38_s9 }
  0x7c   :  { %v12_v5 = vpop.permute.xlu0 %11   ;;  %v24_v6 = vpop.permute.xlu1 %23  }
  0x7d   :  { %14 = vst.msk [vmem:[#allocation0] sm:$0x1] %vm13_vm1, %v12_v5  }
  0x80   :  { %v18_v7 = vpop.permute.xlu0 %17  }
  0x81   :  { %20 = vst.msk [vmem:[#allocation0] sm:$0x1] %vm19_vm2, %v18_v7  }
  0x82   :  { %26 = vst.msk [vmem:[#allocation0] sm:$0x1] %vm25_vm3, %v24_v6  }
  0x89   :  { %v30_v8 = vld [vmem:[#allocation0] sm:$0x1] }
  0x8a   :  { %32 = vst [vmem:[%s56_s1] sm:$0x1] %v30_v8 }

// kernel: unet_up_origin_forward.1
= control target key start
LH: loop header
LB: loop body
LE: loop exit
PB: predicated region body
PF: predicated region fallthrough
CT: control target
= control target key end

     0   :  { %s18433_s13 = smov 0   ;;  %s22744_s0 = inlined_call_operand.vmem [shape: f32[2,176,16], index: 0, kind: input, shape index: {}]   ;;  %s22745_s1 = inlined_call_operand.vmem [shape: f32[2,176,32], index: 1, kind: input, shape index: {}]   ;;  %s22746_s2 = inlined_call_operand.vmem [shape: f32[128,1], index: 2, kind: input, shape index: {}]   ;;  %s22747_s3 = inlined_call_operand.vmem [shape: f32[9,16,32], index: 3, kind: input, shape index: {}]   ;;  %s22748_s4 = inlined_call_operand.vmem [shape: f32[16,8,32], index: 4, kind: input, shape index: {}]   ;;  %s22749_s5 = inlined_call_operand.vmem [shape: f32[16,8,32], index: 5, kind: input, shape index: {}]   ;;  %s22750_s6 = inlined_call_operand.vmem [shape: f32[16,8,32], index: 6, kind: input, shape index: {}]   ;;  %s22751_s7 = inlined_call_operand.vmem [shape: f32[1,32], index: 7, kind: input, shape index: {}]   ;;  %s22752_s8 = inlined_call_operand.vmem [shape: f32[1,32], index: 8, kind: input, shape index: {}]   ;;  %s22753_s9 = inlined_call_operand.vmem [shape: f32[1,32], index: 9, kind: input, shape index: {}]   ;;  %s22754_s10 = inlined_call_operand.vmem [shape: f32[2,128,32], index: 10, kind: output, shape index: {}]  }
   0x1 LB: > { %s13927_s14 = sadd.s32 4294967295, %s18371_s13   ;;  %p13931_p0 = scmp.ge.s32.totalorder %s18371_s13, 1  ;;  %s18371_s13 = sphi %s18433_s13, %s20_s13  }
   0x2   : > { %p322_p1 = scmp.lt.s32.totalorder %s18371_s13, 3 }
   0x4   : > { %p323_p2 = pnand %p13931_p0, %p322_p1 }
   0x6   : > { %326 = sbr.rel (%p323_p2) target bundleno = 2699 (0xa8b), region = 60 }
   0xd   : > { %v13936_v0 = vld [vmem:[%s22747_s3 + $0x10] sm:$0xff]  ;;  %v13937_v1 = vld [vmem:[%s22747_s3 + $0x18] sm:$0xff]  ;;  %p365_p3 = scmp.lt.s32.totalorder %s13927_s14, 1  ;;  %v413_v2 = vld [vmem:[%s22747_s3] sm:$0xff]  ;;  %vm434_vm0 = vcmask 130048   ;;  %vm380_vm1 = vcmask 261120  }
   0xe   : > { %v17393_v3 = vpack.c.bf16 %v13937_v1, %v13936_v0  ;;  %v414_v4 = vld [vmem:[%s22747_s3 + $0x8] sm:$0xff]  ;;  %v13970_v6 = vld [vmem:[%s22747_s3 + $0x20] sm:$0xff]  ;;  %v13988_v26 = vld [vmem:[%s22747_s3 + $0x30] sm:$0xff]  ;;  %vm383_vm2 = vcmask 253952   ;;  %s18375_s19 = smov 104   ;;  %s18376_s24 = smov 112  }
   0xf   : > { %s22931_s14 = smov (!%p365_p3, %s13927_s14), 1  ;;  %v17397_v5 = vpack.c.bf16 %v414_v4, %v413_v2  ;;  %v13971_v7 = vld [vmem:[%s22747_s3 + $0x28] sm:$0xff]  ;;  %v13989_v27 = vld [vmem:[%s22747_s3 + $0x38] sm:$0xff]  ;;  %v14006_v45 = vld [vmem:[%s22747_s3 + $0x40] sm:$0xff]  ;;  %vm2650_vm3 = vcmask 64512   ;;  %s18377_s17 = smov 120  }
  0x10   : > { %17394 = vmatprep.subr.bf16.mxu0 %v17393_v3  ;;  %s18295_s23 = smul.u32 176, %s22931_s14  ;;  %v17401_v11 = vpack.c.bf16 %v13971_v7, %v13970_v6  ;;  %v17405_v30 = vpack.c.bf16 %v13989_v27, %v13988_v26  ;;  %v14007_v46 = vld [vmem:[%s22747_s3 + $0x48] sm:$0xff]  ;;  %v14024_v63 = vld [vmem:[%s22747_s3 + $0x50] sm:$0xff]  ;;  %v14025_v0 = vld [vmem:[%s22747_s3 + $0x58] sm:$0xff] }
  0x11   : > { %17396 = vmatpush3.bf16.msra.mxu0 %v17393_v3  ;;  %v17409_v49 = vpack.c.bf16 %v14007_v46, %v14006_v45  ;;  %v17413_v1 = vpack.c.bf16 %v14025_v0, %v14024_v63  ;;  %v14042_v4 = vld [vmem:[%s22747_s3 + $0x60] sm:$0xff]  ;;  %v2447_v27 = vld [vmem:[%s22746_s2 + $0x38] sm:$0xff]  ;;  %v2453_v45 = vld [vmem:[%s22746_s2 + $0x68] sm:$0xff] }
  0x12   : > { %17398 = vmatprep.subr.bf16.mxu0 %v17397_v5  ;;  %s18467_s30 = scalar_lea.vmem %s22744_s0, %s18295_s23  ;;  %v2452_v46 = vld [vmem:[%s22746_s2 + $0x60] sm:$0xff]  ;;  %s18986_s18 = scalar_lea.vmem %s22745_s1, %s18295_s23 }
  0x13   : > { %v415_v8 = vld [vmem:[%s18467_s30 + $0x1] sm:$0xff]  ;;  %v416_v9 = vld [vmem:[%s18467_s30 + $0x9] sm:$0xff]  ;;  %v18472_v10 = vld [vmem:[%s18467_s30 + $0x11] sm:$0xff] }
  0x14   : > { %15897 = vmatprep.mubr.msk.f32.mxu0 %vm434_vm0, %v415_v8  ;;  %v18479_v12 = vld [vmem:[%s18467_s30 + $0x19] sm:$0xff]  ;;  %v18482_v13 = vld [vmem:[%s18467_s30 + $0x21] sm:$0xff]  ;;  %v18489_v14 = vld [vmem:[%s18467_s30 + $0x29] sm:$0xff] }
  0x15   : > { %15898 = vmatmul.mubr.msk.f32.vlgmr.msra.gmra.mrb[0].mxu0 %vm434_vm0, %v416_v9  ;;  %v18492_v15 = vld [vmem:[%s18467_s30 + $0x31] sm:$0xff]  ;;  %v18499_v16 = vld [vmem:[%s18467_s30 + $0x39] sm:$0xff]  ;;  %v18502_v17 = vld [vmem:[%s18467_s30 + $0x41] sm:$0xff] }
  0x16   : > { %17400 = vmatpush3.bf16.msra.mxu0 %v17397_v5  ;;  %15900 = vmatprep.mubr.msk.f32.mxu0 %vm434_vm0, %v18472_v10  ;;  %v18509_v18 = vld [vmem:[%s18467_s30 + $0x49] sm:$0xff]  ;;  %v18512_v19 = vld [vmem:[%s18467_s30 + $0x51] sm:$0xff]  ;;  %v18519_v20 = vld [vmem:[%s18467_s30 + $0x59] sm:$0xff] }
  0x17   : > { %17402 = vmatprep.subr.bf16.mxu0 %v17401_v11  ;;  %v18522_v21 = vld [vmem:[%s18467_s30 + $0x61] sm:$0xff]  ;;  %v18529_v22 = vld [vmem:[%s18467_s30 + $0x69] sm:$0xff]  ;;  %v18532_v23 = vld [vmem:[%s18467_s30 + $0x71] sm:$0xff] }
  0x18   : > { %v18539_v24 = vld [vmem:[%s18467_s30 + $0x79] sm:$0xff]  ;;  %v398_v28 = vld [vmem:[%s18467_s30 + $0x8] sm:$0xff]  ;;  %v18553_v29 = vld [vmem:[%s18467_s30 + $0x10] sm:$0xff] }
  0x19   : > { %15901 = vmatmul.mubr.msk.f32.gmra.mrb[2].mxu0 %vm434_vm0, %v18479_v12  ;;  %v397_v25 = vld [vmem:[%s18467_s30] sm:$0xff]  ;;  %v18559_v31 = vld [vmem:[%s18467_s30 + $0x18] sm:$0xff]  ;;  %v18569_v33 = vld [vmem:[%s18467_s30 + $0x28] sm:$0xff] }
  0x1a   : > { %15903 = vmatprep.mubr.msk.f32.mxu0 %vm434_vm0, %v18482_v13  ;;  %v18562_v32 = vld [vmem:[%s18467_s30 + $0x20] sm:$0xff]  ;;  %v18572_v34 = vld [vmem:[%s18467_s30 + $0x30] sm:$0xff]  ;;  %v18579_v35 = vld [vmem:[%s18467_s30 + $0x38] sm:$0xff] }
  0x1b   : > { %v18582_v36 = vld [vmem:[%s18467_s30 + $0x40] sm:$0xff]  ;;  %v18589_v37 = vld [vmem:[%s18467_s30 + $0x48] sm:$0xff]  ;;  %v18592_v38 = vld [vmem:[%s18467_s30 + $0x50] sm:$0xff] }
  0x1c   : > { %v18599_v39 = vld [vmem:[%s18467_s30 + $0x58] sm:$0xff]  ;;  %v18602_v40 = vld [vmem:[%s18467_s30 + $0x60] sm:$0xff]  ;;  %v18609_v41 = vld [vmem:[%s18467_s30 + $0x68] sm:$0xff] }
  0x1d   : > { %15904 = vmatmul.mubr.msk.f32.gmra.mrb[4].mxu0 %vm434_vm0, %v18489_v14  ;;  %v18612_v42 = vld [vmem:[%s18467_s30 + $0x70] sm:$0xff]  ;;  %v18619_v43 = vld [vmem:[%s18467_s30 + $0x78] sm:$0xff]  ;;  %v821_v44 = vld [vmem:[%s18467_s30 + $0x2] sm:$0xff] }
  0x1e   : > { %15906 = vmatprep.mubr.msk.f32.mxu0 %vm434_vm0, %v18492_v15  ;;  %v822_v47 = vld [vmem:[%s18467_s30 + $0xa] sm:$0xff]  ;;  %v18633_v48 = vld [vmem:[%s18467_s30 + $0x12] sm:$0xff]  ;;  %v18639_v50 = vld [vmem:[%s18467_s30 + $0x1a] sm:$0xff] }
  0x1f   : > { %v18642_v51 = vld [vmem:[%s18467_s30 + $0x22] sm:$0xff]  ;;  %v18649_v52 = vld [vmem:[%s18467_s30 + $0x2a] sm:$0xff]  ;;  %v18652_v53 = vld [vmem:[%s18467_s30 + $0x32] sm:$0xff] }
  0x20   : > { %v18659_v54 = vld [vmem:[%s18467_s30 + $0x3a] sm:$0xff]  ;;  %v18662_v55 = vld [vmem:[%s18467_s30 + $0x42] sm:$0xff]  ;;  %v18669_v56 = vld [vmem:[%s18467_s30 + $0x4a] sm:$0xff] }
  0x21   : > { %15907 = vmatmul.mubr.msk.f32.gmra.mrb[6].mxu0 %vm434_vm0, %v18499_v16  ;;  %v18672_v57 = vld [vmem:[%s18467_s30 + $0x52] sm:$0xff]  ;;  %v18679_v58 = vld [vmem:[%s18467_s30 + $0x5a] sm:$0xff]  ;;  %v18682_v59 = vld [vmem:[%s18467_s30 + $0x62] sm:$0xff] }
  0x22   : > { %15909 = vmatprep.mubr.msk.f32.mxu0 %vm434_vm0, %v18502_v17  ;;  %v18689_v60 = vld [vmem:[%s18467_s30 + $0x6a] sm:$0xff]  ;;  %v18692_v61 = vld [vmem:[%s18467_s30 + $0x72] sm:$0xff]  ;;  %v18699_v62 = vld [vmem:[%s18467_s30 + $0x7a] sm:$0xff] }
  0x23   : > { %v18736_v2 = vld [vmem:[%s18467_s30 + $0x80] sm:$0xff]  ;;  %v18743_v3 = vld [vmem:[%s18467_s30 + $0x88] sm:$0xff]  ;;  %v14060_v9 = vld [vmem:[%s22747_s3 + $0x70] sm:$0xff] }
  0x24   : > { %v14043_v5 = vld [vmem:[%s22747_s3 + $0x68] sm:$0xff] }
  0x25   : > { %15910 = vmatmul.mubr.msk.f32.gmra.mrb[8].mxu0 %vm434_vm0, %v18509_v18  ;;  %v17417_v6 = vpack.c.bf16 %v14043_v5, %v14042_v4  ;;  %v18780_v7 = vld [vmem:[%s18467_s30 + $0x81] sm:$0xff]  ;;  %v18787_v8 = vld [vmem:[%s18467_s30 + $0x89] sm:$0xff] }
  0x26   : > { %15912 = vmatprep.mubr.msk.f32.mxu0 %vm434_vm0, %v18512_v19  ;;  %v1519_v63 = vld [vmem:[%s18467_s30 + $0x82] sm:$0xff]  ;;  %v1520_v0 = vld [vmem:[%s18467_s30 + $0x8a] sm:$0xff] }
  0x27   : > { %v14079_v4 = vld [vmem:[%s22747_s3 + $0x88] sm:$0xff] }
  0x29   : > { %15913 = vmatmul.mubr.msk.f32.gmra.mrb[10].mxu0 %vm434_vm0, %v18519_v20 }
  0x2a   : > { %15915 = vmatprep.mubr.msk.f32.mxu0 %vm434_vm0, %v18522_v21 }
  0x2d   : > { %15916 = vmatmul.mubr.msk.f32.gmra.mrb[12].mxu0 %vm434_vm0, %v18529_v22 }
  0x2e   : > { %15918 = vmatprep.mubr.msk.f32.mxu0 %vm434_vm0, %v18532_v23 }
  0x31   : > { %15919 = vmatmul.mubr.msk.f32.gmra.mrb[14].mxu0 %vm434_vm0, %v18539_v24 }
  0x32   : > { %15925 = vmatprep.mubr.msk.f32.mxu0 %vm434_vm0, %v397_v25  ;;  %v18373_v25 = vmov 0  }
  0x33   : > { %18310 = vset.pattern.permute.xlu1 %v18373_v25  ;;  %18309 = vset.pattern.permute.xlu0 %v18373_v25 }
  0x35   : > { %15926 = vmatmul.mubr.msk.f32.vlgmr.msra.gmra.mrb[0].mxu0 %vm434_vm0, %v398_v28  ;;  %v2445_v28 = vld [vmem:[%s22746_s2 + $0x28] sm:$0xff] }
  0x36   : > { %17404 = vmatpush3.bf16.msra.mxu0 %v17401_v11  ;;  %15928 = vmatprep.mubr.msk.f32.mxu0 %vm434_vm0, %v18553_v29  ;;  %v2446_v11 = vld [vmem:[%s22746_s2 + $0x30] sm:$0xff] }
  0x37   : > { %17406 = vmatprep.subr.bf16.mxu0 %v17405_v30  ;;  %2488 = vperm.xlu1 %18310, %v2446_v11  }
  0x39   : > { %15929 = vmatmul.mubr.msk.f32.gmra.mrb[2].mxu0 %vm434_vm0, %v18559_v31 }
  0x3a   : > { %15931 = vmatprep.mubr.msk.f32.mxu0 %vm434_vm0, %v18562_v32 }
  0x3b   : > { %2493 = vperm.xlu1 %18310, %v2447_v27  }
  0x3d   : > { %15932 = vmatmul.mubr.msk.f32.gmra.mrb[4].mxu0 %vm434_vm0, %v18569_v33 }
  0x3e   : > { %15934 = vmatprep.mubr.msk.f32.mxu0 %vm434_vm0, %v18572_v34 }
  0x41   : > { %15935 = vmatmul.mubr.msk.f32.gmra.mrb[6].mxu0 %vm434_vm0, %v18579_v35 }
  0x42   : > { %15937 = vmatprep.mubr.msk.f32.mxu0 %vm434_vm0, %v18582_v36 }
  0x45   : > { %15938 = vmatmul.mubr.msk.f32.gmra.mrb[8].mxu0 %vm434_vm0, %v18589_v37 }
  0x46   : > { %15940 = vmatprep.mubr.msk.f32.mxu0 %vm434_vm0, %v18592_v38 }
  0x49   : > { %15941 = vmatmul.mubr.msk.f32.gmra.mrb[10].mxu0 %vm434_vm0, %v18599_v39 }
  0x4a   : > { %15943 = vmatprep.mubr.msk.f32.mxu0 %vm434_vm0, %v18602_v40 }
  0x4d   : > { %15944 = vmatmul.mubr.msk.f32.gmra.mrb[12].mxu0 %vm434_vm0, %v18609_v41 }
  0x4e   : > { %15946 = vmatprep.mubr.msk.f32.mxu0 %vm434_vm0, %v18612_v42 }
  0x51   : > { %15947 = vmatmul.mubr.msk.f32.gmra.mrb[14].mxu0 %vm434_vm0, %v18619_v43 }
  0x52   : > { %15953 = vmatprep.mubr.msk.f32.mxu0 %vm434_vm0, %v821_v44  ;;  %v2450_v44 = vld [vmem:[%s22746_s2 + $0x50] sm:$0xff] }
  0x55   : > { %15954 = vmatmul.mubr.msk.f32.vlgmr.msra.gmra.mrb[0].mxu0 %vm434_vm0, %v822_v47  ;;  %v2441_v47 = vld [vmem:[%s22746_s2 + $0x8] sm:$0xff] }
  0x56   : > { %17408 = vmatpush3.bf16.msra.mxu0 %v17405_v30  ;;  %15956 = vmatprep.mubr.msk.f32.mxu0 %vm434_vm0, %v18633_v48  ;;  %v2448_v30 = vld [vmem:[%s22746_s2 + $0x40] sm:$0xff] }
  0x57   : > { %17410 = vmatprep.subr.bf16.mxu0 %v17409_v49 }
  0x59   : > { %15957 = vmatmul.mubr.msk.f32.gmra.mrb[2].mxu0 %vm434_vm0, %v18639_v50 }
  0x5a   : > { %15959 = vmatprep.mubr.msk.f32.mxu0 %vm434_vm0, %v18642_v51 }
  0x5d   : > { %15960 = vmatmul.mubr.msk.f32.gmra.mrb[4].mxu0 %vm434_vm0, %v18649_v52 }
  0x5e   : > { %15962 = vmatprep.mubr.msk.f32.mxu0 %vm434_vm0, %v18652_v53 }
  0x61   : > { %15963 = vmatmul.mubr.msk.f32.gmra.mrb[6].mxu0 %vm434_vm0, %v18659_v54 }
  0x62   : > { %15965 = vmatprep.mubr.msk.f32.mxu0 %vm434_vm0, %v18662_v55 }
  0x65   : > { %15966 = vmatmul.mubr.msk.f32.gmra.mrb[8].mxu0 %vm434_vm0, %v18669_v56 }
  0x66   : > { %15968 = vmatprep.mubr.msk.f32.mxu0 %vm434_vm0, %v18672_v57 }
  0x69   : > { %15969 = vmatmul.mubr.msk.f32.gmra.mrb[10].mxu0 %vm434_vm0, %v18679_v58 }
  0x6a   : > { %15971 = vmatprep.mubr.msk.f32.mxu0 %vm434_vm0, %v18682_v59 }
  0x6d   : > { %15972 = vmatmul.mubr.msk.f32.gmra.mrb[12].mxu0 %vm434_vm0, %v18689_v60 }
  0x6e   : > { %15974 = vmatprep.mubr.msk.f32.mxu0 %vm434_vm0, %v18692_v61 }
  0x71   : > { %15975 = vmatmul.mubr.msk.f32.gmra.mrb[14].mxu0 %vm434_vm0, %v18699_v62 }
  0x72   : > { %15981 = vmatprep.mubr.msk.f32.mxu0 %vm434_vm0, %v18553_v29  ;;  %v2449_v29 = vld [vmem:[%s22746_s2 + $0x48] sm:$0xff] }
  0x73   : > { %2503 = vperm.xlu1 %18310, %v2449_v29  }
  0x75   : > { %15982 = vmatmul.mubr.msk.f32.vlgmr.msra.gmra.mrb[0].mxu0 %vm434_vm0, %v18559_v31  ;;  %v2451_v31 = vld [vmem:[%s22746_s2 + $0x58] sm:$0xff] }
  0x76   : > { %17412 = vmatpush3.bf16.msra.mxu0 %v17409_v49  ;;  %15984 = vmatprep.mubr.msk.f32.mxu0 %vm434_vm0, %v18562_v32  ;;  %v2443_v49 = vld [vmem:[%s22746_s2 + $0x18] sm:$0xff] }
  0x77   : > { %17414 = vmatprep.subr.bf16.mxu0 %v17413_v1  ;;  %2513 = vperm.xlu1 %18310, %v2451_v31  }
  0x79   : > { %15985 = vmatmul.mubr.msk.f32.gmra.mrb[2].mxu0 %vm434_vm0, %v18569_v33 }
  0x7a   : > { %15987 = vmatprep.mubr.msk.f32.mxu0 %vm434_vm0, %v18572_v34 }
  0x7b   : > { %2523 = vperm.xlu1 %18310, %v2453_v45  }
  0x7d   : > { %15988 = vmatmul.mubr.msk.f32.gmra.mrb[4].mxu0 %vm434_vm0, %v18579_v35 }
  0x7e   : > { %15990 = vmatprep.mubr.msk.f32.mxu0 %vm434_vm0, %v18582_v36 }
  0x7f   : > { %2463 = vperm.xlu1 %18310, %v2441_v47  }
  0x81   : > { %15991 = vmatmul.mubr.msk.f32.gmra.mrb[6].mxu0 %vm434_vm0, %v18589_v37 }
  0x82   : > { %15993 = vmatprep.mubr.msk.f32.mxu0 %vm434_vm0, %v18592_v38 }
  0x83   : > { %2473 = vperm.xlu1 %18310, %v2443_v49  }
  0x85   : > { %15994 = vmatmul.mubr.msk.f32.gmra.mrb[8].mxu0 %vm434_vm0, %v18599_v39 }
  0x86   : > { %15996 = vmatprep.mubr.msk.f32.mxu0 %vm434_vm0, %v18602_v40 }
  0x89   : > { %15997 = vmatmul.mubr.msk.f32.gmra.mrb[10].mxu0 %vm434_vm0, %v18609_v41 }
  0x8a   : > { %15999 = vmatprep.mubr.msk.f32.mxu0 %vm434_vm0, %v18612_v42 }
  0x8d   : > { %16000 = vmatmul.mubr.msk.f32.gmra.mrb[12].mxu0 %vm434_vm0, %v18619_v43 }
  0x8e   : > { %16002 = vmatprep.mubr.msk.f32.mxu0 %vm434_vm0, %v18736_v2 }
  0x91   : > { %16003 = vmatmul.mubr.msk.f32.gmra.mrb[14].mxu0 %vm434_vm0, %v18743_v3 }
  0x92   : > { %16009 = vmatprep.mubr.msk.f32.mxu0 %vm434_vm0, %v18472_v10  ;;  %v14061_v10 = vld [vmem:[%s22747_s3 + $0x78] sm:$0xff] }
  0x93   : > { %v17421_v26 = vpack.c.bf16 %v14061_v10, %v14060_v9 }
  0x95   : > { %16010 = vmatmul.mubr.msk.f32.vlgmr.msra.gmra.mrb[0].mxu0 %vm434_vm0, %v18479_v12  ;;  %v2444_v12 = vld [vmem:[%s22746_s2 + $0x20] sm:$0xff] }
  0x96   : > { %17416 = vmatpush3.bf16.msra.mxu0 %v17413_v1  ;;  %16012 = vmatprep.mubr.msk.f32.mxu0 %vm434_vm0, %v18482_v13  ;;  %v14078_v1 = vld [vmem:[%s22747_s3 + $0x80] sm:$0xff] }
  0x97   : > { %17418 = vmatprep.subr.bf16.mxu0 %v17417_v6  ;;  %2478 = vperm.xlu0 %18309, %v2444_v12   ;;  %v17425_v5 = vpack.c.bf16 %v14079_v4, %v14078_v1 }
  0x99   : > { %16013 = vmatmul.mubr.msk.f32.gmra.mrb[2].mxu0 %vm434_vm0, %v18489_v14 }
  0x9a   : > { %16015 = vmatprep.mubr.msk.f32.mxu0 %vm434_vm0, %v18492_v15 }
  0x9b   : > { %2483 = vperm.xlu0 %18309, %v2445_v28  }
  0x9d   : > { %16016 = vmatmul.mubr.msk.f32.gmra.mrb[4].mxu0 %vm434_vm0, %v18499_v16 }
  0x9e   : > { %16018 = vmatprep.mubr.msk.f32.mxu0 %vm434_vm0, %v18502_v17 }
  0x9f   : > { %2498 = vperm.xlu0 %18309, %v2448_v30  }
  0xa1   : > { %16019 = vmatmul.mubr.msk.f32.gmra.mrb[6].mxu0 %vm434_vm0, %v18509_v18 }
  0xa2   : > { %16021 = vmatprep.mubr.msk.f32.mxu0 %vm434_vm0, %v18512_v19 }
  0xa3   : > { %2508 = vperm.xlu0 %18309, %v2450_v44  }
  0xa5   : > { %16022 = vmatmul.mubr.msk.f32.gmra.mrb[8].mxu0 %vm434_vm0, %v18519_v20 }
  0xa6   : > { %16024 = vmatprep.mubr.msk.f32.mxu0 %vm434_vm0, %v18522_v21 }
  0xa7   : > { %2518 = vperm.xlu0 %18309, %v2452_v46  }
  0xa9   : > { %16025 = vmatmul.mubr.msk.f32.gmra.mrb[10].mxu0 %vm434_vm0, %v18529_v22 }
  0xaa   : > { %16027 = vmatprep.mubr.msk.f32.mxu0 %vm434_vm0, %v18532_v23 }
  0xad   : > { %16028 = vmatmul.mubr.msk.f32.gmra.mrb[12].mxu0 %vm434_vm0, %v18539_v24 }
  0xae   : > { %16030 = vmatprep.mubr.msk.f32.mxu0 %vm434_vm0, %v18780_v7 }
  0xb1   : > { %16031 = vmatmul.mubr.msk.f32.gmra.mrb[14].mxu0 %vm434_vm0, %v18787_v8 }
  0xb2   : > { %16037 = vmatprep.mubr.msk.f32.mxu0 %vm434_vm0, %v18633_v48  ;;  %v2440_v48 = vld [vmem:[%s22746_s2] sm:$0xff] }
  0xb3   : > { %2458 = vperm.xlu0 %18309, %v2440_v48  }
  0xb5   : > { %16038 = vmatmul.mubr.msk.f32.vlgmr.msra.gmra.mrb[0].mxu0 %vm434_vm0, %v18639_v50  ;;  %v2442_v50 = vld [vmem:[%s22746_s2 + $0x10] sm:$0xff] }
  0xb6   : > { %17420 = vmatpush3.bf16.msra.mxu0 %v17417_v6  ;;  %16040 = vmatprep.mubr.msk.f32.mxu0 %vm434_vm0, %v18642_v51 }
  0xb7   : > { %17422 = vmatprep.subr.bf16.mxu0 %v17421_v26  ;;  %2468 = vperm.xlu0 %18309, %v2442_v50  }
  0xb9   : > { %16041 = vmatmul.mubr.msk.f32.gmra.mrb[2].mxu0 %vm434_vm0, %v18649_v52 }
  0xba   : > { %16043 = vmatprep.mubr.msk.f32.mxu0 %vm434_vm0, %v18652_v53 }
  0xbd   : > { %16044 = vmatmul.mubr.msk.f32.gmra.mrb[4].mxu0 %vm434_vm0, %v18659_v54 }
  0xbe   : > { %16046 = vmatprep.mubr.msk.f32.mxu0 %vm434_vm0, %v18662_v55 }
  0xc1   : > { %16047 = vmatmul.mubr.msk.f32.gmra.mrb[6].mxu0 %vm434_vm0, %v18669_v56 }
  0xc2   : > { %16049 = vmatprep.mubr.msk.f32.mxu0 %vm434_vm0, %v18672_v57 }
  0xc5   : > { %16050 = vmatmul.mubr.msk.f32.gmra.mrb[8].mxu0 %vm434_vm0, %v18679_v58 }
  0xc6   : > { %16052 = vmatprep.mubr.msk.f32.mxu0 %vm434_vm0, %v18682_v59 }
  0xc9   : > { %16053 = vmatmul.mubr.msk.f32.gmra.mrb[10].mxu0 %vm434_vm0, %v18689_v60 }
  0xca   : > { %16055 = vmatprep.mubr.msk.f32.mxu0 %vm434_vm0, %v18692_v61 }
  0xcd   : > { %16056 = vmatmul.mubr.msk.f32.gmra.mrb[12].mxu0 %vm434_vm0, %v18699_v62 }
  0xce   : > { %16058 = vmatprep.mubr.msk.f32.mxu0 %vm434_vm0, %v1519_v63 }
  0xd1   : > { %16059 = vmatmul.mubr.msk.f32.gmra.mrb[14].mxu0 %vm434_vm0, %v1520_v0 }
  0xd2   : > { %16065 = vmatprep.mubr.msk.f32.mxu0 %vm434_vm0, %v18562_v32  ;;  %v1747_v32 = vld [vmem:[%s18467_s30 + $0x90] sm:$0xff] }
  0xd5   : > { %16066 = vmatmul.mubr.msk.f32.vlgmr.msra.gmra.mrb[0].mxu0 %vm434_vm0, %v18569_v33  ;;  %v1748_v33 = vld [vmem:[%s18467_s30 + $0x98] sm:$0xff] }
  0xd6   : > { %17424 = vmatpush3.bf16.msra.mxu0 %v17421_v26  ;;  %16068 = vmatprep.mubr.msk.f32.mxu0 %vm434_vm0, %v18572_v34 }
  0xd7   : > { %17426 = vmatprep.subr.bf16.mxu0 %v17425_v5 }
  0xd9   : > { %16069 = vmatmul.mubr.msk.f32.gmra.mrb[2].mxu0 %vm434_vm0, %v18579_v35 }
  0xda   : > { %16071 = vmatprep.mubr.msk.f32.mxu0 %vm434_vm0, %v18582_v36 }
  0xdd   : > { %16072 = vmatmul.mubr.msk.f32.gmra.mrb[4].mxu0 %vm434_vm0, %v18589_v37 }
  0xde   : > { %16074 = vmatprep.mubr.msk.f32.mxu0 %vm434_vm0, %v18592_v38 }
  0xe1   : > { %16075 = vmatmul.mubr.msk.f32.gmra.mrb[6].mxu0 %vm434_vm0, %v18599_v39  ;;  %v18999_v39 = vld [vmem:[%s22751_s7] ss:$0 sm:$0xff] }
  0xe2   : > { %16077 = vmatprep.mubr.msk.f32.mxu0 %vm434_vm0, %v18602_v40 }
  0xe5   : > { %16078 = vmatmul.mubr.msk.f32.gmra.mrb[8].mxu0 %vm434_vm0, %v18609_v41 }
  0xe6   : > { %16080 = vmatprep.mubr.msk.f32.mxu0 %vm434_vm0, %v18612_v42 }
  0xe9   : > { %16081 = vmatmul.mubr.msk.f32.gmra.mrb[10].mxu0 %vm434_vm0, %v18619_v43 }
  0xea   : > { %16083 = vmatprep.mubr.msk.f32.mxu0 %vm434_vm0, %v18736_v2 }
  0xed   : > { %16084 = vmatmul.mubr.msk.f32.gmra.mrb[12].mxu0 %vm434_vm0, %v18743_v3 }
  0xee   : > { %16086 = vmatprep.mubr.msk.f32.mxu0 %vm434_vm0, %v1747_v32 }
  0xf1   : > { %16087 = vmatmul.mubr.msk.f32.gmra.mrb[14].mxu0 %vm434_vm0, %v1748_v33 }
  0xf2   : > { %16093 = vmatprep.mubr.msk.f32.mxu0 %vm434_vm0, %v18482_v13  ;;  %v1975_v13 = vld [vmem:[%s18467_s30 + $0x91] sm:$0xff] }
  0xf5   : > { %16094 = vmatmul.mubr.msk.f32.vlgmr.msra.gmra.mrb[0].mxu0 %vm434_vm0, %v18489_v14  ;;  %v1976_v14 = vld [vmem:[%s18467_s30 + $0x99] sm:$0xff] }
  0xf6   : > { %17428 = vmatpush3.bf16.msra.mxu0 %v17425_v5  ;;  %16096 = vmatprep.mubr.msk.f32.mxu0 %vm434_vm0, %v18492_v15  ;;  %v2203_v15 = vld [vmem:[%s18467_s30 + $0x92] sm:$0xff] }
  0xf9   : > { %16097 = vmatmul.mubr.msk.f32.gmra.mrb[2].mxu0 %vm434_vm0, %v18499_v16  ;;  %v2204_v16 = vld [vmem:[%s18467_s30 + $0x9a] sm:$0xff] }
  0xfa   : > { %16099 = vmatprep.mubr.msk.f32.mxu0 %vm434_vm0, %v18502_v17  ;;  %v18374_v17 = vmov 0.0  }
  0xfb   : > { %382 = vst.msk [vmem:[#allocation2 + $0x8] sm:$0xff] %vm380_vm1, %v18374_v17  ;;  %381 = vst.msk [vmem:[#allocation2] sm:$0xff] %vm380_vm1, %v18374_v17 }
  0xfc   : > { %384 = vst.msk [vmem:[#allocation2 + $0x10] sm:$0x1] %vm383_vm2, %v18374_v17  ;;  %392 = vst.msk [vmem:[#allocation3 + $0x10] sm:$0x1] %vm383_vm2, %v18374_v17 }
  0xfd   : > { %16100 = vmatmul.mubr.msk.f32.gmra.mrb[4].mxu0 %vm434_vm0, %v18509_v18  ;;  %385 = vst.msk [vmem:[#allocation2 + $0x91] sm:$0xff] %vm380_vm1, %v18374_v17  ;;  %386 = vst.msk [vmem:[#allocation2 + $0x99] sm:$0xff] %vm380_vm1, %v18374_v17  ;;  %v3072_v18 = vld [vmem:[%s18986_s18 + $0x9] sm:$0xff] }
  0xfe   : > { %16102 = vmatprep.mubr.msk.f32.mxu0 %vm434_vm0, %v18512_v19  ;;  %387 = vst.msk [vmem:[#allocation2 + $0xa1] sm:$0xff] %vm380_vm1, %v18374_v17  ;;  %390 = vst.msk [vmem:[#allocation3] sm:$0xff] %vm380_vm1, %v18374_v17  ;;  %3561 = vrot.lane.b32.xlu1 %v3072_v18, %s18375_s19  ;;  %v3071_v19 = vld [vmem:[%s18986_s18 + $0x1] sm:$0xff] }
  0xff   : > { %391 = vst.msk [vmem:[#allocation3 + $0x8] sm:$0xff] %vm380_vm1, %v18374_v17  ;;  %393 = vst.msk [vmem:[#allocation3 + $0x91] sm:$0xff] %vm380_vm1, %v18374_v17  ;;  %3559 = vrot.lane.b32.xlu0 %v3071_v19, %s18375_s19 }
 0x100   : > { %394 = vst.msk [vmem:[#allocation3 + $0x99] sm:$0xff] %vm380_vm1, %v18374_v17  ;;  %395 = vst.msk [vmem:[#allocation3 + $0xa1] sm:$0xff] %vm380_vm1, %v18374_v17  ;;  %v19050_v17 = vld [vmem:[%s22749_s5 + $0x10] sm:$0xff] }
 0x101   : > { %16103 = vmatmul.mubr.msk.f32.gmra.mrb[6].mxu0 %vm434_vm0, %v18519_v20  ;;  %v2489_v20 = vpop.permute.xlu1 %2488 }
 0x102   : > { %16105 = vmatprep.mubr.msk.f32.mxu0 %vm434_vm0, %v18522_v21 }
 0x105   : > { %16106 = vmatmul.mubr.msk.f32.gmra.mrb[8].mxu0 %vm434_vm0, %v18529_v22  ;;  %v2494_v22 = vpop.permute.xlu1 %2493 }
 0x106   : > { %16108 = vmatprep.mubr.msk.f32.mxu0 %vm434_vm0, %v18532_v23 }
 0x109   : > { %16109 = vmatmul.mubr.msk.f32.gmra.mrb[10].mxu0 %vm434_vm0, %v18539_v24  ;;  %v2504_v24 = vpop.permute.xlu1 %2503 }
 0x10a   : > { %16111 = vmatprep.mubr.msk.f32.mxu0 %vm434_vm0, %v18780_v7 }
 0x10d   : > { %16112 = vmatmul.mubr.msk.f32.gmra.mrb[12].mxu0 %vm434_vm0, %v18787_v8  ;;  %v2514_v35 = vpop.permute.xlu1 %2513 }
 0x10e   : > { %16114 = vmatprep.mubr.msk.f32.mxu0 %vm434_vm0, %v1975_v13 }
 0x111   : > { %16115 = vmatmul.mubr.msk.f32.gmra.mrb[14].mxu0 %vm434_vm0, %v1976_v14  ;;  %v18992_v37 = vpop.permute.xlu1 %2523 }
 0x112   : > { %16121 = vmatprep.mubr.msk.f32.mxu0 %vm434_vm0, %v18642_v51 }
 0x115   : > { %16122 = vmatmul.mubr.msk.f32.vlgmr.msra.gmra.mrb[0].mxu0 %vm434_vm0, %v18649_v52  ;;  %v2464_v40 = vpop.permute.xlu1 %2463 }
 0x116   : > { %16124 = vmatprep.mubr.msk.f32.mxu0 %vm434_vm0, %v18652_v53  ;;  %v2479_v21 = vpop.permute.xlu0 %2478 }
 0x119   : > { %16125 = vmatmul.mubr.msk.f32.gmra.mrb[2].mxu0 %vm434_vm0, %v18659_v54 }
 0x11a   : > { %16127 = vmatprep.mubr.msk.f32.mxu0 %vm434_vm0, %v18662_v55  ;;  %v2484_v23 = vpop.permute.xlu0 %2483 }
 0x11d   : > { %16128 = vmatmul.mubr.msk.f32.gmra.mrb[4].mxu0 %vm434_vm0, %v18669_v56  ;;  %v2474_v56 = vpop.permute.xlu1 %2473 }
 0x11e   : > { %16130 = vmatprep.mubr.msk.f32.mxu0 %vm434_vm0, %v18672_v57  ;;  %v2499_v34 = vpop.permute.xlu0 %2498 }
 0x121   : > { %16131 = vmatmul.mubr.msk.f32.gmra.mrb[6].mxu0 %vm434_vm0, %v18679_v58 }
 0x122   : > { %16133 = vmatprep.mubr.msk.f32.mxu0 %vm434_vm0, %v18682_v59  ;;  %v2509_v36 = vpop.permute.xlu0 %2508 }
 0x125   : > { %16134 = vmatmul.mubr.msk.f32.gmra.mrb[8].mxu0 %vm434_vm0, %v18689_v60 }
 0x126   : > { %16136 = vmatprep.mubr.msk.f32.mxu0 %vm434_vm0, %v18692_v61  ;;  %v18994_v38 = vpop.permute.xlu0 %2518 }
 0x129   : > { %16137 = vmatmul.mubr.msk.f32.gmra.mrb[10].mxu0 %vm434_vm0, %v18699_v62  ;;  %v14129_v62 = vld [vmem:[%s22748_s4 + $0x8] sm:$0xff] }
 0x12a   : > { %16139 = vmatprep.mubr.msk.f32.mxu0 %vm434_vm0, %v1519_v63  ;;  %17429 = vmatprep.subr.mxu1 %v14129_v62 }
 0x12b   : > { %17430 = vmatpush3.msra.mxu1 %v14129_v62 }
 0x12c   : > { %16249 = vmatprep.subr.mxu1 %v19050_v17 }
 0x12d   : > { %16140 = vmatmul.mubr.msk.f32.gmra.mrb[12].mxu0 %vm434_vm0, %v1520_v0 }
 0x12e   : > { %16142 = vmatprep.mubr.msk.f32.mxu0 %vm434_vm0, %v2203_v15 }
 0x131   : > { %16143 = vmatmul.mubr.msk.f32.gmra.mrb[14].mxu0 %vm434_vm0, %v2204_v16 }
 0x132   : > { %v2459_v41 = vpop.permute.xlu0 %2458 }
 0x136   : > { %v2469_v59 = vpop.permute.xlu0 %2468 }
 0x1e8   : > { %v16123_v42 = vpop.f32.mrb[0].mxu0 }
 0x1e9   : > { %v2425_v43 = vadd.f32 %v16123_v42, %v18999_v39  ;;  %v2322_v51 = vpop.f32.mrb[1].mxu0  ;;  %v19107_v42 = vld [vmem:[%s18986_s18 + $0x39] sm:$0xff] }
 0x1ea   : > { %v2424_v52 = vadd.f32 %v18999_v39, %v2322_v51  ;;  %v19117_v51 = vld [vmem:[%s18986_s18 + $0x49] sm:$0xff] }
 0x1eb   : > { %v2537_v53 = vmul.f32 %v2464_v40, %v2425_v43  ;;  %v19097_v40 = vld [vmem:[%s18986_s18 + $0x29] sm:$0xff]  ;;  %v19110_v43 = vld [vmem:[%s18986_s18 + $0x31] sm:$0xff] }
 0x1ec   : > { %v2536_v54 = vmul.f32 %v2459_v41, %v2424_v52  ;;  %v16126_v55 = vpop.f32.mrb[2].mxu0  ;;  %v19100_v41 = vld [vmem:[%s18986_s18 + $0x21] sm:$0xff] }
 0x1ed   : > { %2553 = vst.msk [vmem:[#allocation2 + $0x19] sm:$0xff] %vm380_vm1, %v2537_v53  ;;  %v2427_v57 = vadd.f32 %v16126_v55, %v18999_v39  ;;  %v2332_v58 = vpop.f32.mrb[3].mxu0  ;;  %v19120_v52 = vld [vmem:[%s18986_s18 + $0x41] sm:$0xff]  ;;  %v19127_v53 = vld [vmem:[%s18986_s18 + $0x59] sm:$0xff]  ;;  %v19137_v55 = vld [vmem:[%s18986_s18 + $0x69] sm:$0xff] }
 0x1ee   : > { %2552 = vst.msk [vmem:[#allocation2 + $0x11] sm:$0xff] %vm380_vm1, %v2536_v54  ;;  %v2426_v60 = vadd.f32 %v18999_v39, %v2332_v58  ;;  %v19130_v54 = vld [vmem:[%s18986_s18 + $0x51] sm:$0xff] }
 0x1ef   : > { %v2539_v61 = vmul.f32 %v2474_v56, %v2427_v57  ;;  %v19140_v56 = vld [vmem:[%s18986_s18 + $0x61] sm:$0xff]  ;;  %v19147_v57 = vld [vmem:[%s18986_s18 + $0x79] sm:$0xff]  ;;  %v19150_v58 = vld [vmem:[%s18986_s18 + $0x71] sm:$0xff] }
 0x1f0   : > { %v2538_v2 = vmul.f32 %v2469_v59, %v2426_v60  ;;  %v16129_v3 = vpop.f32.mrb[4].mxu0  ;;  %v3054_v59 = vld [vmem:[#allocation2 + $0x9] sm:$0xff]  ;;  %v3053_v60 = vld [vmem:[#allocation2 + $0x1] sm:$0xff] }
 0x1f1   : > { %2555 = vst.msk [vmem:[#allocation2 + $0x29] sm:$0xff] %vm380_vm1, %v2539_v61  ;;  %v2429_v6 = vadd.f32 %v16129_v3, %v18999_v39  ;;  %v2342_v7 = vpop.f32.mrb[5].mxu0 }
 0x1f2   : > { %2554 = vst.msk [vmem:[#allocation2 + $0x21] sm:$0xff] %vm380_vm1, %v2538_v2  ;;  %v2428_v8 = vadd.f32 %v18999_v39, %v2342_v7  ;;  %v4011_v7 = vld [vmem:[%s18986_s18 + $0x2] sm:$0xff] }
 0x1f3   : > { %v2541_v9 = vmul.f32 %v2484_v23, %v2429_v6  ;;  %v2454_v6 = vld [vmem:[%s22746_s2 + $0x70] sm:$0xff] }
 0x1f4   : > { %v2540_v10 = vmul.f32 %v2479_v21, %v2428_v8  ;;  %v16132_v11 = vpop.f32.mrb[6].mxu0  ;;  %v19158_v61 = vld [vmem:[#allocation2 + $0x19] sm:$0xff] }
 0x1f5   : > { %2557 = vst.msk [vmem:[#allocation2 + $0x39] sm:$0xff] %vm380_vm1, %v2541_v9  ;;  %v2431_v12 = vadd.f32 %v16132_v11, %v18999_v39  ;;  %v2352_v25 = vpop.f32.mrb[7].mxu0  ;;  %v19162_v62 = vld [vmem:[#allocation2 + $0x11] sm:$0xff]  ;;  %v4014_v11 = vld [vmem:[%s18986_s18 + $0x1a] sm:$0xff] }
 0x1f6   : > { %2556 = vst.msk [vmem:[#allocation2 + $0x31] sm:$0xff] %vm380_vm1, %v2540_v10  ;;  %v2430_v26 = vadd.f32 %v18999_v39, %v2352_v25  ;;  %v4013_v8 = vld [vmem:[%s18986_s18 + $0x12] sm:$0xff]  ;;  %v4012_v9 = vld [vmem:[%s18986_s18 + $0xa] sm:$0xff]  ;;  %v4015_v10 = vld [vmem:[%s18986_s18 + $0x22] sm:$0xff] }
 0x1f7   : > { %v2543_v27 = vmul.f32 %v2494_v22, %v2431_v12  ;;  %v4017_v12 = vld [vmem:[%s18986_s18 + $0x32] sm:$0xff]  ;;  %v4016_v25 = vld [vmem:[%s18986_s18 + $0x2a] sm:$0xff] }
 0x1f8   : > { %v2542_v28 = vmul.f32 %v2489_v20, %v2430_v26  ;;  %v16135_v29 = vpop.f32.mrb[8].mxu0  ;;  %v19166_v2 = vld [vmem:[#allocation2 + $0x29] sm:$0xff] }
 0x1f9   : > { %2559 = vst.msk [vmem:[#allocation2 + $0x49] sm:$0xff] %vm380_vm1, %v2543_v27  ;;  %v2433_v30 = vadd.f32 %v16135_v29, %v18999_v39  ;;  %v2362_v31 = vpop.f32.mrb[9].mxu0  ;;  %v19170_v3 = vld [vmem:[#allocation2 + $0x21] sm:$0xff]  ;;  %v4020_v29 = vld [vmem:[%s18986_s18 + $0x4a] sm:$0xff] }
 0x1fa   : > { %2558 = vst.msk [vmem:[#allocation2 + $0x41] sm:$0xff] %vm380_vm1, %v2542_v28  ;;  %v2432_v44 = vadd.f32 %v18999_v39, %v2362_v31  ;;  %v4019_v26 = vld [vmem:[%s18986_s18 + $0x42] sm:$0xff]  ;;  %v4018_v27 = vld [vmem:[%s18986_s18 + $0x3a] sm:$0xff]  ;;  %v4021_v28 = vld [vmem:[%s18986_s18 + $0x52] sm:$0xff] }
 0x1fb   : > { %v2545_v45 = vmul.f32 %v2504_v24, %v2433_v30  ;;  %v4023_v30 = vld [vmem:[%s18986_s18 + $0x62] sm:$0xff]  ;;  %v4022_v31 = vld [vmem:[%s18986_s18 + $0x5a] sm:$0xff] }
 0x1fc   : > { %v2544_v46 = vmul.f32 %v2499_v34, %v2432_v44  ;;  %v16138_v47 = vpop.f32.mrb[10].mxu0  ;;  %v19022_v48 = vld [vmem:[#allocation2 + $0x39] sm:$0xff] }
 0x1fd   : > { %2561 = vst.msk [vmem:[#allocation2 + $0x59] sm:$0xff] %vm380_vm1, %v2545_v45  ;;  %v2435_v49 = vadd.f32 %v16138_v47, %v18999_v39  ;;  %3344 = vrot.lane.b32.xlu1 %v19022_v48, %s18376_s24  ;;  %v2372_v50 = vpop.f32.mrb[11].mxu0  ;;  %v19028_v63 = vld [vmem:[#allocation2 + $0x31] sm:$0xff]  ;;  %v3560_v47 = vpop.permute.xlu0 %3559 }
 0x1fe   : > { %2560 = vst.msk [vmem:[#allocation2 + $0x51] sm:$0xff] %vm380_vm1, %v2544_v46  ;;  %v2434_v0 = vadd.f32 %v18999_v39, %v2372_v50  ;;  %3342 = vrot.lane.b32.xlu0 %v19028_v63, %s18376_s24  ;;  %v4025_v44 = vld [vmem:[%s18986_s18 + $0x72] sm:$0xff]  ;;  %v4024_v45 = vld [vmem:[%s18986_s18 + $0x6a] sm:$0xff]  ;;  %v3562_v46 = vpop.permute.xlu1 %3561  ;;  %v4026_v50 = vld [vmem:[%s18986_s18 + $0x7a] sm:$0xff] }
 0x1ff   : > { %v2547_v1 = vmul.f32 %v2514_v35, %v2435_v49  ;;  %v3993_v49 = vld [vmem:[#allocation2 + $0x2] sm:$0xff] }
 0x200   : > { %v2546_v4 = vmul.f32 %v2509_v36, %v2434_v0  ;;  %v16141_v5 = vpop.f32.mrb[12].mxu0  ;;  %v19034_v32 = vld [vmem:[#allocation2 + $0x49] sm:$0xff] }
 0x201   : > { %2563 = vst.msk [vmem:[#allocation2 + $0x69] sm:$0xff] %vm380_vm1, %v2547_v1  ;;  %v2437_v33 = vadd.f32 %v16141_v5, %v18999_v39  ;;  %3348 = vrot.lane.b32.xlu1 %v19034_v32, %s18376_s24  ;;  %v2382_v13 = vpop.f32.mrb[13].mxu0  ;;  %v19040_v14 = vld [vmem:[#allocation2 + $0x41] sm:$0xff]  ;;  %v3994_v5 = vld [vmem:[#allocation2 + $0xa] sm:$0xff] }
 0x202   : > { %2562 = vst.msk [vmem:[#allocation2 + $0x61] sm:$0xff] %vm380_vm1, %v2546_v4  ;;  %v2436_v15 = vadd.f32 %v18999_v39, %v2382_v13  ;;  %3346 = vrot.lane.b32.xlu0 %v19040_v14, %s18376_s24  ;;  %v3995_v4 = vld [vmem:[#allocation2 + $0x12] sm:$0xff] }
 0x203   : > { %v2549_v16 = vmul.f32 %v18992_v37, %v2437_v33  ;;  %v14163_v33 = vld [vmem:[%s22748_s4 + $0x10] sm:$0xff] }
 0x204   : > { %v2548_v18 = vmul.f32 %v18994_v38, %v2436_v15  ;;  %v16144_v19 = vpop.f32.mrb[14].mxu0  ;;  %v19053_v20 = vld [vmem:[#allocation2 + $0x59] sm:$0xff] }
 0x205   : > { %2565 = vst.msk [vmem:[#allocation2 + $0x79] sm:$0xff] %vm380_vm1, %v2549_v16  ;;  %v19058_v21 = vadd.f32 %v16144_v19, %v18999_v39  ;;  %3352 = vrot.lane.b32.xlu1 %v19053_v20, %s18376_s24  ;;  %v2392_v22 = vpop.f32.mrb[15].mxu0  ;;  %v19062_v23 = vld [vmem:[#allocation2 + $0x51] sm:$0xff]  ;;  %v19087_v38 = vld [vmem:[%s18986_s18 + $0x19] sm:$0xff]  ;;  %v3997_v16 = vld [vmem:[#allocation2 + $0x22] sm:$0xff] }
 0x206   : > { %2564 = vst.msk [vmem:[#allocation2 + $0x71] sm:$0xff] %vm380_vm1, %v2548_v18  ;;  %v19066_v24 = vadd.f32 %v18999_v39, %v2392_v22  ;;  %3350 = vrot.lane.b32.xlu0 %v19062_v23, %s18376_s24  ;;  %v19090_v39 = vld [vmem:[%s18986_s18 + $0x11] sm:$0xff]  ;;  %v3996_v18 = vld [vmem:[#allocation2 + $0x1a] sm:$0xff] }
 0x208   : > { %v19070_v34 = vld [vmem:[#allocation2 + $0x69] sm:$0xff] }
 0x209   : > { %3356 = vrot.lane.b32.xlu1 %v19070_v34, %s18376_s24  ;;  %v19074_v35 = vld [vmem:[#allocation2 + $0x61] sm:$0xff] }
 0x20a   : > { %3354 = vrot.lane.b32.xlu0 %v19074_v35, %s18376_s24 }
 0x20c   : > { %v19078_v36 = vld [vmem:[#allocation2 + $0x79] sm:$0xff] }
 0x20d   : > { %3360 = vrot.lane.b32.xlu1 %v19078_v36, %s18376_s24  ;;  %v19082_v37 = vld [vmem:[#allocation2 + $0x71] sm:$0xff] }
 0x20e   : > { %3358 = vrot.lane.b32.xlu0 %v19082_v37, %s18376_s24 }
 0x211   : > { %3565 = vrot.lane.b32.xlu1 %v19087_v38, %s18375_s19 }
 0x212   : > { %3563 = vrot.lane.b32.xlu0 %v19090_v39, %s18375_s19 }
 0x215   : > { %3569 = vrot.lane.b32.xlu1 %v19097_v40, %s18375_s19 }
 0x216   : > { %3567 = vrot.lane.b32.xlu0 %v19100_v41, %s18375_s19 }
 0x219   : > { %3573 = vrot.lane.b32.xlu1 %v19107_v42, %s18375_s19 }
 0x21a   : > { %3571 = vrot.lane.b32.xlu0 %v19110_v43, %s18375_s19 }
 0x21d   : > { %3577 = vrot.lane.b32.xlu1 %v19117_v51, %s18375_s19 }
 0x21e   : > { %3575 = vrot.lane.b32.xlu0 %v19120_v52, %s18375_s19 }
 0x221   : > { %3581 = vrot.lane.b32.xlu1 %v19127_v53, %s18375_s19 }
 0x222   : > { %3579 = vrot.lane.b32.xlu0 %v19130_v54, %s18375_s19 }
 0x225   : > { %3585 = vrot.lane.b32.xlu1 %v19137_v55, %s18375_s19 }
 0x226   : > { %3583 = vrot.lane.b32.xlu0 %v19140_v56, %s18375_s19 }
 0x229   : > { %3589 = vrot.lane.b32.xlu1 %v19147_v57, %s18375_s19 }
 0x22a   : > { %3587 = vrot.lane.b32.xlu0 %v19150_v58, %s18375_s19 }
 0x22d   : > { %3770 = vrot.lane.b32.xlu1 %v3054_v59, %s18375_s19  ;;  %v3999_v59 = vld [vmem:[#allocation2 + $0x32] sm:$0xff] }
 0x22e   : > { %3768 = vrot.lane.b32.xlu0 %v3053_v60, %s18375_s19 }
 0x231   : > { %3774 = vrot.lane.b32.xlu1 %v19158_v61, %s18375_s19 }
 0x232   : > { %3772 = vrot.lane.b32.xlu0 %v19162_v62, %s18375_s19 }
 0x235   : > { %3778 = vrot.lane.b32.xlu1 %v19166_v2, %s18375_s19 }
 0x236   : > { %3776 = vrot.lane.b32.xlu0 %v19170_v3, %s18375_s19 }
 0x239   : > { %3782 = vrot.lane.b32.xlu1 %v19022_v48, %s18375_s19 }
 0x23a   : > { %3780 = vrot.lane.b32.xlu0 %v19028_v63, %s18375_s19 }
 0x23d   : > { %3786 = vrot.lane.b32.xlu1 %v19034_v32, %s18375_s19 }
 0x23e   : > { %3784 = vrot.lane.b32.xlu0 %v19040_v14, %s18375_s19 }
 0x241   : > { %3788 = vrot.lane.b32.xlu1 %v19062_v23, %s18375_s19 }
 0x242   : > { %2528 = vperm.xlu0 %18309, %v2454_v6  }
 0x245   : > { %3792 = vrot.lane.b32.xlu1 %v19074_v35, %s18375_s19 }
 0x246   : > { %3790 = vrot.lane.b32.xlu0 %v19053_v20, %s18375_s19 }
 0x249   : > { %3796 = vrot.lane.b32.xlu1 %v19082_v37, %s18375_s19 }
 0x24a   : > { %3794 = vrot.lane.b32.xlu0 %v19070_v34, %s18375_s19 }
 0x24d   : > { %4045 = vrot.lane.b32.xlu1 %v4011_v7, %s18376_s24  ;;  %v4001_v7 = vld [vmem:[#allocation2 + $0x42] sm:$0xff] }
 0x24e   : > { %3798 = vrot.lane.b32.xlu0 %v19078_v36, %s18375_s19 }
 0x251   : > { %4049 = vrot.lane.b32.xlu1 %v4013_v8, %s18376_s24  ;;  %v4000_v8 = vld [vmem:[#allocation2 + $0x3a] sm:$0xff] }
 0x252   : > { %4047 = vrot.lane.b32.xlu0 %v4012_v9, %s18376_s24  ;;  %v2455_v9 = vld [vmem:[%s22746_s2 + $0x78] sm:$0xff] }
 0x255   : > { %4053 = vrot.lane.b32.xlu1 %v4015_v10, %s18376_s24 }
 0x256   : > { %4051 = vrot.lane.b32.xlu0 %v4014_v11, %s18376_s24 }
 0x259   : > { %4057 = vrot.lane.b32.xlu1 %v4017_v12, %s18376_s24  ;;  %v4002_v12 = vld [vmem:[#allocation2 + $0x4a] sm:$0xff] }
 0x25a   : > { %4055 = vrot.lane.b32.xlu0 %v4016_v25, %s18376_s24 }
 0x25d   : > { %4061 = vrot.lane.b32.xlu1 %v4019_v26, %s18376_s24 }
 0x25e   : > { %4059 = vrot.lane.b32.xlu0 %v4018_v27, %s18376_s24  ;;  %v4004_v27 = vld [vmem:[#allocation2 + $0x5a] sm:$0xff] }
 0x261   : > { %4065 = vrot.lane.b32.xlu1 %v4021_v28, %s18376_s24  ;;  %v4003_v28 = vld [vmem:[#allocation2 + $0x52] sm:$0xff] }
 0x262   : > { %4063 = vrot.lane.b32.xlu0 %v4020_v29, %s18376_s24  ;;  %v14198_v29 = vld [vmem:[%s22749_s5 + $0x18] sm:$0xff] }
 0x265   : > { %4069 = vrot.lane.b32.xlu1 %v4023_v30, %s18376_s24 }
 0x266   : > { %4067 = vrot.lane.b32.xlu0 %v4022_v31, %s18376_s24 }
 0x269   : > { %4073 = vrot.lane.b32.xlu1 %v4025_v44, %s18376_s24  ;;  %v4006_v44 = vld [vmem:[#allocation2 + $0x6a] sm:$0xff] }
 0x26a   : > { %4071 = vrot.lane.b32.xlu0 %v4024_v45, %s18376_s24  ;;  %v4005_v45 = vld [vmem:[#allocation2 + $0x62] sm:$0xff] }
 0x26d   : > { %4270 = vrot.lane.b32.xlu1 %v3993_v49, %s18376_s24  ;;  %v4007_v49 = vld [vmem:[#allocation2 + $0x72] sm:$0xff] }
 0x26e   : > { %4075 = vrot.lane.b32.xlu0 %v4026_v50, %s18376_s24 }
 0x26f   : > { %v3345_v0 = vpop.permute.xlu1 %3344 }
 0x270   : > { %v3343_v1 = vpop.permute.xlu0 %3342 }
 0x271   : > { %16234 = vmatprep.mubr.msk.f32.mxu1 %vm2650_vm3, %v3343_v1  ;;  %4274 = vrot.lane.b32.xlu1 %v3995_v4, %s18376_s24 }
 0x272   : > { %16235 = vmatmul.mubr.msk.f32.vlgmr.msra.gmra.mrb[0].mxu1 %vm2650_vm3, %v3345_v0  ;;  %4272 = vrot.lane.b32.xlu0 %v3994_v5, %s18376_s24  ;;  %v19272_v0 = vld [vmem:[%s18986_s18 + $0x10] sm:$0xff]  ;;  %v19279_v5 = vld [vmem:[%s18986_s18 + $0x20] sm:$0xff] }
 0x273   : > { %v3349_v13 = vpop.permute.xlu1 %3348  ;;  %16250 = vmatpush3.msra.mxu1 %v19050_v17  ;;  %v3998_v17 = vld [vmem:[#allocation2 + $0x2a] sm:$0xff] }
 0x274   : > { %v3347_v15 = vpop.permute.xlu0 %3346  ;;  %16275 = vmatprep.subr.mxu1 %v14163_v33 }
 0x275   : > { %16237 = vmatprep.mubr.msk.f32.mxu1 %vm2650_vm3, %v3347_v15  ;;  %4278 = vrot.lane.b32.xlu1 %v3997_v16, %s18376_s24  ;;  %v19286_v15 = vld [vmem:[%s18986_s18 + $0x30] sm:$0xff] }
 0x276   : > { %16238 = vmatmul.mubr.msk.f32.gmra.mrb[2].mxu1 %vm2650_vm3, %v3349_v13  ;;  %4276 = vrot.lane.b32.xlu0 %v3996_v18, %s18376_s24 }
 0x277   : > { %v3353_v19 = vpop.permute.xlu1 %3352 }
 0x278   : > { %v3351_v22 = vpop.permute.xlu0 %3350 }
 0x279   : > { %16240 = vmatprep.mubr.msk.f32.mxu1 %vm2650_vm3, %v3351_v22  ;;  %4282 = vrot.lane.b32.xlu1 %v3999_v59, %s18376_s24 }
 0x27a   : > { %16241 = vmatmul.mubr.msk.f32.gmra.mrb[4].mxu1 %vm2650_vm3, %v3353_v19  ;;  %4280 = vrot.lane.b32.xlu0 %v3998_v17, %s18376_s24  ;;  %v19293_v19 = vld [vmem:[%s18986_s18 + $0x40] sm:$0xff]  ;;  %v19300_v17 = vld [vmem:[%s18986_s18 + $0x50] sm:$0xff] }
 0x27b   : > { %v3357_v60 = vpop.permute.xlu1 %3356 }
 0x27c   : > { %v3355_v6 = vpop.permute.xlu0 %3354 }
 0x27d   : > { %16243 = vmatprep.mubr.msk.f32.mxu1 %vm2650_vm3, %v3355_v6  ;;  %4286 = vrot.lane.b32.xlu1 %v4001_v7, %s18376_s24  ;;  %v19307_v7 = vld [vmem:[%s18986_s18 + $0x60] sm:$0xff] }
 0x27e   : > { %16244 = vmatmul.mubr.msk.f32.gmra.mrb[6].mxu1 %vm2650_vm3, %v3357_v60  ;;  %4284 = vrot.lane.b32.xlu0 %v4000_v8, %s18376_s24 }
 0x27f   : > { %v3361_v10 = vpop.permute.xlu1 %3360 }
 0x280   : > { %v3359_v11 = vpop.permute.xlu0 %3358 }
 0x281   : > { %2533 = vperm.xlu1 %18310, %v2455_v9   ;;  %16246 = vmatprep.mubr.msk.f32.mxu1 %vm2650_vm3, %v3359_v11  ;;  %v19312_v9 = vld [vmem:[%s22748_s4 + $0x18] sm:$0xff]  ;;  %v19319_v11 = vld [vmem:[%s18986_s18 + $0x70] sm:$0xff] }
 0x282   : > { %4288 = vrot.lane.b32.xlu0 %v4002_v12, %s18376_s24  ;;  %16247 = vmatmul.mubr.msk.f32.gmra.mrb[8].mxu1 %vm2650_vm3, %v3361_v10 }
 0x283   : > { %v3566_v25 = vpop.permute.xlu1 %3565  ;;  %16251 = vmatprep.mubr.msk.f32.mxu1 %vm2650_vm3, %v3560_v47 }
 0x284   : > { %v3564_v26 = vpop.permute.xlu0 %3563 }
 0x285   : > { %4292 = vrot.lane.b32.xlu1 %v4004_v27, %s18376_s24 }
 0x286   : > { %4290 = vrot.lane.b32.xlu0 %v4003_v28, %s18376_s24  ;;  %16252 = vmatmul.mubr.msk.f32.vlgmr.msra.gmra.mrb[10].mxu1 %vm2650_vm3, %v3562_v46 }
 0x287   : > { %v3570_v30 = vpop.permute.xlu1 %3569  ;;  %16254 = vmatprep.mubr.msk.f32.mxu1 %vm2650_vm3, %v3564_v26  ;;  %16276 = vmatpush3.msra.mxu1 %v14163_v33  ;;  %v19327_v26 = vld [vmem:[%s18986_s18 + $0x80] sm:$0xff] }
 0x288   : > { %v3568_v31 = vpop.permute.xlu0 %3567  ;;  %16301 = vmatprep.subr.mxu1 %v14198_v29 }
 0x289   : > { %4296 = vrot.lane.b32.xlu1 %v4006_v44, %s18376_s24  ;;  %v19339_v44 = vld [vmem:[#allocation2 + $0x20] sm:$0xff] }
 0x28a   : > { %4294 = vrot.lane.b32.xlu0 %v4005_v45, %s18376_s24  ;;  %16255 = vmatmul.mubr.msk.f32.gmra.mrb[12].mxu1 %vm2650_vm3, %v3566_v25 }
 0x28b   : > { %v3574_v47 = vpop.permute.xlu1 %3573  ;;  %16257 = vmatprep.mubr.msk.f32.mxu1 %vm2650_vm3, %v3568_v31 }
 0x28c   : > { %v3572_v46 = vpop.permute.xlu0 %3571 }
 0x28e   : > { %4298 = vrot.lane.b32.xlu0 %v4007_v49, %s18376_s24  ;;  %16258 = vmatmul.mubr.msk.f32.gmra.mrb[14].mxu1 %vm2650_vm3, %v3570_v30  ;;  %v19349_v49 = vld [vmem:[#allocation2 + $0x40] sm:$0xff] }
 0x28f   : > { %v3578_v50 = vpop.permute.xlu1 %3577  ;;  %16260 = vmatprep.mubr.msk.f32.mxu1 %vm2650_vm3, %v3572_v46 }
 0x290   : > { %v3576_v1 = vpop.permute.xlu0 %3575 }
 0x292   : > { %4547 = vrot.lane.b32.xlu0 %v19272_v0, %s18377_s17  ;;  %16261 = vmatmul.mubr.msk.f32.gmra.mrb[0].mxu1 %vm2650_vm3, %v3574_v47  ;;  %v19345_v47 = vld [vmem:[#allocation2 + $0x30] sm:$0xff] }
 0x293   : > { %v3582_v4 = vpop.permute.xlu1 %3581  ;;  %16263 = vmatprep.mubr.msk.f32.mxu1 %vm2650_vm3, %v3576_v1 }
 0x294   : > { %v3580_v33 = vpop.permute.xlu0 %3579 }
 0x296   : > { %4551 = vrot.lane.b32.xlu0 %v19279_v5, %s18377_s17  ;;  %16264 = vmatmul.mubr.msk.f32.gmra.mrb[2].mxu1 %vm2650_vm3, %v3578_v50 }
 0x297   : > { %v3586_v13 = vpop.permute.xlu1 %3585  ;;  %16266 = vmatprep.mubr.msk.f32.mxu1 %vm2650_vm3, %v3580_v33 }
 0x298   : > { %v3584_v16 = vpop.permute.xlu0 %3583 }
 0x29a   : > { %4555 = vrot.lane.b32.xlu0 %v19286_v15, %s18377_s17  ;;  %16267 = vmatmul.mubr.msk.f32.gmra.mrb[4].mxu1 %vm2650_vm3, %v3582_v4  ;;  %v19353_v4 = vld [vmem:[#allocation2 + $0x50] sm:$0xff] }
 0x29b   : > { %v3590_v18 = vpop.permute.xlu1 %3589  ;;  %16269 = vmatprep.mubr.msk.f32.mxu1 %vm2650_vm3, %v3584_v16 }
 0x29c   : > { %v3588_v22 = vpop.permute.xlu0 %3587 }
 0x29e   : > { %4559 = vrot.lane.b32.xlu0 %v19293_v19, %s18377_s17  ;;  %16270 = vmatmul.mubr.msk.f32.gmra.mrb[6].mxu1 %vm2650_vm3, %v3586_v13 }
 0x29f   : > { %v3771_v59 = vpop.permute.xlu1 %3770  ;;  %16272 = vmatprep.mubr.msk.f32.mxu1 %vm2650_vm3, %v3588_v22 }
 0x2a0   : > { %v3769_v60 = vpop.permute.xlu0 %3768 }
 0x2a2   : > { %4563 = vrot.lane.b32.xlu0 %v19300_v17, %s18377_s17  ;;  %16273 = vmatmul.mubr.msk.f32.gmra.mrb[8].mxu1 %vm2650_vm3, %v3590_v18  ;;  %v19359_v18 = vld [vmem:[#allocation2 + $0x60] sm:$0xff] }
 0x2a3   : > { %v3775_v6 = vpop.permute.xlu1 %3774  ;;  %16277 = vmatprep.mubr.msk.f32.mxu1 %vm2650_vm3, %v3769_v60 }
 0x2a4   : > { %v3773_v8 = vpop.permute.xlu0 %3772 }
 0x2a6   : > { %4567 = vrot.lane.b32.xlu0 %v19307_v7, %s18377_s17  ;;  %16278 = vmatmul.mubr.msk.f32.vlgmr.msra.gmra.mrb[10].mxu1 %vm2650_vm3, %v3771_v59 }
 0x2a7   : > { %v3779_v10 = vpop.permute.xlu1 %3778  ;;  %16280 = vmatprep.mubr.msk.f32.mxu1 %vm2650_vm3, %v3773_v8  ;;  %16302 = vmatpush3.msra.mxu1 %v14198_v29  ;;  %v19333_v29 = vld [vmem:[#allocation2 + $0x10] sm:$0xff] }
 0x2a8   : > { %v3777_v12 = vpop.permute.xlu0 %3776  ;;  %16327 = vmatprep.subr.mxu1 %v19312_v9 }
 0x2aa   : > { %4571 = vrot.lane.b32.xlu0 %v19319_v11, %s18377_s17  ;;  %16281 = vmatmul.mubr.msk.f32.gmra.mrb[12].mxu1 %vm2650_vm3, %v3775_v6 }
 0x2ab   : > { %v3783_v25 = vpop.permute.xlu1 %3782  ;;  %16283 = vmatprep.mubr.msk.f32.mxu1 %vm2650_vm3, %v3777_v12  ;;  %v19375_v12 = vld [vmem:[%s18986_s18 + $0x18] sm:$0xff] }
 0x2ac   : > { %v3781_v27 = vpop.permute.xlu0 %3780 }
 0x2ae   : > { %4575 = vrot.lane.b32.xlu0 %v19327_v26, %s18377_s17  ;;  %16284 = vmatmul.mubr.msk.f32.gmra.mrb[14].mxu1 %vm2650_vm3, %v3779_v10 }
 0x2af   : > { %v3787_v28 = vpop.permute.xlu1 %3786  ;;  %16286 = vmatprep.mubr.msk.f32.mxu1 %vm2650_vm3, %v3781_v27 }
 0x2b0   : > { %v3785_v30 = vpop.permute.xlu0 %3784 }
 0x2b2   : > { %4772 = vrot.lane.b32.xlu0 %v19333_v29, %s18377_s17  ;;  %16287 = vmatmul.mubr.msk.f32.gmra.mrb[0].mxu1 %vm2650_vm3, %v3783_v25 }
 0x2b3   : > { %v3789_v31 = vpop.permute.xlu1 %3788  ;;  %16289 = vmatprep.mubr.msk.f32.mxu1 %vm2650_vm3, %v3785_v30  ;;  %v14232_v30 = vld [vmem:[%s22749_s5 + $0x20] sm:$0xff] }
 0x2b6   : > { %4776 = vrot.lane.b32.xlu0 %v19339_v44, %s18377_s17  ;;  %16290 = vmatmul.mubr.msk.f32.gmra.mrb[2].mxu1 %vm2650_vm3, %v3787_v28  ;;  %v19384_v28 = vld [vmem:[%s18986_s18 + $0x28] sm:$0xff] }
 0x2b7   : > { %v3793_v45 = vpop.permute.xlu1 %3792  ;;  %16292 = vmatprep.mubr.msk.f32.mxu1 %vm2650_vm3, %v3789_v31 }
 0x2ba   : > { %4780 = vrot.lane.b32.xlu0 %v19345_v47, %s18377_s17 }
 0x2bb   : > { %v3797_v46 = vpop.permute.xlu1 %3796 }
 0x2be   : > { %4784 = vrot.lane.b32.xlu0 %v19349_v49, %s18377_s17 }
 0x2bf   : > { %v4046_v50 = vpop.permute.xlu1 %4045 }
 0x2c1   : > { %v2529_v1 = vpop.permute.xlu0 %2528 }
 0x2c2   : > { %v2550_v33 = vmul.f32 %v2529_v1, %v19066_v24  ;;  %4788 = vrot.lane.b32.xlu0 %v19353_v4, %s18377_s17  ;;  %v19365_v24 = vld [vmem:[#allocation2 + $0x70] sm:$0xff]  ;;  %v19406_v1 = vld [vmem:[%s18986_s18 + $0x48] sm:$0xff] }
 0x2c3   : > { %v4050_v13 = vpop.permute.xlu1 %4049 }
 0x2c4   : > { %2566 = vst.msk [vmem:[#allocation2 + $0x81] sm:$0xff] %vm380_vm1, %v2550_v33 }
 0x2c5   : > { %v3791_v16 = vpop.permute.xlu0 %3790 }
 0x2c6   : > { %4792 = vrot.lane.b32.xlu0 %v19359_v18, %s18377_s17  ;;  %16293 = vmatmul.mubr.msk.f32.gmra.mrb[4].mxu1 %vm2650_vm3, %v3791_v16 }
 0x2c7   : > { %v4054_v22 = vpop.permute.xlu1 %4053  ;;  %16295 = vmatprep.mubr.msk.f32.mxu1 %vm2650_vm3, %v3793_v45 }
 0x2c9   : > { %v3795_v59 = vpop.permute.xlu0 %3794 }
 0x2ca   : > { %4796 = vrot.lane.b32.xlu0 %v19365_v24, %s18377_s17  ;;  %16296 = vmatmul.mubr.msk.f32.gmra.mrb[6].mxu1 %vm2650_vm3, %v3795_v59  ;;  %v19424_v59 = vld [vmem:[%s18986_s18 + $0x68] sm:$0xff] }
 0x2cb   : > { %v4058_v60 = vpop.permute.xlu1 %4057  ;;  %16298 = vmatprep.mubr.msk.f32.mxu1 %vm2650_vm3, %v3797_v46  ;;  %v4008_v6 = vld [vmem:[#allocation2 + $0x7a] sm:$0xff] }
 0x2cc   : > { %4300 = vrot.lane.b32.xlu1 %v4008_v6, %s18376_s24  ;;  %v19372_v10 = vld [vmem:[#allocation2 + $0x80] sm:$0xff]  ;;  %v19397_v46 = vld [vmem:[%s18986_s18 + $0x38] sm:$0xff] }
 0x2cd   : > { %v3799_v8 = vpop.permute.xlu0 %3798 }
 0x2ce   : > { %16299 = vmatmul.mubr.msk.f32.gmra.mrb[8].mxu1 %vm2650_vm3, %v3799_v8  ;;  %4800 = vrot.lane.b32.xlu0 %v19372_v10, %s18377_s17  ;;  %v19433_v8 = vld [vmem:[%s18986_s18 + $0x78] sm:$0xff] }
 0x2cf   : > { %v4062_v25 = vpop.permute.xlu1 %4061  ;;  %16303 = vmatprep.mubr.msk.f32.mxu1 %vm2650_vm3, %v4046_v50 }
 0x2d0   : > { %4549 = vrot.lane.b32.xlu1 %v19375_v12, %s18377_s17 }
 0x2d1   : > { %v4048_v27 = vpop.permute.xlu0 %4047 }
 0x2d2   : > { %16304 = vmatmul.mubr.msk.f32.vlgmr.msra.gmra.mrb[10].mxu1 %vm2650_vm3, %v4048_v27  ;;  %5439 = vrot.lane.b32.xlu0 %v19090_v39, %s18377_s17  ;;  %v19442_v27 = vld [vmem:[%s18986_s18 + $0x88] sm:$0xff] }
 0x2d3   : > { %v4066_v31 = vpop.permute.xlu1 %4065  ;;  %16306 = vmatprep.mubr.msk.f32.mxu1 %vm2650_vm3, %v4050_v13  ;;  %16328 = vmatpush3.msra.mxu1 %v19312_v9  ;;  %v19415_v13 = vld [vmem:[%s18986_s18 + $0x58] sm:$0xff] }
 0x2d4   : > { %4553 = vrot.lane.b32.xlu1 %v19384_v28, %s18377_s17  ;;  %16353 = vmatprep.subr.mxu1 %v14232_v30 }
 0x2d5   : > { %v4052_v45 = vpop.permute.xlu0 %4051 }
 0x2d6   : > { %16307 = vmatmul.mubr.msk.f32.gmra.mrb[12].mxu1 %vm2650_vm3, %v4052_v45  ;;  %5443 = vrot.lane.b32.xlu0 %v19100_v41, %s18377_s17  ;;  %v19449_v45 = vld [vmem:[%s18986_s18 + $0x81] sm:$0xff] }
 0x2d7   : > { %16309 = vmatprep.mubr.msk.f32.mxu1 %vm2650_vm3, %v4054_v22  ;;  %v4070_v50 = vpop.permute.xlu1 %4069 }
 0x2d8   : > { %4557 = vrot.lane.b32.xlu1 %v19397_v46, %s18377_s17 }
 0x2d9   : > { %v4056_v9 = vpop.permute.xlu0 %4055 }
 0x2da   : > { %16310 = vmatmul.mubr.msk.f32.gmra.mrb[14].mxu1 %vm2650_vm3, %v4056_v9  ;;  %5447 = vrot.lane.b32.xlu0 %v19110_v43, %s18377_s17  ;;  %v19457_v9 = vld [vmem:[#allocation2 + $0x18] sm:$0xff] }
 0x2db   : > { %16312 = vmatprep.mubr.msk.f32.mxu1 %vm2650_vm3, %v4058_v60  ;;  %v4074_v16 = vpop.permute.xlu1 %4073 }
 0x2dc   : > { %4561 = vrot.lane.b32.xlu1 %v19406_v1, %s18377_s17 }
 0x2dd   : > { %v4060_v33 = vpop.permute.xlu0 %4059 }
 0x2de   : > { %16313 = vmatmul.mubr.msk.f32.gmra.mrb[0].mxu1 %vm2650_vm3, %v4060_v33  ;;  %5451 = vrot.lane.b32.xlu0 %v19120_v52, %s18377_s17 }
 0x2df   : > { %16315 = vmatprep.mubr.msk.f32.mxu1 %vm2650_vm3, %v4062_v25  ;;  %v4271_v60 = vpop.permute.xlu1 %4270 }
 0x2e0   : > { %4565 = vrot.lane.b32.xlu1 %v19415_v13, %s18377_s17 }
 0x2e1   : > { %v4064_v22 = vpop.permute.xlu0 %4063 }
 0x2e2   : > { %16316 = vmatmul.mubr.msk.f32.gmra.mrb[2].mxu1 %vm2650_vm3, %v4064_v22  ;;  %5455 = vrot.lane.b32.xlu0 %v19130_v54, %s18377_s17  ;;  %v19464_v22 = vld [vmem:[%s22748_s4 + $0x20] sm:$0xff] }
 0x2e3   : > { %16318 = vmatprep.mubr.msk.f32.mxu1 %vm2650_vm3, %v4066_v31  ;;  %v4275_v31 = vpop.permute.xlu1 %4274 }
 0x2e4   : > { %4569 = vrot.lane.b32.xlu1 %v19424_v59, %s18377_s17 }
 0x2e5   : > { %v4068_v6 = vpop.permute.xlu0 %4067 }
 0x2e6   : > { %16319 = vmatmul.mubr.msk.f32.gmra.mrb[4].mxu1 %vm2650_vm3, %v4068_v6  ;;  %5459 = vrot.lane.b32.xlu0 %v19140_v56, %s18377_s17 }
 0x2e7   : > { %16321 = vmatprep.mubr.msk.f32.mxu1 %vm2650_vm3, %v4070_v50  ;;  %v4279_v33 = vpop.permute.xlu1 %4278 }
 0x2e8   : > { %4573 = vrot.lane.b32.xlu1 %v19433_v8, %s18377_s17 }
 0x2e9   : > { %v4072_v25 = vpop.permute.xlu0 %4071 }
 0x2ea   : > { %16322 = vmatmul.mubr.msk.f32.gmra.mrb[6].mxu1 %vm2650_vm3, %v4072_v25  ;;  %5463 = vrot.lane.b32.xlu0 %v19150_v58, %s18377_s17 }
 0x2eb   : > { %16324 = vmatprep.mubr.msk.f32.mxu1 %vm2650_vm3, %v4074_v16  ;;  %v4283_v25 = vpop.permute.xlu1 %4282 }
 0x2ec   : > { %4577 = vrot.lane.b32.xlu1 %v19442_v27, %s18377_s17 }
 0x2ed   : > { %v4076_v50 = vpop.permute.xlu0 %4075 }
 0x2ee   : > { %16325 = vmatmul.mubr.msk.f32.gmra.mrb[8].mxu1 %vm2650_vm3, %v4076_v50  ;;  %5467 = vrot.lane.b32.xlu0 %v19449_v45, %s18377_s17  ;;  %v19479_v50 = vld [vmem:[#allocation2 + $0x38] sm:$0xff] }
 0x2ef   : > { %16329 = vmatprep.mubr.msk.f32.mxu1 %vm2650_vm3, %v4271_v60  ;;  %v19470_v60 = vld [vmem:[#allocation2 + $0x28] sm:$0xff] }
 0x2f0   : > { %4774 = vrot.lane.b32.xlu1 %v19457_v9, %s18377_s17 }
 0x2f1   : > { %v4273_v16 = vpop.permute.xlu0 %4272 }
 0x2f2   : > { %16330 = vmatmul.mubr.msk.f32.vlgmr.msra.gmra.mrb[10].mxu1 %vm2650_vm3, %v4273_v16  ;;  %5648 = vrot.lane.b32.xlu0 %v19162_v62, %s18377_s17  ;;  %v4287_v16 = vpop.permute.xlu1 %4286 }
 0x2f3   : > { %16332 = vmatprep.mubr.msk.f32.mxu1 %vm2650_vm3, %v4275_v31  ;;  %16354 = vmatpush3.msra.mxu1 %v14232_v30  ;;  %v19487_v31 = vld [vmem:[#allocation2 + $0x48] sm:$0xff] }
 0x2f4   : > { %4778 = vrot.lane.b32.xlu1 %v19470_v60, %s18377_s17  ;;  %16379 = vmatprep.subr.mxu1 %v19464_v22 }
 0x2f5   : > { %v4277_v6 = vpop.permute.xlu0 %4276 }
 0x2f6   : > { %16333 = vmatmul.mubr.msk.f32.gmra.mrb[12].mxu1 %vm2650_vm3, %v4277_v6  ;;  %5652 = vrot.lane.b32.xlu0 %v19170_v3, %s18377_s17  ;;  %v19495_v6 = vld [vmem:[#allocation2 + $0x58] sm:$0xff] }
 0x2f7   : > { %16335 = vmatprep.mubr.msk.f32.mxu1 %vm2650_vm3, %v4279_v33 }
 0x2f8   : > { %4782 = vrot.lane.b32.xlu1 %v19479_v50, %s18377_s17 }
 0x2f9   : > { %v4281_v30 = vpop.permute.xlu0 %4280 }
 0x2fa   : > { %16336 = vmatmul.mubr.msk.f32.gmra.mrb[14].mxu1 %vm2650_vm3, %v4281_v30  ;;  %5656 = vrot.lane.b32.xlu0 %v19028_v63, %s18377_s17 }
 0x2fb   : > { %16338 = vmatprep.mubr.msk.f32.mxu1 %vm2650_vm3, %v4283_v25 }
 0x2fc   : > { %4786 = vrot.lane.b32.xlu1 %v19487_v31, %s18377_s17 }
 0x2fd   : > { %v4285_v33 = vpop.permute.xlu0 %4284 }
 0x2fe   : > { %16339 = vmatmul.mubr.msk.f32.gmra.mrb[0].mxu1 %vm2650_vm3, %v4285_v33  ;;  %5660 = vrot.lane.b32.xlu0 %v19040_v14, %s18377_s17  ;;  %v19504_v33 = vld [vmem:[#allocation2 + $0x68] sm:$0xff] }
 0x2ff   : > { %16341 = vmatprep.mubr.msk.f32.mxu1 %vm2650_vm3, %v4287_v16 }
 0x300   : > { %v2534_v30 = vpop.permute.xlu1 %2533  ;;  %4790 = vrot.lane.b32.xlu1 %v19495_v6, %s18377_s17 }
 0x301   : > { %v2551_v63 = vmul.f32 %v2534_v30, %v19058_v21  ;;  %v4289_v25 = vpop.permute.xlu0 %4288  ;;  %v19512_v21 = vld [vmem:[#allocation2 + $0x78] sm:$0xff] }
 0x302   : > { %16342 = vmatmul.mubr.msk.f32.gmra.mrb[2].mxu1 %vm2650_vm3, %v4289_v25  ;;  %5664 = vrot.lane.b32.xlu0 %v19062_v23, %s18377_s17  ;;  %v19524_v25 = vld [vmem:[#allocation2 + $0x81] sm:$0xff] }
 0x303   : > { %2567 = vst.msk [vmem:[#allocation2 + $0x89] sm:$0xff] %vm380_vm1, %v2551_v63 }
 0x304   : > { %v4293_v14 = vpop.permute.xlu1 %4292  ;;  %4794 = vrot.lane.b32.xlu1 %v19504_v33, %s18377_s17 }
 0x305   : > { %v4291_v16 = vpop.permute.xlu0 %4290 }
 0x306   : > { %16344 = vmatprep.mubr.msk.f32.mxu1 %vm2650_vm3, %v4291_v16  ;;  %5668 = vrot.lane.b32.xlu0 %v19074_v35, %s18377_s17 }
 0x307   : > { %16345 = vmatmul.mubr.msk.f32.gmra.mrb[4].mxu1 %vm2650_vm3, %v4293_v14 }
 0x308   : > { %4798 = vrot.lane.b32.xlu1 %v19512_v21, %s18377_s17  ;;  %v4297_v30 = vpop.permute.xlu1 %4296 }
 0x309   : > { %v4295_v23 = vpop.permute.xlu0 %4294 }
 0x30a   : > { %16347 = vmatprep.mubr.msk.f32.mxu1 %vm2650_vm3, %v4295_v23  ;;  %5672 = vrot.lane.b32.xlu0 %v19082_v37, %s18377_s17  ;;  %v19519_v63 = vld [vmem:[#allocation2 + $0x88] sm:$0xff]  ;;  %v19756_v23 = vld [vmem:[%s22749_s5 + $0x30] sm:$0xff] }
 0x30b   : > { %16348 = vmatmul.mubr.msk.f32.gmra.mrb[6].mxu1 %vm2650_vm3, %v4297_v30  ;;  %v18315_v30 = vld [vmem:[%s18986_s18 + $0x21] sm:$0xff] }
 0x30c   : > { %4802 = vrot.lane.b32.xlu1 %v19519_v63, %s18377_s17 }
 0x30d   : > { %v4299_v35 = vpop.permute.xlu0 %4298 }
 0x30e   : > { %16350 = vmatprep.mubr.msk.f32.mxu1 %vm2650_vm3, %v4299_v35  ;;  %5676 = vrot.lane.b32.xlu0 %v19524_v25, %s18377_s17  ;;  %v19770_v35 = vld [vmem:[#allocation2 + $0x61] sm:$0xff] }
 0x310   : > { %5441 = vrot.lane.b32.xlu1 %v19087_v38, %s18377_s17 }
 0x311   : > { %v4548_v14 = vpop.permute.xlu0 %4547 }
 0x312   : > { %6315 = vrot.lane.b32.xlu0 %v19272_v0, %s18375_s19  ;;  %v19556_v0 = vld [vmem:[%s18986_s18 + $0x89] sm:$0xff] }
 0x314   : > { %5445 = vrot.lane.b32.xlu1 %v19097_v40, %s18377_s17 }
 0x315   : > { %v4552_v37 = vpop.permute.xlu0 %4551 }
 0x316   : > { %6319 = vrot.lane.b32.xlu0 %v19279_v5, %s18375_s19 }
 0x318   : > { %5449 = vrot.lane.b32.xlu1 %v19107_v42, %s18377_s17 }
 0x319   : > { %v4556_v16 = vpop.permute.xlu0 %4555 }
 0x31a   : > { %6323 = vrot.lane.b32.xlu0 %v19286_v15, %s18375_s19 }
 0x31c   : > { %5453 = vrot.lane.b32.xlu1 %v19117_v51, %s18377_s17 }
 0x31d   : > { %v4560_v38 = vpop.permute.xlu0 %4559 }
 0x31e   : > { %6327 = vrot.lane.b32.xlu0 %v19293_v19, %s18375_s19 }
 0x320   : > { %5457 = vrot.lane.b32.xlu1 %v19127_v53, %s18377_s17 }
 0x321   : > { %v4564_v40 = vpop.permute.xlu0 %4563 }
 0x322   : > { %6331 = vrot.lane.b32.xlu0 %v19300_v17, %s18375_s19 }
 0x324   : > { %5461 = vrot.lane.b32.xlu1 %v19137_v55, %s18377_s17 }
 0x325   : > { %v4568_v42 = vpop.permute.xlu0 %4567 }
 0x326   : > { %6335 = vrot.lane.b32.xlu0 %v19307_v7, %s18375_s19  ;;  %v19619_v7 = vld [vmem:[#allocation2 + $0x89] sm:$0xff] }
 0x328   : > { %5465 = vrot.lane.b32.xlu1 %v19147_v57, %s18377_s17 }
 0x329   : > { %v4572_v51 = vpop.permute.xlu0 %4571 }
 0x32a   : > { %6339 = vrot.lane.b32.xlu0 %v19319_v11, %s18375_s19 }
 0x32c   : > { %5469 = vrot.lane.b32.xlu1 %v19556_v0, %s18377_s17 }
 0x32d   : > { %v19562_v53 = vpop.permute.xlu0 %4575 }
 0x32e   : > { %6343 = vrot.lane.b32.xlu0 %v19327_v26, %s18375_s19 }
 0x330   : > { %5650 = vrot.lane.b32.xlu1 %v19158_v61, %s18377_s17 }
 0x331   : > { %v19568_v55 = vpop.permute.xlu0 %4772 }
 0x332   : > { %6524 = vrot.lane.b32.xlu0 %v19333_v29, %s18375_s19 }
 0x334   : > { %5654 = vrot.lane.b32.xlu1 %v19166_v2, %s18377_s17 }
 0x335   : > { %v19574_v57 = vpop.permute.xlu0 %4776 }
 0x336   : > { %6528 = vrot.lane.b32.xlu0 %v19339_v44, %s18375_s19 }
 0x338   : > { %5658 = vrot.lane.b32.xlu1 %v19022_v48, %s18377_s17 }
 0x339   : > { %v19580_v5 = vpop.permute.xlu0 %4780 }
 0x33a   : > { %6532 = vrot.lane.b32.xlu0 %v19345_v47, %s18375_s19 }
 0x33c   : > { %5662 = vrot.lane.b32.xlu1 %v19034_v32, %s18377_s17  ;;  %v14266_v32 = vld [vmem:[%s22749_s5 + $0x28] sm:$0xff] }
 0x33d   : > { %v19586_v61 = vpop.permute.xlu0 %4784 }
 0x33e   : > { %6536 = vrot.lane.b32.xlu0 %v19349_v49, %s18375_s19  ;;  %v4301_v2 = vpop.permute.xlu1 %4300 }
 0x33f   : > { %16351 = vmatmul.mubr.msk.f32.gmra.mrb[8].mxu1 %vm2650_vm3, %v4301_v2  ;;  %v19824_v2 = vld [vmem:[%s18986_s18 + $0x59] sm:$0xff] }
 0x340   : > { %5666 = vrot.lane.b32.xlu1 %v19053_v20, %s18377_s17  ;;  %16355 = vmatprep.mubr.msk.f32.mxu1 %vm2650_vm3, %v4548_v14 }
 0x341   : > { %v19594_v48 = vpop.permute.xlu0 %4788 }
 0x342   : > { %6540 = vrot.lane.b32.xlu0 %v19353_v4, %s18375_s19  ;;  %v4550_v15 = vpop.permute.xlu1 %4549 }
 0x343   : > { %16356 = vmatmul.mubr.msk.f32.vlgmr.msra.gmra.mrb[10].mxu1 %vm2650_vm3, %v4550_v15 }
 0x344   : > { %16380 = vmatpush3.msra.mxu1 %v19464_v22  ;;  %5670 = vrot.lane.b32.xlu1 %v19070_v34, %s18377_s17 }
 0x345   : > { %v19605_v20 = vpop.permute.xlu0 %4792  ;;  %16358 = vmatprep.mubr.msk.f32.mxu1 %vm2650_vm3, %v4552_v37  ;;  %16405 = vmatprep.subr.mxu1 %v14266_v32  ;;  %v19777_v37 = vld [vmem:[%s18986_s18 + $0x29] sm:$0xff] }
 0x346   : > { %6544 = vrot.lane.b32.xlu0 %v19359_v18, %s18375_s19  ;;  %v4554_v19 = vpop.permute.xlu1 %4553 }
 0x347   : > { %16359 = vmatmul.mubr.msk.f32.gmra.mrb[12].mxu1 %vm2650_vm3, %v4554_v19  ;;  %v18328_v19 = vld [vmem:[%s18986_s18 + $0x71] sm:$0xff] }
 0x348   : > { %5674 = vrot.lane.b32.xlu1 %v19078_v36, %s18377_s17  ;;  %16361 = vmatprep.mubr.msk.f32.mxu1 %vm2650_vm3, %v4556_v16 }
 0x349   : > { %v19614_v17 = vpop.permute.xlu0 %4796 }
 0x34a   : > { %6548 = vrot.lane.b32.xlu0 %v19365_v24, %s18375_s19  ;;  %v4558_v34 = vpop.permute.xlu1 %4557 }
 0x34b   : > { %16362 = vmatmul.mubr.msk.f32.gmra.mrb[14].mxu1 %vm2650_vm3, %v4558_v34 }
 0x34c   : > { %5678 = vrot.lane.b32.xlu1 %v19619_v7, %s18377_s17  ;;  %16364 = vmatprep.mubr.msk.f32.mxu1 %vm2650_vm3, %v4560_v38  ;;  %v19787_v38 = vld [vmem:[#allocation2 + $0x71] sm:$0xff] }
 0x34d   : > { %v19624_v11 = vpop.permute.xlu0 %4800 }
 0x34e   : > { %6552 = vrot.lane.b32.xlu0 %v19372_v10, %s18375_s19  ;;  %v4562_v36 = vpop.permute.xlu1 %4561  ;;  %v14265_v10 = vld [vmem:[%s22748_s4 + $0x28] sm:$0xff] }
 0x34f   : > { %16365 = vmatmul.mubr.msk.f32.gmra.mrb[0].mxu1 %vm2650_vm3, %v4562_v36 }
 0x350   : > { %6317 = vrot.lane.b32.xlu1 %v19375_v12, %s18375_s19  ;;  %16367 = vmatprep.mubr.msk.f32.mxu1 %vm2650_vm3, %v4564_v40 }
 0x351   : > { %v19632_v26 = vpop.permute.xlu0 %5439 }
 0x352   : > { %6753 = vrot.lane.b32.xlu0 %v19090_v39, %s18376_s24  ;;  %v4566_v29 = vpop.permute.xlu1 %4565 }
 0x353   : > { %16368 = vmatmul.mubr.msk.f32.gmra.mrb[2].mxu1 %vm2650_vm3, %v4566_v29 }
 0x354   : > { %6321 = vrot.lane.b32.xlu1 %v19384_v28, %s18375_s19  ;;  %16370 = vmatprep.mubr.msk.f32.mxu1 %vm2650_vm3, %v4568_v42  ;;  %v19794_v42 = vld [vmem:[%s18986_s18 + $0x39] sm:$0xff] }
 0x355   : > { %v19640_v44 = vpop.permute.xlu0 %5443 }
 0x356   : > { %6757 = vrot.lane.b32.xlu0 %v19100_v41, %s18376_s24  ;;  %v4570_v47 = vpop.permute.xlu1 %4569 }
 0x357   : > { %16371 = vmatmul.mubr.msk.f32.gmra.mrb[4].mxu1 %vm2650_vm3, %v4570_v47  ;;  %v18330_v47 = vld [vmem:[#allocation2 + $0x11] sm:$0xff] }
 0x358   : > { %6325 = vrot.lane.b32.xlu1 %v19397_v46, %s18375_s19  ;;  %16373 = vmatprep.mubr.msk.f32.mxu1 %vm2650_vm3, %v4572_v51 }
 0x359   : > { %v19648_v49 = vpop.permute.xlu0 %5447 }
 0x35a   : > { %6761 = vrot.lane.b32.xlu0 %v19110_v43, %s18376_s24  ;;  %v4574_v4 = vpop.permute.xlu1 %4573 }
 0x35b   : > { %16374 = vmatmul.mubr.msk.f32.gmra.mrb[6].mxu1 %vm2650_vm3, %v4574_v4 }
 0x35c   : > { %6329 = vrot.lane.b32.xlu1 %v19406_v1, %s18375_s19  ;;  %16376 = vmatprep.mubr.msk.f32.mxu1 %vm2650_vm3, %v19562_v53 }
 0x35d   : > { %v19657_v41 = vpop.permute.xlu0 %5451 }
 0x35e   : > { %6765 = vrot.lane.b32.xlu0 %v19120_v52, %s18376_s24  ;;  %v4578_v18 = vpop.permute.xlu1 %4577 }
 0x35f   : > { %16377 = vmatmul.mubr.msk.f32.gmra.mrb[8].mxu1 %vm2650_vm3, %v4578_v18 }
 0x360   : > { %6333 = vrot.lane.b32.xlu1 %v19415_v13, %s18375_s19  ;;  %16381 = vmatprep.mubr.msk.f32.mxu1 %vm2650_vm3, %v19568_v55  ;;  %v19809_v55 = vld [vmem:[%s18986_s18 + $0x49] sm:$0xff] }
 0x361   : > { %v19666_v43 = vpop.permute.xlu0 %5455 }
 0x362   : > { %6769 = vrot.lane.b32.xlu0 %v19130_v54, %s18376_s24  ;;  %v4775_v24 = vpop.permute.xlu1 %4774 }
 0x363   : > { %16382 = vmatmul.mubr.msk.f32.vlgmr.msra.gmra.mrb[10].mxu1 %vm2650_vm3, %v4775_v24  ;;  %v14299_v24 = vld [vmem:[%s22748_s4 + $0x30] sm:$0xff] }
 0x364   : > { %16406 = vmatpush3.msra.mxu1 %v14266_v32  ;;  %6337 = vrot.lane.b32.xlu1 %v19424_v59, %s18375_s19 }
 0x365   : > { %16384 = vmatprep.mubr.msk.f32.mxu1 %vm2650_vm3, %v19574_v57  ;;  %v19678_v52 = vpop.permute.xlu0 %5459  ;;  %16431 = vmatprep.subr.mxu1 %v14265_v10 }
 0x366   : > { %6773 = vrot.lane.b32.xlu0 %v19140_v56, %s18376_s24  ;;  %v4779_v54 = vpop.permute.xlu1 %4778 }
 0x367   : > { %16385 = vmatmul.mubr.msk.f32.gmra.mrb[12].mxu1 %vm2650_vm3, %v4779_v54  ;;  %v18332_v54 = vld [vmem:[#allocation2 + $0x21] sm:$0xff] }
 0x368   : > { %6341 = vrot.lane.b32.xlu1 %v19433_v8, %s18375_s19  ;;  %16387 = vmatprep.mubr.msk.f32.mxu1 %vm2650_vm3, %v19580_v5  ;;  %v19725_v8 = vld [vmem:[#allocation2 + $0x31] sm:$0xff] }
 0x369   : > { %v19687_v12 = vpop.permute.xlu0 %5463  ;;  %v18324_v5 = vld [vmem:[%s18986_s18 + $0x11] sm:$0xff] }
 0x36a   : > { %6777 = vrot.lane.b32.xlu0 %v19150_v58, %s18376_s24  ;;  %v4783_v28 = vpop.permute.xlu1 %4782 }
 0x36b   : > { %16388 = vmatmul.mubr.msk.f32.gmra.mrb[14].mxu1 %vm2650_vm3, %v4783_v28 }
 0x36c   : > { %6345 = vrot.lane.b32.xlu1 %v19442_v27, %s18375_s19  ;;  %16390 = vmatprep.mubr.msk.f32.mxu1 %vm2650_vm3, %v19586_v61 }
 0x36d   : > { %v19696_v56 = vpop.permute.xlu0 %5467 }
 0x36e   : > { %6781 = vrot.lane.b32.xlu0 %v19449_v45, %s18376_s24  ;;  %v4787_v46 = vpop.permute.xlu1 %4786 }
 0x36f   : > { %16391 = vmatmul.mubr.msk.f32.gmra.mrb[0].mxu1 %vm2650_vm3, %v4787_v46 }
 0x370   : > { %6526 = vrot.lane.b32.xlu1 %v19457_v9, %s18375_s19  ;;  %16393 = vmatprep.mubr.msk.f32.mxu1 %vm2650_vm3, %v19594_v48  ;;  %v19736_v9 = vld [vmem:[#allocation2 + $0x41] sm:$0xff] }
 0x371   : > { %v19705_v58 = vpop.permute.xlu0 %5648  ;;  %v18326_v48 = vld [vmem:[%s18986_s18 + $0x61] sm:$0xff] }
 0x372   : > { %6962 = vrot.lane.b32.xlu0 %v19162_v62, %s18376_s24  ;;  %v4791_v1 = vpop.permute.xlu1 %4790 }
 0x373   : > { %16394 = vmatmul.mubr.msk.f32.gmra.mrb[2].mxu1 %vm2650_vm3, %v4791_v1  ;;  %v19891_v1 = vld [vmem:[#allocation2 + $0x29] sm:$0xff] }
 0x374   : > { %6530 = vrot.lane.b32.xlu1 %v19470_v60, %s18375_s19  ;;  %16396 = vmatprep.mubr.msk.f32.mxu1 %vm2650_vm3, %v19605_v20  ;;  %v19838_v20 = vld [vmem:[%s18986_s18 + $0x69] sm:$0xff] }
 0x375   : > { %v19714_v13 = vpop.permute.xlu0 %5652 }
 0x376   : > { %6966 = vrot.lane.b32.xlu0 %v19170_v3, %s18376_s24  ;;  %v4795_v59 = vpop.permute.xlu1 %4794 }
 0x377   : > { %16397 = vmatmul.mubr.msk.f32.gmra.mrb[4].mxu1 %vm2650_vm3, %v4795_v59 }
 0x378   : > { %6534 = vrot.lane.b32.xlu1 %v19479_v50, %s18375_s19  ;;  %16399 = vmatprep.mubr.msk.f32.mxu1 %vm2650_vm3, %v19614_v17  ;;  %v19747_v50 = vld [vmem:[#allocation2 + $0x51] sm:$0xff] }
 0x379   : > { %v19723_v62 = vpop.permute.xlu0 %5656 }
 0x37a   : > { %6970 = vrot.lane.b32.xlu0 %v19725_v8, %s18376_s24  ;;  %v4799_v27 = vpop.permute.xlu1 %4798 }
 0x37b   : > { %16400 = vmatmul.mubr.msk.f32.gmra.mrb[6].mxu1 %vm2650_vm3, %v4799_v27 }
 0x37c   : > { %6538 = vrot.lane.b32.xlu1 %v19487_v31, %s18375_s19  ;;  %16402 = vmatprep.mubr.msk.f32.mxu1 %vm2650_vm3, %v19624_v11  ;;  %v19852_v11 = vld [vmem:[%s18986_s18 + $0x79] sm:$0xff] }
 0x37d   : > { %v19734_v3 = vpop.permute.xlu0 %5660 }
 0x37e   : > { %6974 = vrot.lane.b32.xlu0 %v19736_v9, %s18376_s24  ;;  %v4803_v22 = vpop.permute.xlu1 %4802 }
 0x37f   : > { %16403 = vmatmul.mubr.msk.f32.gmra.mrb[8].mxu1 %vm2650_vm3, %v4803_v22  ;;  %v19904_v22 = vld [vmem:[#allocation2 + $0x39] sm:$0xff] }
 0x380   : > { %6542 = vrot.lane.b32.xlu1 %v19495_v6, %s18375_s19  ;;  %16407 = vmatprep.mubr.msk.f32.mxu1 %vm2650_vm3, %v19090_v39  ;;  %v19759_v6 = vld [vmem:[%s18986_s18 + $0x19] sm:$0xff] }
 0x381   : > { %v19745_v60 = vpop.permute.xlu0 %5664 }
 0x382   : > { %6978 = vrot.lane.b32.xlu0 %v19747_v50, %s18376_s24  ;;  %v19751_v31 = vpop.permute.xlu1 %5441 }
 0x383   : > { %16408 = vmatmul.mubr.msk.f32.vlgmr.msra.gmra.mrb[10].mxu1 %vm2650_vm3, %v19759_v6 }
 0x384   : > { %16432 = vmatpush3.msra.mxu1 %v14265_v10  ;;  %6546 = vrot.lane.b32.xlu1 %v19504_v33, %s18375_s19  ;;  %v18318_v33 = vld [vmem:[%s18986_s18 + $0x31] sm:$0xff]  ;;  %v19878_v10 = vld [vmem:[#allocation2 + $0x19] sm:$0xff] }
 0x385   : > { %v19765_v39 = vpop.permute.xlu0 %5668  ;;  %16410 = vmatprep.mubr.msk.f32.mxu1 %vm2650_vm3, %v18315_v30  ;;  %16457 = vmatprep.subr.mxu1 %v19756_v23 }
 0x386   : > { %6982 = vrot.lane.b32.xlu0 %v19770_v35, %s18376_s24  ;;  %v19774_v14 = vpop.permute.xlu1 %5445 }
 0x387   : > { %16411 = vmatmul.mubr.msk.f32.gmra.mrb[12].mxu1 %vm2650_vm3, %v19777_v37 }
 0x388   : > { %6550 = vrot.lane.b32.xlu1 %v19512_v21, %s18375_s19  ;;  %16413 = vmatprep.mubr.msk.f32.mxu1 %vm2650_vm3, %v18318_v33  ;;  %v18321_v21 = vld [vmem:[%s18986_s18 + $0x41] sm:$0xff] }
 0x389   : > { %v19785_v16 = vpop.permute.xlu0 %5672 }
 0x38a   : > { %6986 = vrot.lane.b32.xlu0 %v19787_v38, %s18376_s24  ;;  %v19791_v40 = vpop.permute.xlu1 %5449 }
 0x38b   : > { %16414 = vmatmul.mubr.msk.f32.gmra.mrb[14].mxu1 %vm2650_vm3, %v19794_v42 }
 0x38c   : > { %6554 = vrot.lane.b32.xlu1 %v19519_v63, %s18375_s19  ;;  %16416 = vmatprep.mubr.msk.f32.mxu1 %vm2650_vm3, %v18321_v21  ;;  %v18323_v63 = vld [vmem:[%s18986_s18 + $0x51] sm:$0xff] }
 0x38d   : > { %v19802_v51 = vpop.permute.xlu0 %5676 }
 0x38e   : > { %6990 = vrot.lane.b32.xlu0 %v19524_v25, %s18376_s24  ;;  %v19806_v53 = vpop.permute.xlu1 %5453 }
 0x38f   : > { %16417 = vmatmul.mubr.msk.f32.gmra.mrb[0].mxu1 %vm2650_vm3, %v19809_v55 }
 0x390   : > { %6755 = vrot.lane.b32.xlu1 %v19759_v6, %s18376_s24  ;;  %16419 = vmatprep.mubr.msk.f32.mxu1 %vm2650_vm3, %v18323_v63 }
 0x391   : > { %v19817_v57 = vpop.permute.xlu0 %6315 }
 0x392   : > { %7191 = vrot.lane.b32.xlu0 %v18324_v5, %s18375_s19  ;;  %v19821_v61 = vpop.permute.xlu1 %5457 }
 0x393   : > { %16420 = vmatmul.mubr.msk.f32.gmra.mrb[2].mxu1 %vm2650_vm3, %v19824_v2 }
 0x394   : > { %6759 = vrot.lane.b32.xlu1 %v19777_v37, %s18376_s24  ;;  %16422 = vmatprep.mubr.msk.f32.mxu1 %vm2650_vm3, %v18326_v48 }
 0x395   : > { %v19832_v15 = vpop.permute.xlu0 %6319 }
 0x396   : > { %7195 = vrot.lane.b32.xlu0 %v18315_v30, %s18375_s19  ;;  %v19835_v32 = vpop.permute.xlu1 %5461 }
 0x397   : > { %16423 = vmatmul.mubr.msk.f32.gmra.mrb[4].mxu1 %vm2650_vm3, %v19838_v20 }
 0x398   : > { %6763 = vrot.lane.b32.xlu1 %v19794_v42, %s18376_s24  ;;  %16425 = vmatprep.mubr.msk.f32.mxu1 %vm2650_vm3, %v18328_v19 }
 0x399   : > { %v19846_v17 = vpop.permute.xlu0 %6323 }
 0x39a   : > { %7199 = vrot.lane.b32.xlu0 %v18318_v33, %s18375_s19  ;;  %v19849_v34 = vpop.permute.xlu1 %5465  ;;  %v19918_v33 = vld [vmem:[#allocation2 + $0x49] sm:$0xff] }
 0x39b   : > { %16426 = vmatmul.mubr.msk.f32.gmra.mrb[6].mxu1 %vm2650_vm3, %v19852_v11 }
 0x39c   : > { %6767 = vrot.lane.b32.xlu1 %v19809_v55, %s18376_s24  ;;  %16428 = vmatprep.mubr.msk.f32.mxu1 %vm2650_vm3, %v19449_v45 }
 0x39d   : > { %v19860_v36 = vpop.permute.xlu0 %6327 }
 0x39e   : > { %7203 = vrot.lane.b32.xlu0 %v18321_v21, %s18375_s19  ;;  %v19863_v29 = vpop.permute.xlu1 %5469 }
 0x39f   : > { %16429 = vmatmul.mubr.msk.f32.gmra.mrb[8].mxu1 %vm2650_vm3, %v19556_v0 }
 0x3a0   : > { %6771 = vrot.lane.b32.xlu1 %v19824_v2, %s18376_s24  ;;  %16433 = vmatprep.mubr.msk.f32.mxu1 %vm2650_vm3, %v18330_v47 }
 0x3a1   : > { %v19870_v4 = vpop.permute.xlu0 %6331 }
 0x3a2   : > { %7207 = vrot.lane.b32.xlu0 %v18323_v63, %s18375_s19  ;;  %v19873_v18 = vpop.permute.xlu1 %5650 }
 0x3a3   : > { %16434 = vmatmul.mubr.msk.f32.vlgmr.msra.gmra.mrb[10].mxu1 %vm2650_vm3, %v19878_v10 }
 0x3a4   : > { %16458 = vmatpush3.msra.mxu1 %v19756_v23  ;;  %6775 = vrot.lane.b32.xlu1 %v19838_v20, %s18376_s24 }
 0x3a5   : > { %16436 = vmatprep.mubr.msk.f32.mxu1 %vm2650_vm3, %v18332_v54  ;;  %v19886_v28 = vpop.permute.xlu0 %6335  ;;  %16483 = vmatprep.subr.mxu1 %v14299_v24 }
 0x3a6   : > { %7211 = vrot.lane.b32.xlu0 %v18326_v48, %s18375_s19  ;;  %v19889_v46 = vpop.permute.xlu1 %5654 }
 0x3a7   : > { %16437 = vmatmul.mubr.msk.f32.gmra.mrb[12].mxu1 %vm2650_vm3, %v19891_v1 }
 0x3a8   : > { %6779 = vrot.lane.b32.xlu1 %v19852_v11, %s18376_s24  ;;  %16439 = vmatprep.mubr.msk.f32.mxu1 %vm2650_vm3, %v19725_v8 }
 0x3a9   : > { %v19899_v59 = vpop.permute.xlu0 %6339 }
 0x3aa   : > { %7215 = vrot.lane.b32.xlu0 %v18328_v19, %s18375_s19  ;;  %v19902_v27 = vpop.permute.xlu1 %5658  ;;  %v19944_v19 = vld [vmem:[#allocation2 + $0x69] sm:$0xff] }
 0x3ab   : > { %16440 = vmatmul.mubr.msk.f32.gmra.mrb[14].mxu1 %vm2650_vm3, %v19904_v22 }
 0x3ac   : > { %6783 = vrot.lane.b32.xlu1 %v19556_v0, %s18376_s24  ;;  %16442 = vmatprep.mubr.msk.f32.mxu1 %vm2650_vm3, %v19736_v9 }
 0x3ad   : > { %v19912_v23 = vpop.permute.xlu0 %6343 }
 0x3ae   : > { %22782 = vst [vmem:[#allocation4_spill] sm:$0xff] %v19912_v23  ;;  %7219 = vrot.lane.b32.xlu0 %v19449_v45, %s18375_s19  ;;  %v19916_v30 = vpop.permute.xlu1 %5662  ;;  %v19931_v45 = vld [vmem:[#allocation2 + $0x59] sm:$0xff] }
 0x3af   : > { %16443 = vmatmul.mubr.msk.f32.gmra.mrb[0].mxu1 %vm2650_vm3, %v19918_v33 }
 0x3b0   : > { %6964 = vrot.lane.b32.xlu1 %v19878_v10, %s18376_s24  ;;  %16445 = vmatprep.mubr.msk.f32.mxu1 %vm2650_vm3, %v19747_v50 }
 0x3b1   : > { %v19926_v21 = vpop.permute.xlu0 %6524 }
 0x3b2   : > { %22783 = vst [vmem:[#allocation5_spill] sm:$0xff] %v19926_v21  ;;  %7400 = vrot.lane.b32.xlu0 %v18330_v47, %s18375_s19  ;;  %v19929_v63 = vpop.permute.xlu1 %5666 }
 0x3b3   : > { %16446 = vmatmul.mubr.msk.f32.gmra.mrb[2].mxu1 %vm2650_vm3, %v19931_v45 }
 0x3b4   : > { %6968 = vrot.lane.b32.xlu1 %v19891_v1, %s18376_s24  ;;  %16448 = vmatprep.mubr.msk.f32.mxu1 %vm2650_vm3, %v19770_v35 }
 0x3b5   : > { %v19939_v5 = vpop.permute.xlu0 %6528 }
 0x3b6   : > { %22784 = vst [vmem:[#allocation6_spill] sm:$0xff] %v19939_v5  ;;  %7404 = vrot.lane.b32.xlu0 %v18332_v54, %s18375_s19  ;;  %v19942_v48 = vpop.permute.xlu1 %5670  ;;  %v19958_v54 = vld [vmem:[#allocation2 + $0x79] sm:$0xff] }
 0x3b7   : > { %16449 = vmatmul.mubr.msk.f32.gmra.mrb[4].mxu1 %vm2650_vm3, %v19944_v19 }
 0x3b8   : > { %6972 = vrot.lane.b32.xlu1 %v19904_v22, %s18376_s24  ;;  %16451 = vmatprep.mubr.msk.f32.mxu1 %vm2650_vm3, %v19787_v38 }
 0x3b9   : > { %v19952_v47 = vpop.permute.xlu0 %6532 }
 0x3ba   : > { %22785 = vst [vmem:[#allocation7_spill] sm:$0xff] %v19952_v47  ;;  %7408 = vrot.lane.b32.xlu0 %v19725_v8, %s18375_s19  ;;  %v19956_v5 = vpop.permute.xlu1 %5674 }
 0x3bb   : > { %16452 = vmatmul.mubr.msk.f32.gmra.mrb[6].mxu1 %vm2650_vm3, %v19958_v54 }
 0x3bc   : > { %6976 = vrot.lane.b32.xlu1 %v19918_v33, %s18376_s24  ;;  %16454 = vmatprep.mubr.msk.f32.mxu1 %vm2650_vm3, %v19524_v25 }
 0x3bd   : > { %v19966_v21 = vpop.permute.xlu0 %6536 }
 0x3be   : > { %22786 = vst [vmem:[#allocation8_spill] sm:$0xff] %v19966_v21  ;;  %7412 = vrot.lane.b32.xlu0 %v19736_v9, %s18375_s19  ;;  %v19970_v47 = vpop.permute.xlu1 %5678  ;;  %v14334_v9 = vld [vmem:[%s22749_s5 + $0x38] sm:$0xff] }
 0x3bf   : > { %16455 = vmatmul.mubr.msk.f32.gmra.mrb[8].mxu1 %vm2650_vm3, %v19619_v7 }
 0x3c0   : > { %6980 = vrot.lane.b32.xlu1 %v19931_v45, %s18376_s24  ;;  %16459 = vmatprep.mubr.msk.f32.mxu1 %vm2650_vm3, %v19632_v26 }
 0x3c1   : > { %v19978_v8 = vpop.permute.xlu0 %6540 }
 0x3c2   : > { %7416 = vrot.lane.b32.xlu0 %v19747_v50, %s18375_s19  ;;  %v19982_v21 = vpop.permute.xlu1 %6317 }
 0x3c3   : > { %16460 = vmatmul.mubr.msk.f32.vlgmr.msra.gmra.mrb[10].mxu1 %vm2650_vm3, %v19751_v31 }
 0x3c4   : > { %16484 = vmatpush3.msra.mxu1 %v14299_v24  ;;  %6984 = vrot.lane.b32.xlu1 %v19944_v19, %s18376_s24 }
 0x3c5   : > { %v19991_v23 = vpop.permute.xlu0 %6544  ;;  %16462 = vmatprep.mubr.msk.f32.mxu1 %vm2650_vm3, %v19640_v44  ;;  %16509 = vmatprep.subr.mxu1 %v14334_v9 }
 0x3c6   : > { %7420 = vrot.lane.b32.xlu0 %v19770_v35, %s18375_s19  ;;  %v19997_v26 = vpop.permute.xlu1 %6321  ;;  %v20026_v35 = vld [vmem:[%s18986_s18 + $0x12] sm:$0xff] }
 0x3c7   : > { %16463 = vmatmul.mubr.msk.f32.gmra.mrb[12].mxu1 %vm2650_vm3, %v19774_v14  ;;  %v20041_v14 = vld [vmem:[%s18986_s18 + $0x22] sm:$0xff] }
 0x3c8   : > { %6988 = vrot.lane.b32.xlu1 %v19958_v54, %s18376_s24  ;;  %16465 = vmatprep.mubr.msk.f32.mxu1 %vm2650_vm3, %v19648_v49 }
 0x3c9   : > { %v20005_v50 = vpop.permute.xlu0 %6548 }
 0x3ca   : > { %7424 = vrot.lane.b32.xlu0 %v19787_v38, %s18375_s19  ;;  %v20009_v44 = vpop.permute.xlu1 %6325  ;;  %v20056_v38 = vld [vmem:[%s18986_s18 + $0x32] sm:$0xff] }
 0x3cb   : > { %16466 = vmatmul.mubr.msk.f32.gmra.mrb[14].mxu1 %vm2650_vm3, %v19791_v40  ;;  %v20071_v40 = vld [vmem:[%s18986_s18 + $0x42] sm:$0xff] }
 0x3cc   : > { %6992 = vrot.lane.b32.xlu1 %v19619_v7, %s18376_s24  ;;  %16468 = vmatprep.mubr.msk.f32.mxu1 %vm2650_vm3, %v19657_v41 }
 0x3cd   : > { %v20017_v31 = vpop.permute.xlu0 %6552 }
 0x3ce   : > { %7428 = vrot.lane.b32.xlu0 %v19524_v25, %s18375_s19  ;;  %v20021_v49 = vpop.permute.xlu1 %6329 }
 0x3cf   : > { %16469 = vmatmul.mubr.msk.f32.gmra.mrb[0].mxu1 %vm2650_vm3, %v19806_v53  ;;  %v20086_v53 = vld [vmem:[%s18986_s18 + $0x52] sm:$0xff] }
 0x3d0   : > { %7193 = vrot.lane.b32.xlu1 %v19759_v6, %s18375_s19  ;;  %16471 = vmatprep.mubr.msk.f32.mxu1 %vm2650_vm3, %v19666_v43 }
 0x3d1   : > { %v20032_v41 = vpop.permute.xlu0 %6753 }
 0x3d2   : > { %7629 = vrot.lane.b32.xlu0 %v20026_v35, %s18376_s24  ;;  %v20036_v25 = vpop.permute.xlu1 %6333 }
 0x3d3   : > { %16472 = vmatmul.mubr.msk.f32.gmra.mrb[2].mxu1 %vm2650_vm3, %v19821_v61  ;;  %v14333_v61 = vld [vmem:[%s22748_s4 + $0x38] sm:$0xff] }
 0x3d4   : > { %7197 = vrot.lane.b32.xlu1 %v19777_v37, %s18375_s19  ;;  %16474 = vmatprep.mubr.msk.f32.mxu1 %vm2650_vm3, %v19678_v52 }
 0x3d5   : > { %v20047_v43 = vpop.permute.xlu0 %6757 }
 0x3d6   : > { %7633 = vrot.lane.b32.xlu0 %v20041_v14, %s18376_s24  ;;  %v20051_v6 = vpop.permute.xlu1 %6337 }
 0x3d7   : > { %16475 = vmatmul.mubr.msk.f32.gmra.mrb[4].mxu1 %vm2650_vm3, %v19835_v32  ;;  %v20104_v32 = vld [vmem:[%s18986_s18 + $0x62] sm:$0xff] }
 0x3d8   : > { %7201 = vrot.lane.b32.xlu1 %v19794_v42, %s18375_s19  ;;  %16477 = vmatprep.mubr.msk.f32.mxu1 %vm2650_vm3, %v19687_v12 }
 0x3d9   : > { %v20062_v52 = vpop.permute.xlu0 %6761 }
 0x3da   : > { %7637 = vrot.lane.b32.xlu0 %v20056_v38, %s18376_s24  ;;  %v20066_v37 = vpop.permute.xlu1 %6341 }
 0x3db   : > { %16478 = vmatmul.mubr.msk.f32.gmra.mrb[6].mxu1 %vm2650_vm3, %v19849_v34  ;;  %v20119_v34 = vld [vmem:[%s18986_s18 + $0x72] sm:$0xff] }
 0x3dc   : > { %7205 = vrot.lane.b32.xlu1 %v19809_v55, %s18375_s19  ;;  %16480 = vmatprep.mubr.msk.f32.mxu1 %vm2650_vm3, %v19696_v56 }
 0x3dd   : > { %v20077_v12 = vpop.permute.xlu0 %6765 }
 0x3de   : > { %7641 = vrot.lane.b32.xlu0 %v20071_v40, %s18376_s24  ;;  %v20081_v42 = vpop.permute.xlu1 %6345 }
 0x3df   : > { %16481 = vmatmul.mubr.msk.f32.gmra.mrb[8].mxu1 %vm2650_vm3, %v19863_v29  ;;  %v20134_v29 = vld [vmem:[%s18986_s18 + $0x82] sm:$0xff] }
 0x3e0   : > { %7209 = vrot.lane.b32.xlu1 %v19824_v2, %s18375_s19  ;;  %16485 = vmatprep.mubr.msk.f32.mxu1 %vm2650_vm3, %v19705_v58 }
 0x3e1   : > { %v20092_v56 = vpop.permute.xlu0 %6769 }
 0x3e2   : > { %7645 = vrot.lane.b32.xlu0 %v20086_v53, %s18376_s24  ;;  %v20096_v55 = vpop.permute.xlu1 %6526 }
 0x3e3   : > { %16486 = vmatmul.mubr.msk.f32.vlgmr.msra.gmra.mrb[10].mxu1 %vm2650_vm3, %v19873_v18  ;;  %v20154_v18 = vld [vmem:[#allocation2 + $0x12] sm:$0xff] }
 0x3e4   : > { %16510 = vmatpush3.msra.mxu1 %v14334_v9  ;;  %7213 = vrot.lane.b32.xlu1 %v19838_v20, %s18375_s19 }
 0x3e5   : > { %16488 = vmatprep.mubr.msk.f32.mxu1 %vm2650_vm3, %v19714_v13  ;;  %v20110_v58 = vpop.permute.xlu0 %6773  ;;  %16535 = vmatprep.subr.mxu1 %v14333_v61 }
 0x3e6   : > { %7649 = vrot.lane.b32.xlu0 %v20104_v32, %s18376_s24  ;;  %v20114_v2 = vpop.permute.xlu1 %6530 }
 0x3e7   : > { %16489 = vmatmul.mubr.msk.f32.gmra.mrb[12].mxu1 %vm2650_vm3, %v19889_v46  ;;  %v20182_v46 = vld [vmem:[#allocation2 + $0x32] sm:$0xff] }
 0x3e8   : > { %7217 = vrot.lane.b32.xlu1 %v19852_v11, %s18375_s19  ;;  %16491 = vmatprep.mubr.msk.f32.mxu1 %vm2650_vm3, %v19723_v62 }
 0x3e9   : > { %v20125_v13 = vpop.permute.xlu0 %6777 }
 0x3ea   : > { %7653 = vrot.lane.b32.xlu0 %v20119_v34, %s18376_s24  ;;  %v20129_v20 = vpop.permute.xlu1 %6534 }
 0x3eb   : > { %16492 = vmatmul.mubr.msk.f32.gmra.mrb[14].mxu1 %vm2650_vm3, %v19902_v27 }
 0x3ec   : > { %7221 = vrot.lane.b32.xlu1 %v19556_v0, %s18375_s19  ;;  %16494 = vmatprep.mubr.msk.f32.mxu1 %vm2650_vm3, %v19734_v3 }
 0x3ed   : > { %v20140_v11 = vpop.permute.xlu0 %6781 }
 0x3ee   : > { %22787 = vst [vmem:[#allocation9_spill] sm:$0xff] %v20140_v11  ;;  %7657 = vrot.lane.b32.xlu0 %v20134_v29, %s18376_s24  ;;  %v20144_v62 = vpop.permute.xlu1 %6538  ;;  %v20341_v11 = vld [vmem:[%s18986_s18 + $0x70] sm:$0xff] }
 0x3ef   : > { %16495 = vmatmul.mubr.msk.f32.gmra.mrb[0].mxu1 %vm2650_vm3, %v19916_v30 }
 0x3f0   : > { %7402 = vrot.lane.b32.xlu1 %v19878_v10, %s18375_s19  ;;  %16497 = vmatprep.mubr.msk.f32.mxu1 %vm2650_vm3, %v19745_v60  ;;  %v20168_v60 = vld [vmem:[#allocation2 + $0x22] sm:$0xff] }
 0x3f1   : > { %v20152_v0 = vpop.permute.xlu0 %6962 }
 0x3f2   : > { %22788 = vst [vmem:[#allocation10_spill] sm:$0xff] %v20152_v0  ;;  %7838 = vrot.lane.b32.xlu0 %v20154_v18, %s18376_s24  ;;  %v20158_v3 = vpop.permute.xlu1 %6542  ;;  %v20323_v0 = vld [vmem:[%s18986_s18 + $0x60] sm:$0xff] }
 0x3f3   : > { %16498 = vmatmul.mubr.msk.f32.gmra.mrb[2].mxu1 %vm2650_vm3, %v19929_v63 }
 0x3f4   : > { %7406 = vrot.lane.b32.xlu1 %v19891_v1, %s18375_s19  ;;  %16500 = vmatprep.mubr.msk.f32.mxu1 %vm2650_vm3, %v19765_v39 }
 0x3f5   : > { %v20166_v24 = vpop.permute.xlu0 %6966 }
 0x3f6   : > { %22789 = vst [vmem:[#allocation11_spill] sm:$0xff] %v20166_v24  ;;  %7842 = vrot.lane.b32.xlu0 %v20168_v60, %s18376_s24  ;;  %v20172_v10 = vpop.permute.xlu1 %6546  ;;  %v20309_v24 = vld [vmem:[%s18986_s18 + $0x50] sm:$0xff] }
 0x3f7   : > { %16501 = vmatmul.mubr.msk.f32.gmra.mrb[4].mxu1 %vm2650_vm3, %v19942_v48 }
 0x3f8   : > { %7410 = vrot.lane.b32.xlu1 %v19904_v22, %s18375_s19  ;;  %16503 = vmatprep.mubr.msk.f32.mxu1 %vm2650_vm3, %v19785_v16  ;;  %v20196_v16 = vld [vmem:[#allocation2 + $0x42] sm:$0xff] }
 0x3f9   : > { %v20180_v39 = vpop.permute.xlu0 %6970 }
 0x3fa   : > { %22790 = vst [vmem:[#allocation12_spill] sm:$0xff] %v20180_v39  ;;  %7846 = vrot.lane.b32.xlu0 %v20182_v46, %s18376_s24  ;;  %v20186_v1 = vpop.permute.xlu1 %6550  ;;  %v20295_v39 = vld [vmem:[%s18986_s18 + $0x40] sm:$0xff] }
 0x3fb   : > { %16504 = vmatmul.mubr.msk.f32.gmra.mrb[6].mxu1 %vm2650_vm3, %v19956_v5  ;;  %v20220_v5 = vld [vmem:[%s22749_s5 + $0x40] sm:$0xff] }
 0x3fc   : > { %7414 = vrot.lane.b32.xlu1 %v19918_v33, %s18375_s19  ;;  %16506 = vmatprep.mubr.msk.f32.mxu1 %vm2650_vm3, %v19802_v51  ;;  %v5892_v51 = vld [vmem:[%s18986_s18 + $0x1a] sm:$0xff]  ;;  %v20211_v33 = vld [vmem:[#allocation2 + $0x52] sm:$0xff] }
 0x3fd   : > { %v20194_v27 = vpop.permute.xlu0 %6974 }
 0x3fe   : > { %22791 = vst [vmem:[#allocation13_spill] sm:$0xff] %v20194_v27  ;;  %7850 = vrot.lane.b32.xlu0 %v20196_v16, %s18376_s24  ;;  %v20200_v22 = vpop.permute.xlu1 %6554  ;;  %v20281_v27 = vld [vmem:[%s18986_s18 + $0x30] sm:$0xff] }
 0x3ff   : > { %16507 = vmatmul.mubr.msk.f32.gmra.mrb[8].mxu1 %vm2650_vm3, %v19970_v47  ;;  %v20228_v47 = vld [vmem:[#allocation2 + $0x62] sm:$0xff] }
 0x400   : > { %7418 = vrot.lane.b32.xlu1 %v19931_v45, %s18375_s19  ;;  %16511 = vmatprep.mubr.msk.f32.mxu1 %vm2650_vm3, %v20026_v35  ;;  %v5894_v45 = vld [vmem:[%s18986_s18 + $0x2a] sm:$0xff] }
 0x401   : > { %v20209_v30 = vpop.permute.xlu0 %6978 }
 0x402   : > { %22792 = vst [vmem:[#allocation14_spill] sm:$0xff] %v20209_v30  ;;  %7854 = vrot.lane.b32.xlu0 %v20211_v33, %s18376_s24  ;;  %v20215_v63 = vpop.permute.xlu1 %6755  ;;  %v20267_v30 = vld [vmem:[%s18986_s18 + $0x20] sm:$0xff] }
 0x403   : > { %16512 = vmatmul.mubr.msk.f32.vlgmr.msra.gmra.mrb[10].mxu1 %vm2650_vm3, %v5892_v51 }
 0x404   : > { %16536 = vmatpush3.msra.mxu1 %v14333_v61  ;;  %7422 = vrot.lane.b32.xlu1 %v19944_v19, %s18375_s19  ;;  %v5896_v19 = vld [vmem:[%s18986_s18 + $0x3a] sm:$0xff] }
 0x405   : > { %v20226_v48 = vpop.permute.xlu0 %6982  ;;  %16514 = vmatprep.mubr.msk.f32.mxu1 %vm2650_vm3, %v20041_v14  ;;  %16561 = vmatprep.subr.mxu1 %v20220_v5  ;;  %v20245_v14 = vld [vmem:[#allocation2 + $0x72] sm:$0xff] }
 0x406   : > { %22793 = vst [vmem:[#allocation15_spill] sm:$0xff] %v20226_v48  ;;  %7858 = vrot.lane.b32.xlu0 %v20228_v47, %s18376_s24  ;;  %v20235_v9 = vpop.permute.xlu1 %6759 }
 0x407   : > { %16515 = vmatmul.mubr.msk.f32.gmra.mrb[12].mxu1 %vm2650_vm3, %v5894_v45 }
 0x408   : > { %7426 = vrot.lane.b32.xlu1 %v19958_v54, %s18375_s19  ;;  %16517 = vmatprep.mubr.msk.f32.mxu1 %vm2650_vm3, %v20056_v38  ;;  %v5898_v54 = vld [vmem:[%s18986_s18 + $0x4a] sm:$0xff] }
 0x409   : > { %v20243_v35 = vpop.permute.xlu0 %6986 }
 0x40a   : > { %22794 = vst [vmem:[#allocation16_spill] sm:$0xff] %v20243_v35  ;;  %7862 = vrot.lane.b32.xlu0 %v20245_v14, %s18376_s24  ;;  %v20249_v61 = vpop.permute.xlu1 %6763  ;;  %v20259_v35 = vld [vmem:[#allocation2 + $0x82] sm:$0xff] }
 0x40b   : > { %16518 = vmatmul.mubr.msk.f32.gmra.mrb[14].mxu1 %vm2650_vm3, %v5896_v19 }
 0x40c   : > { %7430 = vrot.lane.b32.xlu1 %v19619_v7, %s18375_s19  ;;  %16520 = vmatprep.mubr.msk.f32.mxu1 %vm2650_vm3, %v20071_v40  ;;  %v5900_v7 = vld [vmem:[%s18986_s18 + $0x5a] sm:$0xff] }
 0x40d   : > { %v20257_v38 = vpop.permute.xlu0 %6990 }
 0x40e   : > { %22795 = vst [vmem:[#allocation17_spill] sm:$0xff] %v20257_v38  ;;  %7866 = vrot.lane.b32.xlu0 %v20259_v35, %s18376_s24  ;;  %v20263_v48 = vpop.permute.xlu1 %6767 }
 0x40f   : > { %16521 = vmatmul.mubr.msk.f32.gmra.mrb[0].mxu1 %vm2650_vm3, %v5898_v54 }
 0x410   : > { %7631 = vrot.lane.b32.xlu1 %v5892_v51, %s18376_s24  ;;  %16523 = vmatprep.mubr.msk.f32.mxu1 %vm2650_vm3, %v20086_v53  ;;  %v5902_v53 = vld [vmem:[%s18986_s18 + $0x6a] sm:$0xff] }
 0x411   : > { %v20273_v40 = vpop.permute.xlu0 %7191 }
 0x412   : > { %22796 = vst [vmem:[#allocation18_spill] sm:$0xff] %v20273_v40  ;;  %8115 = vrot.lane.b32.xlu0 %v20267_v30, %s18377_s17  ;;  %v20277_v38 = vpop.permute.xlu1 %6771 }
 0x413   : > { %16524 = vmatmul.mubr.msk.f32.gmra.mrb[2].mxu1 %vm2650_vm3, %v5900_v7 }
 0x414   : > { %7635 = vrot.lane.b32.xlu1 %v5894_v45, %s18376_s24  ;;  %16526 = vmatprep.mubr.msk.f32.mxu1 %vm2650_vm3, %v20104_v32  ;;  %v5904_v32 = vld [vmem:[%s18986_s18 + $0x7a] sm:$0xff] }
 0x415   : > { %v20287_v51 = vpop.permute.xlu0 %7195 }
 0x416   : > { %22797 = vst [vmem:[#allocation19_spill] sm:$0xff] %v20287_v51  ;;  %8119 = vrot.lane.b32.xlu0 %v20281_v27, %s18377_s17  ;;  %v20291_v40 = vpop.permute.xlu1 %6775 }
 0x417   : > { %16527 = vmatmul.mubr.msk.f32.gmra.mrb[4].mxu1 %vm2650_vm3, %v5902_v53 }
 0x418   : > { %7639 = vrot.lane.b32.xlu1 %v5896_v19, %s18376_s24  ;;  %16529 = vmatprep.mubr.msk.f32.mxu1 %vm2650_vm3, %v20119_v34  ;;  %v5906_v19 = vld [vmem:[%s18986_s18 + $0x8a] sm:$0xff] }
 0x419   : > { %v20301_v45 = vpop.permute.xlu0 %7199 }
 0x41a   : > { %22798 = vst [vmem:[#allocation20_spill] sm:$0xff] %v20301_v45  ;;  %8123 = vrot.lane.b32.xlu0 %v20295_v39, %s18377_s17  ;;  %v20305_v51 = vpop.permute.xlu1 %6779 }
 0x41b   : > { %16530 = vmatmul.mubr.msk.f32.gmra.mrb[6].mxu1 %vm2650_vm3, %v5904_v32 }
 0x41c   : > { %7643 = vrot.lane.b32.xlu1 %v5898_v54, %s18376_s24  ;;  %16532 = vmatprep.mubr.msk.f32.mxu1 %vm2650_vm3, %v20134_v29 }
 0x41d   : > { %v20315_v34 = vpop.permute.xlu0 %7203 }
 0x41e   : > { %22799 = vst [vmem:[#allocation21_spill] sm:$0xff] %v20315_v34  ;;  %8127 = vrot.lane.b32.xlu0 %v20309_v24, %s18377_s17  ;;  %v20319_v45 = vpop.permute.xlu1 %6783  ;;  %v5874_v34 = vld [vmem:[#allocation2 + $0x1a] sm:$0xff] }
 0x41f   : > { %22800 = vst [vmem:[#allocation22_spill] sm:$0xff] %v20319_v45  ;;  %16533 = vmatmul.mubr.msk.f32.gmra.mrb[8].mxu1 %vm2650_vm3, %v5906_v19  ;;  %v20337_v45 = vld [vmem:[%s22748_s4 + $0x40] sm:$0xff] }
 0x420   : > { %16537 = vmatprep.mubr.msk.f32.mxu1 %vm2650_vm3, %v20154_v18  ;;  %7647 = vrot.lane.b32.xlu1 %v5900_v7, %s18376_s24 }
 0x421   : > { %v20328_v54 = vpop.permute.xlu0 %7207 }
 0x422   : > { %22801 = vst [vmem:[#allocation23_spill] sm:$0xff] %v20328_v54  ;;  %8131 = vrot.lane.b32.xlu0 %v20323_v0, %s18377_s17  ;;  %v20332_v29 = vpop.permute.xlu1 %6964  ;;  %v5876_v54 = vld [vmem:[#allocation2 + $0x2a] sm:$0xff] }
 0x423   : > { %22802 = vst [vmem:[#allocation24_spill] sm:$0xff] %v20332_v29  ;;  %16538 = vmatmul.mubr.msk.f32.vlgmr.msra.gmra.mrb[10].mxu1 %vm2650_vm3, %v5874_v34  ;;  %v8093_v29 = vld [vmem:[%s18986_s18 + $0x80] sm:$0xff] }
 0x424   : > { %16562 = vmatpush3.msra.mxu1 %v20220_v5  ;;  %16540 = vmatprep.mubr.msk.f32.mxu1 %vm2650_vm3, %v20168_v60 }
 0x425   : > { %7651 = vrot.lane.b32.xlu1 %v5902_v53, %s18376_s24  ;;  %v20347_v18 = vpop.permute.xlu0 %7211  ;;  %16587 = vmatprep.subr.mxu1 %v20337_v45  ;;  %v5878_v53 = vld [vmem:[#allocation2 + $0x3a] sm:$0xff] }
 0x426   : > { %22803 = vst [vmem:[#allocation25_spill] sm:$0xff] %v20347_v18  ;;  %8135 = vrot.lane.b32.xlu0 %v20341_v11, %s18377_s17  ;;  %v20352_v7 = vpop.permute.xlu1 %6968  ;;  %v8095_v18 = vld [vmem:[%s18986_s18 + $0x90] sm:$0xff] }
 0x427   : > { %22804 = vst [vmem:[#allocation26_spill] sm:$0xff] %v20352_v7  ;;  %16541 = vmatmul.mubr.msk.f32.gmra.mrb[12].mxu1 %vm2650_vm3, %v5876_v54 }
 0x428   : > { %16543 = vmatprep.mubr.msk.f32.mxu1 %vm2650_vm3, %v20182_v46 }
 0x429   : > { %7655 = vrot.lane.b32.xlu1 %v5904_v32, %s18376_s24  ;;  %v20359_v60 = vpop.permute.xlu0 %7215  ;;  %v5880_v32 = vld [vmem:[#allocation2 + $0x4a] sm:$0xff] }
 0x42a   : > { %22805 = vst [vmem:[#allocation27_spill] sm:$0xff] %v20359_v60  ;;  %8139 = vrot.lane.b32.xlu0 %v8093_v29, %s18377_s17  ;;  %v20362_v5 = vpop.permute.xlu1 %6972  ;;  %v20380_v60 = vld [vmem:[#allocation2 + $0x20] sm:$0xff] }
 0x42b   : > { %16544 = vmatmul.mubr.msk.f32.gmra.mrb[14].mxu1 %vm2650_vm3, %v5878_v53 }
 0x42c   : > { %16546 = vmatprep.mubr.msk.f32.mxu1 %vm2650_vm3, %v20196_v16 }
 0x42d   : > { %7659 = vrot.lane.b32.xlu1 %v5906_v19, %s18376_s24  ;;  %v20369_v7 = vpop.permute.xlu0 %7219  ;;  %v5882_v19 = vld [vmem:[#allocation2 + $0x5a] sm:$0xff] }
 0x42e   : > { %22806 = vst [vmem:[#allocation28_spill] sm:$0xff] %v20369_v7  ;;  %8143 = vrot.lane.b32.xlu0 %v8095_v18, %s18377_s17  ;;  %v20372_v46 = vpop.permute.xlu1 %6976  ;;  %v5886_v7 = vld [vmem:[#allocation2 + $0x7a] sm:$0xff] }
 0x42f   : > { %16547 = vmatmul.mubr.msk.f32.gmra.mrb[0].mxu1 %vm2650_vm3, %v5880_v32 }
 0x430   : > { %16549 = vmatprep.mubr.msk.f32.mxu1 %vm2650_vm3, %v20211_v33 }
 0x431   : > { %7840 = vrot.lane.b32.xlu1 %v5874_v34, %s18376_s24  ;;  %v20378_v29 = vpop.permute.xlu0 %7400  ;;  %v20392_v34 = vld [vmem:[#allocation2 + $0x30] sm:$0xff] }
 0x432   : > { %22807 = vst [vmem:[#allocation29_spill] sm:$0xff] %v20378_v29  ;;  %8340 = vrot.lane.b32.xlu0 %v20380_v60, %s18377_s17  ;;  %v20384_v16 = vpop.permute.xlu1 %6980  ;;  %v5884_v29 = vld [vmem:[#allocation2 + $0x6a] sm:$0xff] }
 0x433   : > { %16550 = vmatmul.mubr.msk.f32.gmra.mrb[2].mxu1 %vm2650_vm3, %v5882_v19 }
 0x434   : > { %16552 = vmatprep.mubr.msk.f32.mxu1 %vm2650_vm3, %v20228_v47 }
 0x435   : > { %7844 = vrot.lane.b32.xlu1 %v5876_v54, %s18376_s24  ;;  %v20390_v33 = vpop.permute.xlu0 %7404  ;;  %v20404_v54 = vld [vmem:[#allocation2 + $0x40] sm:$0xff] }
 0x436   : > { %22808 = vst [vmem:[#allocation30_spill] sm:$0xff] %v20390_v33  ;;  %8344 = vrot.lane.b32.xlu0 %v20392_v34, %s18377_s17  ;;  %v20396_v18 = vpop.permute.xlu1 %6984 }
 0x437   : > { %22809 = vst [vmem:[#allocation31_spill] sm:$0xff] %v20396_v18  ;;  %16553 = vmatmul.mubr.msk.f32.gmra.mrb[4].mxu1 %vm2650_vm3, %v5884_v29  ;;  %v5888_v18 = vld [vmem:[#allocation2 + $0x8a] sm:$0xff] }
 0x438   : > { %16555 = vmatprep.mubr.msk.f32.mxu1 %vm2650_vm3, %v20245_v14 }
 0x439   : > { %7848 = vrot.lane.b32.xlu1 %v5878_v53, %s18376_s24  ;;  %v20402_v47 = vpop.permute.xlu0 %7408  ;;  %v20416_v53 = vld [vmem:[#allocation2 + $0x50] sm:$0xff] }
 0x43a   : > { %22810 = vst [vmem:[#allocation32_spill] sm:$0xff] %v20402_v47  ;;  %8348 = vrot.lane.b32.xlu0 %v20404_v54, %s18377_s17  ;;  %v20408_v33 = vpop.permute.xlu1 %6988 }
 0x43b   : > { %16556 = vmatmul.mubr.msk.f32.gmra.mrb[6].mxu1 %vm2650_vm3, %v5886_v7 }
 0x43c   : > { %16558 = vmatprep.mubr.msk.f32.mxu1 %vm2650_vm3, %v20259_v35 }
 0x43d   : > { %7852 = vrot.lane.b32.xlu1 %v5880_v32, %s18376_s24  ;;  %v20414_v14 = vpop.permute.xlu0 %7412  ;;  %v20428_v32 = vld [vmem:[#allocation2 + $0x60] sm:$0xff] }
 0x43e   : > { %22811 = vst [vmem:[#allocation33_spill] sm:$0xff] %v20414_v14  ;;  %8352 = vrot.lane.b32.xlu0 %v20416_v53, %s18377_s17  ;;  %v20420_v47 = vpop.permute.xlu1 %6992 }
 0x43f   : > { %22812 = vst [vmem:[#allocation34_spill] sm:$0xff] %v20420_v47  ;;  %16559 = vmatmul.mubr.msk.f32.gmra.mrb[8].mxu1 %vm2650_vm3, %v5888_v18  ;;  %v20437_v47 = vld [vmem:[%s22749_s5 + $0x48] sm:$0xff] }
 0x440   : > { %16563 = vmatprep.mubr.msk.f32.mxu1 %vm2650_vm3, %v19817_v57 }
 0x441   : > { %7856 = vrot.lane.b32.xlu1 %v5882_v19, %s18376_s24  ;;  %v20426_v35 = vpop.permute.xlu0 %7416  ;;  %v20447_v19 = vld [vmem:[#allocation2 + $0x70] sm:$0xff] }
 0x442   : > { %22813 = vst [vmem:[#allocation35_spill] sm:$0xff] %v20426_v35  ;;  %8356 = vrot.lane.b32.xlu0 %v20428_v32, %s18377_s17  ;;  %v20432_v14 = vpop.permute.xlu1 %7193 }
 0x443   : > { %16564 = vmatmul.mubr.msk.f32.vlgmr.msra.gmra.mrb[10].mxu1 %vm2650_vm3, %v19982_v21  ;;  %v8075_v21 = vld [vmem:[#allocation2 + $0x80] sm:$0xff] }
 0x444   : > { %16588 = vmatpush3.msra.mxu1 %v20337_v45  ;;  %16566 = vmatprep.mubr.msk.f32.mxu1 %vm2650_vm3, %v19832_v15 }
 0x445   : > { %7860 = vrot.lane.b32.xlu1 %v5884_v29, %s18376_s24  ;;  %v20445_v57 = vpop.permute.xlu0 %7420  ;;  %16613 = vmatprep.subr.mxu1 %v20437_v47  ;;  %v8082_v29 = vld [vmem:[%s18986_s18 + $0x28] sm:$0xff] }
 0x446   : > { %8360 = vrot.lane.b32.xlu0 %v20447_v19, %s18377_s17  ;;  %v20452_v35 = vpop.permute.xlu1 %7197 }
 0x447   : > { %16567 = vmatmul.mubr.msk.f32.gmra.mrb[12].mxu1 %vm2650_vm3, %v19997_v26  ;;  %v8077_v26 = vld [vmem:[#allocation2 + $0x90] sm:$0xff] }
 0x448   : > { %16569 = vmatprep.mubr.msk.f32.mxu1 %vm2650_vm3, %v19846_v17 }
 0x449   : > { %7864 = vrot.lane.b32.xlu1 %v5886_v7, %s18376_s24  ;;  %v20459_v15 = vpop.permute.xlu0 %7424 }
 0x44a   : > { %8364 = vrot.lane.b32.xlu0 %v8075_v21, %s18377_s17  ;;  %v20462_v45 = vpop.permute.xlu1 %7201  ;;  %v2585_v21 = vld [vmem:[%s18986_s18] sm:$0xff] }
 0x44b   : > { %16570 = vmatmul.mubr.msk.f32.gmra.mrb[14].mxu1 %vm2650_vm3, %v20009_v44 }
 0x44c   : > { %16572 = vmatprep.mubr.msk.f32.mxu1 %vm2650_vm3, %v19860_v36 }
 0x44d   : > { %7868 = vrot.lane.b32.xlu1 %v5888_v18, %s18376_s24  ;;  %v20469_v17 = vpop.permute.xlu0 %7428  ;;  %v8084_v18 = vld [vmem:[%s18986_s18 + $0x38] sm:$0xff] }
 0x44e   : > { %22814 = vst [vmem:[#allocation36_spill] sm:$0xff] %v20469_v17  ;;  %8368 = vrot.lane.b32.xlu0 %v8077_v26, %s18377_s17  ;;  %v20472_v7 = vpop.permute.xlu1 %7205  ;;  %v2586_v26 = vld [vmem:[%s18986_s18 + $0x8] sm:$0xff] }
 0x44f   : > { %16573 = vmatmul.mubr.msk.f32.gmra.mrb[0].mxu1 %vm2650_vm3, %v20021_v49  ;;  %v22820_v17 = vld [vmem:[#allocation5_spill] sm:$0xff] }
 0x450   : > { %16575 = vmatprep.mubr.msk.f32.mxu1 %vm2650_vm3, %v19870_v4 }
 0x451   : > { %8117 = vrot.lane.b32.xlu1 %v8082_v29, %s18377_s17  ;;  %v20481_v36 = vpop.permute.xlu0 %7629 }
 0x452   : > { %22815 = vst [vmem:[#allocation37_spill] sm:$0xff] %v20481_v36  ;;  %2618 = vrot.lane.b32.xlu0 %v2585_v21, %s18375_s19  ;;  %v20484_v44 = vpop.permute.xlu1 %7209  ;;  %v8086_v21 = vld [vmem:[%s18986_s18 + $0x48] sm:$0xff]  ;;  %v2587_v36 = vld [vmem:[%s18986_s18 + $0x10] sm:$0xff] }
 0x453   : > { %16576 = vmatmul.mubr.msk.f32.gmra.mrb[2].mxu1 %vm2650_vm3, %v20036_v25 }
 0x454   : > { %16578 = vmatprep.mubr.msk.f32.mxu1 %vm2650_vm3, %v19886_v28 }
 0x455   : > { %8121 = vrot.lane.b32.xlu1 %v8084_v18, %s18377_s17  ;;  %v20493_v4 = vpop.permute.xlu0 %7633 }
 0x456   : > { %22816 = vst [vmem:[#allocation38_spill] sm:$0xff] %v20493_v4  ;;  %2620 = vrot.lane.b32.xlu0 %v2586_v26, %s18375_s19  ;;  %v20496_v49 = vpop.permute.xlu1 %7213  ;;  %v20511_v26 = vld [vmem:[%s18986_s18 + $0x58] sm:$0xff] }
 0x457   : > { %16579 = vmatmul.mubr.msk.f32.gmra.mrb[4].mxu1 %vm2650_vm3, %v20051_v6  ;;  %v2588_v4 = vld [vmem:[%s18986_s18 + $0x18] sm:$0xff]  ;;  %v22818_v6 = vld [vmem:[#allocation4_spill] sm:$0xff] }
 0x458   : > { %16581 = vmatprep.mubr.msk.f32.mxu1 %vm2650_vm3, %v19899_v59 }
 0x459   : > { %8125 = vrot.lane.b32.xlu1 %v8086_v21, %s18377_s17  ;;  %v20505_v28 = vpop.permute.xlu0 %7637 }
 0x45a   : > { %22817 = vst [vmem:[#allocation39_spill] sm:$0xff] %v20505_v28  ;;  %2622 = vrot.lane.b32.xlu0 %v2587_v36, %s18375_s19  ;;  %v20508_v25 = vpop.permute.xlu1 %7217  ;;  %v20526_v28 = vld [vmem:[%s18986_s18 + $0x68] sm:$0xff] }
 0x45b   : > { %16582 = vmatmul.mubr.msk.f32.gmra.mrb[6].mxu1 %vm2650_vm3, %v20066_v37 }
 0x45c   : > { %16584 = vmatprep.mubr.msk.f32.mxu1 %vm2650_vm3, %v22818_v6  ;;  %v20541_v6 = vld [vmem:[%s18986_s18 + $0x78] sm:$0xff] }
 0x45d   : > { %8129 = vrot.lane.b32.xlu1 %v20511_v26, %s18377_s17  ;;  %v20520_v59 = vpop.permute.xlu0 %7641 }
 0x45e   : > { %22819 = vst [vmem:[#allocation4_spill] sm:$0xff] %v20520_v59  ;;  %2624 = vrot.lane.b32.xlu0 %v2588_v4, %s18375_s19  ;;  %v20523_v36 = vpop.permute.xlu1 %7221  ;;  %v8094_v59 = vld [vmem:[%s18986_s18 + $0x88] sm:$0xff] }
 0x45f   : > { %16585 = vmatmul.mubr.msk.f32.gmra.mrb[8].mxu1 %vm2650_vm3, %v20081_v42  ;;  %v20546_v42 = vld [vmem:[%s22748_s4 + $0x48] sm:$0xff] }
 0x460   : > { %16589 = vmatprep.mubr.msk.f32.mxu1 %vm2650_vm3, %v22820_v17  ;;  %v22822_v17 = vld [vmem:[#allocation6_spill] sm:$0xff] }
 0x461   : > { %8133 = vrot.lane.b32.xlu1 %v20526_v28, %s18377_s17  ;;  %v20534_v37 = vpop.permute.xlu0 %7645 }
 0x462   : > { %22821 = vst [vmem:[#allocation5_spill] sm:$0xff] %v20534_v37  ;;  %2626 = vrot.lane.b32.xlu0 %v20267_v30, %s18375_s19  ;;  %v20538_v4 = vpop.permute.xlu1 %7402 }
 0x463   : > { %16590 = vmatmul.mubr.msk.f32.vlgmr.msra.gmra.mrb[10].mxu1 %vm2650_vm3, %v20096_v55  ;;  %v22824_v55 = vld [vmem:[#allocation7_spill] sm:$0xff] }
 0x464   : > { %16614 = vmatpush3.msra.mxu1 %v20437_v47  ;;  %16592 = vmatprep.mubr.msk.f32.mxu1 %vm2650_vm3, %v22822_v17 }
 0x465   : > { %8137 = vrot.lane.b32.xlu1 %v20541_v6, %s18377_s17  ;;  %v20555_v30 = vpop.permute.xlu0 %7649  ;;  %16639 = vmatprep.subr.mxu1 %v20546_v42 }
 0x466   : > { %22823 = vst [vmem:[#allocation6_spill] sm:$0xff] %v20555_v30  ;;  %2628 = vrot.lane.b32.xlu0 %v8082_v29, %s18375_s19  ;;  %v20559_v37 = vpop.permute.xlu1 %7406  ;;  %v8096_v30 = vld [vmem:[%s18986_s18 + $0x98] sm:$0xff]  ;;  %v22825_v29 = vld [vmem:[#allocation8_spill] sm:$0xff] }
 0x467   : > { %16593 = vmatmul.mubr.msk.f32.gmra.mrb[12].mxu1 %vm2650_vm3, %v20114_v2 }
 0x468   : > { %16595 = vmatprep.mubr.msk.f32.mxu1 %vm2650_vm3, %v22824_v55 }
 0x469   : > { %8141 = vrot.lane.b32.xlu1 %v8094_v59, %s18377_s17  ;;  %v20567_v47 = vpop.permute.xlu0 %7653 }
 0x46a   : > { %2630 = vrot.lane.b32.xlu0 %v20281_v27, %s18375_s19  ;;  %v20571_v17 = vpop.permute.xlu1 %7410  ;;  %v20588_v27 = vld [vmem:[#allocation2 + $0x28] sm:$0xff] }
 0x46b   : > { %16596 = vmatmul.mubr.msk.f32.gmra.mrb[14].mxu1 %vm2650_vm3, %v20129_v20 }
 0x46c   : > { %16598 = vmatprep.mubr.msk.f32.mxu1 %vm2650_vm3, %v22825_v29  ;;  %v2568_v29 = vld [vmem:[#allocation2] sm:$0xff] }
 0x46d   : > { %8145 = vrot.lane.b32.xlu1 %v8096_v30, %s18377_s17  ;;  %v20579_v2 = vpop.permute.xlu0 %7657 }
 0x46e   : > { %2632 = vrot.lane.b32.xlu0 %v8084_v18, %s18375_s19  ;;  %v20582_v59 = vpop.permute.xlu1 %7414 }
 0x46f   : > { %16599 = vmatmul.mubr.msk.f32.gmra.mrb[0].mxu1 %vm2650_vm3, %v20144_v62  ;;  %v20602_v62 = vld [vmem:[#allocation2 + $0x38] sm:$0xff] }
 0x470   : > { %16601 = vmatprep.mubr.msk.f32.mxu1 %vm2650_vm3, %v19978_v8 }
 0x471   : > { %8342 = vrot.lane.b32.xlu1 %v20588_v27, %s18377_s17  ;;  %v20592_v20 = vpop.permute.xlu0 %7838 }
 0x472   : > { %2634 = vrot.lane.b32.xlu0 %v20295_v39, %s18375_s19  ;;  %v20596_v30 = vpop.permute.xlu1 %7418 }
 0x473   : > { %16602 = vmatmul.mubr.msk.f32.gmra.mrb[2].mxu1 %vm2650_vm3, %v20158_v3  ;;  %v2601_v3 = vld [vmem:[%s22749_s5] sm:$0xff] }
 0x474   : > { %16604 = vmatprep.mubr.msk.f32.mxu1 %vm2650_vm3, %v19991_v23  ;;  %v20618_v23 = vld [vmem:[#allocation2 + $0x48] sm:$0xff]  ;;  %16145 = vmatprep.subr.mxu0 %v2601_v3 }
 0x475   : > { %8346 = vrot.lane.b32.xlu1 %v20602_v62, %s18377_s17  ;;  %v20606_v8 = vpop.permute.xlu0 %7842  ;;  %16146 = vmatpush3.msra.mxu0 %v2601_v3  ;;  %v20726_v3 = vld [vmem:[%s18986_s18 + $0x31] sm:$0xff] }
 0x476   : > { %2636 = vrot.lane.b32.xlu0 %v8086_v21, %s18375_s19  ;;  %v20609_v18 = vpop.permute.xlu1 %7422  ;;  %22828 = vst [vmem:[#allocation40_spill] sm:$0xff] %v20726_v3 }
 0x477   : > { %16605 = vmatmul.mubr.msk.f32.gmra.mrb[4].mxu1 %vm2650_vm3, %v20172_v10 }
 0x478   : > { %16607 = vmatprep.mubr.msk.f32.mxu1 %vm2650_vm3, %v20005_v50  ;;  %v20632_v50 = vld [vmem:[#allocation2 + $0x58] sm:$0xff] }
 0x479   : > { %8350 = vrot.lane.b32.xlu1 %v20618_v23, %s18377_s17  ;;  %v20622_v39 = vpop.permute.xlu0 %7846 }
 0x47a   : > { %2638 = vrot.lane.b32.xlu0 %v20309_v24, %s18375_s19  ;;  %v20626_v10 = vpop.permute.xlu1 %7426  ;;  %v20644_v24 = vld [vmem:[#allocation2 + $0x68] sm:$0xff] }
 0x47b   : > { %16608 = vmatmul.mubr.msk.f32.gmra.mrb[6].mxu1 %vm2650_vm3, %v20186_v1 }
 0x47c   : > { %16610 = vmatprep.mubr.msk.f32.mxu1 %vm2650_vm3, %v20017_v31 }
 0x47d   : > { %8354 = vrot.lane.b32.xlu1 %v20632_v50, %s18377_s17  ;;  %v20636_v21 = vpop.permute.xlu0 %7850 }
 0x47e   : > { %2640 = vrot.lane.b32.xlu0 %v20511_v26, %s18375_s19  ;;  %v20640_v55 = vpop.permute.xlu1 %7430  ;;  %v20659_v26 = vld [vmem:[%s22749_s5 + $0x50] sm:$0xff] }
 0x47f   : > { %16611 = vmatmul.mubr.msk.f32.gmra.mrb[8].mxu1 %vm2650_vm3, %v20200_v22 }
 0x480   : > { %16615 = vmatprep.mubr.msk.f32.mxu1 %vm2650_vm3, %v20032_v41  ;;  %v20664_v41 = vld [vmem:[#allocation2 + $0x78] sm:$0xff] }
 0x481   : > { %8358 = vrot.lane.b32.xlu1 %v20644_v24, %s18377_s17  ;;  %v20650_v31 = vpop.permute.xlu0 %7854 }
 0x482   : > { %2642 = vrot.lane.b32.xlu0 %v20323_v0, %s18375_s19  ;;  %v20654_v1 = vpop.permute.xlu1 %7631 }
 0x483   : > { %16616 = vmatmul.mubr.msk.f32.vlgmr.msra.gmra.mrb[10].mxu1 %vm2650_vm3, %v20215_v63  ;;  %v8076_v63 = vld [vmem:[#allocation2 + $0x88] sm:$0xff] }
 0x484   : > { %16640 = vmatpush3.msra.mxu1 %v20546_v42  ;;  %16618 = vmatprep.mubr.msk.f32.mxu1 %vm2650_vm3, %v20047_v43 }
 0x485   : > { %8362 = vrot.lane.b32.xlu1 %v20664_v41, %s18377_s17  ;;  %v20670_v0 = vpop.permute.xlu0 %7858  ;;  %16665 = vmatprep.subr.mxu1 %v20659_v26 }
 0x486   : > { %2644 = vrot.lane.b32.xlu0 %v20526_v28, %s18375_s19  ;;  %v20675_v22 = vpop.permute.xlu1 %7635  ;;  %v8078_v28 = vld [vmem:[#allocation2 + $0x98] sm:$0xff] }
 0x487   : > { %16619 = vmatmul.mubr.msk.f32.gmra.mrb[12].mxu1 %vm2650_vm3, %v20235_v9 }
 0x488   : > { %16621 = vmatprep.mubr.msk.f32.mxu1 %vm2650_vm3, %v20062_v52 }
 0x489   : > { %8366 = vrot.lane.b32.xlu1 %v8076_v63, %s18377_s17  ;;  %v20682_v43 = vpop.permute.xlu0 %7862 }
 0x48a   : > { %2646 = vrot.lane.b32.xlu0 %v20341_v11, %s18375_s19  ;;  %v20686_v42 = vpop.permute.xlu1 %7639  ;;  %v20700_v11 = vld [vmem:[%s18986_s18 + $0x21] sm:$0xff] }
 0x48b   : > { %16622 = vmatmul.mubr.msk.f32.gmra.mrb[14].mxu1 %vm2650_vm3, %v20249_v61  ;;  %22826 = vst [vmem:[#allocation7_spill] sm:$0xff] %v20700_v11 }
 0x48c   : > { %16624 = vmatprep.mubr.msk.f32.mxu1 %vm2650_vm3, %v20077_v12 }
 0x48d   : > { %8370 = vrot.lane.b32.xlu1 %v8078_v28, %s18377_s17  ;;  %v20693_v52 = vpop.permute.xlu0 %7866  ;;  %v2570_v28 = vld [vmem:[#allocation2 + $0x10] sm:$0xff] }
 0x48e   : > { %2648 = vrot.lane.b32.xlu0 %v20541_v6, %s18375_s19  ;;  %v20697_v9 = vpop.permute.xlu1 %7643  ;;  %v20714_v6 = vld [vmem:[%s18986_s18 + $0x29] sm:$0xff] }
 0x48f   : > { %16625 = vmatmul.mubr.msk.f32.gmra.mrb[0].mxu1 %vm2650_vm3, %v20263_v48  ;;  %22827 = vst [vmem:[#allocation8_spill] sm:$0xff] %v20714_v6  ;;  %v2569_v48 = vld [vmem:[#allocation2 + $0x8] sm:$0xff] }
 0x490   : > { %16627 = vmatprep.mubr.msk.f32.mxu1 %vm2650_vm3, %v20092_v56 }
 0x491   : > { %9007 = vrot.lane.b32.xlu1 %v20700_v11, %s18377_s17  ;;  %v20708_v12 = vpop.permute.xlu0 %8115  ;;  %v22833_v11 = vld [vmem:[#allocation22_spill] sm:$0xff] }
 0x492   : > { %2844 = vrot.lane.b32.xlu0 %v2568_v29, %s18375_s19  ;;  %v20711_v61 = vpop.permute.xlu1 %7647 }
 0x493   : > { %16628 = vmatmul.mubr.msk.f32.gmra.mrb[2].mxu1 %vm2650_vm3, %v20277_v38  ;;  %v20735_v38 = vld [vmem:[%s22748_s4] sm:$0xff] }
 0x494   : > { %16630 = vmatprep.mubr.msk.f32.mxu1 %vm2650_vm3, %v20110_v58  ;;  %16171 = vmatprep.subr.mxu0 %v20735_v38 }
 0x495   : > { %9009 = vrot.lane.b32.xlu1 %v20714_v6, %s18377_s17  ;;  %v20722_v56 = vpop.permute.xlu0 %8119 }
 0x496   : > { %2846 = vrot.lane.b32.xlu0 %v2569_v48, %s18375_s19  ;;  %v22830_v48 = vld [vmem:[#allocation9_spill] sm:$0xff] }
 0x497   : > { %v20728_v63 = vpop.permute.xlu1 %7651  ;;  %16631 = vmatmul.mubr.msk.f32.gmra.mrb[4].mxu1 %vm2650_vm3, %v20291_v40  ;;  %v20746_v40 = vld [vmem:[%s18986_s18 + $0x39] sm:$0xff] }
 0x498   : > { %16633 = vmatprep.mubr.msk.f32.mxu1 %vm2650_vm3, %v20125_v13  ;;  %22829 = vst [vmem:[#allocation41_spill] sm:$0xff] %v20746_v40 }
 0x499   : > { %9011 = vrot.lane.b32.xlu1 %v20726_v3, %s18377_s17  ;;  %v20742_v58 = vpop.permute.xlu0 %8123  ;;  %v2571_v3 = vld [vmem:[#allocation2 + $0x18] sm:$0xff] }
 0x49a   : > { %2848 = vrot.lane.b32.xlu0 %v2570_v28, %s18375_s19  ;;  %v20760_v28 = vld [vmem:[%s18986_s18 + $0x41] sm:$0xff] }
 0x49b   : > { %v20748_v29 = vpop.permute.xlu1 %7655  ;;  %16634 = vmatmul.mubr.msk.f32.gmra.mrb[6].mxu1 %vm2650_vm3, %v20305_v51  ;;  %22832 = vst [vmem:[#allocation42_spill] sm:$0xff] %v20760_v28  ;;  %v22834_v51 = vld [vmem:[#allocation10_spill] sm:$0xff] }
 0x49c   : > { %16636 = vmatprep.mubr.msk.f32.mxu1 %vm2650_vm3, %v22830_v48 }
 0x49d   : > { %9013 = vrot.lane.b32.xlu1 %v20746_v40, %s18377_s17  ;;  %v20756_v13 = vpop.permute.xlu0 %8127  ;;  %v14435_v40 = vld [vmem:[%s22748_s4 + $0x50] sm:$0xff] }
 0x49e   : > { %22831 = vst [vmem:[#allocation9_spill] sm:$0xff] %v20756_v13  ;;  %2850 = vrot.lane.b32.xlu0 %v2571_v3, %s18375_s19  ;;  %v20775_v3 = vld [vmem:[%s18986_s18 + $0x49] sm:$0xff] }
 0x49f   : > { %v20762_v6 = vpop.permute.xlu1 %7659  ;;  %16637 = vmatmul.mubr.msk.f32.gmra.mrb[8].mxu1 %vm2650_vm3, %v22833_v11  ;;  %22836 = vst [vmem:[#allocation10_spill] sm:$0xff] %v20775_v3  ;;  %v22837_v11 = vld [vmem:[#allocation24_spill] sm:$0xff] }
 0x4a0   : > { %16641 = vmatprep.mubr.msk.f32.mxu1 %vm2650_vm3, %v22834_v51  ;;  %v22838_v51 = vld [vmem:[#allocation11_spill] sm:$0xff] }
 0x4a1   : > { %9015 = vrot.lane.b32.xlu1 %v20760_v28, %s18377_s17  ;;  %v20770_v48 = vpop.permute.xlu0 %8131  ;;  %v20794_v28 = vld [vmem:[%s18986_s18 + $0x51] sm:$0xff] }
 0x4a2   : > { %22835 = vst [vmem:[#allocation22_spill] sm:$0xff] %v20770_v48  ;;  %2852 = vrot.lane.b32.xlu0 %v20380_v60, %s18375_s19  ;;  %22839 = vst [vmem:[#allocation24_spill] sm:$0xff] %v20794_v28 }
 0x4a3   : > { %v20780_v13 = vpop.permute.xlu1 %7840  ;;  %16642 = vmatmul.mubr.msk.f32.vlgmr.msra.gmra.mrb[10].mxu1 %vm2650_vm3, %v22837_v11  ;;  %v22840_v11 = vld [vmem:[#allocation26_spill] sm:$0xff] }
 0x4a4   : > { %16666 = vmatpush3.msra.mxu1 %v20659_v26  ;;  %16644 = vmatprep.mubr.msk.f32.mxu1 %vm2650_vm3, %v22838_v51  ;;  %v22841_v26 = vld [vmem:[#allocation12_spill] sm:$0xff] }
 0x4a5   : > { %9017 = vrot.lane.b32.xlu1 %v20775_v3, %s18377_s17  ;;  %v20789_v60 = vpop.permute.xlu0 %8135  ;;  %16691 = vmatprep.subr.mxu1 %v14435_v40 }
 0x4a6   : > { %2854 = vrot.lane.b32.xlu0 %v20588_v27, %s18375_s19  ;;  %v20809_v27 = vld [vmem:[%s18986_s18 + $0x59] sm:$0xff] }
 0x4a7   : > { %v20796_v48 = vpop.permute.xlu1 %7844  ;;  %16645 = vmatmul.mubr.msk.f32.gmra.mrb[12].mxu1 %vm2650_vm3, %v22840_v11  ;;  %22842 = vst [vmem:[#allocation11_spill] sm:$0xff] %v20809_v27  ;;  %v22843_v11 = vld [vmem:[#allocation13_spill] sm:$0xff] }
 0x4a8   : > { %16647 = vmatprep.mubr.msk.f32.mxu1 %vm2650_vm3, %v22841_v26 }
 0x4a9   : > { %9019 = vrot.lane.b32.xlu1 %v20794_v28, %s18377_s17  ;;  %v20804_v51 = vpop.permute.xlu0 %8139 }
 0x4aa   : > { %2856 = vrot.lane.b32.xlu0 %v20392_v34, %s18375_s19  ;;  %v20824_v34 = vld [vmem:[%s18986_s18 + $0x61] sm:$0xff] }
 0x4ab   : > { %v20811_v3 = vpop.permute.xlu1 %7848  ;;  %16648 = vmatmul.mubr.msk.f32.gmra.mrb[14].mxu1 %vm2650_vm3, %v20362_v5  ;;  %22844 = vst [vmem:[#allocation26_spill] sm:$0xff] %v20824_v34  ;;  %v22845_v5 = vld [vmem:[#allocation14_spill] sm:$0xff] }
 0x4ac   : > { %16650 = vmatprep.mubr.msk.f32.mxu1 %vm2650_vm3, %v22843_v11 }
 0x4ad   : > { %9021 = vrot.lane.b32.xlu1 %v20809_v27, %s18377_s17  ;;  %v20819_v26 = vpop.permute.xlu0 %8143 }
 0x4ae   : > { %2858 = vrot.lane.b32.xlu0 %v20602_v62, %s18375_s19  ;;  %v20839_v62 = vld [vmem:[%s18986_s18 + $0x69] sm:$0xff] }
 0x4af   : > { %v20826_v28 = vpop.permute.xlu1 %7852  ;;  %16651 = vmatmul.mubr.msk.f32.gmra.mrb[0].mxu1 %vm2650_vm3, %v20372_v46  ;;  %22847 = vst [vmem:[#allocation13_spill] sm:$0xff] %v20839_v62  ;;  %v22848_v46 = vld [vmem:[#allocation15_spill] sm:$0xff] }
 0x4b0   : > { %16653 = vmatprep.mubr.msk.f32.mxu1 %vm2650_vm3, %v22845_v5 }
 0x4b1   : > { %9023 = vrot.lane.b32.xlu1 %v20824_v34, %s18377_s17  ;;  %v20834_v11 = vpop.permute.xlu0 %8340 }
 0x4b2   : > { %22846 = vst [vmem:[#allocation12_spill] sm:$0xff] %v20834_v11  ;;  %2860 = vrot.lane.b32.xlu0 %v20404_v54, %s18375_s19  ;;  %v20854_v54 = vld [vmem:[%s18986_s18 + $0x71] sm:$0xff] }
 0x4b3   : > { %v20841_v27 = vpop.permute.xlu1 %7856  ;;  %16654 = vmatmul.mubr.msk.f32.gmra.mrb[2].mxu1 %vm2650_vm3, %v20384_v16  ;;  %22849 = vst [vmem:[#allocation14_spill] sm:$0xff] %v20854_v54  ;;  %v22850_v11 = vld [vmem:[#allocation31_spill] sm:$0xff]  ;;  %v22851_v16 = vld [vmem:[#allocation16_spill] sm:$0xff] }
 0x4b4   : > { %16656 = vmatprep.mubr.msk.f32.mxu1 %vm2650_vm3, %v22848_v46 }
 0x4b5   : > { %9025 = vrot.lane.b32.xlu1 %v20839_v62, %s18377_s17  ;;  %v20849_v5 = vpop.permute.xlu0 %8344 }
 0x4b6   : > { %2862 = vrot.lane.b32.xlu0 %v20618_v23, %s18375_s19  ;;  %v20869_v23 = vld [vmem:[%s18986_s18 + $0x79] sm:$0xff] }
 0x4b7   : > { %v20856_v34 = vpop.permute.xlu1 %7860  ;;  %16657 = vmatmul.mubr.msk.f32.gmra.mrb[4].mxu1 %vm2650_vm3, %v22850_v11  ;;  %22853 = vst [vmem:[#allocation31_spill] sm:$0xff] %v20869_v23  ;;  %v22854_v11 = vld [vmem:[#allocation17_spill] sm:$0xff] }
 0x4b8   : > { %16659 = vmatprep.mubr.msk.f32.mxu1 %vm2650_vm3, %v22851_v16 }
 0x4b9   : > { %9027 = vrot.lane.b32.xlu1 %v20854_v54, %s18377_s17  ;;  %v20864_v46 = vpop.permute.xlu0 %8348  ;;  %v20884_v54 = vld [vmem:[%s18986_s18 + $0x81] sm:$0xff] }
 0x4ba   : > { %22852 = vst [vmem:[#allocation15_spill] sm:$0xff] %v20864_v46  ;;  %2864 = vrot.lane.b32.xlu0 %v20416_v53, %s18375_s19  ;;  %22855 = vst [vmem:[#allocation16_spill] sm:$0xff] %v20884_v54  ;;  %v22856_v46 = vld [vmem:[#allocation34_spill] sm:$0xff] }
 0x4bb   : > { %v20871_v62 = vpop.permute.xlu1 %7864  ;;  %16660 = vmatmul.mubr.msk.f32.gmra.mrb[6].mxu1 %vm2650_vm3, %v20408_v33  ;;  %v22857_v33 = vld [vmem:[#allocation18_spill] sm:$0xff] }
 0x4bc   : > { %16662 = vmatprep.mubr.msk.f32.mxu1 %vm2650_vm3, %v22854_v11 }
 0x4bd   : > { %9029 = vrot.lane.b32.xlu1 %v20869_v23, %s18377_s17  ;;  %v20879_v16 = vpop.permute.xlu0 %8352  ;;  %v20904_v23 = vld [vmem:[%s22749_s5 + $0x58] sm:$0xff] }
 0x4be   : > { %2866 = vrot.lane.b32.xlu0 %v20632_v50, %s18375_s19  ;;  %v20899_v50 = vld [vmem:[%s18986_s18 + $0x89] sm:$0xff] }
 0x4bf   : > { %v20886_v53 = vpop.permute.xlu1 %7868  ;;  %16663 = vmatmul.mubr.msk.f32.gmra.mrb[8].mxu1 %vm2650_vm3, %v22856_v46  ;;  %22859 = vst [vmem:[#allocation34_spill] sm:$0xff] %v20899_v50 }
 0x4c0   : > { %16667 = vmatprep.mubr.msk.f32.mxu1 %vm2650_vm3, %v22857_v33  ;;  %v22860_v33 = vld [vmem:[#allocation19_spill] sm:$0xff] }
 0x4c1   : > { %9031 = vrot.lane.b32.xlu1 %v20884_v54, %s18377_s17  ;;  %v20894_v11 = vpop.permute.xlu0 %8356  ;;  %v20920_v54 = vld [vmem:[%s18986_s18 + $0x91] sm:$0xff] }
 0x4c2   : > { %22858 = vst [vmem:[#allocation17_spill] sm:$0xff] %v20894_v11  ;;  %2868 = vrot.lane.b32.xlu0 %v20428_v32, %s18375_s19  ;;  %22861 = vst [vmem:[#allocation18_spill] sm:$0xff] %v20920_v54 }
 0x4c3   : > { %v20906_v46 = vpop.permute.xlu1 %8117  ;;  %16668 = vmatmul.mubr.msk.f32.vlgmr.msra.gmra.mrb[10].mxu1 %vm2650_vm3, %v20432_v14  ;;  %v22862_v14 = vld [vmem:[#allocation20_spill] sm:$0xff] }
 0x4c4   : > { %16692 = vmatpush3.msra.mxu1 %v14435_v40  ;;  %16670 = vmatprep.mubr.msk.f32.mxu1 %vm2650_vm3, %v22860_v33 }
 0x4c5   : > { %9033 = vrot.lane.b32.xlu1 %v20899_v50, %s18377_s17  ;;  %v20914_v32 = vpop.permute.xlu0 %8360  ;;  %16717 = vmatprep.subr.mxu1 %v20904_v23  ;;  %v22867_v50 = vld [vmem:[#allocation25_spill] sm:$0xff] }
 0x4c6   : > { %2870 = vrot.lane.b32.xlu0 %v20644_v24, %s18375_s19  ;;  %v20935_v24 = vld [vmem:[%s18986_s18 + $0x99] sm:$0xff] }
 0x4c7   : > { %v20922_v11 = vpop.permute.xlu1 %8121  ;;  %16671 = vmatmul.mubr.msk.f32.gmra.mrb[12].mxu1 %vm2650_vm3, %v20452_v35  ;;  %22863 = vst [vmem:[#allocation19_spill] sm:$0xff] %v20935_v24  ;;  %v22864_v35 = vld [vmem:[#allocation21_spill] sm:$0xff] }
 0x4c8   : > { %16673 = vmatprep.mubr.msk.f32.mxu1 %vm2650_vm3, %v22862_v14 }
 0x4c9   : > { %9035 = vrot.lane.b32.xlu1 %v20920_v54, %s18377_s17  ;;  %v20930_v40 = vpop.permute.xlu0 %8364  ;;  %v20953_v54 = vld [vmem:[#allocation2 + $0x21] sm:$0xff] }
 0x4ca   : > { %2872 = vrot.lane.b32.xlu0 %v20447_v19, %s18375_s19  ;;  %22865 = vst [vmem:[#allocation20_spill] sm:$0xff] %v20953_v54 }
 0x4cb   : > { %v20937_v33 = vpop.permute.xlu1 %8125  ;;  %16674 = vmatmul.mubr.msk.f32.gmra.mrb[14].mxu1 %vm2650_vm3, %v20462_v45  ;;  %v22866_v45 = vld [vmem:[#allocation23_spill] sm:$0xff] }
 0x4cc   : > { %16676 = vmatprep.mubr.msk.f32.mxu1 %vm2650_vm3, %v22864_v35 }
 0x4cd   : > { %9037 = vrot.lane.b32.xlu1 %v20935_v24, %s18377_s17  ;;  %v20945_v14 = vpop.permute.xlu0 %8368  ;;  %v18339_v24 = vld [vmem:[%s18986_s18 + $0x1] sm:$0xff] }
 0x4ce   : > { %2874 = vrot.lane.b32.xlu0 %v20664_v41, %s18375_s19 }
 0x4cf   : > { %v20949_v19 = vpop.permute.xlu1 %8129  ;;  %16677 = vmatmul.mubr.msk.f32.gmra.mrb[0].mxu1 %vm2650_vm3, %v20472_v7  ;;  %v20966_v7 = vld [vmem:[#allocation2 + $0x29] sm:$0xff] }
 0x4d0   : > { %16679 = vmatprep.mubr.msk.f32.mxu1 %vm2650_vm3, %v22866_v45 }
 0x4d1   : > { %9216 = vrot.lane.b32.xlu1 %v20953_v54, %s18377_s17  ;;  %v2619_v35 = vpop.permute.xlu0 %2618  ;;  %v18340_v54 = vld [vmem:[%s18986_s18 + $0x11] sm:$0xff] }
 0x4d2   : > { %3105 = vrot.lane.b32.xlu0 %v18339_v24, %s18376_s24  ;;  %16147 = vmatprep.mubr.msk.f32.mxu0 %vm2650_vm3, %v2619_v35 }
 0x4d3   : > { %v20962_v41 = vpop.permute.xlu1 %8133  ;;  %16680 = vmatmul.mubr.msk.f32.gmra.mrb[2].mxu1 %vm2650_vm3, %v20484_v44  ;;  %v20980_v44 = vld [vmem:[#allocation2 + $0x31] sm:$0xff] }
 0x4d4   : > { %16682 = vmatprep.mubr.msk.f32.mxu1 %vm2650_vm3, %v22867_v50  ;;  %22868 = vst [vmem:[#allocation21_spill] sm:$0xff] %v20980_v44  ;;  %v22869_v50 = vld [vmem:[#allocation27_spill] sm:$0xff] }
 0x4d5   : > { %9218 = vrot.lane.b32.xlu1 %v20966_v7, %s18377_s17  ;;  %v2621_v45 = vpop.permute.xlu0 %2620 }
 0x4d6   : > { %3109 = vrot.lane.b32.xlu0 %v18340_v54, %s18376_s24  ;;  %16148 = vmatmul.mubr.msk.f32.vlgmr.msra.gmra.mrb[16].mxu0 %vm2650_vm3, %v2621_v45  ;;  %v18341_v54 = vld [vmem:[%s18986_s18 + $0x21] sm:$0xff] }
 0x4d7   : > { %v20975_v24 = vpop.permute.xlu1 %8137  ;;  %16683 = vmatmul.mubr.msk.f32.gmra.mrb[4].mxu1 %vm2650_vm3, %v20496_v49  ;;  %16172 = vmatpush3.msra.mxu0 %v20735_v38  ;;  %v20993_v49 = vld [vmem:[#allocation2 + $0x39] sm:$0xff] }
 0x4d8   : > { %16685 = vmatprep.mubr.msk.f32.mxu1 %vm2650_vm3, %v22869_v50  ;;  %22870 = vst [vmem:[#allocation23_spill] sm:$0xff] %v20993_v49  ;;  %v22871_v38 = vld [vmem:[#allocation28_spill] sm:$0xff] }
 0x4d9   : > { %9220 = vrot.lane.b32.xlu1 %v20980_v44, %s18377_s17  ;;  %v2623_v35 = vpop.permute.xlu0 %2622  ;;  %v18342_v44 = vld [vmem:[%s18986_s18 + $0x31] sm:$0xff] }
 0x4da   : > { %3113 = vrot.lane.b32.xlu0 %v18341_v54, %s18376_s24  ;;  %16150 = vmatprep.mubr.msk.f32.mxu0 %vm2650_vm3, %v2623_v35  ;;  %v21008_v54 = vld [vmem:[#allocation2 + $0x41] sm:$0xff] }
 0x4db   : > { %v20989_v45 = vpop.permute.xlu1 %8141  ;;  %16686 = vmatmul.mubr.msk.f32.gmra.mrb[6].mxu1 %vm2650_vm3, %v20508_v25  ;;  %v22872_v25 = vld [vmem:[#allocation29_spill] sm:$0xff]  ;;  %22873 = vst [vmem:[#allocation25_spill] sm:$0xff] %v21008_v54 }
 0x4dc   : > { %16688 = vmatprep.mubr.msk.f32.mxu1 %vm2650_vm3, %v22871_v38 }
 0x4dd   : > { %9222 = vrot.lane.b32.xlu1 %v20993_v49, %s18377_s17  ;;  %v2625_v50 = vpop.permute.xlu0 %2624  ;;  %v18343_v49 = vld [vmem:[%s18986_s18 + $0x41] sm:$0xff] }
 0x4de   : > { %3117 = vrot.lane.b32.xlu0 %v18342_v44, %s18376_s24  ;;  %16151 = vmatmul.mubr.msk.f32.gmra.mrb[18].mxu0 %vm2650_vm3, %v2625_v50  ;;  %v21018_v44 = vld [vmem:[%s22748_s4 + $0x58] sm:$0xff]  ;;  %v22874_v50 = vld [vmem:[#allocation30_spill] sm:$0xff] }
 0x4df   : > { %v21002_v35 = vpop.permute.xlu1 %8145  ;;  %16689 = vmatmul.mubr.msk.f32.gmra.mrb[8].mxu1 %vm2650_vm3, %v20523_v36 }
 0x4e0   : > { %16693 = vmatprep.mubr.msk.f32.mxu1 %vm2650_vm3, %v22872_v25  ;;  %v21027_v25 = vld [vmem:[#allocation2 + $0x49] sm:$0xff] }
 0x4e1   : > { %9224 = vrot.lane.b32.xlu1 %v21008_v54, %s18377_s17  ;;  %v2627_v38 = vpop.permute.xlu0 %2626  ;;  %22875 = vst [vmem:[#allocation27_spill] sm:$0xff] %v21027_v25  ;;  %v18345_v54 = vld [vmem:[%s18986_s18 + $0x61] sm:$0xff] }
 0x4e2   : > { %3121 = vrot.lane.b32.xlu0 %v18343_v49, %s18376_s24  ;;  %16153 = vmatprep.mubr.msk.f32.mxu0 %vm2650_vm3, %v2627_v38  ;;  %v18344_v38 = vld [vmem:[%s18986_s18 + $0x51] sm:$0xff] }
 0x4e3   : > { %v21020_v36 = vpop.permute.xlu1 %8342  ;;  %16694 = vmatmul.mubr.msk.f32.vlgmr.msra.gmra.mrb[10].mxu1 %vm2650_vm3, %v20538_v4 }
 0x4e4   : > { %16718 = vmatpush3.msra.mxu1 %v20904_v23  ;;  %16696 = vmatprep.mubr.msk.f32.mxu1 %vm2650_vm3, %v22874_v50  ;;  %v22876_v23 = vld [vmem:[#allocation32_spill] sm:$0xff]  ;;  %v21041_v50 = vld [vmem:[#allocation2 + $0x51] sm:$0xff] }
 0x4e5   : > { %9226 = vrot.lane.b32.xlu1 %v21027_v25, %s18377_s17  ;;  %v2629_v49 = vpop.permute.xlu0 %2628  ;;  %16743 = vmatprep.subr.mxu1 %v21018_v44  ;;  %22877 = vst [vmem:[#allocation28_spill] sm:$0xff] %v21041_v50 }
 0x4e6   : > { %3125 = vrot.lane.b32.xlu0 %v18344_v38, %s18376_s24  ;;  %16154 = vmatmul.mubr.msk.f32.gmra.mrb[20].mxu0 %vm2650_vm3, %v2629_v49  ;;  %v21054_v38 = vld [vmem:[#allocation2 + $0x59] sm:$0xff] }
 0x4e7   : > { %v21035_v4 = vpop.permute.xlu1 %8346  ;;  %16697 = vmatmul.mubr.msk.f32.gmra.mrb[12].mxu1 %vm2650_vm3, %v20559_v37  ;;  %v22878_v37 = vld [vmem:[#allocation33_spill] sm:$0xff]  ;;  %22879 = vst [vmem:[#allocation29_spill] sm:$0xff] %v21054_v38 }
 0x4e8   : > { %16699 = vmatprep.mubr.msk.f32.mxu1 %vm2650_vm3, %v22876_v23 }
 0x4e9   : > { %9228 = vrot.lane.b32.xlu1 %v21041_v50, %s18377_s17  ;;  %v2631_v25 = vpop.permute.xlu0 %2630  ;;  %v18346_v50 = vld [vmem:[%s18986_s18 + $0x71] sm:$0xff] }
 0x4ea   : > { %3129 = vrot.lane.b32.xlu0 %v18345_v54, %s18376_s24  ;;  %16156 = vmatprep.mubr.msk.f32.mxu0 %vm2650_vm3, %v2631_v25  ;;  %v21067_v25 = vld [vmem:[#allocation2 + $0x61] sm:$0xff] }
 0x4eb   : > { %v21048_v49 = vpop.permute.xlu1 %8350  ;;  %16700 = vmatmul.mubr.msk.f32.gmra.mrb[14].mxu1 %vm2650_vm3, %v20571_v17  ;;  %v22880_v17 = vld [vmem:[#allocation35_spill] sm:$0xff] }
 0x4ec   : > { %16702 = vmatprep.mubr.msk.f32.mxu1 %vm2650_vm3, %v22878_v37 }
 0x4ed   : > { %9230 = vrot.lane.b32.xlu1 %v21054_v38, %s18377_s17  ;;  %v2633_v23 = vpop.permute.xlu0 %2632  ;;  %v18347_v38 = vld [vmem:[#allocation2 + $0x1] sm:$0xff] }
 0x4ee   : > { %3133 = vrot.lane.b32.xlu0 %v18346_v50, %s18376_s24  ;;  %16157 = vmatmul.mubr.msk.f32.gmra.mrb[22].mxu0 %vm2650_vm3, %v2633_v23 }
 0x4ef   : > { %v21061_v54 = vpop.permute.xlu1 %8354  ;;  %16703 = vmatmul.mubr.msk.f32.gmra.mrb[0].mxu1 %vm2650_vm3, %v20582_v59  ;;  %v21079_v59 = vld [vmem:[#allocation2 + $0x69] sm:$0xff] }
 0x4f0   : > { %16705 = vmatprep.mubr.msk.f32.mxu1 %vm2650_vm3, %v22880_v17  ;;  %v18348_v17 = vld [vmem:[#allocation2 + $0x11] sm:$0xff] }
 0x4f1   : > { %9232 = vrot.lane.b32.xlu1 %v21067_v25, %s18377_s17  ;;  %v2635_v37 = vpop.permute.xlu0 %2634 }
 0x4f2   : > { %3330 = vrot.lane.b32.xlu0 %v18347_v38, %s18376_s24  ;;  %16159 = vmatprep.mubr.msk.f32.mxu0 %vm2650_vm3, %v2635_v37  ;;  %v18349_v37 = vld [vmem:[#allocation2 + $0x21] sm:$0xff] }
 0x4f3   : > { %v21073_v50 = vpop.permute.xlu1 %8358  ;;  %16706 = vmatmul.mubr.msk.f32.gmra.mrb[2].mxu1 %vm2650_vm3, %v20596_v30 }
 0x4f4   : > { %16708 = vmatprep.mubr.msk.f32.mxu1 %vm2650_vm3, %v20445_v57  ;;  %v21091_v57 = vld [vmem:[#allocation2 + $0x71] sm:$0xff] }
 0x4f5   : > { %9234 = vrot.lane.b32.xlu1 %v21079_v59, %s18377_s17  ;;  %v2637_v23 = vpop.permute.xlu0 %2636  ;;  %22881 = vst [vmem:[#allocation30_spill] sm:$0xff] %v21091_v57 }
 0x4f6   : > { %3334 = vrot.lane.b32.xlu0 %v18348_v17, %s18376_s24  ;;  %16160 = vmatmul.mubr.msk.f32.gmra.mrb[24].mxu0 %vm2650_vm3, %v2637_v23  ;;  %v21106_v17 = vld [vmem:[#allocation2 + $0x79] sm:$0xff] }
 0x4f7   : > { %v21085_v38 = vpop.permute.xlu1 %8362  ;;  %16709 = vmatmul.mubr.msk.f32.gmra.mrb[4].mxu1 %vm2650_vm3, %v20609_v18  ;;  %v22882_v18 = vld [vmem:[#allocation36_spill] sm:$0xff]  ;;  %22883 = vst [vmem:[#allocation32_spill] sm:$0xff] %v21106_v17 }
 0x4f8   : > { %16711 = vmatprep.mubr.msk.f32.mxu1 %vm2650_vm3, %v20459_v15  ;;  %v9918_v15 = vld [vmem:[%s22746_s2] sm:$0xff] }
 0x4f9   : > { %9236 = vrot.lane.b32.xlu1 %v21091_v57, %s18377_s17  ;;  %v2639_v30 = vpop.permute.xlu0 %2638  ;;  %v21121_v57 = vld [vmem:[#allocation2 + $0x81] sm:$0xff] }
 0x4fa   : > { %3338 = vrot.lane.b32.xlu0 %v18349_v37, %s18376_s24  ;;  %16162 = vmatprep.mubr.msk.f32.mxu0 %vm2650_vm3, %v2639_v30  ;;  %22884 = vst [vmem:[#allocation33_spill] sm:$0xff] %v21121_v57 }
 0x4fb   : > { %v21097_v23 = vpop.permute.xlu1 %8366  ;;  %16712 = vmatmul.mubr.msk.f32.gmra.mrb[6].mxu1 %vm2650_vm3, %v20626_v10  ;;  %v9920_v10 = vld [vmem:[%s22746_s2 + $0x10] sm:$0xff] }
 0x4fc   : > { %16714 = vmatprep.mubr.msk.f32.mxu1 %vm2650_vm3, %v22882_v18  ;;  %v14130_v18 = vld [vmem:[%s22749_s5 + $0x8] sm:$0xff] }
 0x4fd   : > { %9238 = vrot.lane.b32.xlu1 %v21106_v17, %s18377_s17  ;;  %v2641_v37 = vpop.permute.xlu0 %2640  ;;  %v22885_v17 = vld [vmem:[#allocation37_spill] sm:$0xff]  ;;  %16197 = vmatprep.subr.mxu0 %v14130_v18 }
 0x4fe   : > { %9936 = vperm.xlu0 %18309, %v9918_v15   ;;  %16163 = vmatmul.mubr.msk.f32.gmra.mrb[26].mxu0 %vm2650_vm3, %v2641_v37 }
 0x4ff   : > { %v21111_v30 = vpop.permute.xlu1 %8370  ;;  %16715 = vmatmul.mubr.msk.f32.gmra.mrb[8].mxu1 %vm2650_vm3, %v20640_v55  ;;  %v21131_v55 = vld [vmem:[%s22749_s5 + $0x60] sm:$0xff] }
 0x500   : > { %16719 = vmatprep.mubr.msk.f32.mxu1 %vm2650_vm3, %v22885_v17  ;;  %v9922_v17 = vld [vmem:[%s22746_s2 + $0x20] sm:$0xff] }
 0x501   : > { %9240 = vrot.lane.b32.xlu1 %v21121_v57, %s18377_s17  ;;  %v2643_v15 = vpop.permute.xlu0 %2642  ;;  %v21141_v57 = vld [vmem:[#allocation2 + $0x89] sm:$0xff] }
 0x502   : > { %9946 = vperm.xlu0 %18309, %v9920_v10   ;;  %16165 = vmatprep.mubr.msk.f32.mxu0 %vm2650_vm3, %v2643_v15  ;;  %22887 = vst [vmem:[#allocation36_spill] sm:$0xff] %v21141_v57  ;;  %v22888_v10 = vld [vmem:[#allocation38_spill] sm:$0xff] }
 0x503   : > { %v21133_v37 = vpop.permute.xlu1 %9007  ;;  %16720 = vmatmul.mubr.msk.f32.vlgmr.msra.gmra.mrb[10].mxu1 %vm2650_vm3, %v20654_v1 }
 0x504   : > { %22886 = vst [vmem:[#allocation35_spill] sm:$0xff] %v21133_v37  ;;  %16744 = vmatpush3.msra.mxu1 %v21018_v44  ;;  %16722 = vmatprep.mubr.msk.f32.mxu1 %vm2650_vm3, %v22888_v10  ;;  %v21148_v37 = vld [vmem:[#allocation2 + $0x91] sm:$0xff] }
 0x505   : > { %9242 = vrot.lane.b32.xlu1 %v21141_v57, %s18377_s17  ;;  %v2645_v15 = vpop.permute.xlu0 %2644  ;;  %16769 = vmatprep.subr.mxu1 %v21131_v55  ;;  %v9924_v44 = vld [vmem:[%s22746_s2 + $0x30] sm:$0xff]  ;;  %v22890_v10 = vld [vmem:[#allocation39_spill] sm:$0xff] }
 0x506   : > { %9956 = vperm.xlu0 %18309, %v9922_v17   ;;  %16166 = vmatmul.mubr.msk.f32.gmra.mrb[28].mxu0 %vm2650_vm3, %v2645_v15  ;;  %v21162_v57 = vld [vmem:[#allocation2 + $0x99] sm:$0xff] }
 0x507   : > { %v21151_v1 = vpop.permute.xlu1 %9009  ;;  %16723 = vmatmul.mubr.msk.f32.gmra.mrb[12].mxu1 %vm2650_vm3, %v20675_v22  ;;  %v9926_v22 = vld [vmem:[%s22746_s2 + $0x40] sm:$0xff] }
 0x508   : > { %22889 = vst [vmem:[#allocation37_spill] sm:$0xff] %v21151_v1  ;;  %16725 = vmatprep.mubr.msk.f32.mxu1 %vm2650_vm3, %v22890_v10  ;;  %v22892_v10 = vld [vmem:[#allocation4_spill] sm:$0xff] }
 0x509   : > { %9244 = vrot.lane.b32.xlu1 %v21148_v37, %s18377_s17  ;;  %v2647_v17 = vpop.permute.xlu0 %2646 }
 0x50a   : > { %9966 = vperm.xlu0 %18309, %v9924_v44   ;;  %16168 = vmatprep.mubr.msk.f32.mxu0 %vm2650_vm3, %v2647_v17 }
 0x50b   : > { %v21165_v15 = vpop.permute.xlu1 %9011  ;;  %16726 = vmatmul.mubr.msk.f32.gmra.mrb[14].mxu1 %vm2650_vm3, %v20686_v42  ;;  %v9928_v42 = vld [vmem:[%s22746_s2 + $0x50] sm:$0xff] }
 0x50c   : > { %22891 = vst [vmem:[#allocation38_spill] sm:$0xff] %v21165_v15  ;;  %16728 = vmatprep.mubr.msk.f32.mxu1 %vm2650_vm3, %v22892_v10  ;;  %v22893_v15 = vld [vmem:[#allocation5_spill] sm:$0xff] }
 0x50d   : > { %9246 = vrot.lane.b32.xlu1 %v21162_v57, %s18377_s17  ;;  %v2649_v44 = vpop.permute.xlu0 %2648  ;;  %v18350_v10 = vld [vmem:[%s18986_s18 + $0x9] sm:$0xff] }
 0x50e   : > { %9976 = vperm.xlu0 %18309, %v9926_v22   ;;  %16169 = vmatmul.mubr.msk.f32.gmra.mrb[30].mxu0 %vm2650_vm3, %v2649_v44  ;;  %v22894_v44 = vld [vmem:[#allocation6_spill] sm:$0xff] }
 0x50f   : > { %v21177_v17 = vpop.permute.xlu1 %9013  ;;  %16729 = vmatmul.mubr.msk.f32.gmra.mrb[0].mxu1 %vm2650_vm3, %v20697_v9  ;;  %v9930_v9 = vld [vmem:[%s22746_s2 + $0x60] sm:$0xff] }
 0x510   : > { %16731 = vmatprep.mubr.msk.f32.mxu1 %vm2650_vm3, %v22893_v15  ;;  %v18351_v15 = vld [vmem:[%s18986_s18 + $0x19] sm:$0xff] }
 0x511   : > { %3107 = vrot.lane.b32.xlu1 %v18350_v10, %s18376_s24  ;;  %v2845_v1 = vpop.permute.xlu0 %2844 }
 0x512   : > { %9986 = vperm.xlu0 %18309, %v9928_v42   ;;  %16173 = vmatprep.mubr.msk.f32.mxu0 %vm2650_vm3, %v2845_v1  ;;  %v18353_v42 = vld [vmem:[%s18986_s18 + $0x29] sm:$0xff] }
 0x513   : > { %v21189_v22 = vpop.permute.xlu1 %9015  ;;  %16732 = vmatmul.mubr.msk.f32.gmra.mrb[2].mxu1 %vm2650_vm3, %v20711_v61  ;;  %v21210_v61 = vld [vmem:[%s22748_s4 + $0x8] sm:$0xff] }
 0x514   : > { %16734 = vmatprep.mubr.msk.f32.mxu1 %vm2650_vm3, %v22894_v44 }
 0x515   : > { %3111 = vrot.lane.b32.xlu1 %v18351_v15, %s18376_s24  ;;  %v2847_v10 = vpop.permute.xlu0 %2846  ;;  %v18355_v15 = vld [vmem:[%s18986_s18 + $0x49] sm:$0xff] }
 0x516   : > { %9996 = vperm.xlu0 %18309, %v9930_v9   ;;  %16174 = vmatmul.mubr.msk.f32.vlgmr.msra.gmra.mrb[16].mxu0 %vm2650_vm3, %v2847_v10 }
 0x517   : > { %v21201_v1 = vpop.permute.xlu1 %9017  ;;  %16735 = vmatmul.mubr.msk.f32.gmra.mrb[4].mxu1 %vm2650_vm3, %v20728_v63  ;;  %16198 = vmatpush3.msra.mxu0 %v14130_v18 }
 0x518   : > { %16737 = vmatprep.mubr.msk.f32.mxu1 %vm2650_vm3, %v20567_v47  ;;  %16223 = vmatprep.subr.mxu0 %v21210_v61  ;;  %v18354_v47 = vld [vmem:[%s18986_s18 + $0x39] sm:$0xff] }
 0x519   : > { %3115 = vrot.lane.b32.xlu1 %v18353_v42, %s18376_s24  ;;  %v2849_v9 = vpop.permute.xlu0 %2848 }
 0x51a   : > { %16176 = vmatprep.mubr.msk.f32.mxu0 %vm2650_vm3, %v2849_v9  ;;  %v18358_v9 = vld [vmem:[%s18986_s18 + $0x79] sm:$0xff] }
 0x51b   : > { %v21216_v44 = vpop.permute.xlu1 %9019  ;;  %16738 = vmatmul.mubr.msk.f32.gmra.mrb[6].mxu1 %vm2650_vm3, %v20748_v29  ;;  %v21237_v29 = vld [vmem:[%s22748_s4 + $0x60] sm:$0xff] }
 0x51c   : > { %16740 = vmatprep.mubr.msk.f32.mxu1 %vm2650_vm3, %v20579_v2 }
 0x51d   : > { %3119 = vrot.lane.b32.xlu1 %v18354_v47, %s18376_s24  ;;  %v2851_v63 = vpop.permute.xlu0 %2850  ;;  %v18359_v47 = vld [vmem:[#allocation2 + $0x9] sm:$0xff] }
 0x51e   : > { %16177 = vmatmul.mubr.msk.f32.gmra.mrb[18].mxu0 %vm2650_vm3, %v2851_v63  ;;  %v18360_v63 = vld [vmem:[#allocation2 + $0x19] sm:$0xff] }
 0x51f   : > { %v21225_v18 = vpop.permute.xlu1 %9021  ;;  %16741 = vmatmul.mubr.msk.f32.gmra.mrb[8].mxu1 %vm2650_vm3, %v20762_v6 }
 0x520   : > { %16745 = vmatprep.mubr.msk.f32.mxu1 %vm2650_vm3, %v20592_v20  ;;  %v18356_v20 = vld [vmem:[%s18986_s18 + $0x59] sm:$0xff] }
 0x521   : > { %3123 = vrot.lane.b32.xlu1 %v18355_v15, %s18376_s24  ;;  %v2853_v2 = vpop.permute.xlu0 %2852  ;;  %v18361_v15 = vld [vmem:[#allocation2 + $0x29] sm:$0xff] }
 0x522   : > { %16179 = vmatprep.mubr.msk.f32.mxu0 %vm2650_vm3, %v2853_v2 }
 0x523   : > { %v21239_v10 = vpop.permute.xlu1 %9023  ;;  %16746 = vmatmul.mubr.msk.f32.vlgmr.msra.gmra.mrb[10].mxu1 %vm2650_vm3, %v20780_v13  ;;  %v18357_v13 = vld [vmem:[%s18986_s18 + $0x69] sm:$0xff] }
 0x524   : > { %16770 = vmatpush3.msra.mxu1 %v21131_v55  ;;  %16748 = vmatprep.mubr.msk.f32.mxu1 %vm2650_vm3, %v20606_v8 }
 0x525   : > { %3127 = vrot.lane.b32.xlu1 %v18356_v20, %s18376_s24  ;;  %v2855_v6 = vpop.permute.xlu0 %2854  ;;  %16795 = vmatprep.subr.mxu1 %v21237_v29 }
 0x526   : > { %16180 = vmatmul.mubr.msk.f32.gmra.mrb[20].mxu0 %vm2650_vm3, %v2855_v6  ;;  %v14538_v6 = vld [vmem:[%s22749_s5 + $0x68] sm:$0xff] }
 0x527   : > { %v21250_v42 = vpop.permute.xlu1 %9025  ;;  %16749 = vmatmul.mubr.msk.f32.gmra.mrb[12].mxu1 %vm2650_vm3, %v20796_v48 }
 0x528   : > { %16751 = vmatprep.mubr.msk.f32.mxu1 %vm2650_vm3, %v20622_v39 }
 0x529   : > { %3131 = vrot.lane.b32.xlu1 %v18357_v13, %s18376_s24  ;;  %v2857_v8 = vpop.permute.xlu0 %2856 }
 0x52a   : > { %16182 = vmatprep.mubr.msk.f32.mxu0 %vm2650_vm3, %v2857_v8 }
 0x52b   : > { %v21259_v55 = vpop.permute.xlu1 %9027  ;;  %16752 = vmatmul.mubr.msk.f32.gmra.mrb[14].mxu1 %vm2650_vm3, %v20811_v3 }
 0x52c   : > { %16754 = vmatprep.mubr.msk.f32.mxu1 %vm2650_vm3, %v20636_v21 }
 0x52d   : > { %3135 = vrot.lane.b32.xlu1 %v18358_v9, %s18376_s24  ;;  %v2859_v48 = vpop.permute.xlu0 %2858  ;;  %v22895_v9 = vld [vmem:[#allocation9_spill] sm:$0xff] }
 0x52e   : > { %16183 = vmatmul.mubr.msk.f32.gmra.mrb[22].mxu0 %vm2650_vm3, %v2859_v48 }
 0x52f   : > { %v21268_v39 = vpop.permute.xlu1 %9029  ;;  %16755 = vmatmul.mubr.msk.f32.gmra.mrb[0].mxu1 %vm2650_vm3, %v20826_v28 }
 0x530   : > { %16757 = vmatprep.mubr.msk.f32.mxu1 %vm2650_vm3, %v20650_v31 }
 0x531   : > { %3332 = vrot.lane.b32.xlu1 %v18359_v47, %s18376_s24  ;;  %v2861_v3 = vpop.permute.xlu0 %2860  ;;  %v22896_v47 = vld [vmem:[#allocation22_spill] sm:$0xff] }
 0x532   : > { %16185 = vmatprep.mubr.msk.f32.mxu0 %vm2650_vm3, %v2861_v3  ;;  %v9931_v3 = vld [vmem:[%s22746_s2 + $0x68] sm:$0xff] }
 0x533   : > { %v21276_v21 = vpop.permute.xlu1 %9031  ;;  %16758 = vmatmul.mubr.msk.f32.gmra.mrb[2].mxu1 %vm2650_vm3, %v20841_v27 }
 0x534   : > { %16760 = vmatprep.mubr.msk.f32.mxu1 %vm2650_vm3, %v20670_v0  ;;  %v9919_v0 = vld [vmem:[%s22746_s2 + $0x8] sm:$0xff] }
 0x535   : > { %3336 = vrot.lane.b32.xlu1 %v18360_v63, %s18376_s24  ;;  %v2863_v28 = vpop.permute.xlu0 %2862 }
 0x536   : > { %16186 = vmatmul.mubr.msk.f32.gmra.mrb[24].mxu0 %vm2650_vm3, %v2863_v28 }
 0x537   : > { %v21284_v31 = vpop.permute.xlu1 %9033  ;;  %16761 = vmatmul.mubr.msk.f32.gmra.mrb[4].mxu1 %vm2650_vm3, %v20856_v34  ;;  %v9921_v34 = vld [vmem:[%s22746_s2 + $0x18] sm:$0xff] }
 0x538   : > { %16763 = vmatprep.mubr.msk.f32.mxu1 %vm2650_vm3, %v20682_v43 }
 0x539   : > { %3340 = vrot.lane.b32.xlu1 %v18361_v15, %s18376_s24  ;;  %v2865_v27 = vpop.permute.xlu0 %2864 }
 0x53a   : > { %16188 = vmatprep.mubr.msk.f32.mxu0 %vm2650_vm3, %v2865_v27 }
 0x53b   : > { %v21295_v2 = vpop.permute.xlu1 %9035  ;;  %16764 = vmatmul.mubr.msk.f32.gmra.mrb[6].mxu1 %vm2650_vm3, %v20871_v62 }
 0x53c   : > { %16766 = vmatprep.mubr.msk.f32.mxu1 %vm2650_vm3, %v20693_v52  ;;  %v9923_v52 = vld [vmem:[%s22746_s2 + $0x28] sm:$0xff] }
 0x53d   : > { %9941 = vperm.xlu1 %18310, %v9919_v0   ;;  %v2867_v43 = vpop.permute.xlu0 %2866  ;;  %v22901_v0 = vld [vmem:[#allocation8_spill] sm:$0xff] }
 0x53e   : > { %16189 = vmatmul.mubr.msk.f32.gmra.mrb[26].mxu0 %vm2650_vm3, %v2867_v43  ;;  %v22903_v43 = vld [vmem:[#allocation41_spill] sm:$0xff] }
 0x53f   : > { %v21305_v20 = vpop.permute.xlu1 %9037  ;;  %16767 = vmatmul.mubr.msk.f32.gmra.mrb[8].mxu1 %vm2650_vm3, %v20886_v53  ;;  %v9925_v53 = vld [vmem:[%s22746_s2 + $0x38] sm:$0xff] }
 0x540   : > { %16771 = vmatprep.mubr.msk.f32.mxu1 %vm2650_vm3, %v20708_v12 }
 0x541   : > { %9951 = vperm.xlu1 %18310, %v9921_v34   ;;  %v2869_v62 = vpop.permute.xlu0 %2868  ;;  %v22904_v34 = vld [vmem:[#allocation42_spill] sm:$0xff] }
 0x542   : > { %16191 = vmatprep.mubr.msk.f32.mxu0 %vm2650_vm3, %v2869_v62 }
 0x543   : > { %v21318_v13 = vpop.permute.xlu1 %9216  ;;  %16772 = vmatmul.mubr.msk.f32.vlgmr.msra.gmra.mrb[10].mxu1 %vm2650_vm3, %v20906_v46 }
 0x544   : > { %16796 = vmatpush3.msra.mxu1 %v21237_v29  ;;  %16774 = vmatprep.mubr.msk.f32.mxu1 %vm2650_vm3, %v20722_v56  ;;  %v9927_v56 = vld [vmem:[%s22746_s2 + $0x48] sm:$0xff] }
 0x545   : > { %9961 = vperm.xlu1 %18310, %v9923_v52   ;;  %v2871_v12 = vpop.permute.xlu0 %2870  ;;  %16821 = vmatprep.subr.mxu1 %v14538_v6 }
 0x546   : > { %16192 = vmatmul.mubr.msk.f32.gmra.mrb[28].mxu0 %vm2650_vm3, %v2871_v12 }
 0x547   : > { %v21329_v8 = vpop.permute.xlu1 %9218  ;;  %16775 = vmatmul.mubr.msk.f32.gmra.mrb[12].mxu1 %vm2650_vm3, %v20922_v11 }
 0x548   : > { %16777 = vmatprep.mubr.msk.f32.mxu1 %vm2650_vm3, %v20742_v58  ;;  %v9929_v58 = vld [vmem:[%s22746_s2 + $0x58] sm:$0xff] }
 0x549   : > { %9971 = vperm.xlu1 %18310, %v9925_v53   ;;  %v2873_v46 = vpop.permute.xlu0 %2872  ;;  %v22907_v53 = vld [vmem:[#allocation11_spill] sm:$0xff] }
 0x54a   : > { %16194 = vmatprep.mubr.msk.f32.mxu0 %vm2650_vm3, %v2873_v46 }
 0x54b   : > { %v21339_v29 = vpop.permute.xlu1 %9220  ;;  %16778 = vmatmul.mubr.msk.f32.gmra.mrb[14].mxu1 %vm2650_vm3, %v20937_v33 }
 0x54c   : > { %16780 = vmatprep.mubr.msk.f32.mxu1 %vm2650_vm3, %v22895_v9 }
 0x54d   : > { %9981 = vperm.xlu1 %18310, %v9927_v56   ;;  %v2875_v11 = vpop.permute.xlu0 %2874  ;;  %v22908_v56 = vld [vmem:[#allocation26_spill] sm:$0xff] }
 0x54e   : > { %16195 = vmatmul.mubr.msk.f32.gmra.mrb[30].mxu0 %vm2650_vm3, %v2875_v11  ;;  %v22909_v11 = vld [vmem:[#allocation13_spill] sm:$0xff] }
 0x54f   : > { %v21349_v48 = vpop.permute.xlu1 %9222  ;;  %16781 = vmatmul.mubr.msk.f32.gmra.mrb[0].mxu1 %vm2650_vm3, %v20949_v19 }
 0x550   : > { %16783 = vmatprep.mubr.msk.f32.mxu1 %vm2650_vm3, %v22896_v47 }
 0x551   : > { %9991 = vperm.xlu1 %18310, %v9929_v58   ;;  %v3106_v33 = vpop.permute.xlu0 %3105  ;;  %v22910_v58 = vld [vmem:[#allocation14_spill] sm:$0xff] }
 0x552   : > { %16199 = vmatprep.mubr.msk.f32.mxu0 %vm2650_vm3, %v3106_v33 }
 0x553   : > { %v21359_v63 = vpop.permute.xlu1 %9224  ;;  %16784 = vmatmul.mubr.msk.f32.gmra.mrb[2].mxu1 %vm2650_vm3, %v20962_v41 }
 0x554   : > { %16786 = vmatprep.mubr.msk.f32.mxu1 %vm2650_vm3, %v20789_v60  ;;  %v22897_v60 = vld [vmem:[#allocation12_spill] sm:$0xff] }
 0x555   : > { %10001 = vperm.xlu1 %18310, %v9931_v3   ;;  %v22911_v3 = vld [vmem:[#allocation31_spill] sm:$0xff] }
 0x557   : > { %v21365_v19 = vpop.permute.xlu1 %9226  ;;  %16787 = vmatmul.mubr.msk.f32.gmra.mrb[4].mxu1 %vm2650_vm3, %v20975_v24 }
 0x558   : > { %16789 = vmatprep.mubr.msk.f32.mxu1 %vm2650_vm3, %v20804_v51  ;;  %v14537_v51 = vld [vmem:[%s22748_s4 + $0x68] sm:$0xff] }
 0x55b   : > { %v21371_v28 = vpop.permute.xlu1 %9228  ;;  %16790 = vmatmul.mubr.msk.f32.gmra.mrb[6].mxu1 %vm2650_vm3, %v20989_v45  ;;  %v22898_v45 = vld [vmem:[#allocation15_spill] sm:$0xff] }
 0x55c   : > { %16792 = vmatprep.mubr.msk.f32.mxu1 %vm2650_vm3, %v20819_v26 }
 0x55f   : > { %v21377_v41 = vpop.permute.xlu1 %9230  ;;  %16793 = vmatmul.mubr.msk.f32.gmra.mrb[8].mxu1 %vm2650_vm3, %v21002_v35 }
 0x560   : > { %16797 = vmatprep.mubr.msk.f32.mxu1 %vm2650_vm3, %v22897_v60  ;;  %v22912_v60 = vld [vmem:[#allocation16_spill] sm:$0xff] }
 0x563   : > { %v21386_v24 = vpop.permute.xlu1 %9232  ;;  %16798 = vmatmul.mubr.msk.f32.vlgmr.msra.gmra.mrb[10].mxu1 %vm2650_vm3, %v21020_v36 }
 0x564   : > { %16822 = vmatpush3.msra.mxu1 %v14538_v6  ;;  %16800 = vmatprep.mubr.msk.f32.mxu1 %vm2650_vm3, %v20849_v5  ;;  %v22899_v5 = vld [vmem:[#allocation17_spill] sm:$0xff]  ;;  %v22905_v6 = vld [vmem:[#allocation10_spill] sm:$0xff] }
 0x565   : > { %16847 = vmatprep.subr.mxu1 %v14537_v51 }
 0x567   : > { %v21392_v26 = vpop.permute.xlu1 %9234  ;;  %16801 = vmatmul.mubr.msk.f32.gmra.mrb[12].mxu1 %vm2650_vm3, %v21035_v4  ;;  %v3110_v4 = vpop.permute.xlu0 %3109 }
 0x568   : > { %16803 = vmatprep.mubr.msk.f32.mxu1 %vm2650_vm3, %v22898_v45  ;;  %v22913_v45 = vld [vmem:[#allocation34_spill] sm:$0xff] }
 0x56b   : > { %v21398_v35 = vpop.permute.xlu1 %9236  ;;  %16804 = vmatmul.mubr.msk.f32.gmra.mrb[14].mxu1 %vm2650_vm3, %v21048_v49 }
 0x56c   : > { %16806 = vmatprep.mubr.msk.f32.mxu1 %vm2650_vm3, %v20879_v16  ;;  %v3114_v16 = vpop.permute.xlu0 %3113 }
 0x56f   : > { %v21404_v36 = vpop.permute.xlu1 %9238  ;;  %16807 = vmatmul.mubr.msk.f32.gmra.mrb[0].mxu1 %vm2650_vm3, %v21061_v54 }
 0x570   : > { %16809 = vmatprep.mubr.msk.f32.mxu1 %vm2650_vm3, %v22899_v5 }
 0x573   : > { %v21410_v15 = vpop.permute.xlu1 %9240  ;;  %16810 = vmatmul.mubr.msk.f32.gmra.mrb[2].mxu1 %vm2650_vm3, %v21073_v50  ;;  %v3118_v50 = vpop.permute.xlu0 %3117 }
 0x574   : > { %16812 = vmatprep.mubr.msk.f32.mxu1 %vm2650_vm3, %v20914_v32  ;;  %v22900_v32 = vld [vmem:[#allocation7_spill] sm:$0xff] }
 0x577   : > { %v21416_v49 = vpop.permute.xlu1 %9242  ;;  %16813 = vmatmul.mubr.msk.f32.gmra.mrb[4].mxu1 %vm2650_vm3, %v21085_v38 }
 0x578   : > { %16815 = vmatprep.mubr.msk.f32.mxu1 %vm2650_vm3, %v20930_v40  ;;  %v14572_v40 = vld [vmem:[%s22749_s5 + $0x70] sm:$0xff] }
 0x57b   : > { %v21422_v54 = vpop.permute.xlu1 %9244  ;;  %16816 = vmatmul.mubr.msk.f32.gmra.mrb[6].mxu1 %vm2650_vm3, %v21097_v23  ;;  %v3122_v23 = vpop.permute.xlu0 %3121 }
 0x57c   : > { %16818 = vmatprep.mubr.msk.f32.mxu1 %vm2650_vm3, %v20945_v14  ;;  %v22902_v14 = vld [vmem:[#allocation40_spill] sm:$0xff] }
 0x57f   : > { %v21428_v27 = vpop.permute.xlu1 %9246  ;;  %16819 = vmatmul.mubr.msk.f32.gmra.mrb[8].mxu1 %vm2650_vm3, %v21111_v30  ;;  %v3126_v62 = vpop.permute.xlu0 %3125 }
 0x580   : > { %16823 = vmatprep.mubr.msk.f32.mxu1 %vm2650_vm3, %v22900_v32  ;;  %v22916_v32 = vld [vmem:[#allocation20_spill] sm:$0xff] }
 0x583   : > { %v3108_v38 = vpop.permute.xlu1 %3107  ;;  %16824 = vmatmul.mubr.msk.f32.vlgmr.msra.gmra.mrb[10].mxu1 %vm2650_vm3, %v22901_v0  ;;  %v3130_v46 = vpop.permute.xlu0 %3129 }
 0x584   : > { %16200 = vmatmul.mubr.msk.f32.vlgmr.msra.gmra.mrb[16].mxu0 %vm2650_vm3, %v3108_v38  ;;  %16848 = vmatpush3.msra.mxu1 %v14537_v51 }
 0x585   : > { %16202 = vmatprep.mubr.msk.f32.mxu0 %vm2650_vm3, %v3110_v4  ;;  %16826 = vmatprep.mubr.msk.f32.mxu1 %vm2650_vm3, %v22902_v14  ;;  %v22914_v4 = vld [vmem:[#allocation18_spill] sm:$0xff]  ;;  %v22917_v14 = vld [vmem:[#allocation21_spill] sm:$0xff] }
 0x586   : > { %16224 = vmatpush3.msra.mxu0 %v21210_v61  ;;  %16873 = vmatprep.subr.mxu1 %v14572_v40  ;;  %v22906_v61 = vld [vmem:[#allocation24_spill] sm:$0xff] }
 0x587   : > { %v3112_v30 = vpop.permute.xlu1 %3111  ;;  %16827 = vmatmul.mubr.msk.f32.gmra.mrb[12].mxu1 %vm2650_vm3, %v22903_v43  ;;  %v3134_v47 = vpop.permute.xlu0 %3133  ;;  %v22918_v43 = vld [vmem:[#allocation23_spill] sm:$0xff] }
 0x588   : > { %16203 = vmatmul.mubr.msk.f32.gmra.mrb[18].mxu0 %vm2650_vm3, %v3112_v30  ;;  %16829 = vmatprep.mubr.msk.f32.mxu1 %vm2650_vm3, %v22904_v34 }
 0x589   : > { %16205 = vmatprep.mubr.msk.f32.mxu0 %vm2650_vm3, %v3114_v16 }
 0x58b   : > { %v3116_v52 = vpop.permute.xlu1 %3115  ;;  %16830 = vmatmul.mubr.msk.f32.gmra.mrb[14].mxu1 %vm2650_vm3, %v22905_v6  ;;  %v3331_v5 = vpop.permute.xlu0 %3330  ;;  %v22922_v6 = vld [vmem:[#allocation29_spill] sm:$0xff] }
 0x58c   : > { %16206 = vmatmul.mubr.msk.f32.gmra.mrb[20].mxu0 %vm2650_vm3, %v3116_v52  ;;  %16832 = vmatprep.mubr.msk.f32.mxu1 %vm2650_vm3, %v22906_v61  ;;  %v22921_v52 = vld [vmem:[#allocation28_spill] sm:$0xff]  ;;  %v22923_v61 = vld [vmem:[#allocation30_spill] sm:$0xff] }
 0x58d   : > { %16208 = vmatprep.mubr.msk.f32.mxu0 %vm2650_vm3, %v3118_v50  ;;  %v22915_v50 = vld [vmem:[#allocation19_spill] sm:$0xff] }
 0x58f   : > { %v3120_v12 = vpop.permute.xlu1 %3119  ;;  %16833 = vmatmul.mubr.msk.f32.gmra.mrb[0].mxu1 %vm2650_vm3, %v22907_v53  ;;  %v3335_v38 = vpop.permute.xlu0 %3334  ;;  %v22925_v53 = vld [vmem:[#allocation33_spill] sm:$0xff] }
 0x590   : > { %16209 = vmatmul.mubr.msk.f32.gmra.mrb[22].mxu0 %vm2650_vm3, %v3120_v12  ;;  %16835 = vmatprep.mubr.msk.f32.mxu1 %vm2650_vm3, %v22908_v56  ;;  %v22924_v12 = vld [vmem:[#allocation32_spill] sm:$0xff]  ;;  %v22928_v56 = vld [vmem:[#allocation37_spill] sm:$0xff] }
 0x591   : > { %16211 = vmatprep.mubr.msk.f32.mxu0 %vm2650_vm3, %v3122_v23  ;;  %v14571_v23 = vld [vmem:[%s22748_s4 + $0x70] sm:$0xff] }
 0x593   : > { %v3124_v9 = vpop.permute.xlu1 %3123  ;;  %16836 = vmatmul.mubr.msk.f32.gmra.mrb[2].mxu1 %vm2650_vm3, %v22909_v11  ;;  %v3339_v34 = vpop.permute.xlu0 %3338  ;;  %v9454_v11 = vld [vmem:[#allocation2 + $0x8a] sm:$0xff] }
 0x594   : > { %16212 = vmatmul.mubr.msk.f32.gmra.mrb[24].mxu0 %vm2650_vm3, %v3124_v9  ;;  %16838 = vmatprep.mubr.msk.f32.mxu1 %vm2650_vm3, %v22910_v58  ;;  %v22929_v9 = vld [vmem:[#allocation38_spill] sm:$0xff]  ;;  %v9456_v58 = vld [vmem:[#allocation2 + $0x9a] sm:$0xff] }
 0x595   : > { %16214 = vmatprep.mubr.msk.f32.mxu0 %vm2650_vm3, %v3126_v62 }
 0x597   : > { %v3128_v33 = vpop.permute.xlu1 %3127  ;;  %16839 = vmatmul.mubr.msk.f32.gmra.mrb[4].mxu1 %vm2650_vm3, %v22911_v3 }
 0x598   : > { %16215 = vmatmul.mubr.msk.f32.gmra.mrb[26].mxu0 %vm2650_vm3, %v3128_v33  ;;  %16841 = vmatprep.mubr.msk.f32.mxu1 %vm2650_vm3, %v22912_v60 }
 0x599   : > { %16217 = vmatprep.mubr.msk.f32.mxu0 %vm2650_vm3, %v3130_v46  ;;  %v22926_v46 = vld [vmem:[#allocation36_spill] sm:$0xff] }
 0x59b   : > { %v3132_v51 = vpop.permute.xlu1 %3131  ;;  %16842 = vmatmul.mubr.msk.f32.gmra.mrb[6].mxu1 %vm2650_vm3, %v22913_v45 }
 0x59c   : > { %16218 = vmatmul.mubr.msk.f32.gmra.mrb[28].mxu0 %vm2650_vm3, %v3132_v51  ;;  %16844 = vmatprep.mubr.msk.f32.mxu1 %vm2650_vm3, %v22914_v4 }
 0x59d   : > { %16220 = vmatprep.mubr.msk.f32.mxu0 %vm2650_vm3, %v3134_v47 }
 0x59f   : > { %v3136_v16 = vpop.permute.xlu1 %3135  ;;  %16845 = vmatmul.mubr.msk.f32.gmra.mrb[8].mxu1 %vm2650_vm3, %v22915_v50 }
 0x5a0   : > { %16221 = vmatmul.mubr.msk.f32.gmra.mrb[30].mxu0 %vm2650_vm3, %v3136_v16  ;;  %16849 = vmatprep.mubr.msk.f32.mxu1 %vm2650_vm3, %v22916_v32 }
 0x5a1   : > { %16225 = vmatprep.mubr.msk.f32.mxu0 %vm2650_vm3, %v3331_v5 }
 0x5a3   : > { %v3333_v0 = vpop.permute.xlu1 %3332  ;;  %16850 = vmatmul.mubr.msk.f32.vlgmr.msra.gmra.mrb[10].mxu1 %vm2650_vm3, %v20966_v7  ;;  %v22919_v7 = vld [vmem:[#allocation25_spill] sm:$0xff] }
 0x5a4   : > { %16226 = vmatmul.mubr.msk.f32.vlgmr.msra.gmra.mrb[16].mxu0 %vm2650_vm3, %v3333_v0  ;;  %16874 = vmatpush3.msra.mxu1 %v14572_v40  ;;  %v22920_v40 = vld [vmem:[#allocation27_spill] sm:$0xff] }
 0x5a5   : > { %16228 = vmatprep.mubr.msk.f32.mxu0 %vm2650_vm3, %v3335_v38  ;;  %16852 = vmatprep.mubr.msk.f32.mxu1 %vm2650_vm3, %v22917_v14 }
 0x5a6   : > { %16899 = vmatprep.subr.mxu1 %v14571_v23 }
 0x5a7   : > { %v3337_v30 = vpop.permute.xlu1 %3336  ;;  %16853 = vmatmul.mubr.msk.f32.gmra.mrb[12].mxu1 %vm2650_vm3, %v22918_v43  ;;  %v21662_v43 = vld [vmem:[#allocation3 + $0x1] sm:$0xff] }
 0x5a8   : > { %16229 = vmatmul.mubr.msk.f32.gmra.mrb[18].mxu0 %vm2650_vm3, %v3337_v30  ;;  %16855 = vmatprep.mubr.msk.f32.mxu1 %vm2650_vm3, %v22919_v7  ;;  %v10047_v7 = vld [vmem:[#allocation3 + $0x8] sm:$0xff] }
 0x5a9   : > { %16231 = vmatprep.mubr.msk.f32.mxu0 %vm2650_vm3, %v3339_v34  ;;  %v21664_v34 = vld [vmem:[#allocation3 + $0x9] sm:$0xff]  ;;  %10097 = vrot.lane.b32.xlu0 %v21662_v43, %s18376_s24 }
 0x5aa   : > { %10099 = vrot.lane.b32.xlu1 %v21664_v34, %s18376_s24 }
 0x5ab   : > { %v3341_v62 = vpop.permute.xlu1 %3340  ;;  %16856 = vmatmul.mubr.msk.f32.gmra.mrb[14].mxu1 %vm2650_vm3, %v22920_v40  ;;  %v9937_v40 = vpop.permute.xlu0 %9936 }
 0x5ac   : > { %16232 = vmatmul.mubr.msk.f32.gmra.mrb[20].mxu0 %vm2650_vm3, %v3341_v62  ;;  %16858 = vmatprep.mubr.msk.f32.mxu1 %vm2650_vm3, %v22921_v52  ;;  %v10046_v62 = vld [vmem:[#allocation3] sm:$0xff] }
 0x5ad   : > { %10322 = vrot.lane.b32.xlu0 %v10046_v62, %s18375_s19 }
 0x5ae   : > { %10324 = vrot.lane.b32.xlu1 %v10047_v7, %s18375_s19 }
 0x5af   : > { %16859 = vmatmul.mubr.msk.f32.gmra.mrb[0].mxu1 %vm2650_vm3, %v22922_v6  ;;  %v9947_v6 = vpop.permute.xlu0 %9946 }
 0x5b0   : > { %16861 = vmatprep.mubr.msk.f32.mxu1 %vm2650_vm3, %v21067_v25  ;;  %v22927_v25 = vld [vmem:[#allocation35_spill] sm:$0xff] }
 0x5b3   : > { %16862 = vmatmul.mubr.msk.f32.gmra.mrb[2].mxu1 %vm2650_vm3, %v21079_v59  ;;  %v14606_v59 = vld [vmem:[%s22749_s5 + $0x78] sm:$0xff] }
 0x5b4   : > { %16864 = vmatprep.mubr.msk.f32.mxu1 %vm2650_vm3, %v22923_v61 }
 0x5b7   : > { %16865 = vmatmul.mubr.msk.f32.gmra.mrb[4].mxu1 %vm2650_vm3, %v22924_v12  ;;  %v9957_v12 = vpop.permute.xlu0 %9956 }
 0x5b8   : > { %16867 = vmatprep.mubr.msk.f32.mxu1 %vm2650_vm3, %v22925_v53 }
 0x5bb   : > { %16868 = vmatmul.mubr.msk.f32.gmra.mrb[6].mxu1 %vm2650_vm3, %v22926_v46  ;;  %v21672_v46 = vpop.permute.xlu0 %9966 }
 0x5bc   : > { %16870 = vmatprep.mubr.msk.f32.mxu1 %vm2650_vm3, %v21148_v37  ;;  %v9459_v37 = vld [vmem:[%s18986_s18 + $0x22] sm:$0xff]  ;;  %v9942_v52 = vpop.permute.xlu1 %9941 }
 0x5bf   : > { %16871 = vmatmul.mubr.msk.f32.gmra.mrb[8].mxu1 %vm2650_vm3, %v21162_v57  ;;  %v14605_v57 = vld [vmem:[%s22748_s4 + $0x78] sm:$0xff] }
 0x5c0   : > { %16875 = vmatprep.mubr.msk.f32.mxu1 %vm2650_vm3, %v22927_v25  ;;  %v9952_v61 = vpop.permute.xlu1 %9951 }
 0x5c3   : > { %16876 = vmatmul.mubr.msk.f32.vlgmr.msra.gmra.mrb[10].mxu1 %vm2650_vm3, %v22928_v56 }
 0x5c4   : > { %16900 = vmatpush3.msra.mxu1 %v14571_v23  ;;  %16878 = vmatprep.mubr.msk.f32.mxu1 %vm2650_vm3, %v22929_v9  ;;  %v9962_v53 = vpop.permute.xlu1 %9961 }
 0x5c5   : > { %16925 = vmatprep.subr.mxu1 %v14606_v59 }
 0x5c7   : > { %16879 = vmatmul.mubr.msk.f32.gmra.mrb[12].mxu1 %vm2650_vm3, %v21177_v17  ;;  %v9460_v17 = vld [vmem:[%s18986_s18 + $0x2a] sm:$0xff] }
 0x5c8   : > { %16881 = vmatprep.mubr.msk.f32.mxu1 %vm2650_vm3, %v21189_v22  ;;  %v9461_v22 = vld [vmem:[%s18986_s18 + $0x32] sm:$0xff]  ;;  %v21674_v25 = vpop.permute.xlu1 %9971 }
 0x5cb   : > { %16882 = vmatmul.mubr.msk.f32.gmra.mrb[14].mxu1 %vm2650_vm3, %v21201_v1  ;;  %v9462_v1 = vld [vmem:[%s18986_s18 + $0x3a] sm:$0xff] }
 0x5cc   : > { %16884 = vmatprep.mubr.msk.f32.mxu1 %vm2650_vm3, %v21216_v44  ;;  %v9463_v44 = vld [vmem:[%s18986_s18 + $0x42] sm:$0xff]  ;;  %v21678_v56 = vpop.permute.xlu1 %9981 }
 0x5cf   : > { %16885 = vmatmul.mubr.msk.f32.gmra.mrb[0].mxu1 %vm2650_vm3, %v21225_v18  ;;  %v9464_v18 = vld [vmem:[%s18986_s18 + $0x4a] sm:$0xff] }
 0x5d0   : > { %16887 = vmatprep.mubr.msk.f32.mxu1 %vm2650_vm3, %v21239_v10  ;;  %v9465_v10 = vld [vmem:[%s18986_s18 + $0x52] sm:$0xff] }
 0x5d3   : > { %16888 = vmatmul.mubr.msk.f32.gmra.mrb[2].mxu1 %vm2650_vm3, %v21250_v42  ;;  %v9466_v42 = vld [vmem:[%s18986_s18 + $0x5a] sm:$0xff] }
 0x5d4   : > { %16890 = vmatprep.mubr.msk.f32.mxu1 %vm2650_vm3, %v21259_v55  ;;  %v9467_v55 = vld [vmem:[%s18986_s18 + $0x62] sm:$0xff] }
 0x5d7   : > { %16891 = vmatmul.mubr.msk.f32.gmra.mrb[4].mxu1 %vm2650_vm3, %v21268_v39  ;;  %v9468_v39 = vld [vmem:[%s18986_s18 + $0x6a] sm:$0xff] }
 0x5d8   : > { %16893 = vmatprep.mubr.msk.f32.mxu1 %vm2650_vm3, %v21276_v21  ;;  %v9469_v21 = vld [vmem:[%s18986_s18 + $0x72] sm:$0xff] }
 0x5db   : > { %16894 = vmatmul.mubr.msk.f32.gmra.mrb[6].mxu1 %vm2650_vm3, %v21284_v31  ;;  %v9470_v31 = vld [vmem:[%s18986_s18 + $0x7a] sm:$0xff] }
 0x5dc   : > { %16896 = vmatprep.mubr.msk.f32.mxu1 %vm2650_vm3, %v21295_v2  ;;  %v9471_v2 = vld [vmem:[%s18986_s18 + $0x82] sm:$0xff] }
 0x5df   : > { %16897 = vmatmul.mubr.msk.f32.gmra.mrb[8].mxu1 %vm2650_vm3, %v21305_v20  ;;  %v9472_v20 = vld [vmem:[%s18986_s18 + $0x8a] sm:$0xff] }
 0x5e0   : > { %16901 = vmatprep.mubr.msk.f32.mxu1 %vm2650_vm3, %v21318_v13  ;;  %v9473_v13 = vld [vmem:[%s18986_s18 + $0x92] sm:$0xff] }
 0x5e3   : > { %16902 = vmatmul.mubr.msk.f32.vlgmr.msra.gmra.mrb[10].mxu1 %vm2650_vm3, %v21329_v8  ;;  %v9474_v8 = vld [vmem:[%s18986_s18 + $0x9a] sm:$0xff] }
 0x5e4   : > { %16926 = vmatpush3.msra.mxu1 %v14606_v59  ;;  %16904 = vmatprep.mubr.msk.f32.mxu1 %vm2650_vm3, %v21339_v29  ;;  %v9441_v29 = vld [vmem:[#allocation2 + $0x22] sm:$0xff]  ;;  %v21676_v59 = vpop.permute.xlu0 %9976 }
 0x5e5   : > { %16951 = vmatprep.subr.mxu1 %v14605_v57 }
 0x5e7   : > { %16905 = vmatmul.mubr.msk.f32.gmra.mrb[12].mxu1 %vm2650_vm3, %v21349_v48  ;;  %v9442_v48 = vld [vmem:[#allocation2 + $0x2a] sm:$0xff] }
 0x5e8   : > { %16907 = vmatprep.mubr.msk.f32.mxu1 %vm2650_vm3, %v21359_v63  ;;  %v9443_v63 = vld [vmem:[#allocation2 + $0x32] sm:$0xff]  ;;  %v21680_v9 = vpop.permute.xlu0 %9986 }
 0x5eb   : > { %16908 = vmatmul.mubr.msk.f32.gmra.mrb[14].mxu1 %vm2650_vm3, %v21365_v19  ;;  %v9444_v19 = vld [vmem:[#allocation2 + $0x3a] sm:$0xff] }
 0x5ec   : > { %16910 = vmatprep.mubr.msk.f32.mxu1 %vm2650_vm3, %v21371_v28  ;;  %v9445_v28 = vld [vmem:[#allocation2 + $0x42] sm:$0xff] }
 0x5ef   : > { %16911 = vmatmul.mubr.msk.f32.gmra.mrb[0].mxu1 %vm2650_vm3, %v21377_v41  ;;  %v9446_v41 = vld [vmem:[#allocation2 + $0x4a] sm:$0xff] }
 0x5f0   : > { %16913 = vmatprep.mubr.msk.f32.mxu1 %vm2650_vm3, %v21386_v24  ;;  %v9447_v24 = vld [vmem:[#allocation2 + $0x52] sm:$0xff] }
 0x5f3   : > { %16914 = vmatmul.mubr.msk.f32.gmra.mrb[2].mxu1 %vm2650_vm3, %v21392_v26  ;;  %v9448_v26 = vld [vmem:[#allocation2 + $0x5a] sm:$0xff] }
 0x5f4   : > { %16916 = vmatprep.mubr.msk.f32.mxu1 %vm2650_vm3, %v21398_v35  ;;  %v9449_v35 = vld [vmem:[#allocation2 + $0x62] sm:$0xff] }
 0x5f7   : > { %16917 = vmatmul.mubr.msk.f32.gmra.mrb[4].mxu1 %vm2650_vm3, %v21404_v36  ;;  %v9450_v36 = vld [vmem:[#allocation2 + $0x6a] sm:$0xff] }
 0x5f8   : > { %16919 = vmatprep.mubr.msk.f32.mxu1 %vm2650_vm3, %v21410_v15  ;;  %v9451_v15 = vld [vmem:[#allocation2 + $0x72] sm:$0xff] }
 0x5fb   : > { %16920 = vmatmul.mubr.msk.f32.gmra.mrb[6].mxu1 %vm2650_vm3, %v21416_v49  ;;  %v9452_v49 = vld [vmem:[#allocation2 + $0x7a] sm:$0xff] }
 0x5fc   : > { %16922 = vmatprep.mubr.msk.f32.mxu1 %vm2650_vm3, %v21422_v54  ;;  %v9453_v54 = vld [vmem:[#allocation2 + $0x82] sm:$0xff] }
 0x5ff   : > { %16923 = vmatmul.mubr.msk.f32.gmra.mrb[8].mxu1 %vm2650_vm3, %v21428_v27  ;;  %v9455_v27 = vld [vmem:[#allocation2 + $0x92] sm:$0xff] }
 0x600   : > { %16927 = vmatprep.mubr.msk.f32.mxu1 %vm2650_vm3, %v9459_v37  ;;  %v21685_v37 = vpop.permute.xlu1 %9991 }
 0x603   : > { %16928 = vmatmul.mubr.msk.f32.vlgmr.msra.gmra.mrb[10].mxu1 %vm2650_vm3, %v9460_v17  ;;  %v21687_v17 = vpop.permute.xlu0 %9996 }
 0x604   : > { %16952 = vmatpush3.msra.mxu1 %v14605_v57  ;;  %16930 = vmatprep.mubr.msk.f32.mxu1 %vm2650_vm3, %v9461_v22  ;;  %v14640_v57 = vld [vmem:[%s22750_s6 + $0x8] sm:$0xff] }
 0x605   : > { %16977 = vmatprep.subr.mxu0 %v14640_v57 }
 0x606   : > { %16978 = vmatpush3.msra.mxu0 %v14640_v57 }
 0x607   : > { %16931 = vmatmul.mubr.msk.f32.gmra.mrb[12].mxu1 %vm2650_vm3, %v9462_v1  ;;  %v21692_v1 = vld [vmem:[%s22752_s8] ss:$0 sm:$0xff] }
 0x608   : > { %16933 = vmatprep.mubr.msk.f32.mxu1 %vm2650_vm3, %v9463_v44  ;;  %v21694_v44 = vpop.permute.xlu1 %10001 }
 0x60b   : > { %16934 = vmatmul.mubr.msk.f32.gmra.mrb[14].mxu1 %vm2650_vm3, %v9464_v18 }
 0x60c   : > { %16936 = vmatprep.mubr.msk.f32.mxu1 %vm2650_vm3, %v9465_v10 }
 0x60f   : > { %16937 = vmatmul.mubr.msk.f32.gmra.mrb[0].mxu1 %vm2650_vm3, %v9466_v42 }
 0x610   : > { %16939 = vmatprep.mubr.msk.f32.mxu1 %vm2650_vm3, %v9467_v55 }
 0x613   : > { %16940 = vmatmul.mubr.msk.f32.gmra.mrb[2].mxu1 %vm2650_vm3, %v9468_v39 }
 0x614   : > { %16942 = vmatprep.mubr.msk.f32.mxu1 %vm2650_vm3, %v9469_v21 }
 0x617   : > { %16943 = vmatmul.mubr.msk.f32.gmra.mrb[4].mxu1 %vm2650_vm3, %v9470_v31 }
 0x618   : > { %16945 = vmatprep.mubr.msk.f32.mxu1 %vm2650_vm3, %v9471_v2 }
 0x61b   : > { %16946 = vmatmul.mubr.msk.f32.gmra.mrb[6].mxu1 %vm2650_vm3, %v9472_v20  ;;  %v10098_v31 = vpop.permute.xlu0 %10097 }
 0x61c   : > { %16948 = vmatprep.mubr.msk.f32.mxu1 %vm2650_vm3, %v9473_v13  ;;  %16979 = vmatprep.mubr.msk.f32.mxu0 %vm2650_vm3, %v10098_v31 }
 0x61f   : > { %16949 = vmatmul.mubr.msk.f32.gmra.mrb[8].mxu1 %vm2650_vm3, %v9474_v8  ;;  %v10100_v8 = vpop.permute.xlu1 %10099 }
 0x620   : > { %16953 = vmatprep.mubr.msk.f32.mxu1 %vm2650_vm3, %v9441_v29  ;;  %16980 = vmatmul.mubr.msk.f32.vlgmr.msra.gmra.mrb[32].mxu0 %vm2650_vm3, %v10100_v8 }
 0x623   : > { %16954 = vmatmul.mubr.msk.f32.vlgmr.msra.gmra.mrb[10].mxu1 %vm2650_vm3, %v9442_v48 }
 0x624   : > { %16956 = vmatprep.mubr.msk.f32.mxu1 %vm2650_vm3, %v9443_v63 }
 0x627   : > { %16957 = vmatmul.mubr.msk.f32.gmra.mrb[12].mxu1 %vm2650_vm3, %v9444_v19 }
 0x628   : > { %16959 = vmatprep.mubr.msk.f32.mxu1 %vm2650_vm3, %v9445_v28 }
 0x62b   : > { %16960 = vmatmul.mubr.msk.f32.gmra.mrb[14].mxu1 %vm2650_vm3, %v9446_v41 }
 0x62c   : > { %16962 = vmatprep.mubr.msk.f32.mxu1 %vm2650_vm3, %v9447_v24 }
 0x62f   : > { %16963 = vmatmul.mubr.msk.f32.gmra.mrb[0].mxu1 %vm2650_vm3, %v9448_v26 }
 0x630   : > { %16965 = vmatprep.mubr.msk.f32.mxu1 %vm2650_vm3, %v9449_v35 }
 0x633   : > { %16966 = vmatmul.mubr.msk.f32.gmra.mrb[2].mxu1 %vm2650_vm3, %v9450_v36 }
 0x634   : > { %16968 = vmatprep.mubr.msk.f32.mxu1 %vm2650_vm3, %v9451_v15 }
 0x637   : > { %16969 = vmatmul.mubr.msk.f32.gmra.mrb[4].mxu1 %vm2650_vm3, %v9452_v49 }
 0x638   : > { %16971 = vmatprep.mubr.msk.f32.mxu1 %vm2650_vm3, %v9453_v54 }
 0x63b   : > { %16972 = vmatmul.mubr.msk.f32.gmra.mrb[6].mxu1 %vm2650_vm3, %v9454_v11 }
 0x63c   : > { %16974 = vmatprep.mubr.msk.f32.mxu1 %vm2650_vm3, %v9455_v27 }
 0x63f   : > { %16975 = vmatmul.mubr.msk.f32.gmra.mrb[8].mxu1 %vm2650_vm3, %v9456_v58 }
 0x663   : > { %v21642_v47 = vpop.f32.mrb[22].mxu0 }
 0x664   : > { %v21644_v33 = vpop.f32.mrb[23].mxu0 }
 0x667   : > { %v21646_v3 = vpop.f32.mrb[24].mxu0 }
 0x668   : > { %v21648_v60 = vpop.f32.mrb[25].mxu0 }
 0x66b   : > { %v21650_v51 = vpop.f32.mrb[26].mxu0 }
 0x66c   : > { %v21652_v45 = vpop.f32.mrb[27].mxu0 }
 0x66f   : > { %v21654_v5 = vpop.f32.mrb[28].mxu0 }
 0x670   : > { %v21656_v4 = vpop.f32.mrb[29].mxu0 }
 0x673   : > { %v21658_v16 = vpop.f32.mrb[30].mxu0 }
 0x674   : > { %v21660_v50 = vpop.f32.mrb[31].mxu0 }
 0x677   : > { %v16227_v32 = vpop.f32.mrb[16].mxu0 }
 0x678   : > { %v3460_v38 = vpop.f32.mrb[17].mxu0 }
 0x67b   : > { %v16230_v0 = vpop.f32.mrb[18].mxu0 }
 0x67c   : > { %v3470_v23 = vpop.f32.mrb[19].mxu0 }
 0x67f   : > { %v16233_v14 = vpop.f32.mrb[20].mxu0 }
 0x680   : > { %v3480_v30 = vpop.f32.mrb[21].mxu0 }
 0x6f6   : > { %v16955_v22 = vpop.f32.mrb[10].mxu1 }
 0x6f7   : > { %v17431_v18 = vadd.f32 %v16955_v22, %v16227_v32  ;;  %v9784_v10 = vpop.f32.mrb[11].mxu1 }
 0x6f8   : > { %v17432_v42 = vadd.f32 %v9784_v10, %v3460_v38 }
 0x6f9   : > { %v9887_v55 = vadd.f32 %v17431_v18, %v21692_v1 }
 0x6fa   : > { %v9886_v39 = vadd.f32 %v17432_v42, %v21692_v1  ;;  %v16958_v21 = vpop.f32.mrb[12].mxu1 }
 0x6fb   : > { %v9903_v2 = vmax.f32 %v9887_v55, 0.0  ;;  %v17433_v20 = vadd.f32 %v16958_v21, %v16230_v0  ;;  %v9794_v13 = vpop.f32.mrb[13].mxu1 }
 0x6fc   : > { %v9902_v29 = vmax.f32 %v9886_v39, 0.0  ;;  %v17434_v48 = vadd.f32 %v9794_v13, %v3470_v23 }
 0x6fd   : > { %v10015_v63 = vmul.f32 %v9942_v52, %v9903_v2  ;;  %v9889_v19 = vadd.f32 %v17433_v20, %v21692_v1 }
 0x6fe   : > { %v10014_v28 = vmul.f32 %v9937_v40, %v9902_v29  ;;  %v9888_v41 = vadd.f32 %v17434_v48, %v21692_v1  ;;  %v16961_v24 = vpop.f32.mrb[14].mxu1 }
 0x6ff   : > { %10031 = vst.msk [vmem:[#allocation3 + $0x19] sm:$0xff] %vm380_vm1, %v10015_v63  ;;  %v9905_v26 = vmax.f32 %v9889_v19, 0.0  ;;  %v17435_v35 = vadd.f32 %v16961_v24, %v16233_v14  ;;  %v9804_v36 = vpop.f32.mrb[15].mxu1 }
 0x700   : > { %10030 = vst.msk [vmem:[#allocation3 + $0x11] sm:$0xff] %vm380_vm1, %v10014_v28  ;;  %v9904_v15 = vmax.f32 %v9888_v41, 0.0  ;;  %v17436_v49 = vadd.f32 %v9804_v36, %v3480_v30 }
 0x701   : > { %v10017_v54 = vmul.f32 %v9952_v61, %v9905_v26  ;;  %v9891_v27 = vadd.f32 %v17435_v35, %v21692_v1 }
 0x702   : > { %v10016_v11 = vmul.f32 %v9947_v6, %v9904_v15  ;;  %v9890_v58 = vadd.f32 %v17436_v49, %v21692_v1  ;;  %v16964_v32 = vpop.f32.mrb[0].mxu1 }
 0x703   : > { %10033 = vst.msk [vmem:[#allocation3 + $0x29] sm:$0xff] %vm380_vm1, %v10017_v54  ;;  %v9907_v38 = vmax.f32 %v9891_v27, 0.0  ;;  %v17437_v0 = vadd.f32 %v16964_v32, %v21642_v47  ;;  %v9814_v23 = vpop.f32.mrb[1].mxu1 }
 0x704   : > { %10032 = vst.msk [vmem:[#allocation3 + $0x21] sm:$0xff] %vm380_vm1, %v10016_v11  ;;  %v9906_v14 = vmax.f32 %v9890_v58, 0.0  ;;  %v17438_v7 = vadd.f32 %v9814_v23, %v21644_v33 }
 0x705   : > { %v10019_v62 = vmul.f32 %v9962_v53, %v9907_v38  ;;  %v9893_v30 = vadd.f32 %v17437_v0, %v21692_v1 }
 0x706   : > { %v10018_v40 = vmul.f32 %v9957_v12, %v9906_v14  ;;  %v9892_v52 = vadd.f32 %v17438_v7, %v21692_v1  ;;  %v16967_v6 = vpop.f32.mrb[2].mxu1  ;;  %v21712_v61 = vld [vmem:[#allocation3 + $0x19] sm:$0xff] }
 0x707   : > { %10035 = vst.msk [vmem:[#allocation3 + $0x39] sm:$0xff] %vm380_vm1, %v10019_v62  ;;  %v9909_v57 = vmax.f32 %v9893_v30, 0.0  ;;  %v17439_v47 = vadd.f32 %v16967_v6, %v21646_v3  ;;  %v9824_v22 = vpop.f32.mrb[3].mxu1  ;;  %10103 = vrot.lane.b32.xlu1 %v21712_v61, %s18376_s24  ;;  %v21718_v18 = vld [vmem:[#allocation3 + $0x11] sm:$0xff] }
 0x708   : > { %10034 = vst.msk [vmem:[#allocation3 + $0x31] sm:$0xff] %vm380_vm1, %v10018_v40  ;;  %v9908_v33 = vmax.f32 %v9892_v52, 0.0  ;;  %v17440_v12 = vadd.f32 %v9824_v22, %v21648_v60  ;;  %10101 = vrot.lane.b32.xlu0 %v21718_v18, %s18376_s24  ;;  %v21734_v2 = vld [vmem:[#allocation3 + $0x10] sm:$0xff]  ;;  %v21809_v23 = vld [vmem:[#allocation3 + $0x18] sm:$0xff] }
 0x709   : > { %v10021_v53 = vmul.f32 %v21674_v25, %v9909_v57  ;;  %v9895_v10 = vadd.f32 %v17439_v47, %v21692_v1  ;;  %v9932_v57 = vld [vmem:[%s22746_s2 + $0x70] sm:$0xff] }
 0x70a   : > { %v10020_v3 = vmul.f32 %v21672_v46, %v9908_v33  ;;  %v9894_v42 = vadd.f32 %v17440_v12, %v21692_v1  ;;  %v16970_v55 = vpop.f32.mrb[4].mxu1  ;;  %v21728_v39 = vld [vmem:[#allocation3 + $0x29] sm:$0xff] }
 0x70b   : > { %10037 = vst.msk [vmem:[#allocation3 + $0x49] sm:$0xff] %vm380_vm1, %v10021_v53  ;;  %v9911_v21 = vmax.f32 %v9895_v10, 0.0  ;;  %v17441_v31 = vadd.f32 %v16970_v55, %v21650_v51  ;;  %v9834_v60 = vpop.f32.mrb[5].mxu1  ;;  %10107 = vrot.lane.b32.xlu1 %v21728_v39, %s18376_s24  ;;  %v21750_v28 = vld [vmem:[#allocation3 + $0x21] sm:$0xff] }
 0x70c   : > { %10036 = vst.msk [vmem:[#allocation3 + $0x41] sm:$0xff] %vm380_vm1, %v10020_v3  ;;  %v9910_v25 = vmax.f32 %v9894_v42, 0.0  ;;  %v17442_v46 = vadd.f32 %v9834_v60, %v21652_v45  ;;  %10326 = vrot.lane.b32.xlu0 %v21734_v2, %s18375_s19  ;;  %v21817_v7 = vld [vmem:[#allocation3 + $0x28] sm:$0xff]  ;;  %v21821_v62 = vld [vmem:[#allocation3 + $0x20] sm:$0xff] }
 0x70d   : > { %v10023_v20 = vmul.f32 %v21678_v56, %v9911_v21  ;;  %v9897_v13 = vadd.f32 %v17441_v31, %v21692_v1  ;;  %v21873_v3 = vld [vmem:[%s22750_s6 + $0x10] sm:$0xff]  ;;  %v10759_v42 = vld [vmem:[#allocation3 + $0xa] sm:$0xff]  ;;  %v21915_v21 = vld [vmem:[#allocation3 + $0x12] sm:$0xff] }
 0x70e   : > { %v10022_v51 = vmul.f32 %v21676_v59, %v9910_v25  ;;  %v9896_v8 = vadd.f32 %v17442_v46, %v21692_v1  ;;  %v16973_v29 = vpop.f32.mrb[6].mxu1  ;;  %v21744_v48 = vld [vmem:[#allocation3 + $0x39] sm:$0xff]  ;;  %v21923_v60 = vld [vmem:[#allocation3 + $0x22] sm:$0xff] }
 0x70f   : > { %10039 = vst.msk [vmem:[#allocation3 + $0x59] sm:$0xff] %vm380_vm1, %v10023_v20  ;;  %v9913_v63 = vmax.f32 %v9897_v13, 0.0  ;;  %v17443_v19 = vadd.f32 %v16973_v29, %v21654_v5  ;;  %v9844_v45 = vpop.f32.mrb[7].mxu1  ;;  %10111 = vrot.lane.b32.xlu1 %v21744_v48, %s18376_s24  ;;  %v21766_v54 = vld [vmem:[#allocation3 + $0x31] sm:$0xff]  ;;  %v21911_v55 = vld [vmem:[#allocation3 + $0x1a] sm:$0xff] }
 0x710   : > { %10038 = vst.msk [vmem:[#allocation3 + $0x51] sm:$0xff] %vm380_vm1, %v10022_v51  ;;  %v9912_v56 = vmax.f32 %v9896_v8, 0.0  ;;  %v17444_v59 = vadd.f32 %v9844_v45, %v21656_v4  ;;  %10105 = vrot.lane.b32.xlu0 %v21750_v28, %s18376_s24  ;;  %v21825_v30 = vld [vmem:[#allocation3 + $0x38] sm:$0xff]  ;;  %v21829_v40 = vld [vmem:[#allocation3 + $0x30] sm:$0xff]  ;;  %v10325_v51 = vpop.permute.xlu1 %10324  ;;  %v10323_v8 = vpop.permute.xlu0 %10322 }
 0x711   : > { %v10025_v41 = vmul.f32 %v21685_v37, %v9913_v63  ;;  %v9899_v24 = vadd.f32 %v17443_v19, %v21692_v1  ;;  %v21919_v31 = vld [vmem:[#allocation3 + $0x2a] sm:$0xff]  ;;  %v21931_v46 = vld [vmem:[#allocation3 + $0x32] sm:$0xff] }
 0x712   : > { %v10024_v5 = vmul.f32 %v21680_v9, %v9912_v56  ;;  %v9898_v26 = vadd.f32 %v17444_v59, %v21692_v1  ;;  %v16976_v35 = vpop.f32.mrb[8].mxu1  ;;  %v21760_v36 = vld [vmem:[#allocation3 + $0x49] sm:$0xff] }
 0x713   : > { %10041 = vst.msk [vmem:[#allocation3 + $0x69] sm:$0xff] %vm380_vm1, %v10025_v41  ;;  %v9915_v15 = vmax.f32 %v9899_v24, 0.0  ;;  %v17445_v49 = vadd.f32 %v16976_v35, %v21658_v16  ;;  %v9854_v4 = vpop.f32.mrb[9].mxu1  ;;  %10115 = vrot.lane.b32.xlu1 %v21760_v36, %s18376_s24  ;;  %v21833_v52 = vld [vmem:[#allocation3 + $0x48] sm:$0xff]  ;;  %v21837_v6 = vld [vmem:[#allocation3 + $0x40] sm:$0xff] }
 0x714   : > { %10040 = vst.msk [vmem:[#allocation3 + $0x61] sm:$0xff] %vm380_vm1, %v10024_v5  ;;  %v9914_v37 = vmax.f32 %v9898_v26, 0.0  ;;  %v17446_v9 = vadd.f32 %v9854_v4, %v21660_v50  ;;  %10109 = vrot.lane.b32.xlu0 %v21766_v54, %s18376_s24  ;;  %v21785_v50 = vld [vmem:[#allocation3 + $0x41] sm:$0xff] }
 0x715   : > { %v10027_v27 = vmul.f32 %v21694_v44, %v9915_v15  ;;  %v21774_v11 = vadd.f32 %v17445_v49, %v21692_v1  ;;  %v21927_v25 = vld [vmem:[#allocation3 + $0x3a] sm:$0xff]  ;;  %v21939_v13 = vld [vmem:[#allocation3 + $0x42] sm:$0xff] }
 0x716   : > { %v10026_v16 = vmul.f32 %v21687_v17, %v9914_v37  ;;  %v21778_v58 = vadd.f32 %v17446_v9, %v21692_v1  ;;  %v21780_v32 = vld [vmem:[#allocation3 + $0x59] sm:$0xff]  ;;  %v10062_v17 = vld [vmem:[%s22750_s6] sm:$0xff] }
 0x717   : > { %10043 = vst.msk [vmem:[#allocation3 + $0x79] sm:$0xff] %vm380_vm1, %v10027_v27  ;;  %10119 = vrot.lane.b32.xlu1 %v21780_v32, %s18376_s24  ;;  %17003 = vmatprep.subr.mxu0 %v10062_v17  ;;  %v21797_v44 = vld [vmem:[#allocation3 + $0x51] sm:$0xff] }
 0x718   : > { %10042 = vst.msk [vmem:[#allocation3 + $0x71] sm:$0xff] %vm380_vm1, %v10026_v16  ;;  %10113 = vrot.lane.b32.xlu0 %v21785_v50, %s18376_s24  ;;  %17004 = vmatpush3.msra.mxu0 %v10062_v17  ;;  %v21844_v47 = vld [vmem:[#allocation3 + $0x50] sm:$0xff]  ;;  %v21852_v33 = vld [vmem:[#allocation3 + $0x58] sm:$0xff] }
 0x719   : > { %17029 = vmatprep.subr.mxu0 %v21873_v3  ;;  %v21935_v20 = vld [vmem:[#allocation3 + $0x4a] sm:$0xff]  ;;  %v21947_v63 = vld [vmem:[#allocation3 + $0x52] sm:$0xff] }
 0x71a   : > { %v21793_v1 = vld [vmem:[#allocation3 + $0x69] sm:$0xff] }
 0x71b   : > { %10123 = vrot.lane.b32.xlu1 %v21793_v1, %s18376_s24  ;;  %v21805_v0 = vld [vmem:[#allocation3 + $0x61] sm:$0xff] }
 0x71c   : > { %10117 = vrot.lane.b32.xlu0 %v21797_v44, %s18376_s24  ;;  %v21848_v22 = vld [vmem:[#allocation3 + $0x60] sm:$0xff]  ;;  %v21860_v53 = vld [vmem:[#allocation3 + $0x68] sm:$0xff] }
 0x71d   : > { %v21943_v29 = vld [vmem:[#allocation3 + $0x5a] sm:$0xff]  ;;  %v21956_v59 = vld [vmem:[#allocation3 + $0x62] sm:$0xff] }
 0x71e   : > { %v21801_v38 = vld [vmem:[#allocation3 + $0x79] sm:$0xff] }
 0x71f   : > { %10127 = vrot.lane.b32.xlu1 %v21801_v38, %s18376_s24  ;;  %v21813_v14 = vld [vmem:[#allocation3 + $0x71] sm:$0xff] }
 0x720   : > { %10121 = vrot.lane.b32.xlu0 %v21805_v0, %s18376_s24  ;;  %v21856_v12 = vld [vmem:[#allocation3 + $0x70] sm:$0xff]  ;;  %v21866_v10 = vld [vmem:[#allocation3 + $0x78] sm:$0xff] }
 0x721   : > { %v21951_v56 = vld [vmem:[#allocation3 + $0x6a] sm:$0xff]  ;;  %v21961_v5 = vld [vmem:[#allocation3 + $0x72] sm:$0xff] }
 0x723   : > { %10328 = vrot.lane.b32.xlu1 %v21809_v23, %s18375_s19 }
 0x724   : > { %10125 = vrot.lane.b32.xlu0 %v21813_v14, %s18376_s24 }
 0x727   : > { %10332 = vrot.lane.b32.xlu1 %v21817_v7, %s18375_s19 }
 0x728   : > { %10330 = vrot.lane.b32.xlu0 %v21821_v62, %s18375_s19 }
 0x72b   : > { %10336 = vrot.lane.b32.xlu1 %v21825_v30, %s18375_s19 }
 0x72c   : > { %10334 = vrot.lane.b32.xlu0 %v21829_v40, %s18375_s19 }
 0x72f   : > { %10340 = vrot.lane.b32.xlu1 %v21833_v52, %s18375_s19 }
 0x730   : > { %10338 = vrot.lane.b32.xlu0 %v21837_v6, %s18375_s19 }
 0x733   : > { %10342 = vrot.lane.b32.xlu1 %v21844_v47, %s18375_s19 }
 0x734   : > { %10006 = vperm.xlu0 %18309, %v9932_v57  }
 0x737   : > { %10346 = vrot.lane.b32.xlu1 %v21848_v22, %s18375_s19 }
 0x738   : > { %10344 = vrot.lane.b32.xlu0 %v21852_v33, %s18375_s19 }
 0x73b   : > { %10350 = vrot.lane.b32.xlu1 %v21856_v12, %s18375_s19 }
 0x73c   : > { %10348 = vrot.lane.b32.xlu0 %v21860_v53, %s18375_s19 }
 0x73f   : > { %10533 = vrot.lane.b32.xlu1 %v21662_v43, %s18375_s19  ;;  %v9933_v43 = vld [vmem:[%s22746_s2 + $0x78] sm:$0xff] }
 0x740   : > { %10352 = vrot.lane.b32.xlu0 %v21866_v10, %s18375_s19 }
 0x743   : > { %10537 = vrot.lane.b32.xlu1 %v21718_v18, %s18375_s19 }
 0x744   : > { %10535 = vrot.lane.b32.xlu0 %v21664_v34, %s18375_s19  ;;  %v10758_v34 = vld [vmem:[#allocation3 + $0x2] sm:$0xff] }
 0x747   : > { %10541 = vrot.lane.b32.xlu1 %v21750_v28, %s18375_s19 }
 0x748   : > { %10539 = vrot.lane.b32.xlu0 %v21712_v61, %s18375_s19 }
 0x74b   : > { %10545 = vrot.lane.b32.xlu1 %v21766_v54, %s18375_s19 }
 0x74c   : > { %10543 = vrot.lane.b32.xlu0 %v21728_v39, %s18375_s19 }
 0x74f   : > { %10549 = vrot.lane.b32.xlu1 %v21785_v50, %s18375_s19 }
 0x750   : > { %10547 = vrot.lane.b32.xlu0 %v21744_v48, %s18375_s19 }
 0x753   : > { %10011 = vperm.xlu1 %18310, %v9933_v43  }
 0x754   : > { %10551 = vrot.lane.b32.xlu0 %v21760_v36, %s18375_s19 }
 0x757   : > { %10555 = vrot.lane.b32.xlu1 %v21780_v32, %s18375_s19 }
 0x758   : > { %10553 = vrot.lane.b32.xlu0 %v21797_v44, %s18375_s19 }
 0x75b   : > { %10559 = vrot.lane.b32.xlu1 %v21793_v1, %s18375_s19 }
 0x75c   : > { %10557 = vrot.lane.b32.xlu0 %v21805_v0, %s18375_s19 }
 0x75f   : > { %10563 = vrot.lane.b32.xlu1 %v21801_v38, %s18375_s19 }
 0x760   : > { %10561 = vrot.lane.b32.xlu0 %v21813_v14, %s18375_s19 }
 0x763   : > { %10794 = vrot.lane.b32.xlu1 %v10759_v42, %s18376_s24  ;;  %v14690_v42 = vld [vmem:[%s22750_s6 + $0x18] sm:$0xff] }
 0x764   : > { %10792 = vrot.lane.b32.xlu0 %v10758_v34, %s18376_s24 }
 0x767   : > { %10798 = vrot.lane.b32.xlu1 %v21911_v55, %s18376_s24 }
 0x768   : > { %10796 = vrot.lane.b32.xlu0 %v21915_v21, %s18376_s24 }
 0x76b   : > { %10802 = vrot.lane.b32.xlu1 %v21919_v31, %s18376_s24 }
 0x76c   : > { %10800 = vrot.lane.b32.xlu0 %v21923_v60, %s18376_s24 }
 0x76f   : > { %10806 = vrot.lane.b32.xlu1 %v21927_v25, %s18376_s24 }
 0x770   : > { %10804 = vrot.lane.b32.xlu0 %v21931_v46, %s18376_s24 }
 0x773   : > { %10810 = vrot.lane.b32.xlu1 %v21935_v20, %s18376_s24 }
 0x774   : > { %10808 = vrot.lane.b32.xlu0 %v21939_v13, %s18376_s24 }
 0x777   : > { %10814 = vrot.lane.b32.xlu1 %v21943_v29, %s18376_s24 }
 0x778   : > { %10812 = vrot.lane.b32.xlu0 %v21947_v63, %s18376_s24 }
 0x779   : > { %v10104_v19 = vpop.permute.xlu1 %10103 }
 0x77a   : > { %v10102_v45 = vpop.permute.xlu0 %10101 }
 0x77b   : > { %10818 = vrot.lane.b32.xlu1 %v21951_v56, %s18376_s24  ;;  %16982 = vmatprep.mubr.msk.f32.mxu0 %vm2650_vm3, %v10102_v45 }
 0x77c   : > { %10816 = vrot.lane.b32.xlu0 %v21956_v59, %s18376_s24  ;;  %16983 = vmatmul.mubr.msk.f32.gmra.mrb[34].mxu0 %vm2650_vm3, %v10104_v19 }
 0x77d   : > { %v10108_v41 = vpop.permute.xlu1 %10107 }
 0x77e   : > { %v10327_v24 = vpop.permute.xlu0 %10326 }
 0x780   : > { %10820 = vrot.lane.b32.xlu0 %v21961_v5, %s18376_s24 }
 0x781   : > { %v10112_v26 = vpop.permute.xlu1 %10111 }
 0x782   : > { %v10106_v35 = vpop.permute.xlu0 %10105 }
 0x783   : > { %16985 = vmatprep.mubr.msk.f32.mxu0 %vm2650_vm3, %v10106_v35 }
 0x784   : > { %11051 = vrot.lane.b32.xlu0 %v21734_v2, %s18377_s17  ;;  %16986 = vmatmul.mubr.msk.f32.gmra.mrb[36].mxu0 %vm2650_vm3, %v10108_v41 }
 0x785   : > { %v10116_v15 = vpop.permute.xlu1 %10115 }
 0x786   : > { %v10110_v49 = vpop.permute.xlu0 %10109 }
 0x787   : > { %16988 = vmatprep.mubr.msk.f32.mxu0 %vm2650_vm3, %v10110_v49 }
 0x788   : > { %11055 = vrot.lane.b32.xlu0 %v21821_v62, %s18377_s17  ;;  %16989 = vmatmul.mubr.msk.f32.gmra.mrb[38].mxu0 %vm2650_vm3, %v10112_v26 }
 0x789   : > { %v10120_v4 = vpop.permute.xlu1 %10119 }
 0x78a   : > { %v10114_v37 = vpop.permute.xlu0 %10113 }
 0x78b   : > { %16991 = vmatprep.mubr.msk.f32.mxu0 %vm2650_vm3, %v10114_v37 }
 0x78c   : > { %11059 = vrot.lane.b32.xlu0 %v21829_v40, %s18377_s17  ;;  %16992 = vmatmul.mubr.msk.f32.gmra.mrb[40].mxu0 %vm2650_vm3, %v10116_v15 }
 0x78d   : > { %v10124_v9 = vpop.permute.xlu1 %10123 }
 0x78e   : > { %v10118_v27 = vpop.permute.xlu0 %10117 }
 0x78f   : > { %16994 = vmatprep.mubr.msk.f32.mxu0 %vm2650_vm3, %v10118_v27 }
 0x790   : > { %11063 = vrot.lane.b32.xlu0 %v21837_v6, %s18377_s17  ;;  %16995 = vmatmul.mubr.msk.f32.gmra.mrb[42].mxu0 %vm2650_vm3, %v10120_v4 }
 0x791   : > { %v10128_v16 = vpop.permute.xlu1 %10127 }
 0x792   : > { %v10122_v17 = vpop.permute.xlu0 %10121 }
 0x793   : > { %16997 = vmatprep.mubr.msk.f32.mxu0 %vm2650_vm3, %v10122_v17 }
 0x794   : > { %11067 = vrot.lane.b32.xlu0 %v21844_v47, %s18377_s17  ;;  %16998 = vmatmul.mubr.msk.f32.gmra.mrb[44].mxu0 %vm2650_vm3, %v10124_v9 }
 0x795   : > { %v10329_v57 = vpop.permute.xlu1 %10328 }
 0x796   : > { %v10126_v43 = vpop.permute.xlu0 %10125 }
 0x797   : > { %17000 = vmatprep.mubr.msk.f32.mxu0 %vm2650_vm3, %v10126_v43 }
 0x798   : > { %11071 = vrot.lane.b32.xlu0 %v21848_v22, %s18377_s17  ;;  %17001 = vmatmul.mubr.msk.f32.gmra.mrb[46].mxu0 %vm2650_vm3, %v10128_v16 }
 0x799   : > { %17005 = vmatprep.mubr.msk.f32.mxu0 %vm2650_vm3, %v10323_v8  ;;  %v10333_v34 = vpop.permute.xlu1 %10332 }
 0x79a   : > { %v10331_v19 = vpop.permute.xlu0 %10330 }
 0x79c   : > { %11075 = vrot.lane.b32.xlu0 %v21856_v12, %s18377_s17  ;;  %17006 = vmatmul.mubr.msk.f32.vlgmr.msra.gmra.mrb[32].mxu0 %vm2650_vm3, %v10325_v51 }
 0x79d   : > { %17008 = vmatprep.mubr.msk.f32.mxu0 %vm2650_vm3, %v10327_v24  ;;  %v10337_v45 = vpop.permute.xlu1 %10336  ;;  %17030 = vmatpush3.msra.mxu0 %v21873_v3  ;;  %v9916_v24 = vmax.f32 %v21778_v58, 0.0 }
 0x79e   : > { %17055 = vmatprep.subr.mxu0 %v14690_v42  ;;  %v10335_v41 = vpop.permute.xlu0 %10334 }
 0x7a0   : > { %17009 = vmatmul.mubr.msk.f32.gmra.mrb[34].mxu0 %vm2650_vm3, %v10329_v57 }
 0x7a1   : > { %17011 = vmatprep.mubr.msk.f32.mxu0 %vm2650_vm3, %v10331_v19  ;;  %v10341_v8 = vpop.permute.xlu1 %10340 }
 0x7a2   : > { %v10339_v35 = vpop.permute.xlu0 %10338 }
 0x7a4   : > { %17012 = vmatmul.mubr.msk.f32.gmra.mrb[36].mxu0 %vm2650_vm3, %v10333_v34  ;;  %v14707_v34 = vld [vmem:[%s22750_s6 + $0x20] sm:$0xff] }
 0x7a5   : > { %17014 = vmatprep.mubr.msk.f32.mxu0 %vm2650_vm3, %v10335_v41  ;;  %v10343_v26 = vpop.permute.xlu1 %10342 }
 0x7a8   : > { %17015 = vmatmul.mubr.msk.f32.gmra.mrb[38].mxu0 %vm2650_vm3, %v10337_v45 }
 0x7a9   : > { %17017 = vmatprep.mubr.msk.f32.mxu0 %vm2650_vm3, %v10339_v35  ;;  %v10347_v51 = vpop.permute.xlu1 %10346 }
 0x7ac   : > { %17018 = vmatmul.mubr.msk.f32.gmra.mrb[40].mxu0 %vm2650_vm3, %v10341_v8 }
 0x7ad   : > { %17020 = vmatprep.mubr.msk.f32.mxu0 %vm2650_vm3, %v10343_v26  ;;  %v10351_v3 = vpop.permute.xlu1 %10350  ;;  %v9917_v26 = vmax.f32 %v21774_v11, 0.0 }
 0x7b1   : > { %v10534_v4 = vpop.permute.xlu1 %10533 }
 0x7b3   : > { %v10007_v15 = vpop.permute.xlu0 %10006 }
 0x7b4   : > { %v10028_v49 = vmul.f32 %v10007_v15, %v9916_v24 }
 0x7b5   : > { %v10538_v27 = vpop.permute.xlu1 %10537 }
 0x7b6   : > { %10044 = vst.msk [vmem:[#allocation3 + $0x81] sm:$0xff] %vm380_vm1, %v10028_v49 }
 0x7b7   : > { %v10345_v37 = vpop.permute.xlu0 %10344 }
 0x7b8   : > { %17021 = vmatmul.mubr.msk.f32.gmra.mrb[42].mxu0 %vm2650_vm3, %v10345_v37 }
 0x7b9   : > { %17023 = vmatprep.mubr.msk.f32.mxu0 %vm2650_vm3, %v10347_v51  ;;  %v10542_v57 = vpop.permute.xlu1 %10541 }
 0x7bb   : > { %v10349_v9 = vpop.permute.xlu0 %10348 }
 0x7bc   : > { %17024 = vmatmul.mubr.msk.f32.gmra.mrb[44].mxu0 %vm2650_vm3, %v10349_v9 }
 0x7bd   : > { %17026 = vmatprep.mubr.msk.f32.mxu0 %vm2650_vm3, %v10351_v3  ;;  %v22012_v16 = vld [vmem:[#allocation3 + $0x7a] sm:$0xff]  ;;  %v10546_v45 = vpop.permute.xlu1 %10545 }
 0x7be   : > { %v22014_v17 = vld [vmem:[#allocation3 + $0x80] sm:$0xff]  ;;  %10822 = vrot.lane.b32.xlu1 %v22012_v16, %s18376_s24 }
 0x7bf   : > { %11079 = vrot.lane.b32.xlu0 %v22014_v17, %s18377_s17  ;;  %v10353_v58 = vpop.permute.xlu0 %10352  ;;  %v22070_v37 = vld [vmem:[#allocation3 + $0x81] sm:$0xff] }
 0x7c0   : > { %17027 = vmatmul.mubr.msk.f32.gmra.mrb[46].mxu0 %vm2650_vm3, %v10353_v58 }
 0x7c1   : > { %17031 = vmatprep.mubr.msk.f32.mxu0 %vm2650_vm3, %v10534_v4  ;;  %v10550_v8 = vpop.permute.xlu1 %10549 }
 0x7c2   : > { %11053 = vrot.lane.b32.xlu1 %v21809_v23, %s18377_s17 }
 0x7c3   : > { %11505 = vrot.lane.b32.xlu0 %v21718_v18, %s18377_s17  ;;  %v10536_v43 = vpop.permute.xlu0 %10535 }
 0x7c4   : > { %17032 = vmatmul.mubr.msk.f32.vlgmr.msra.gmra.mrb[32].mxu0 %vm2650_vm3, %v10536_v43  ;;  %v22087_v43 = vld [vmem:[%s22750_s6 + $0x28] sm:$0xff] }
 0x7c5   : > { %17034 = vmatprep.mubr.msk.f32.mxu0 %vm2650_vm3, %v10538_v27  ;;  %17056 = vmatpush3.msra.mxu0 %v14690_v42 }
 0x7c6   : > { %11057 = vrot.lane.b32.xlu1 %v21817_v7, %s18377_s17  ;;  %17081 = vmatprep.subr.mxu0 %v14707_v34 }
 0x7c7   : > { %11509 = vrot.lane.b32.xlu0 %v21750_v28, %s18377_s17  ;;  %v10540_v19 = vpop.permute.xlu0 %10539 }
 0x7c8   : > { %17035 = vmatmul.mubr.msk.f32.gmra.mrb[34].mxu0 %vm2650_vm3, %v10540_v19 }
 0x7c9   : > { %17037 = vmatprep.mubr.msk.f32.mxu0 %vm2650_vm3, %v10542_v57 }
 0x7ca   : > { %11061 = vrot.lane.b32.xlu1 %v21825_v30, %s18377_s17 }
 0x7cb   : > { %11513 = vrot.lane.b32.xlu0 %v21766_v54, %s18377_s17  ;;  %v10544_v42 = vpop.permute.xlu0 %10543 }
 0x7cc   : > { %17038 = vmatmul.mubr.msk.f32.gmra.mrb[36].mxu0 %vm2650_vm3, %v10544_v42 }
 0x7cd   : > { %17040 = vmatprep.mubr.msk.f32.mxu0 %vm2650_vm3, %v10546_v45 }
 0x7ce   : > { %11065 = vrot.lane.b32.xlu1 %v21833_v52, %s18377_s17 }
 0x7cf   : > { %11517 = vrot.lane.b32.xlu0 %v21785_v50, %s18377_s17  ;;  %v10548_v41 = vpop.permute.xlu0 %10547 }
 0x7d0   : > { %17041 = vmatmul.mubr.msk.f32.gmra.mrb[38].mxu0 %vm2650_vm3, %v10548_v41 }
 0x7d1   : > { %17043 = vmatprep.mubr.msk.f32.mxu0 %vm2650_vm3, %v10550_v8 }
 0x7d2   : > { %11069 = vrot.lane.b32.xlu1 %v21852_v33, %s18377_s17  ;;  %v10012_v35 = vpop.permute.xlu1 %10011 }
 0x7d3   : > { %11521 = vrot.lane.b32.xlu0 %v21797_v44, %s18377_s17  ;;  %v10029_v51 = vmul.f32 %v10012_v35, %v9917_v26  ;;  %v10552_v3 = vpop.permute.xlu0 %10551 }
 0x7d4   : > { %17044 = vmatmul.mubr.msk.f32.gmra.mrb[40].mxu0 %vm2650_vm3, %v10552_v3 }
 0x7d5   : > { %10045 = vst.msk [vmem:[#allocation3 + $0x89] sm:$0xff] %vm380_vm1, %v10029_v51 }
 0x7d6   : > { %11073 = vrot.lane.b32.xlu1 %v21860_v53, %s18377_s17  ;;  %v10556_v11 = vpop.permute.xlu1 %10555 }
 0x7d7   : > { %11525 = vrot.lane.b32.xlu0 %v21805_v0, %s18377_s17  ;;  %v10554_v24 = vpop.permute.xlu0 %10553 }
 0x7d8   : > { %17046 = vmatprep.mubr.msk.f32.mxu0 %vm2650_vm3, %v10554_v24 }
 0x7d9   : > { %17047 = vmatmul.mubr.msk.f32.gmra.mrb[42].mxu0 %vm2650_vm3, %v10556_v11 }
 0x7da   : > { %11077 = vrot.lane.b32.xlu1 %v21866_v10, %s18377_s17  ;;  %v10560_v15 = vpop.permute.xlu1 %10559 }
 0x7db   : > { %11529 = vrot.lane.b32.xlu0 %v21813_v14, %s18377_s17  ;;  %v10558_v49 = vpop.permute.xlu0 %10557 }
 0x7dc   : > { %17049 = vmatprep.mubr.msk.f32.mxu0 %vm2650_vm3, %v10558_v49  ;;  %v22067_v4 = vld [vmem:[#allocation3 + $0x88] sm:$0xff] }
 0x7dd   : > { %17050 = vmatmul.mubr.msk.f32.gmra.mrb[44].mxu0 %vm2650_vm3, %v10560_v15  ;;  %v22126_v24 = vld [vmem:[#allocation3 + $0x89] sm:$0xff] }
 0x7de   : > { %11081 = vrot.lane.b32.xlu1 %v22067_v4, %s18377_s17  ;;  %v10564_v9 = vpop.permute.xlu1 %10563 }
 0x7df   : > { %11533 = vrot.lane.b32.xlu0 %v22070_v37, %s18377_s17  ;;  %v10562_v27 = vpop.permute.xlu0 %10561 }
 0x7e0   : > { %17052 = vmatprep.mubr.msk.f32.mxu0 %vm2650_vm3, %v10562_v27 }
 0x7e1   : > { %17053 = vmatmul.mubr.msk.f32.gmra.mrb[46].mxu0 %vm2650_vm3, %v10564_v9 }
 0x7e2   : > { %11507 = vrot.lane.b32.xlu1 %v21712_v61, %s18377_s17  ;;  %v10795_v58 = vpop.permute.xlu1 %10794 }
 0x7e3   : > { %11959 = vrot.lane.b32.xlu0 %v21734_v2, %s18375_s19  ;;  %v10793_v57 = vpop.permute.xlu0 %10792 }
 0x7e4   : > { %17057 = vmatprep.mubr.msk.f32.mxu0 %vm2650_vm3, %v10793_v57 }
 0x7e5   : > { %17058 = vmatmul.mubr.msk.f32.vlgmr.msra.gmra.mrb[32].mxu0 %vm2650_vm3, %v10795_v58 }
 0x7e6   : > { %11511 = vrot.lane.b32.xlu1 %v21728_v39, %s18377_s17  ;;  %v10799_v2 = vpop.permute.xlu1 %10798  ;;  %17082 = vmatpush3.msra.mxu0 %v14707_v34 }
 0x7e7   : > { %11963 = vrot.lane.b32.xlu0 %v21821_v62, %s18375_s19  ;;  %v10797_v19 = vpop.permute.xlu0 %10796  ;;  %17107 = vmatprep.subr.mxu0 %v22087_v43 }
 0x7e8   : > { %17060 = vmatprep.mubr.msk.f32.mxu0 %vm2650_vm3, %v10797_v19 }
 0x7e9   : > { %17061 = vmatmul.mubr.msk.f32.gmra.mrb[34].mxu0 %vm2650_vm3, %v10799_v2 }
 0x7ea   : > { %11515 = vrot.lane.b32.xlu1 %v21744_v48, %s18377_s17  ;;  %v10803_v45 = vpop.permute.xlu1 %10802 }
 0x7eb   : > { %11967 = vrot.lane.b32.xlu0 %v21829_v40, %s18375_s19  ;;  %v10801_v42 = vpop.permute.xlu0 %10800 }
 0x7ec   : > { %17063 = vmatprep.mubr.msk.f32.mxu0 %vm2650_vm3, %v10801_v42 }
 0x7ed   : > { %17064 = vmatmul.mubr.msk.f32.gmra.mrb[36].mxu0 %vm2650_vm3, %v10803_v45 }
 0x7ee   : > { %11519 = vrot.lane.b32.xlu1 %v21760_v36, %s18377_s17  ;;  %v10807_v34 = vpop.permute.xlu1 %10806 }
 0x7ef   : > { %11971 = vrot.lane.b32.xlu0 %v21837_v6, %s18375_s19  ;;  %v10805_v8 = vpop.permute.xlu0 %10804 }
 0x7f0   : > { %17066 = vmatprep.mubr.msk.f32.mxu0 %vm2650_vm3, %v10805_v8  ;;  %v14741_v8 = vld [vmem:[%s22750_s6 + $0x30] sm:$0xff] }
 0x7f1   : > { %17067 = vmatmul.mubr.msk.f32.gmra.mrb[38].mxu0 %vm2650_vm3, %v10807_v34 }
 0x7f2   : > { %11523 = vrot.lane.b32.xlu1 %v21780_v32, %s18377_s17  ;;  %v10811_v41 = vpop.permute.xlu1 %10810 }
 0x7f3   : > { %11975 = vrot.lane.b32.xlu0 %v21844_v47, %s18375_s19  ;;  %v10809_v26 = vpop.permute.xlu0 %10808 }
 0x7f4   : > { %17069 = vmatprep.mubr.msk.f32.mxu0 %vm2650_vm3, %v10809_v26 }
 0x7f5   : > { %17070 = vmatmul.mubr.msk.f32.gmra.mrb[40].mxu0 %vm2650_vm3, %v10811_v41 }
 0x7f6   : > { %11527 = vrot.lane.b32.xlu1 %v21793_v1, %s18377_s17  ;;  %v10815_v35 = vpop.permute.xlu1 %10814 }
 0x7f7   : > { %11979 = vrot.lane.b32.xlu0 %v21848_v22, %s18375_s19  ;;  %v10813_v51 = vpop.permute.xlu0 %10812 }
 0x7f8   : > { %17072 = vmatprep.mubr.msk.f32.mxu0 %vm2650_vm3, %v10813_v51 }
 0x7f9   : > { %17073 = vmatmul.mubr.msk.f32.gmra.mrb[42].mxu0 %vm2650_vm3, %v10815_v35 }
 0x7fa   : > { %11531 = vrot.lane.b32.xlu1 %v21801_v38, %s18377_s17  ;;  %v10819_v11 = vpop.permute.xlu1 %10818 }
 0x7fb   : > { %11983 = vrot.lane.b32.xlu0 %v21856_v12, %s18375_s19  ;;  %v10817_v3 = vpop.permute.xlu0 %10816 }
 0x7fc   : > { %17075 = vmatprep.mubr.msk.f32.mxu0 %vm2650_vm3, %v10817_v3 }
 0x7fd   : > { %17076 = vmatmul.mubr.msk.f32.gmra.mrb[44].mxu0 %vm2650_vm3, %v10819_v11 }
 0x7fe   : > { %11535 = vrot.lane.b32.xlu1 %v22126_v24, %s18377_s17 }
 0x7ff   : > { %11987 = vrot.lane.b32.xlu0 %v22014_v17, %s18375_s19  ;;  %v10821_v15 = vpop.permute.xlu0 %10820 }
 0x800   : > { %17078 = vmatprep.mubr.msk.f32.mxu0 %vm2650_vm3, %v10821_v15 }
 0x802   : > { %11961 = vrot.lane.b32.xlu1 %v21809_v23, %s18375_s19 }
 0x803   : > { %12186 = vrot.lane.b32.xlu0 %v21718_v18, %s18376_s24  ;;  %v11052_v49 = vpop.permute.xlu0 %11051 }
 0x806   : > { %11965 = vrot.lane.b32.xlu1 %v21817_v7, %s18375_s19 }
 0x807   : > { %12190 = vrot.lane.b32.xlu0 %v21750_v28, %s18376_s24  ;;  %v11056_v9 = vpop.permute.xlu0 %11055 }
 0x80a   : > { %11969 = vrot.lane.b32.xlu1 %v21825_v30, %s18375_s19 }
 0x80b   : > { %12194 = vrot.lane.b32.xlu0 %v21766_v54, %s18376_s24  ;;  %v11060_v23 = vpop.permute.xlu0 %11059 }
 0x80e   : > { %11973 = vrot.lane.b32.xlu1 %v21833_v52, %s18375_s19 }
 0x80f   : > { %12198 = vrot.lane.b32.xlu0 %v21785_v50, %s18376_s24  ;;  %v11064_v27 = vpop.permute.xlu0 %11063 }
 0x812   : > { %11977 = vrot.lane.b32.xlu1 %v21852_v33, %s18375_s19 }
 0x813   : > { %12202 = vrot.lane.b32.xlu0 %v21797_v44, %s18376_s24  ;;  %v11068_v58 = vpop.permute.xlu0 %11067 }
 0x816   : > { %11981 = vrot.lane.b32.xlu1 %v21860_v53, %s18375_s19 }
 0x817   : > { %12206 = vrot.lane.b32.xlu0 %v21805_v0, %s18376_s24  ;;  %v11072_v57 = vpop.permute.xlu0 %11071 }
 0x81a   : > { %11985 = vrot.lane.b32.xlu1 %v21866_v10, %s18375_s19 }
 0x81b   : > { %12210 = vrot.lane.b32.xlu0 %v21813_v14, %s18376_s24  ;;  %v11076_v2 = vpop.permute.xlu0 %11075 }
 0x81e   : > { %11989 = vrot.lane.b32.xlu1 %v22067_v4, %s18375_s19 }
 0x81f   : > { %12214 = vrot.lane.b32.xlu0 %v22070_v37, %s18376_s24 }
 0x822   : > { %12188 = vrot.lane.b32.xlu1 %v21712_v61, %s18376_s24 }
 0x823   : > { %12413 = vrot.lane.b32.xlu0 %v21718_v18, %s18375_s19 }
 0x826   : > { %12192 = vrot.lane.b32.xlu1 %v21728_v39, %s18376_s24 }
 0x827   : > { %12417 = vrot.lane.b32.xlu0 %v21750_v28, %s18375_s19 }
 0x82a   : > { %12196 = vrot.lane.b32.xlu1 %v21744_v48, %s18376_s24 }
 0x82b   : > { %12421 = vrot.lane.b32.xlu0 %v21766_v54, %s18375_s19 }
 0x82e   : > { %12200 = vrot.lane.b32.xlu1 %v21760_v36, %s18376_s24 }
 0x82f   : > { %12425 = vrot.lane.b32.xlu0 %v21785_v50, %s18375_s19 }
 0x830   : > { %v10823_v45 = vpop.permute.xlu1 %10822 }
 0x831   : > { %v11080_v19 = vpop.permute.xlu0 %11079  ;;  %17079 = vmatmul.mubr.msk.f32.gmra.mrb[46].mxu0 %vm2650_vm3, %v10823_v45  ;;  %v22277_v45 = vld [vmem:[#allocation3 + $0x82] sm:$0xff] }
 0x832   : > { %12204 = vrot.lane.b32.xlu1 %v21780_v32, %s18376_s24  ;;  %17083 = vmatprep.mubr.msk.f32.mxu0 %vm2650_vm3, %v11052_v49 }
 0x833   : > { %12429 = vrot.lane.b32.xlu0 %v21797_v44, %s18375_s19 }
 0x834   : > { %v11054_v34 = vpop.permute.xlu1 %11053 }
 0x835   : > { %v22187_v42 = vpop.permute.xlu0 %11505  ;;  %17084 = vmatmul.mubr.msk.f32.vlgmr.msra.gmra.mrb[32].mxu0 %vm2650_vm3, %v11054_v34 }
 0x836   : > { %17108 = vmatpush3.msra.mxu0 %v22087_v43  ;;  %12208 = vrot.lane.b32.xlu1 %v21793_v1, %s18376_s24 }
 0x837   : > { %12433 = vrot.lane.b32.xlu0 %v21805_v0, %s18375_s19  ;;  %17086 = vmatprep.mubr.msk.f32.mxu0 %vm2650_vm3, %v11056_v9 }
 0x838   : > { %v11058_v41 = vpop.permute.xlu1 %11057  ;;  %17133 = vmatprep.subr.mxu0 %v14741_v8 }
 0x839   : > { %v22199_v26 = vpop.permute.xlu0 %11509  ;;  %17087 = vmatmul.mubr.msk.f32.gmra.mrb[34].mxu0 %vm2650_vm3, %v11058_v41 }
 0x83a   : > { %17089 = vmatprep.mubr.msk.f32.mxu0 %vm2650_vm3, %v11060_v23  ;;  %12212 = vrot.lane.b32.xlu1 %v21801_v38, %s18376_s24 }
 0x83b   : > { %12437 = vrot.lane.b32.xlu0 %v21813_v14, %s18375_s19 }
 0x83c   : > { %v11062_v43 = vpop.permute.xlu1 %11061 }
 0x83d   : > { %17090 = vmatmul.mubr.msk.f32.gmra.mrb[36].mxu0 %vm2650_vm3, %v11062_v43  ;;  %v22211_v35 = vpop.permute.xlu0 %11513  ;;  %v14792_v43 = vld [vmem:[%s22750_s6 + $0x48] sm:$0xff] }
 0x83e   : > { %17092 = vmatprep.mubr.msk.f32.mxu0 %vm2650_vm3, %v11064_v27  ;;  %12216 = vrot.lane.b32.xlu1 %v22126_v24, %s18376_s24 }
 0x83f   : > { %12441 = vrot.lane.b32.xlu0 %v22070_v37, %s18375_s19 }
 0x840   : > { %v11066_v51 = vpop.permute.xlu1 %11065 }
 0x841   : > { %17093 = vmatmul.mubr.msk.f32.gmra.mrb[38].mxu0 %vm2650_vm3, %v11066_v51  ;;  %v22221_v11 = vpop.permute.xlu0 %11517  ;;  %v14809_v51 = vld [vmem:[%s22750_s6 + $0x50] sm:$0xff] }
 0x842   : > { %17095 = vmatprep.mubr.msk.f32.mxu0 %vm2650_vm3, %v11068_v58  ;;  %12415 = vrot.lane.b32.xlu1 %v21712_v61, %s18375_s19 }
 0x843   : > { %12640 = vrot.lane.b32.xlu0 %v21915_v21, %s18376_s24 }
 0x844   : > { %v11070_v3 = vpop.permute.xlu1 %11069 }
 0x845   : > { %17096 = vmatmul.mubr.msk.f32.gmra.mrb[40].mxu0 %vm2650_vm3, %v11070_v3  ;;  %v22233_v49 = vpop.permute.xlu0 %11521  ;;  %v22512_v3 = vld [vmem:[#allocation3 + $0x79] sm:$0xff] }
 0x846   : > { %17098 = vmatprep.mubr.msk.f32.mxu0 %vm2650_vm3, %v11072_v57  ;;  %12419 = vrot.lane.b32.xlu1 %v21728_v39, %s18375_s19  ;;  %v14758_v57 = vld [vmem:[%s22750_s6 + $0x38] sm:$0xff] }
 0x847   : > { %12644 = vrot.lane.b32.xlu0 %v21923_v60, %s18376_s24 }
 0x848   : > { %v11074_v15 = vpop.permute.xlu1 %11073 }
 0x849   : > { %17099 = vmatmul.mubr.msk.f32.gmra.mrb[42].mxu0 %vm2650_vm3, %v11074_v15  ;;  %v22243_v27 = vpop.permute.xlu0 %11525 }
 0x84a   : > { %17101 = vmatprep.mubr.msk.f32.mxu0 %vm2650_vm3, %v11076_v2  ;;  %12423 = vrot.lane.b32.xlu1 %v21744_v48, %s18375_s19 }
 0x84b   : > { %12648 = vrot.lane.b32.xlu0 %v21931_v46, %s18376_s24 }
 0x84c   : > { %v11078_v9 = vpop.permute.xlu1 %11077 }
 0x84d   : > { %17102 = vmatmul.mubr.msk.f32.gmra.mrb[44].mxu0 %vm2650_vm3, %v11078_v9  ;;  %v22259_v2 = vpop.permute.xlu0 %11529 }
 0x84e   : > { %17104 = vmatprep.mubr.msk.f32.mxu0 %vm2650_vm3, %v11080_v19  ;;  %12427 = vrot.lane.b32.xlu1 %v21760_v36, %s18375_s19 }
 0x84f   : > { %12652 = vrot.lane.b32.xlu0 %v21939_v13, %s18376_s24 }
 0x850   : > { %v11082_v23 = vpop.permute.xlu1 %11081 }
 0x851   : > { %17105 = vmatmul.mubr.msk.f32.gmra.mrb[46].mxu0 %vm2650_vm3, %v11082_v23  ;;  %v22273_v19 = vpop.permute.xlu0 %11533 }
 0x852   : > { %17109 = vmatprep.mubr.msk.f32.mxu0 %vm2650_vm3, %v21718_v18  ;;  %12431 = vrot.lane.b32.xlu1 %v21780_v32, %s18375_s19 }
 0x853   : > { %12656 = vrot.lane.b32.xlu0 %v21947_v63, %s18376_s24 }
 0x854   : > { %v11508_v58 = vpop.permute.xlu1 %11507 }
 0x855   : > { %17110 = vmatmul.mubr.msk.f32.vlgmr.msra.gmra.mrb[32].mxu0 %vm2650_vm3, %v21712_v61 }
 0x856   : > { %17134 = vmatpush3.msra.mxu0 %v14741_v8  ;;  %12435 = vrot.lane.b32.xlu1 %v21793_v1, %s18375_s19 }
 0x857   : > { %12660 = vrot.lane.b32.xlu0 %v21956_v59, %s18376_s24  ;;  %17112 = vmatprep.mubr.msk.f32.mxu0 %vm2650_vm3, %v21750_v28 }
 0x858   : > { %v11512_v18 = vpop.permute.xlu1 %11511  ;;  %17159 = vmatprep.subr.mxu0 %v14758_v57 }
 0x859   : > { %17113 = vmatmul.mubr.msk.f32.gmra.mrb[34].mxu0 %vm2650_vm3, %v21728_v39 }
 0x85a   : > { %17115 = vmatprep.mubr.msk.f32.mxu0 %vm2650_vm3, %v21766_v54  ;;  %12439 = vrot.lane.b32.xlu1 %v21801_v38, %s18375_s19 }
 0x85b   : > { %12664 = vrot.lane.b32.xlu0 %v21961_v5, %s18376_s24 }
 0x85c   : > { %v11516_v61 = vpop.permute.xlu1 %11515 }
 0x85d   : > { %17116 = vmatmul.mubr.msk.f32.gmra.mrb[36].mxu0 %vm2650_vm3, %v21744_v48  ;;  %v22291_v48 = vpop.permute.xlu0 %11959 }
 0x85e   : > { %17118 = vmatprep.mubr.msk.f32.mxu0 %vm2650_vm3, %v21785_v50  ;;  %12443 = vrot.lane.b32.xlu1 %v22126_v24, %s18375_s19  ;;  %s14914_s19 = sshll.u32 %s22931_s14, 7 }
 0x85f   : > { %12668 = vrot.lane.b32.xlu0 %v22277_v45, %s18376_s24  ;;  %s22707_s11 = scalar_lea.vmem %s22754_s10, %s14914_s19 }
 0x860   : > { %v11520_v39 = vpop.permute.xlu1 %11519 }
 0x861   : > { %17119 = vmatmul.mubr.msk.f32.gmra.mrb[38].mxu0 %vm2650_vm3, %v21760_v36 }
 0x862   : > { %17121 = vmatprep.mubr.msk.f32.mxu0 %vm2650_vm3, %v21797_v44  ;;  %12642 = vrot.lane.b32.xlu1 %v21911_v55, %s18376_s24  ;;  %v22303_v44 = vpop.permute.xlu0 %11963 }
 0x863   : > { %12899 = vrot.lane.b32.xlu0 %v21821_v62, %s18377_s17  ;;  %v14775_v62 = vld [vmem:[%s22750_s6 + $0x40] sm:$0xff] }
 0x864   : > { %v11524_v34 = vpop.permute.xlu1 %11523 }
 0x865   : > { %17122 = vmatmul.mubr.msk.f32.gmra.mrb[40].mxu0 %vm2650_vm3, %v21780_v32 }
 0x866   : > { %17124 = vmatprep.mubr.msk.f32.mxu0 %vm2650_vm3, %v21805_v0  ;;  %12646 = vrot.lane.b32.xlu1 %v21919_v31, %s18376_s24 }
 0x867   : > { %12903 = vrot.lane.b32.xlu0 %v21829_v40, %s18377_s17 }
 0x868   : > { %v11528_v36 = vpop.permute.xlu1 %11527 }
 0x869   : > { %17125 = vmatmul.mubr.msk.f32.gmra.mrb[42].mxu0 %vm2650_vm3, %v21793_v1  ;;  %v22319_v1 = vpop.permute.xlu0 %11967 }
 0x86a   : > { %17127 = vmatprep.mubr.msk.f32.mxu0 %vm2650_vm3, %v21813_v14  ;;  %12650 = vrot.lane.b32.xlu1 %v21927_v25, %s18376_s24 }
 0x86b   : > { %12907 = vrot.lane.b32.xlu0 %v21837_v6, %s18377_s17 }
 0x86c   : > { %v11532_v32 = vpop.permute.xlu1 %11531 }
 0x86d   : > { %17128 = vmatmul.mubr.msk.f32.gmra.mrb[44].mxu0 %vm2650_vm3, %v21801_v38  ;;  %v22333_v14 = vpop.permute.xlu0 %11971 }
 0x86e   : > { %17130 = vmatprep.mubr.msk.f32.mxu0 %vm2650_vm3, %v22070_v37  ;;  %12654 = vrot.lane.b32.xlu1 %v21935_v20, %s18376_s24 }
 0x86f   : > { %12911 = vrot.lane.b32.xlu0 %v21844_v47, %s18377_s17 }
 0x870   : > { %v11536_v0 = vpop.permute.xlu1 %11535 }
 0x871   : > { %17131 = vmatmul.mubr.msk.f32.gmra.mrb[46].mxu0 %vm2650_vm3, %v22126_v24  ;;  %v22352_v6 = vpop.permute.xlu0 %11975 }
 0x872   : > { %17135 = vmatprep.mubr.msk.f32.mxu0 %vm2650_vm3, %v22187_v42  ;;  %12658 = vrot.lane.b32.xlu1 %v21943_v29, %s18376_s24 }
 0x873   : > { %12915 = vrot.lane.b32.xlu0 %v21848_v22, %s18377_s17  ;;  %v12879_v22 = vld [vmem:[#allocation3 + $0x90] sm:$0xff] }
 0x874   : > { %v22331_v38 = vpop.permute.xlu1 %11961 }
 0x875   : > { %17136 = vmatmul.mubr.msk.f32.vlgmr.msra.gmra.mrb[32].mxu0 %vm2650_vm3, %v11508_v58  ;;  %v22368_v42 = vpop.permute.xlu0 %11979 }
 0x876   : > { %17160 = vmatpush3.msra.mxu0 %v14758_v57  ;;  %12662 = vrot.lane.b32.xlu1 %v21951_v56, %s18376_s24 }
 0x877   : > { %12919 = vrot.lane.b32.xlu0 %v21856_v12, %s18377_s17  ;;  %17138 = vmatprep.mubr.msk.f32.mxu0 %vm2650_vm3, %v22199_v26  ;;  %v22360_v12 = vld [vmem:[#allocation3 + $0x8a] sm:$0xff] }
 0x878   : > { %v22345_v40 = vpop.permute.xlu1 %11965  ;;  %17185 = vmatprep.subr.mxu0 %v14775_v62 }
 0x879   : > { %17139 = vmatmul.mubr.msk.f32.gmra.mrb[34].mxu0 %vm2650_vm3, %v11512_v18  ;;  %v22384_v41 = vpop.permute.xlu0 %11983 }
 0x87a   : > { %17141 = vmatprep.mubr.msk.f32.mxu0 %vm2650_vm3, %v22211_v35  ;;  %12666 = vrot.lane.b32.xlu1 %v22012_v16, %s18376_s24 }
 0x87b   : > { %12923 = vrot.lane.b32.xlu0 %v22014_v17, %s18377_s17 }
 0x87c   : > { %v22356_v47 = vpop.permute.xlu1 %11969 }
 0x87d   : > { %17142 = vmatmul.mubr.msk.f32.gmra.mrb[36].mxu0 %vm2650_vm3, %v11516_v61 }
 0x87e   : > { %17144 = vmatprep.mubr.msk.f32.mxu0 %vm2650_vm3, %v22221_v11  ;;  %12670 = vrot.lane.b32.xlu1 %v22360_v12, %s18376_s24 }
 0x87f   : > { %12927 = vrot.lane.b32.xlu0 %v12879_v22, %s18377_s17 }
 0x880   : > { %v22366_v17 = vpop.permute.xlu1 %11973 }
 0x881   : > { %17145 = vmatmul.mubr.msk.f32.gmra.mrb[38].mxu0 %vm2650_vm3, %v11520_v39 }
 0x882   : > { %17147 = vmatprep.mubr.msk.f32.mxu0 %vm2650_vm3, %v22233_v49  ;;  %12901 = vrot.lane.b32.xlu1 %v21817_v7, %s18377_s17  ;;  %v22399_v7 = vpop.permute.xlu0 %11987  ;;  %v22524_v49 = vld [vmem:[#allocation3 + $0x99] sm:$0xff] }
 0x883   : > { %13353 = vrot.lane.b32.xlu0 %v21750_v28, %s18377_s17 }
 0x884   : > { %v22377_v8 = vpop.permute.xlu1 %11977 }
 0x885   : > { %17148 = vmatmul.mubr.msk.f32.gmra.mrb[40].mxu0 %vm2650_vm3, %v11524_v34 }
 0x886   : > { %17150 = vmatprep.mubr.msk.f32.mxu0 %vm2650_vm3, %v22243_v27  ;;  %12905 = vrot.lane.b32.xlu1 %v21825_v30, %s18377_s17  ;;  %v22402_v30 = vld [vmem:[#allocation3 + $0x51] sm:$0xff]  ;;  %v22419_v26 = vpop.permute.xlu0 %12186 }
 0x887   : > { %13357 = vrot.lane.b32.xlu0 %v21766_v54, %s18377_s17 }
 0x888   : > { %v22388_v28 = vpop.permute.xlu1 %11981 }
 0x889   : > { %17151 = vmatmul.mubr.msk.f32.gmra.mrb[42].mxu0 %vm2650_vm3, %v11528_v36 }
 0x88a   : > { %17153 = vmatprep.mubr.msk.f32.mxu0 %vm2650_vm3, %v22259_v2  ;;  %12909 = vrot.lane.b32.xlu1 %v21833_v52, %s18377_s17  ;;  %v22413_v52 = vld [vmem:[#allocation3 + $0x61] sm:$0xff] }
 0x88b   : > { %13361 = vrot.lane.b32.xlu0 %v21785_v50, %s18377_s17 }
 0x88c   : > { %v22397_v54 = vpop.permute.xlu1 %11985 }
 0x88d   : > { %17154 = vmatmul.mubr.msk.f32.gmra.mrb[44].mxu0 %vm2650_vm3, %v11532_v32 }
 0x88e   : > { %17156 = vmatprep.mubr.msk.f32.mxu0 %vm2650_vm3, %v22273_v19  ;;  %12913 = vrot.lane.b32.xlu1 %v21852_v33, %s18377_s17  ;;  %v22425_v33 = vld [vmem:[#allocation3 + $0x71] sm:$0xff]  ;;  %v14826_v19 = vld [vmem:[%s22750_s6 + $0x58] sm:$0xff] }
 0x88f   : > { %13365 = vrot.lane.b32.xlu0 %v22402_v30, %s18377_s17 }
 0x890   : > { %v22410_v50 = vpop.permute.xlu1 %11989 }
 0x891   : > { %17157 = vmatmul.mubr.msk.f32.gmra.mrb[46].mxu0 %vm2650_vm3, %v11536_v0 }
 0x892   : > { %17161 = vmatprep.mubr.msk.f32.mxu0 %vm2650_vm3, %v21915_v21  ;;  %12917 = vrot.lane.b32.xlu1 %v21860_v53, %s18377_s17  ;;  %v22438_v53 = vpop.permute.xlu0 %12190  ;;  %v22452_v21 = vld [vmem:[#allocation3 + $0x91] sm:$0xff] }
 0x893   : > { %13369 = vrot.lane.b32.xlu0 %v22413_v52, %s18377_s17 }
 0x894   : > { %v22430_v35 = vpop.permute.xlu1 %12188 }
 0x895   : > { %17162 = vmatmul.mubr.msk.f32.vlgmr.msra.gmra.mrb[32].mxu0 %vm2650_vm3, %v21911_v55 }
 0x896   : > { %17186 = vmatpush3.msra.mxu0 %v14775_v62  ;;  %12921 = vrot.lane.b32.xlu1 %v21866_v10, %s18377_s17  ;;  %v12880_v10 = vld [vmem:[#allocation3 + $0x98] sm:$0xff] }
 0x897   : > { %13373 = vrot.lane.b32.xlu0 %v22425_v33, %s18377_s17  ;;  %17164 = vmatprep.mubr.msk.f32.mxu0 %vm2650_vm3, %v21923_v60 }
 0x898   : > { %17211 = vmatprep.subr.mxu0 %v14792_v43  ;;  %v22448_v55 = vpop.permute.xlu1 %12192 }
 0x899   : > { %17165 = vmatmul.mubr.msk.f32.gmra.mrb[34].mxu0 %vm2650_vm3, %v21919_v31  ;;  %v22458_v31 = vpop.permute.xlu0 %12194 }
 0x89a   : > { %17167 = vmatprep.mubr.msk.f32.mxu0 %vm2650_vm3, %v21931_v46  ;;  %12925 = vrot.lane.b32.xlu1 %v22067_v4, %s18377_s17  ;;  %v22465_v46 = vld [vmem:[#allocation3 + $0x29] sm:$0xff] }
 0x89b   : > { %13377 = vrot.lane.b32.xlu0 %v22070_v37, %s18377_s17 }
 0x89c   : > { %v22463_v60 = vpop.permute.xlu1 %12196 }
 0x89d   : > { %17168 = vmatmul.mubr.msk.f32.gmra.mrb[36].mxu0 %vm2650_vm3, %v21927_v25  ;;  %v22471_v25 = vpop.permute.xlu0 %12198 }
 0x89e   : > { %17170 = vmatprep.mubr.msk.f32.mxu0 %vm2650_vm3, %v21939_v13  ;;  %12929 = vrot.lane.b32.xlu1 %v12880_v10, %s18377_s17  ;;  %v22475_v13 = vld [vmem:[#allocation3 + $0x39] sm:$0xff] }
 0x89f   : > { %13381 = vrot.lane.b32.xlu0 %v22452_v21, %s18377_s17 }
 0x8a1   : > { %17171 = vmatmul.mubr.msk.f32.gmra.mrb[38].mxu0 %vm2650_vm3, %v21935_v20  ;;  %v22481_v20 = vpop.permute.xlu1 %12200  ;;  %v12203_v4 = vpop.permute.xlu0 %12202 }
 0x8a2   : > { %17173 = vmatprep.mubr.msk.f32.mxu0 %vm2650_vm3, %v21947_v63  ;;  %13355 = vrot.lane.b32.xlu1 %v22465_v46, %s18377_s17  ;;  %v22485_v63 = vld [vmem:[#allocation3 + $0x49] sm:$0xff] }
 0x8a5   : > { %17174 = vmatmul.mubr.msk.f32.gmra.mrb[40].mxu0 %vm2650_vm3, %v21943_v29  ;;  %v12205_v29 = vpop.permute.xlu1 %12204 }
 0x8a6   : > { %17176 = vmatprep.mubr.msk.f32.mxu0 %vm2650_vm3, %v21956_v59  ;;  %13359 = vrot.lane.b32.xlu1 %v22475_v13, %s18377_s17  ;;  %v22493_v59 = vld [vmem:[#allocation3 + $0x59] sm:$0xff] }
 0x8a9   : > { %17177 = vmatmul.mubr.msk.f32.gmra.mrb[42].mxu0 %vm2650_vm3, %v21951_v56  ;;  %v12207_v56 = vpop.permute.xlu0 %12206 }
 0x8aa   : > { %17179 = vmatprep.mubr.msk.f32.mxu0 %vm2650_vm3, %v21961_v5  ;;  %13363 = vrot.lane.b32.xlu1 %v22485_v63, %s18377_s17  ;;  %v22501_v5 = vld [vmem:[#allocation3 + $0x69] sm:$0xff] }
 0x8ad   : > { %17180 = vmatmul.mubr.msk.f32.gmra.mrb[44].mxu0 %vm2650_vm3, %v22012_v16  ;;  %v12209_v16 = vpop.permute.xlu1 %12208  ;;  %v12211_v11 = vpop.permute.xlu0 %12210 }
 0x8ae   : > { %17182 = vmatprep.mubr.msk.f32.mxu0 %vm2650_vm3, %v22277_v45  ;;  %13367 = vrot.lane.b32.xlu1 %v22493_v59, %s18377_s17 }
 0x8b1   : > { %17183 = vmatmul.mubr.msk.f32.gmra.mrb[46].mxu0 %vm2650_vm3, %v22360_v12  ;;  %v12213_v15 = vpop.permute.xlu1 %12212  ;;  %v12215_v9 = vpop.permute.xlu0 %12214 }
 0x8b2   : > { %17187 = vmatprep.mubr.msk.f32.mxu0 %vm2650_vm3, %v22291_v48  ;;  %13371 = vrot.lane.b32.xlu1 %v22501_v5, %s18377_s17 }
 0x8b5   : > { %17188 = vmatmul.mubr.msk.f32.vlgmr.msra.gmra.mrb[32].mxu0 %vm2650_vm3, %v22331_v38  ;;  %v12217_v23 = vpop.permute.xlu1 %12216  ;;  %v12414_v27 = vpop.permute.xlu0 %12413 }
 0x8b6   : > { %17212 = vmatpush3.msra.mxu0 %v14792_v43  ;;  %17190 = vmatprep.mubr.msk.f32.mxu0 %vm2650_vm3, %v22303_v44 }
 0x8b7   : > { %13375 = vrot.lane.b32.xlu1 %v22512_v3, %s18377_s17  ;;  %17237 = vmatprep.subr.mxu0 %v14809_v51 }
 0x8b9   : > { %17191 = vmatmul.mubr.msk.f32.gmra.mrb[34].mxu0 %vm2650_vm3, %v22345_v40  ;;  %v12416_v58 = vpop.permute.xlu1 %12415  ;;  %v12418_v57 = vpop.permute.xlu0 %12417  ;;  %v14843_v40 = vld [vmem:[%s22750_s6 + $0x60] sm:$0xff] }
 0x8ba   : > { %17193 = vmatprep.mubr.msk.f32.mxu0 %vm2650_vm3, %v22319_v1 }
 0x8bb   : > { %13379 = vrot.lane.b32.xlu1 %v22126_v24, %s18377_s17 }
 0x8bd   : > { %17194 = vmatmul.mubr.msk.f32.gmra.mrb[36].mxu0 %vm2650_vm3, %v22356_v47  ;;  %v12420_v2 = vpop.permute.xlu1 %12419  ;;  %v12422_v18 = vpop.permute.xlu0 %12421 }
 0x8be   : > { %17196 = vmatprep.mubr.msk.f32.mxu0 %vm2650_vm3, %v22333_v14 }
 0x8bf   : > { %13383 = vrot.lane.b32.xlu1 %v22524_v49, %s18377_s17 }
 0x8c1   : > { %17197 = vmatmul.mubr.msk.f32.gmra.mrb[38].mxu0 %vm2650_vm3, %v22366_v17  ;;  %v12424_v61 = vpop.permute.xlu1 %12423  ;;  %v12426_v39 = vpop.permute.xlu0 %12425 }
 0x8c2   : > { %17199 = vmatprep.mubr.msk.f32.mxu0 %vm2650_vm3, %v22352_v6 }
 0x8c5   : > { %17200 = vmatmul.mubr.msk.f32.gmra.mrb[40].mxu0 %vm2650_vm3, %v22377_v8  ;;  %v12428_v48 = vpop.permute.xlu1 %12427  ;;  %v12430_v34 = vpop.permute.xlu0 %12429 }
 0x8c6   : > { %17202 = vmatprep.mubr.msk.f32.mxu0 %vm2650_vm3, %v22368_v42 }
 0x8c9   : > { %17203 = vmatmul.mubr.msk.f32.gmra.mrb[42].mxu0 %vm2650_vm3, %v22388_v28  ;;  %v12432_v36 = vpop.permute.xlu1 %12431  ;;  %v12434_v44 = vpop.permute.xlu0 %12433 }
 0x8ca   : > { %17205 = vmatprep.mubr.msk.f32.mxu0 %vm2650_vm3, %v22384_v41 }
 0x8cd   : > { %17206 = vmatmul.mubr.msk.f32.gmra.mrb[44].mxu0 %vm2650_vm3, %v22397_v54  ;;  %v12436_v32 = vpop.permute.xlu1 %12435  ;;  %v12438_v1 = vpop.permute.xlu0 %12437 }
 0x8ce   : > { %17208 = vmatprep.mubr.msk.f32.mxu0 %vm2650_vm3, %v22399_v7 }
 0x8d1   : > { %17209 = vmatmul.mubr.msk.f32.gmra.mrb[46].mxu0 %vm2650_vm3, %v22410_v50  ;;  %v12440_v0 = vpop.permute.xlu1 %12439  ;;  %v12442_v38 = vpop.permute.xlu0 %12441 }
 0x8d2   : > { %17213 = vmatprep.mubr.msk.f32.mxu0 %vm2650_vm3, %v22419_v26  ;;  %v14860_v26 = vld [vmem:[%s22750_s6 + $0x68] sm:$0xff] }
 0x8d5   : > { %17214 = vmatmul.mubr.msk.f32.vlgmr.msra.gmra.mrb[32].mxu0 %vm2650_vm3, %v22430_v35  ;;  %v12444_v14 = vpop.permute.xlu1 %12443  ;;  %v12641_v62 = vpop.permute.xlu0 %12640 }
 0x8d6   : > { %17238 = vmatpush3.msra.mxu0 %v14809_v51  ;;  %17216 = vmatprep.mubr.msk.f32.mxu0 %vm2650_vm3, %v22438_v53 }
 0x8d7   : > { %17263 = vmatprep.subr.mxu0 %v14826_v19 }
 0x8d9   : > { %17217 = vmatmul.mubr.msk.f32.gmra.mrb[34].mxu0 %vm2650_vm3, %v22448_v55  ;;  %v12643_v6 = vpop.permute.xlu1 %12642  ;;  %v12645_v47 = vpop.permute.xlu0 %12644 }
 0x8da   : > { %17219 = vmatprep.mubr.msk.f32.mxu0 %vm2650_vm3, %v22458_v31 }
 0x8dd   : > { %17220 = vmatmul.mubr.msk.f32.gmra.mrb[36].mxu0 %vm2650_vm3, %v22463_v60  ;;  %v12647_v22 = vpop.permute.xlu1 %12646  ;;  %v12649_v17 = vpop.permute.xlu0 %12648 }
 0x8de   : > { %17222 = vmatprep.mubr.msk.f32.mxu0 %vm2650_vm3, %v22471_v25 }
 0x8e1   : > { %17223 = vmatmul.mubr.msk.f32.gmra.mrb[38].mxu0 %vm2650_vm3, %v22481_v20  ;;  %v12651_v42 = vpop.permute.xlu1 %12650  ;;  %v12653_v8 = vpop.permute.xlu0 %12652 }
 0x8e2   : > { %17225 = vmatprep.mubr.msk.f32.mxu0 %vm2650_vm3, %v12203_v4 }
 0x8e5   : > { %17226 = vmatmul.mubr.msk.f32.gmra.mrb[40].mxu0 %vm2650_vm3, %v12205_v29  ;;  %v12655_v41 = vpop.permute.xlu1 %12654  ;;  %v12657_v28 = vpop.permute.xlu0 %12656  ;;  %v14877_v29 = vld [vmem:[%s22750_s6 + $0x70] sm:$0xff] }
 0x8e6   : > { %17228 = vmatprep.mubr.msk.f32.mxu0 %vm2650_vm3, %v12207_v56 }
 0x8e9   : > { %17229 = vmatmul.mubr.msk.f32.gmra.mrb[42].mxu0 %vm2650_vm3, %v12209_v16  ;;  %v12659_v54 = vpop.permute.xlu1 %12658  ;;  %v12661_v7 = vpop.permute.xlu0 %12660 }
 0x8ea   : > { %17231 = vmatprep.mubr.msk.f32.mxu0 %vm2650_vm3, %v12211_v11 }
 0x8ed   : > { %17232 = vmatmul.mubr.msk.f32.gmra.mrb[44].mxu0 %vm2650_vm3, %v12213_v15  ;;  %v12663_v50 = vpop.permute.xlu1 %12662  ;;  %v12665_v43 = vpop.permute.xlu0 %12664 }
 0x8ee   : > { %17234 = vmatprep.mubr.msk.f32.mxu0 %vm2650_vm3, %v12215_v9 }
 0x8f1   : > { %17235 = vmatmul.mubr.msk.f32.gmra.mrb[46].mxu0 %vm2650_vm3, %v12217_v23  ;;  %v12667_v35 = vpop.permute.xlu1 %12666  ;;  %v12669_v53 = vpop.permute.xlu0 %12668 }
 0x8f2   : > { %17239 = vmatprep.mubr.msk.f32.mxu0 %vm2650_vm3, %v12414_v27 }
 0x8f5   : > { %17240 = vmatmul.mubr.msk.f32.vlgmr.msra.gmra.mrb[32].mxu0 %vm2650_vm3, %v12416_v58  ;;  %v12671_v55 = vpop.permute.xlu1 %12670  ;;  %v12900_v10 = vpop.permute.xlu0 %12899 }
 0x8f6   : > { %17264 = vmatpush3.msra.mxu0 %v14826_v19  ;;  %17242 = vmatprep.mubr.msk.f32.mxu0 %vm2650_vm3, %v12418_v57  ;;  %v18364_v19 = vld [vmem:[#allocation3 + $0x41] sm:$0xff] }
 0x8f7   : > { %17289 = vmatprep.subr.mxu0 %v14843_v40 }
 0x8f9   : > { %17243 = vmatmul.mubr.msk.f32.gmra.mrb[34].mxu0 %vm2650_vm3, %v12420_v2  ;;  %v12902_v31 = vpop.permute.xlu1 %12901  ;;  %v12904_v60 = vpop.permute.xlu0 %12903  ;;  %v18362_v2 = vld [vmem:[#allocation3 + $0x21] sm:$0xff] }
 0x8fa   : > { %17245 = vmatprep.mubr.msk.f32.mxu0 %vm2650_vm3, %v12422_v18  ;;  %v14894_v18 = vld [vmem:[%s22750_s6 + $0x78] sm:$0xff] }
 0x8fd   : > { %17246 = vmatmul.mubr.msk.f32.gmra.mrb[36].mxu0 %vm2650_vm3, %v12424_v61  ;;  %v12906_v25 = vpop.permute.xlu1 %12905  ;;  %v12908_v20 = vpop.permute.xlu0 %12907  ;;  %v18363_v61 = vld [vmem:[#allocation3 + $0x31] sm:$0xff] }
 0x8fe   : > { %17248 = vmatprep.mubr.msk.f32.mxu0 %vm2650_vm3, %v12426_v39 }
 0x901   : > { %17249 = vmatmul.mubr.msk.f32.gmra.mrb[38].mxu0 %vm2650_vm3, %v12428_v48  ;;  %v12910_v4 = vpop.permute.xlu1 %12909  ;;  %v12912_v56 = vpop.permute.xlu0 %12911 }
 0x902   : > { %17251 = vmatprep.mubr.msk.f32.mxu0 %vm2650_vm3, %v12430_v34 }
 0x905   : > { %17252 = vmatmul.mubr.msk.f32.gmra.mrb[40].mxu0 %vm2650_vm3, %v12432_v36  ;;  %v12914_v16 = vpop.permute.xlu1 %12913  ;;  %v12916_v51 = vpop.permute.xlu0 %12915  ;;  %v13578_v36 = vld [vmem:[#allocation3 + $0x22] sm:$0xff] }
 0x906   : > { %17254 = vmatprep.mubr.msk.f32.mxu0 %vm2650_vm3, %v12434_v44  ;;  %v13579_v44 = vld [vmem:[#allocation3 + $0x2a] sm:$0xff] }
 0x909   : > { %17255 = vmatmul.mubr.msk.f32.gmra.mrb[42].mxu0 %vm2650_vm3, %v12436_v32  ;;  %v12918_v11 = vpop.permute.xlu1 %12917  ;;  %v12920_v15 = vpop.permute.xlu0 %12919  ;;  %v13580_v32 = vld [vmem:[#allocation3 + $0x32] sm:$0xff] }
 0x90a   : > { %17257 = vmatprep.mubr.msk.f32.mxu0 %vm2650_vm3, %v12438_v1  ;;  %v13581_v1 = vld [vmem:[#allocation3 + $0x3a] sm:$0xff] }
 0x90d   : > { %17258 = vmatmul.mubr.msk.f32.gmra.mrb[44].mxu0 %vm2650_vm3, %v12440_v0  ;;  %v12922_v9 = vpop.permute.xlu1 %12921  ;;  %v12924_v23 = vpop.permute.xlu0 %12923  ;;  %v13582_v0 = vld [vmem:[#allocation3 + $0x42] sm:$0xff] }
 0x90e   : > { %17260 = vmatprep.mubr.msk.f32.mxu0 %vm2650_vm3, %v12442_v38  ;;  %v13583_v38 = vld [vmem:[#allocation3 + $0x4a] sm:$0xff] }
 0x911   : > { %17261 = vmatmul.mubr.msk.f32.gmra.mrb[46].mxu0 %vm2650_vm3, %v12444_v14  ;;  %v12926_v27 = vpop.permute.xlu1 %12925  ;;  %v12928_v58 = vpop.permute.xlu0 %12927  ;;  %v13584_v14 = vld [vmem:[#allocation3 + $0x52] sm:$0xff] }
 0x912   : > { %17265 = vmatprep.mubr.msk.f32.mxu0 %vm2650_vm3, %v12641_v62  ;;  %v13585_v62 = vld [vmem:[#allocation3 + $0x5a] sm:$0xff] }
 0x915   : > { %17266 = vmatmul.mubr.msk.f32.vlgmr.msra.gmra.mrb[32].mxu0 %vm2650_vm3, %v12643_v6  ;;  %v12930_v57 = vpop.permute.xlu1 %12929  ;;  %v13587_v6 = vld [vmem:[#allocation3 + $0x6a] sm:$0xff] }
 0x916   : > { %17290 = vmatpush3.msra.mxu0 %v14843_v40  ;;  %17268 = vmatprep.mubr.msk.f32.mxu0 %vm2650_vm3, %v12645_v47  ;;  %v13586_v40 = vld [vmem:[#allocation3 + $0x62] sm:$0xff]  ;;  %v13588_v47 = vld [vmem:[#allocation3 + $0x72] sm:$0xff] }
 0x917   : > { %17315 = vmatprep.subr.mxu0 %v14860_v26 }
 0x919   : > { %17269 = vmatmul.mubr.msk.f32.gmra.mrb[34].mxu0 %vm2650_vm3, %v12647_v22  ;;  %v13589_v22 = vld [vmem:[#allocation3 + $0x7a] sm:$0xff] }
 0x91a   : > { %17271 = vmatprep.mubr.msk.f32.mxu0 %vm2650_vm3, %v12649_v17  ;;  %v13592_v17 = vld [vmem:[#allocation3 + $0x92] sm:$0xff] }
 0x91d   : > { %17272 = vmatmul.mubr.msk.f32.gmra.mrb[36].mxu0 %vm2650_vm3, %v12651_v42  ;;  %v13593_v42 = vld [vmem:[#allocation3 + $0x9a] sm:$0xff] }
 0x91e   : > { %17274 = vmatprep.mubr.msk.f32.mxu0 %vm2650_vm3, %v12653_v8  ;;  %v14911_v8 = vld [vmem:[%s22753_s9] ss:$0 sm:$0xff] }
 0x921   : > { %17275 = vmatmul.mubr.msk.f32.gmra.mrb[38].mxu0 %vm2650_vm3, %v12655_v41 }
 0x922   : > { %17277 = vmatprep.mubr.msk.f32.mxu0 %vm2650_vm3, %v12657_v28 }
 0x925   : > { %17278 = vmatmul.mubr.msk.f32.gmra.mrb[40].mxu0 %vm2650_vm3, %v12659_v54 }
 0x926   : > { %17280 = vmatprep.mubr.msk.f32.mxu0 %vm2650_vm3, %v12661_v7 }
 0x929   : > { %17281 = vmatmul.mubr.msk.f32.gmra.mrb[42].mxu0 %vm2650_vm3, %v12663_v50 }
 0x92a   : > { %17283 = vmatprep.mubr.msk.f32.mxu0 %vm2650_vm3, %v12665_v43 }
 0x92d   : > { %17284 = vmatmul.mubr.msk.f32.gmra.mrb[44].mxu0 %vm2650_vm3, %v12667_v35 }
 0x92e   : > { %17286 = vmatprep.mubr.msk.f32.mxu0 %vm2650_vm3, %v12669_v53 }
 0x931   : > { %17287 = vmatmul.mubr.msk.f32.gmra.mrb[46].mxu0 %vm2650_vm3, %v12671_v55 }
 0x932   : > { %17291 = vmatprep.mubr.msk.f32.mxu0 %vm2650_vm3, %v12900_v10 }
 0x935   : > { %17292 = vmatmul.mubr.msk.f32.vlgmr.msra.gmra.mrb[32].mxu0 %vm2650_vm3, %v12902_v31 }
 0x936   : > { %17316 = vmatpush3.msra.mxu0 %v14860_v26  ;;  %17294 = vmatprep.mubr.msk.f32.mxu0 %vm2650_vm3, %v12904_v60 }
 0x937   : > { %17341 = vmatprep.subr.mxu0 %v14877_v29 }
 0x939   : > { %17295 = vmatmul.mubr.msk.f32.gmra.mrb[34].mxu0 %vm2650_vm3, %v12906_v25 }
 0x93a   : > { %17297 = vmatprep.mubr.msk.f32.mxu0 %vm2650_vm3, %v12908_v20 }
 0x93d   : > { %17298 = vmatmul.mubr.msk.f32.gmra.mrb[36].mxu0 %vm2650_vm3, %v12910_v4 }
 0x93e   : > { %17300 = vmatprep.mubr.msk.f32.mxu0 %vm2650_vm3, %v12912_v56 }
 0x941   : > { %17301 = vmatmul.mubr.msk.f32.gmra.mrb[38].mxu0 %vm2650_vm3, %v12914_v16 }
 0x942   : > { %17303 = vmatprep.mubr.msk.f32.mxu0 %vm2650_vm3, %v12916_v51 }
 0x945   : > { %17304 = vmatmul.mubr.msk.f32.gmra.mrb[40].mxu0 %vm2650_vm3, %v12918_v11 }
 0x946   : > { %17306 = vmatprep.mubr.msk.f32.mxu0 %vm2650_vm3, %v12920_v15 }
 0x949   : > { %17307 = vmatmul.mubr.msk.f32.gmra.mrb[42].mxu0 %vm2650_vm3, %v12922_v9 }
 0x94a   : > { %17309 = vmatprep.mubr.msk.f32.mxu0 %vm2650_vm3, %v12924_v23 }
 0x94d   : > { %17310 = vmatmul.mubr.msk.f32.gmra.mrb[44].mxu0 %vm2650_vm3, %v12926_v27 }
 0x94e   : > { %17312 = vmatprep.mubr.msk.f32.mxu0 %vm2650_vm3, %v12928_v58 }
 0x951   : > { %17313 = vmatmul.mubr.msk.f32.gmra.mrb[46].mxu0 %vm2650_vm3, %v12930_v57 }
 0x952   : > { %17317 = vmatprep.mubr.msk.f32.mxu0 %vm2650_vm3, %v18362_v2 }
 0x955   : > { %17318 = vmatmul.mubr.msk.f32.vlgmr.msra.gmra.mrb[32].mxu0 %vm2650_vm3, %v22465_v46  ;;  %v13354_v46 = vpop.permute.xlu0 %13353 }
 0x956   : > { %17342 = vmatpush3.msra.mxu0 %v14877_v29  ;;  %17320 = vmatprep.mubr.msk.f32.mxu0 %vm2650_vm3, %v18363_v61 }
 0x957   : > { %17367 = vmatprep.subr.mxu0 %v14894_v18 }
 0x959   : > { %17321 = vmatmul.mubr.msk.f32.gmra.mrb[34].mxu0 %vm2650_vm3, %v22475_v13  ;;  %v13356_v13 = vpop.permute.xlu1 %13355  ;;  %v13358_v39 = vpop.permute.xlu0 %13357 }
 0x95a   : > { %17323 = vmatprep.mubr.msk.f32.mxu0 %vm2650_vm3, %v18364_v19 }
 0x95d   : > { %17324 = vmatmul.mubr.msk.f32.gmra.mrb[36].mxu0 %vm2650_vm3, %v22485_v63 }
 0x95e   : > { %17326 = vmatprep.mubr.msk.f32.mxu0 %vm2650_vm3, %v22402_v30  ;;  %v13360_v30 = vpop.permute.xlu1 %13359 }
 0x961   : > { %17327 = vmatmul.mubr.msk.f32.gmra.mrb[38].mxu0 %vm2650_vm3, %v22493_v59 }
 0x962   : > { %17329 = vmatprep.mubr.msk.f32.mxu0 %vm2650_vm3, %v22413_v52  ;;  %v13362_v52 = vpop.permute.xlu0 %13361  ;;  %v13364_v63 = vpop.permute.xlu1 %13363 }
 0x965   : > { %17330 = vmatmul.mubr.msk.f32.gmra.mrb[40].mxu0 %vm2650_vm3, %v22501_v5 }
 0x966   : > { %17332 = vmatprep.mubr.msk.f32.mxu0 %vm2650_vm3, %v22425_v33  ;;  %v13366_v33 = vpop.permute.xlu0 %13365 }
 0x969   : > { %17333 = vmatmul.mubr.msk.f32.gmra.mrb[42].mxu0 %vm2650_vm3, %v22512_v3 }
 0x96a   : > { %17335 = vmatprep.mubr.msk.f32.mxu0 %vm2650_vm3, %v22070_v37  ;;  %v13368_v37 = vpop.permute.xlu1 %13367 }
 0x96d   : > { %17336 = vmatmul.mubr.msk.f32.gmra.mrb[44].mxu0 %vm2650_vm3, %v22126_v24  ;;  %v13370_v24 = vpop.permute.xlu0 %13369 }
 0x96e   : > { %17338 = vmatprep.mubr.msk.f32.mxu0 %vm2650_vm3, %v22452_v21  ;;  %v13372_v21 = vpop.permute.xlu1 %13371 }
 0x971   : > { %17339 = vmatmul.mubr.msk.f32.gmra.mrb[46].mxu0 %vm2650_vm3, %v22524_v49  ;;  %v13374_v59 = vpop.permute.xlu0 %13373 }
 0x972   : > { %17343 = vmatprep.mubr.msk.f32.mxu0 %vm2650_vm3, %v13354_v46  ;;  %v13376_v5 = vpop.permute.xlu1 %13375 }
 0x975   : > { %17344 = vmatmul.mubr.msk.f32.vlgmr.msra.gmra.mrb[32].mxu0 %vm2650_vm3, %v13356_v13  ;;  %v13378_v3 = vpop.permute.xlu0 %13377 }
 0x976   : > { %17368 = vmatpush3.msra.mxu0 %v14894_v18  ;;  %17346 = vmatprep.mubr.msk.f32.mxu0 %vm2650_vm3, %v13358_v39  ;;  %v13380_v49 = vpop.permute.xlu1 %13379 }
 0x979   : > { %17347 = vmatmul.mubr.msk.f32.gmra.mrb[34].mxu0 %vm2650_vm3, %v13360_v30  ;;  %v13382_v48 = vpop.permute.xlu0 %13381 }
 0x97a   : > { %17349 = vmatprep.mubr.msk.f32.mxu0 %vm2650_vm3, %v13362_v52  ;;  %v13384_v34 = vpop.permute.xlu1 %13383 }
 0x97d   : > { %17350 = vmatmul.mubr.msk.f32.gmra.mrb[36].mxu0 %vm2650_vm3, %v13364_v63 }
 0x97e   : > { %17352 = vmatprep.mubr.msk.f32.mxu0 %vm2650_vm3, %v13366_v33 }
 0x981   : > { %17353 = vmatmul.mubr.msk.f32.gmra.mrb[38].mxu0 %vm2650_vm3, %v13368_v37 }
 0x982   : > { %17355 = vmatprep.mubr.msk.f32.mxu0 %vm2650_vm3, %v13370_v24 }
 0x985   : > { %17356 = vmatmul.mubr.msk.f32.gmra.mrb[40].mxu0 %vm2650_vm3, %v13372_v21 }
 0x986   : > { %17358 = vmatprep.mubr.msk.f32.mxu0 %vm2650_vm3, %v13374_v59 }
 0x989   : > { %17359 = vmatmul.mubr.msk.f32.gmra.mrb[42].mxu0 %vm2650_vm3, %v13376_v5 }
 0x98a   : > { %17361 = vmatprep.mubr.msk.f32.mxu0 %vm2650_vm3, %v13378_v3 }
 0x98d   : > { %17362 = vmatmul.mubr.msk.f32.gmra.mrb[44].mxu0 %vm2650_vm3, %v13380_v49 }
 0x98e   : > { %17364 = vmatprep.mubr.msk.f32.mxu0 %vm2650_vm3, %v13382_v48 }
 0x991   : > { %17365 = vmatmul.mubr.msk.f32.gmra.mrb[46].mxu0 %vm2650_vm3, %v13384_v34 }
 0x992   : > { %17369 = vmatprep.mubr.msk.f32.mxu0 %vm2650_vm3, %v13578_v36 }
 0x995   : > { %17370 = vmatmul.mubr.msk.f32.vlgmr.msra.gmra.mrb[32].mxu0 %vm2650_vm3, %v13579_v44 }
 0x996   : > { %17372 = vmatprep.mubr.msk.f32.mxu0 %vm2650_vm3, %v13580_v32 }
 0x999   : > { %17373 = vmatmul.mubr.msk.f32.gmra.mrb[34].mxu0 %vm2650_vm3, %v13581_v1 }
 0x99a   : > { %17375 = vmatprep.mubr.msk.f32.mxu0 %vm2650_vm3, %v13582_v0 }
 0x99d   : > { %17376 = vmatmul.mubr.msk.f32.gmra.mrb[36].mxu0 %vm2650_vm3, %v13583_v38 }
 0x99e   : > { %17378 = vmatprep.mubr.msk.f32.mxu0 %vm2650_vm3, %v13584_v14 }
 0x9a1   : > { %17379 = vmatmul.mubr.msk.f32.gmra.mrb[38].mxu0 %vm2650_vm3, %v13585_v62 }
 0x9a2   : > { %17381 = vmatprep.mubr.msk.f32.mxu0 %vm2650_vm3, %v13586_v40 }
 0x9a5   : > { %17382 = vmatmul.mubr.msk.f32.gmra.mrb[40].mxu0 %vm2650_vm3, %v13587_v6 }
 0x9a6   : > { %17384 = vmatprep.mubr.msk.f32.mxu0 %vm2650_vm3, %v13588_v47 }
 0x9a9   : > { %17385 = vmatmul.mubr.msk.f32.gmra.mrb[42].mxu0 %vm2650_vm3, %v13589_v22 }
 0x9aa   : > { %17387 = vmatprep.mubr.msk.f32.mxu0 %vm2650_vm3, %v22277_v45 }
 0x9ad   : > { %17388 = vmatmul.mubr.msk.f32.gmra.mrb[44].mxu0 %vm2650_vm3, %v22360_v12 }
 0x9ae   : > { %17390 = vmatprep.mubr.msk.f32.mxu0 %vm2650_vm3, %v13592_v17 }
 0x9b1   : > { %17391 = vmatmul.mubr.msk.f32.gmra.mrb[46].mxu0 %vm2650_vm3, %v13593_v42 }
 0xa68   : > { %v17371_v41 = vpop.f32.mrb[32].mxu0 }
 0xa69   : > { %v13813_v28 = vadd.f32 %v17371_v41, %v14911_v8  ;;  %v13710_v54 = vpop.f32.mrb[33].mxu0 }
 0xa6a   : > { %v13812_v45 = vadd.f32 %v14911_v8, %v13710_v54 }
 0xa6b   : > { %v13829_v12 = vmax.f32 %v13813_v28, 0.0 }
 0xa6c   : > { %v13828_v7 = vmax.f32 %v13812_v45, 0.0  ;;  %v17374_v50 = vpop.f32.mrb[34].mxu0 }
 0xa6d   : > { %13845 = vst.msk [vmem:[%s22707_s11 + $0x8] sm:$0xff] %vm380_vm1, %v13829_v12  ;;  %v13815_v26 = vadd.f32 %v17374_v50, %v14911_v8  ;;  %v13720_v43 = vpop.f32.mrb[35].mxu0 }
 0xa6e   : > { %13844 = vst.msk [vmem:[%s22707_s11] sm:$0xff] %vm380_vm1, %v13828_v7  ;;  %v13814_v35 = vadd.f32 %v14911_v8, %v13720_v43 }
 0xa6f   : > { %v13831_v53 = vmax.f32 %v13815_v26, 0.0 }
 0xa70   : > { %v13830_v55 = vmax.f32 %v13814_v35, 0.0  ;;  %v17377_v10 = vpop.f32.mrb[36].mxu0 }
 0xa71   : > { %13847 = vst.msk [vmem:[%s22707_s11 + $0x18] sm:$0xff] %vm380_vm1, %v13831_v53  ;;  %v13817_v31 = vadd.f32 %v17377_v10, %v14911_v8  ;;  %v13730_v60 = vpop.f32.mrb[37].mxu0 }
 0xa72   : > { %13846 = vst.msk [vmem:[%s22707_s11 + $0x10] sm:$0xff] %vm380_vm1, %v13830_v55  ;;  %v13816_v25 = vadd.f32 %v14911_v8, %v13730_v60 }
 0xa73   : > { %v13833_v20 = vmax.f32 %v13817_v31, 0.0 }
 0xa74   : > { %v13832_v4 = vmax.f32 %v13816_v25, 0.0  ;;  %v17380_v29 = vpop.f32.mrb[38].mxu0 }
 0xa75   : > { %13849 = vst.msk [vmem:[%s22707_s11 + $0x28] sm:$0xff] %vm380_vm1, %v13833_v20  ;;  %v13819_v56 = vadd.f32 %v17380_v29, %v14911_v8  ;;  %v13740_v16 = vpop.f32.mrb[39].mxu0 }
 0xa76   : > { %13848 = vst.msk [vmem:[%s22707_s11 + $0x20] sm:$0xff] %vm380_vm1, %v13832_v4  ;;  %v13818_v51 = vadd.f32 %v14911_v8, %v13740_v16 }
 0xa77   : > { %v13835_v11 = vmax.f32 %v13819_v56, 0.0 }
 0xa78   : > { %v13834_v15 = vmax.f32 %v13818_v51, 0.0  ;;  %v17383_v9 = vpop.f32.mrb[40].mxu0 }
 0xa79   : > { %13851 = vst.msk [vmem:[%s22707_s11 + $0x38] sm:$0xff] %vm380_vm1, %v13835_v11  ;;  %v13821_v23 = vadd.f32 %v17383_v9, %v14911_v8  ;;  %v13750_v27 = vpop.f32.mrb[41].mxu0 }
 0xa7a   : > { %13850 = vst.msk [vmem:[%s22707_s11 + $0x30] sm:$0xff] %vm380_vm1, %v13834_v15  ;;  %v13820_v58 = vadd.f32 %v14911_v8, %v13750_v27 }
 0xa7b   : > { %v13837_v57 = vmax.f32 %v13821_v23, 0.0 }
 0xa7c   : > { %v13836_v2 = vmax.f32 %v13820_v58, 0.0  ;;  %v17386_v18 = vpop.f32.mrb[42].mxu0 }
 0xa7d   : > { %13853 = vst.msk [vmem:[%s22707_s11 + $0x48] sm:$0xff] %vm380_vm1, %v13837_v57  ;;  %v13823_v61 = vadd.f32 %v17386_v18, %v14911_v8  ;;  %v13760_v19 = vpop.f32.mrb[43].mxu0 }
 0xa7e   : > { %13852 = vst.msk [vmem:[%s22707_s11 + $0x40] sm:$0xff] %vm380_vm1, %v13836_v2  ;;  %v13822_v46 = vadd.f32 %v14911_v8, %v13760_v19 }
 0xa7f   : > { %v13839_v13 = vmax.f32 %v13823_v61, 0.0 }
 0xa80   : > { %v13838_v39 = vmax.f32 %v13822_v46, 0.0  ;;  %v17389_v30 = vpop.f32.mrb[44].mxu0 }
 0xa81   : > { %13855 = vst.msk [vmem:[%s22707_s11 + $0x58] sm:$0xff] %vm380_vm1, %v13839_v13  ;;  %v13825_v52 = vadd.f32 %v17389_v30, %v14911_v8  ;;  %v13770_v63 = vpop.f32.mrb[45].mxu0 }
 0xa82   : > { %13854 = vst.msk [vmem:[%s22707_s11 + $0x50] sm:$0xff] %vm380_vm1, %v13838_v39  ;;  %v13824_v33 = vadd.f32 %v14911_v8, %v13770_v63 }
 0xa83   : > { %v13841_v37 = vmax.f32 %v13825_v52, 0.0 }
 0xa84   : > { %v13840_v24 = vmax.f32 %v13824_v33, 0.0  ;;  %v17392_v21 = vpop.f32.mrb[46].mxu0 }
 0xa85   : > { %13857 = vst.msk [vmem:[%s22707_s11 + $0x68] sm:$0xff] %vm380_vm1, %v13841_v37  ;;  %v13827_v59 = vadd.f32 %v17392_v21, %v14911_v8  ;;  %v13780_v5 = vpop.f32.mrb[47].mxu0 }
 0xa86   : > { %13856 = vst.msk [vmem:[%s22707_s11 + $0x60] sm:$0xff] %vm380_vm1, %v13840_v24  ;;  %v13826_v3 = vadd.f32 %v14911_v8, %v13780_v5 }
 0xa87   : > { %v13843_v49 = vmax.f32 %v13827_v59, 0.0 }
 0xa88   : > { %v13842_v48 = vmax.f32 %v13826_v3, 0.0 }
 0xa89   : > { %13859 = vst.msk [vmem:[%s22707_s11 + $0x78] sm:$0xff] %vm380_vm1, %v13843_v49 }
 0xa8a   : > { %13858 = vst.msk [vmem:[%s22707_s11 + $0x70] sm:$0xff] %vm380_vm1, %v13842_v48 }
 0xa8b PF: > { %s20_s13 = sadd.s32 1, %s18371_s13  }
 0xa8c   : > { %p17_p4 = scmp.ge.s32.totalorder %s20_s13, 4  }
 0xa8e   :  { %19 = sbr.rel (!%p17_p4) target bundleno = 1 (0x1), region = 146 }

</bundles_post_ra>
